<compile_context>
chip_gen: v7x
topology: tpu7x:2x2x1
jax: 0.10.0
libtpu: 0.0.40
codegen_flags: <defaults>
</compile_context>

<pallas_src>
import jax
import jax.numpy as jnp
from jax import lax
from jax.experimental import pallas as pl
from jax.experimental.pallas import tpu as pltpu


# ----------------------------- configuration --------------------------------
DIM = 32                     # channels C
NUM_HEADS = 4
HEAD_DIM = DIM // NUM_HEADS
WINDOW = (2, 2, 2, 2)        # (Nw, Dw, Hw, Ww) -> window tokens L = 16
MLP_RATIO = 2.0
HIDDEN = int(DIM * MLP_RATIO)
SCALE = HEAD_DIM ** -0.5
EPS = 1e-5                   # nn.LayerNorm default eps

# Set to jnp.bfloat16 on v5e/v6e for the bf16-native MXU path (LN / softmax /
# GELU stay f32 regardless).  Kept at float32 here so the in-script check
# against the exact f32 reference stays tight.
MATMUL_DTYPE = jnp.float32

MAX_WINDOW_BLOCK = 128       # upper bound on windows per grid step


# ----------------------------- window glue (JAX) ----------------------------
def window_partition(x, wps):
    N, D, H, W, C = x.shape
    x = x.reshape(N // wps[0], wps[0], D // wps[1], wps[1],
                  H // wps[2], wps[2], W // wps[3], wps[3], C)
    x = jnp.transpose(x, (0, 2, 4, 6, 1, 3, 5, 7, 8))
    return x.reshape(-1, wps[0] * wps[1] * wps[2] * wps[3], C)


def window_reverse(win, wps, N, D, H, W):
    x = win.reshape(N // wps[0], D // wps[1], H // wps[2], W // wps[3],
                    wps[0], wps[1], wps[2], wps[3], -1)
    x = jnp.transpose(x, (0, 4, 1, 5, 2, 6, 3, 7, 8))
    return x.reshape(N, D, H, W, -1)


def _largest_divisor(n, cap):
    cap = max(1, min(cap, n))
    for d in range(cap, 0, -1):
        if n % d == 0:
            return d
    return 1


# ----------------------------- fused Pallas kernel ---------------------------
def _tmsa_kernel(x_ref, g1_ref, b1_ref, wqkv_ref, bqkv_ref, wp_ref, bp_ref,
                 g2_ref, b2_ref, wfc1_ref, bfc1_ref, w2_ref, bo_ref, o_ref):
    """One block of BW windows: (BW, L, C) -> (BW, L, C), full TMSA block."""
    x3 = x_ref[...]                                  # (BW, L, C), f32
    BW, L, C = x3.shape
    half = L // 2
    T = BW * L
    x2 = x3.reshape(T, C)                            # free (leading collapse)

    # -------- LayerNorm (norm1), biased variance like nn.LayerNorm --------
    mu = jnp.mean(x2, axis=-1, keepdims=True)
    var = jnp.mean((x2 - mu) ** 2, axis=-1, keepdims=True)
    y2 = (x2 - mu) * lax.rsqrt(var + EPS) * g1_ref[...] + b1_ref[...]

    # -------- fused QKV projection [qkv_self | qkv_mut], scale pre-folded ----
    qkv = jnp.dot(y2.astype(MATMUL_DTYPE), wqkv_ref[...].astype(MATMUL_DTYPE),
                  preferred_element_type=jnp.float32) + bqkv_ref[...]   # (T, 6C)

    def heads(which):
        # which: 0=q_self 1=k_self 2=v_self 3=q_mut 4=k_mut 5=v_mut
        base = which * C
        return [qkv[:, base + h * HEAD_DIM: base + (h + 1) * HEAD_DIM]
                .reshape(BW, L, HEAD_DIM) for h in range(NUM_HEADS)]

    def attend(q, k, v):
        s = jnp.einsum('bqd,bkd->bqk',
                       q.astype(MATMUL_DTYPE), k.astype(MATMUL_DTYPE),
                       preferred_element_type=jnp.float32)
        s = s - jnp.max(s, axis=-1, keepdims=True)
        p = jnp.exp(s)
        p = p * pl.reciprocal(jnp.sum(p, axis=-1, keepdims=True), approx=True)
        return jnp.einsum('bqk,bkd->bqd',
                          p.astype(MATMUL_DTYPE), v.astype(MATMUL_DTYPE),
                          preferred_element_type=jnp.float32)

    qs, ks, vs = heads(0), heads(1), heads(2)
    qm, km, vm = heads(3), heads(4), heads(5)

    # ---- self attention: all heads stacked on the einsum batch axis ----
    o_self = attend(jnp.concatenate(qs, 0),
                    jnp.concatenate(ks, 0),
                    jnp.concatenate(vs, 0))                          # (H*BW, L, D)
    x_self = jnp.concatenate(
        [o_self[h * BW:(h + 1) * BW] for h in range(NUM_HEADS)], -1)  # (BW, L, C)

    # ---- mutual attention: window halves exchange K/V;
    #      heads x {x1_aligned, x2_aligned} stacked on the batch axis ----
    q_mut = jnp.concatenate([q[:, half:] for q in qm] + [q[:, :half] for q in qm], 0)
    k_mut = jnp.concatenate([k[:, :half] for k in km] + [k[:, half:] for k in km], 0)
    v_mut = jnp.concatenate([v[:, :half] for v in vm] + [v[:, half:] for v in vm], 0)
    o_mut = attend(q_mut, k_mut, v_mut)                              # (2*H*BW, L/2, D)
    x1 = jnp.concatenate(
        [o_mut[h * BW:(h + 1) * BW] for h in range(NUM_HEADS)], -1)   # (BW, L/2, C)
    x2m = jnp.concatenate(
        [o_mut[(NUM_HEADS + h) * BW:(NUM_HEADS + h + 1) * BW]
         for h in range(NUM_HEADS)], -1)                              # (BW, L/2, C)
    x_mut = jnp.concatenate([x1, x2m], 1)                            # (BW, L, C)

    # channel layout matches torch.cat([cat([x1, x2], 1), x_self], 2):
    # columns [0:C] = mutual attention, [C:2C] = self attention.
    x_out = jnp.concatenate([x_mut.reshape(T, C), x_self.reshape(T, C)], -1)

    # -------- single output projection: (T, 2C) @ (2C, C), residual 1 --------
    attn = jnp.dot(x_out.astype(MATMUL_DTYPE), wp_ref[...].astype(MATMUL_DTYPE),
                   preferred_element_type=jnp.float32) + bp_ref[...]
    z2 = x2 + attn                                                   # (T, C)

    # -------- LayerNorm (norm2) + GEGLU MLP (fc11|fc12 fused) + residual 2 ---
    mu2 = jnp.mean(z2, axis=-1, keepdims=True)
    var2 = jnp.mean((z2 - mu2) ** 2, axis=-1, keepdims=True)
    yn = (z2 - mu2) * lax.rsqrt(var2 + EPS) * g2_ref[...] + b2_ref[...]
    h12 = jnp.dot(yn.astype(MATMUL_DTYPE), wfc1_ref[...].astype(MATMUL_DTYPE),
                  preferred_element_type=jnp.float32) + bfc1_ref[...]  # (T, 2*HIDDEN)
    h1 = h12[:, :HIDDEN]
    h2 = h12[:, HIDDEN:]
    # exact erf-GELU (matches torch nn.GELU default)
    g = 0.5 * h1 * (1.0 + lax.erf(h1 * (2.0 ** -0.5)))
    mlp = jnp.dot((g * h2).astype(MATMUL_DTYPE), w2_ref[...].astype(MATMUL_DTYPE),
                  preferred_element_type=jnp.float32) + bo_ref[...]
    o_ref[...] = (z2 + mlp).reshape(BW, L, C)                        # residual 2


# ----------------------------- wrapper ---------------------------------------
def tmsa_forward(x, params, mask_matrix=None):
    # shift_size = (0,0,0): no cyclic shift, mask_matrix ignored (same path as
    # the reference).
    # TODO(synk): shifted-window path (roll_block + additive attention mask)
    # not implemented.
    N, D, H, W, C = x.shape
    assert C == DIM
    assert N % WINDOW[0] == 0 and D % WINDOW[1] == 0
    assert H % WINDOW[2] == 0 and W % WINDOW[3] == 0   # no padding needed

    # ---- one-time parameter fusion / scale folding (tiny) ----
    scale_vec = jnp.concatenate(
        [jnp.full((C,), SCALE, jnp.float32), jnp.ones((2 * C,), jnp.float32)] * 2)
    w_qkv = jnp.concatenate([params['wqs'], params['wqm']], axis=1) * scale_vec[None, :]
    b_qkv = jnp.concatenate([params['bqs'], params['bqm']], axis=1) * scale_vec[None, :]
    w_fc1 = jnp.concatenate([params['w11'], params['w12']], axis=1)
    b_fc1 = jnp.concatenate([params['b11'], params['b12']], axis=1)

    xw = window_partition(x, WINDOW)                   # (B_, L, C)
    B_, L, _ = xw.shape
    # Largest window block <= MAX_WINDOW_BLOCK that divides B_ and keeps the
    # grid length >= 2 (both v7x TensorCores get work).  VMEM is a non-issue.
    BW = _largest_divisor(B_, min(MAX_WINDOW_BLOCK, max(1, B_ // 2)))

    def full(shape):
        return pl.BlockSpec(shape, lambda i, _n=len(shape): (0,) * _n)

    # NOTE: output last dim is C=32 (masked lane stores); a lane-dense
    # (BW, L*C) out_spec would need an in-kernel sublane/lane merge relayout,
    # which is not worth it at this tiny size.
    out_w = pl.pallas_call(
        _tmsa_kernel,
        out_shape=jax.ShapeDtypeStruct((B_, L, C), jnp.float32),
        grid=(B_ // BW,),
        in_specs=[
            pl.BlockSpec((BW, L, C), lambda i: (i, 0, 0)),
            full((1, C)), full((1, C)),                       # g1, b1
            full((C, 6 * C)), full((1, 6 * C)),               # fused qkv
            full((2 * C, C)), full((1, C)),                   # proj
            full((1, C)), full((1, C)),                       # g2, b2
            full((C, 2 * HIDDEN)), full((1, 2 * HIDDEN)),     # fused fc11|fc12
            full((HIDDEN, C)), full((1, C)),                  # fc2
        ],
        out_specs=pl.BlockSpec((BW, L, C), lambda i: (i, 0, 0)),
        compiler_params=pltpu.CompilerParams(dimension_semantics=("parallel",)),
    )(xw, params['g1'], params['b1'], w_qkv, b_qkv, params['wp'], params['bp'],
      params['g2'], params['b2'], w_fc1, b_fc1, params['w2'], params['bo'])

    return window_reverse(out_w, WINDOW, N, D, H, W)


# ----------------------------- pure-JAX reference ----------------------------
def tmsa_ref(x, params):
    N, D, H, W, C = x.shape

    def ln(v, g, b):
        mu = jnp.mean(v, -1, keepdims=True)
        var = jnp.mean((v - mu) ** 2, -1, keepdims=True)
        return (v - mu) / jnp.sqrt(var + EPS) * g + b

    xw = window_partition(x, WINDOW)
    B_, L, _ = xw.shape
    y = ln(xw, params['g1'][0], params['b1'][0])

    def qkv_heads(w, b):
        qkv = y @ w + b[0]
        qkv = qkv.reshape(B_, L, 3, NUM_HEADS, HEAD_DIM).transpose(2, 0, 3, 1, 4)
        return qkv[0], qkv[1], qkv[2]

    def attend(q, k, v):
        s = jnp.einsum('bhqd,bhkd->bhqk', q * SCALE, k)
        p = jax.nn.softmax(s, axis=-1)
        o = jnp.einsum('bhqk,bhkd->bhqd', p, v)
        return o.transpose(0, 2, 1, 3).reshape(B_, q.shape[2], C)

    q, k, v = qkv_heads(params['wqs'], params['bqs'])
    x_self = attend(q, k, v)
    qm, km, vm = qkv_heads(params['wqm'], params['bqm'])
    half = L // 2
    x1 = attend(qm[:, :, half:], km[:, :, :half], vm[:, :, :half])
    x2 = attend(qm[:, :, :half], km[:, :, half:], vm[:, :, half:])
    x_out = jnp.concatenate([jnp.concatenate([x1, x2], 1), x_self], 2)
    attn = x_out @ params['wp'] + params['bp'][0]
    x = x + window_reverse(attn, WINDOW, N, D, H, W)

    y2 = ln(x, params['g2'][0], params['b2'][0])
    h1 = y2 @ params['w11'] + params['b11'][0]
    h2 = y2 @ params['w12'] + params['b12'][0]
    g = 0.5 * h1 * (1.0 + lax.erf(h1 / jnp.sqrt(2.0)))
    return x + ((g * h2) @ params['w2'] + params['bo'][0])


# ----------------------------- params ----------------------------------------
def init_params(key):
    ks = jax.random.split(key, 10)

    def lin(k, fin, fout):
        kw, kb = jax.random.split(k)
        w = jax.random.normal(kw, (fin, fout), jnp.float32) * (fin ** -0.5)
        b = jax.random.normal(kb, (1, fout), jnp.float32) * 0.02
        return w, b

    p = {}
    p['g1'] = 1.0 + 0.1 * jax.random.normal(ks[0], (1, DIM), jnp.float32)
    p['b1'] = 0.1 * jax.random.normal(ks[1], (1, DIM), jnp.float32)
    p['wqs'], p['bqs'] = lin(ks[2], DIM, 3 * DIM)      # qkv_self (bias=True)
    p['wqm'], p['bqm'] = lin(ks[3], DIM, 3 * DIM)      # qkv_mut  (bias=True)
    p['wp'], p['bp'] = lin(ks[4], 2 * DIM, DIM)        # proj (2C -> C, mut_attn=True)
    p['g2'] = 1.0 + 0.1 * jax.random.normal(ks[5], (1, DIM), jnp.float32)
    p['b2'] = 0.1 * jax.random.normal(ks[6], (1, DIM), jnp.float32)
    p['w11'], p['b11'] = lin(ks[7], DIM, HIDDEN)
    p['w12'], p['b12'] = lin(ks[8], DIM, HIDDEN)
    p['w2'], p['bo'] = lin(ks[9], HIDDEN, DIM)
    return p


# ----------------------------- main -------------------------------------------
if __name__ == "__main__":
    key = jax.random.PRNGKey(0)
    kx, kp = jax.random.split(key)
    x = jax.random.normal(kx, (4, 4, 4, 4, DIM), jnp.float32)   # (N, D, H, W, C)
    params = init_params(kp)

    out = jax.jit(tmsa_forward)(x, params)
    out = jax.block_until_ready(out)

    ref = tmsa_ref(x, params)
    err = float(jnp.max(jnp.abs(out - ref)))
    # approx-reciprocal softmax (and the optional bf16 matmul path) relax the
    # match vs the exact-f32 reference a little; any structural bug is O(1).
    tol = 3e-2 if MATMUL_DTYPE == jnp.float32 else 1.5e-1
    assert err < tol, f"Pallas/reference mismatch: max abs err = {err}"

    print("KERNEL_OK")
</pallas_src>

<mosaic_0001>
module attributes {stable_mosaic.version = 11 : i64} {
  func.func @_tmsa_kernel(%arg0: i32, %arg1: memref<8x16x32xf32, #tpu.memory_space<vmem>>, %arg2: memref<1x32xf32, #tpu.memory_space<vmem>>, %arg3: memref<1x32xf32, #tpu.memory_space<vmem>>, %arg4: memref<32x192xf32, #tpu.memory_space<vmem>>, %arg5: memref<1x192xf32, #tpu.memory_space<vmem>>, %arg6: memref<64x32xf32, #tpu.memory_space<vmem>>, %arg7: memref<1x32xf32, #tpu.memory_space<vmem>>, %arg8: memref<1x32xf32, #tpu.memory_space<vmem>>, %arg9: memref<1x32xf32, #tpu.memory_space<vmem>>, %arg10: memref<32x128xf32, #tpu.memory_space<vmem>>, %arg11: memref<1x128xf32, #tpu.memory_space<vmem>>, %arg12: memref<64x32xf32, #tpu.memory_space<vmem>>, %arg13: memref<1x32xf32, #tpu.memory_space<vmem>>, %arg14: memref<8x16x32xf32, #tpu.memory_space<vmem>>) attributes {dimension_semantics = [#tpu.dimension_semantics<parallel>], iteration_bounds = array<i64: 2>, scalar_prefetch = 0 : i64, scratch_operands = 0 : i64, tpu.core_type = #tpu.core_type<tc>, window_params = [{transform_indices = @transform_0, window_bounds = array<i64: 8, 16, 32>}, {pipeline_mode = #tpu.pipeline_mode<synchronous>, transform_indices = @transform_1, window_bounds = array<i64: 1, 32>}, {pipeline_mode = #tpu.pipeline_mode<synchronous>, transform_indices = @transform_2, window_bounds = array<i64: 1, 32>}, {pipeline_mode = #tpu.pipeline_mode<synchronous>, transform_indices = @transform_3, window_bounds = array<i64: 32, 192>}, {pipeline_mode = #tpu.pipeline_mode<synchronous>, transform_indices = @transform_4, window_bounds = array<i64: 1, 192>}, {pipeline_mode = #tpu.pipeline_mode<synchronous>, transform_indices = @transform_5, window_bounds = array<i64: 64, 32>}, {pipeline_mode = #tpu.pipeline_mode<synchronous>, transform_indices = @transform_6, window_bounds = array<i64: 1, 32>}, {pipeline_mode = #tpu.pipeline_mode<synchronous>, transform_indices = @transform_7, window_bounds = array<i64: 1, 32>}, {pipeline_mode = #tpu.pipeline_mode<synchronous>, transform_indices = @transform_8, window_bounds = array<i64: 1, 32>}, {pipeline_mode = #tpu.pipeline_mode<synchronous>, transform_indices = @transform_9, window_bounds = array<i64: 32, 128>}, {pipeline_mode = #tpu.pipeline_mode<synchronous>, transform_indices = @transform_10, window_bounds = array<i64: 1, 128>}, {pipeline_mode = #tpu.pipeline_mode<synchronous>, transform_indices = @transform_11, window_bounds = array<i64: 64, 32>}, {pipeline_mode = #tpu.pipeline_mode<synchronous>, transform_indices = @transform_12, window_bounds = array<i64: 1, 32>}, {transform_indices = @transform_13, window_bounds = array<i64: 8, 16, 32>}]} {
    %c0 = arith.constant 0 : index
    %c0_0 = arith.constant 0 : index
    %c0_1 = arith.constant 0 : index
    %0 = vector.load %arg1[%c0, %c0_0, %c0_1] : memref<8x16x32xf32, #tpu.memory_space<vmem>>, vector<8x16x32xf32>
    %1 = vector.shape_cast %0 : vector<8x16x32xf32> to vector<128x32xf32>
    %cst = arith.constant dense<0.000000e+00> : vector<128xf32>
    %2 = vector.multi_reduction <add>, %1, %cst [1] : vector<128x32xf32> to vector<128xf32>
    %3 = vector.shape_cast %2 : vector<128xf32> to vector<128x1xf32>
    %cst_2 = arith.constant 3.200000e+01 : f32
    %4 = vector.broadcast %cst_2 : f32 to vector<128x1xf32>
    %5 = arith.divf %3, %4 : vector<128x1xf32>
    %6 = vector.broadcast %5 : vector<128x1xf32> to vector<128x32xf32>
    %7 = arith.subf %1, %6 : vector<128x32xf32>
    %8 = arith.mulf %7, %7 : vector<128x32xf32>
    %cst_3 = arith.constant dense<0.000000e+00> : vector<128xf32>
    %9 = vector.multi_reduction <add>, %8, %cst_3 [1] : vector<128x32xf32> to vector<128xf32>
    %10 = vector.shape_cast %9 : vector<128xf32> to vector<128x1xf32>
    %cst_4 = arith.constant 3.200000e+01 : f32
    %11 = vector.broadcast %cst_4 : f32 to vector<128x1xf32>
    %12 = arith.divf %10, %11 : vector<128x1xf32>
    %13 = vector.broadcast %5 : vector<128x1xf32> to vector<128x32xf32>
    %14 = arith.subf %1, %13 : vector<128x32xf32>
    %cst_5 = arith.constant 9.99999974E-6 : f32
    %15 = vector.broadcast %cst_5 : f32 to vector<128x1xf32>
    %16 = arith.addf %12, %15 : vector<128x1xf32>
    %17 = math.rsqrt %16 : vector<128x1xf32>
    %18 = vector.broadcast %17 : vector<128x1xf32> to vector<128x32xf32>
    %19 = arith.mulf %14, %18 : vector<128x32xf32>
    %c0_6 = arith.constant 0 : index
    %c0_7 = arith.constant 0 : index
    %20 = vector.load %arg2[%c0_6, %c0_7] : memref<1x32xf32, #tpu.memory_space<vmem>>, vector<1x32xf32>
    %21 = vector.broadcast %20 : vector<1x32xf32> to vector<128x32xf32>
    %22 = arith.mulf %19, %21 : vector<128x32xf32>
    %c0_8 = arith.constant 0 : index
    %c0_9 = arith.constant 0 : index
    %23 = vector.load %arg3[%c0_8, %c0_9] : memref<1x32xf32, #tpu.memory_space<vmem>>, vector<1x32xf32>
    %24 = vector.broadcast %23 : vector<1x32xf32> to vector<128x32xf32>
    %25 = arith.addf %22, %24 : vector<128x32xf32>
    %c0_10 = arith.constant 0 : index
    %c0_11 = arith.constant 0 : index
    %26 = vector.load %arg4[%c0_10, %c0_11] : memref<32x192xf32, #tpu.memory_space<vmem>>, vector<32x192xf32>
    %cst_12 = arith.constant dense<0.000000e+00> : vector<128x192xf32>
    %27 = tpu.matmul %25, %26, %cst_12 {dimension_numbers = #tpu.dot_dimension_numbers<[1], [0], [0], [1], [0, 0, 1, 1], [], []>} : vector<128x32xf32>, vector<32x192xf32>, vector<128x192xf32> -> vector<128x192xf32>
    %c0_13 = arith.constant 0 : index
    %c0_14 = arith.constant 0 : index
    %28 = vector.load %arg5[%c0_13, %c0_14] : memref<1x192xf32, #tpu.memory_space<vmem>>, vector<1x192xf32>
    %29 = vector.broadcast %28 : vector<1x192xf32> to vector<128x192xf32>
    %30 = arith.addf %27, %29 : vector<128x192xf32>
    %31 = vector.extract_strided_slice %30 {offsets = [0, 0], sizes = [128, 8], strides = [1, 1]} : vector<128x192xf32> to vector<128x8xf32>
    %32 = vector.shape_cast %31 : vector<128x8xf32> to vector<8x16x8xf32>
    %33 = vector.extract_strided_slice %30 {offsets = [0, 8], sizes = [128, 8], strides = [1, 1]} : vector<128x192xf32> to vector<128x8xf32>
    %34 = vector.shape_cast %33 : vector<128x8xf32> to vector<8x16x8xf32>
    %35 = vector.extract_strided_slice %30 {offsets = [0, 16], sizes = [128, 8], strides = [1, 1]} : vector<128x192xf32> to vector<128x8xf32>
    %36 = vector.shape_cast %35 : vector<128x8xf32> to vector<8x16x8xf32>
    %37 = vector.extract_strided_slice %30 {offsets = [0, 24], sizes = [128, 8], strides = [1, 1]} : vector<128x192xf32> to vector<128x8xf32>
    %38 = vector.shape_cast %37 : vector<128x8xf32> to vector<8x16x8xf32>
    %39 = vector.extract_strided_slice %30 {offsets = [0, 32], sizes = [128, 8], strides = [1, 1]} : vector<128x192xf32> to vector<128x8xf32>
    %40 = vector.shape_cast %39 : vector<128x8xf32> to vector<8x16x8xf32>
    %41 = vector.extract_strided_slice %30 {offsets = [0, 40], sizes = [128, 8], strides = [1, 1]} : vector<128x192xf32> to vector<128x8xf32>
    %42 = vector.shape_cast %41 : vector<128x8xf32> to vector<8x16x8xf32>
    %43 = vector.extract_strided_slice %30 {offsets = [0, 48], sizes = [128, 8], strides = [1, 1]} : vector<128x192xf32> to vector<128x8xf32>
    %44 = vector.shape_cast %43 : vector<128x8xf32> to vector<8x16x8xf32>
    %45 = vector.extract_strided_slice %30 {offsets = [0, 56], sizes = [128, 8], strides = [1, 1]} : vector<128x192xf32> to vector<128x8xf32>
    %46 = vector.shape_cast %45 : vector<128x8xf32> to vector<8x16x8xf32>
    %47 = vector.extract_strided_slice %30 {offsets = [0, 64], sizes = [128, 8], strides = [1, 1]} : vector<128x192xf32> to vector<128x8xf32>
    %48 = vector.shape_cast %47 : vector<128x8xf32> to vector<8x16x8xf32>
    %49 = vector.extract_strided_slice %30 {offsets = [0, 72], sizes = [128, 8], strides = [1, 1]} : vector<128x192xf32> to vector<128x8xf32>
    %50 = vector.shape_cast %49 : vector<128x8xf32> to vector<8x16x8xf32>
    %51 = vector.extract_strided_slice %30 {offsets = [0, 80], sizes = [128, 8], strides = [1, 1]} : vector<128x192xf32> to vector<128x8xf32>
    %52 = vector.shape_cast %51 : vector<128x8xf32> to vector<8x16x8xf32>
    %53 = vector.extract_strided_slice %30 {offsets = [0, 88], sizes = [128, 8], strides = [1, 1]} : vector<128x192xf32> to vector<128x8xf32>
    %54 = vector.shape_cast %53 : vector<128x8xf32> to vector<8x16x8xf32>
    %55 = vector.extract_strided_slice %30 {offsets = [0, 96], sizes = [128, 8], strides = [1, 1]} : vector<128x192xf32> to vector<128x8xf32>
    %56 = vector.shape_cast %55 : vector<128x8xf32> to vector<8x16x8xf32>
    %57 = vector.extract_strided_slice %30 {offsets = [0, 104], sizes = [128, 8], strides = [1, 1]} : vector<128x192xf32> to vector<128x8xf32>
    %58 = vector.shape_cast %57 : vector<128x8xf32> to vector<8x16x8xf32>
    %59 = vector.extract_strided_slice %30 {offsets = [0, 112], sizes = [128, 8], strides = [1, 1]} : vector<128x192xf32> to vector<128x8xf32>
    %60 = vector.shape_cast %59 : vector<128x8xf32> to vector<8x16x8xf32>
    %61 = vector.extract_strided_slice %30 {offsets = [0, 120], sizes = [128, 8], strides = [1, 1]} : vector<128x192xf32> to vector<128x8xf32>
    %62 = vector.shape_cast %61 : vector<128x8xf32> to vector<8x16x8xf32>
    %63 = vector.extract_strided_slice %30 {offsets = [0, 128], sizes = [128, 8], strides = [1, 1]} : vector<128x192xf32> to vector<128x8xf32>
    %64 = vector.shape_cast %63 : vector<128x8xf32> to vector<8x16x8xf32>
    %65 = vector.extract_strided_slice %30 {offsets = [0, 136], sizes = [128, 8], strides = [1, 1]} : vector<128x192xf32> to vector<128x8xf32>
    %66 = vector.shape_cast %65 : vector<128x8xf32> to vector<8x16x8xf32>
    %67 = vector.extract_strided_slice %30 {offsets = [0, 144], sizes = [128, 8], strides = [1, 1]} : vector<128x192xf32> to vector<128x8xf32>
    %68 = vector.shape_cast %67 : vector<128x8xf32> to vector<8x16x8xf32>
    %69 = vector.extract_strided_slice %30 {offsets = [0, 152], sizes = [128, 8], strides = [1, 1]} : vector<128x192xf32> to vector<128x8xf32>
    %70 = vector.shape_cast %69 : vector<128x8xf32> to vector<8x16x8xf32>
    %71 = vector.extract_strided_slice %30 {offsets = [0, 160], sizes = [128, 8], strides = [1, 1]} : vector<128x192xf32> to vector<128x8xf32>
    %72 = vector.shape_cast %71 : vector<128x8xf32> to vector<8x16x8xf32>
    %73 = vector.extract_strided_slice %30 {offsets = [0, 168], sizes = [128, 8], strides = [1, 1]} : vector<128x192xf32> to vector<128x8xf32>
    %74 = vector.shape_cast %73 : vector<128x8xf32> to vector<8x16x8xf32>
    %75 = vector.extract_strided_slice %30 {offsets = [0, 176], sizes = [128, 8], strides = [1, 1]} : vector<128x192xf32> to vector<128x8xf32>
    %76 = vector.shape_cast %75 : vector<128x8xf32> to vector<8x16x8xf32>
    %77 = vector.extract_strided_slice %30 {offsets = [0, 184], sizes = [128, 8], strides = [1, 1]} : vector<128x192xf32> to vector<128x8xf32>
    %78 = vector.shape_cast %77 : vector<128x8xf32> to vector<8x16x8xf32>
    %79 = tpu.concatenate %32, %34, %36, %38 in 0 : vector<8x16x8xf32>, vector<8x16x8xf32>, vector<8x16x8xf32>, vector<8x16x8xf32> -> vector<32x16x8xf32>
    %80 = tpu.concatenate %40, %42, %44, %46 in 0 : vector<8x16x8xf32>, vector<8x16x8xf32>, vector<8x16x8xf32>, vector<8x16x8xf32> -> vector<32x16x8xf32>
    %81 = tpu.concatenate %48, %50, %52, %54 in 0 : vector<8x16x8xf32>, vector<8x16x8xf32>, vector<8x16x8xf32>, vector<8x16x8xf32> -> vector<32x16x8xf32>
    "tpu.trace_start"() <{level = 10 : i32, message = "bqd,bkd->bqk"}> : () -> ()
    %cst_15 = arith.constant dense<0.000000e+00> : vector<32x16x16xf32>
    %82 = tpu.matmul %79, %80, %cst_15 {dimension_numbers = #tpu.dot_dimension_numbers<[2], [2], [1], [1], [0, 0, 0, 1, 1, 1], [0], [0]>} : vector<32x16x8xf32>, vector<32x16x8xf32>, vector<32x16x16xf32> -> vector<32x16x16xf32>
    "tpu.trace_stop"() : () -> ()
    %cst_16 = arith.constant dense<0xFF800000> : vector<32x16xf32>
    %83 = vector.multi_reduction <maximumf>, %82, %cst_16 [2] : vector<32x16x16xf32> to vector<32x16xf32>
    %84 = vector.shape_cast %83 : vector<32x16xf32> to vector<32x16x1xf32>
    %85 = vector.broadcast %84 : vector<32x16x1xf32> to vector<32x16x16xf32>
    %86 = arith.subf %82, %85 : vector<32x16x16xf32>
    %87 = math.exp %86 : vector<32x16x16xf32>
    %cst_17 = arith.constant dense<0.000000e+00> : vector<32x16xf32>
    %88 = vector.multi_reduction <add>, %87, %cst_17 [2] : vector<32x16x16xf32> to vector<32x16xf32>
    %89 = vector.shape_cast %88 : vector<32x16xf32> to vector<32x16x1xf32>
    %90 = tpu.reciprocal %89 {approx = true} : vector<32x16x1xf32> -> vector<32x16x1xf32>
    %91 = vector.broadcast %90 : vector<32x16x1xf32> to vector<32x16x16xf32>
    %92 = arith.mulf %87, %91 : vector<32x16x16xf32>
    "tpu.trace_start"() <{level = 10 : i32, message = "bqk,bkd->bqd"}> : () -> ()
    %cst_18 = arith.constant dense<0.000000e+00> : vector<32x16x8xf32>
    %93 = tpu.matmul %92, %81, %cst_18 {dimension_numbers = #tpu.dot_dimension_numbers<[2], [1], [1], [2], [0, 0, 0, 1, 1, 2], [0], [0]>} : vector<32x16x16xf32>, vector<32x16x8xf32>, vector<32x16x8xf32> -> vector<32x16x8xf32>
    "tpu.trace_stop"() : () -> ()
    %94 = vector.extract_strided_slice %93 {offsets = [0, 0, 0], sizes = [8, 16, 8], strides = [1, 1, 1]} : vector<32x16x8xf32> to vector<8x16x8xf32>
    %95 = vector.extract_strided_slice %93 {offsets = [8, 0, 0], sizes = [8, 16, 8], strides = [1, 1, 1]} : vector<32x16x8xf32> to vector<8x16x8xf32>
    %96 = vector.extract_strided_slice %93 {offsets = [16, 0, 0], sizes = [8, 16, 8], strides = [1, 1, 1]} : vector<32x16x8xf32> to vector<8x16x8xf32>
    %97 = vector.extract_strided_slice %93 {offsets = [24, 0, 0], sizes = [8, 16, 8], strides = [1, 1, 1]} : vector<32x16x8xf32> to vector<8x16x8xf32>
    %98 = tpu.concatenate %94, %95, %96, %97 in 2 : vector<8x16x8xf32>, vector<8x16x8xf32>, vector<8x16x8xf32>, vector<8x16x8xf32> -> vector<8x16x32xf32>
    %99 = vector.extract_strided_slice %56 {offsets = [0, 8, 0], sizes = [8, 8, 8], strides = [1, 1, 1]} : vector<8x16x8xf32> to vector<8x8x8xf32>
    %100 = vector.extract_strided_slice %58 {offsets = [0, 8, 0], sizes = [8, 8, 8], strides = [1, 1, 1]} : vector<8x16x8xf32> to vector<8x8x8xf32>
    %101 = vector.extract_strided_slice %60 {offsets = [0, 8, 0], sizes = [8, 8, 8], strides = [1, 1, 1]} : vector<8x16x8xf32> to vector<8x8x8xf32>
    %102 = vector.extract_strided_slice %62 {offsets = [0, 8, 0], sizes = [8, 8, 8], strides = [1, 1, 1]} : vector<8x16x8xf32> to vector<8x8x8xf32>
    %103 = vector.extract_strided_slice %56 {offsets = [0, 0, 0], sizes = [8, 8, 8], strides = [1, 1, 1]} : vector<8x16x8xf32> to vector<8x8x8xf32>
    %104 = vector.extract_strided_slice %58 {offsets = [0, 0, 0], sizes = [8, 8, 8], strides = [1, 1, 1]} : vector<8x16x8xf32> to vector<8x8x8xf32>
    %105 = vector.extract_strided_slice %60 {offsets = [0, 0, 0], sizes = [8, 8, 8], strides = [1, 1, 1]} : vector<8x16x8xf32> to vector<8x8x8xf32>
    %106 = vector.extract_strided_slice %62 {offsets = [0, 0, 0], sizes = [8, 8, 8], strides = [1, 1, 1]} : vector<8x16x8xf32> to vector<8x8x8xf32>
    %107 = tpu.concatenate %99, %100, %101, %102, %103, %104, %105, %106 in 0 : vector<8x8x8xf32>, vector<8x8x8xf32>, vector<8x8x8xf32>, vector<8x8x8xf32>, vector<8x8x8xf32>, vector<8x8x8xf32>, vector<8x8x8xf32>, vector<8x8x8xf32> -> vector<64x8x8xf32>
    %108 = vector.extract_strided_slice %64 {offsets = [0, 0, 0], sizes = [8, 8, 8], strides = [1, 1, 1]} : vector<8x16x8xf32> to vector<8x8x8xf32>
    %109 = vector.extract_strided_slice %66 {offsets = [0, 0, 0], sizes = [8, 8, 8], strides = [1, 1, 1]} : vector<8x16x8xf32> to vector<8x8x8xf32>
    %110 = vector.extract_strided_slice %68 {offsets = [0, 0, 0], sizes = [8, 8, 8], strides = [1, 1, 1]} : vector<8x16x8xf32> to vector<8x8x8xf32>
    %111 = vector.extract_strided_slice %70 {offsets = [0, 0, 0], sizes = [8, 8, 8], strides = [1, 1, 1]} : vector<8x16x8xf32> to vector<8x8x8xf32>
    %112 = vector.extract_strided_slice %64 {offsets = [0, 8, 0], sizes = [8, 8, 8], strides = [1, 1, 1]} : vector<8x16x8xf32> to vector<8x8x8xf32>
    %113 = vector.extract_strided_slice %66 {offsets = [0, 8, 0], sizes = [8, 8, 8], strides = [1, 1, 1]} : vector<8x16x8xf32> to vector<8x8x8xf32>
    %114 = vector.extract_strided_slice %68 {offsets = [0, 8, 0], sizes = [8, 8, 8], strides = [1, 1, 1]} : vector<8x16x8xf32> to vector<8x8x8xf32>
    %115 = vector.extract_strided_slice %70 {offsets = [0, 8, 0], sizes = [8, 8, 8], strides = [1, 1, 1]} : vector<8x16x8xf32> to vector<8x8x8xf32>
    %116 = tpu.concatenate %108, %109, %110, %111, %112, %113, %114, %115 in 0 : vector<8x8x8xf32>, vector<8x8x8xf32>, vector<8x8x8xf32>, vector<8x8x8xf32>, vector<8x8x8xf32>, vector<8x8x8xf32>, vector<8x8x8xf32>, vector<8x8x8xf32> -> vector<64x8x8xf32>
    %117 = vector.extract_strided_slice %72 {offsets = [0, 0, 0], sizes = [8, 8, 8], strides = [1, 1, 1]} : vector<8x16x8xf32> to vector<8x8x8xf32>
    %118 = vector.extract_strided_slice %74 {offsets = [0, 0, 0], sizes = [8, 8, 8], strides = [1, 1, 1]} : vector<8x16x8xf32> to vector<8x8x8xf32>
    %119 = vector.extract_strided_slice %76 {offsets = [0, 0, 0], sizes = [8, 8, 8], strides = [1, 1, 1]} : vector<8x16x8xf32> to vector<8x8x8xf32>
    %120 = vector.extract_strided_slice %78 {offsets = [0, 0, 0], sizes = [8, 8, 8], strides = [1, 1, 1]} : vector<8x16x8xf32> to vector<8x8x8xf32>
    %121 = vector.extract_strided_slice %72 {offsets = [0, 8, 0], sizes = [8, 8, 8], strides = [1, 1, 1]} : vector<8x16x8xf32> to vector<8x8x8xf32>
    %122 = vector.extract_strided_slice %74 {offsets = [0, 8, 0], sizes = [8, 8, 8], strides = [1, 1, 1]} : vector<8x16x8xf32> to vector<8x8x8xf32>
    %123 = vector.extract_strided_slice %76 {offsets = [0, 8, 0], sizes = [8, 8, 8], strides = [1, 1, 1]} : vector<8x16x8xf32> to vector<8x8x8xf32>
    %124 = vector.extract_strided_slice %78 {offsets = [0, 8, 0], sizes = [8, 8, 8], strides = [1, 1, 1]} : vector<8x16x8xf32> to vector<8x8x8xf32>
    %125 = tpu.concatenate %117, %118, %119, %120, %121, %122, %123, %124 in 0 : vector<8x8x8xf32>, vector<8x8x8xf32>, vector<8x8x8xf32>, vector<8x8x8xf32>, vector<8x8x8xf32>, vector<8x8x8xf32>, vector<8x8x8xf32>, vector<8x8x8xf32> -> vector<64x8x8xf32>
    "tpu.trace_start"() <{level = 10 : i32, message = "bqd,bkd->bqk"}> : () -> ()
    %cst_19 = arith.constant dense<0.000000e+00> : vector<64x8x8xf32>
    %126 = tpu.matmul %107, %116, %cst_19 {dimension_numbers = #tpu.dot_dimension_numbers<[2], [2], [1], [1], [0, 0, 0, 1, 1, 1], [0], [0]>} : vector<64x8x8xf32>, vector<64x8x8xf32>, vector<64x8x8xf32> -> vector<64x8x8xf32>
    "tpu.trace_stop"() : () -> ()
    %cst_20 = arith.constant dense<0xFF800000> : vector<64x8xf32>
    %127 = vector.multi_reduction <maximumf>, %126, %cst_20 [2] : vector<64x8x8xf32> to vector<64x8xf32>
    %128 = vector.shape_cast %127 : vector<64x8xf32> to vector<64x8x1xf32>
    %129 = vector.broadcast %128 : vector<64x8x1xf32> to vector<64x8x8xf32>
    %130 = arith.subf %126, %129 : vector<64x8x8xf32>
    %131 = math.exp %130 : vector<64x8x8xf32>
    %cst_21 = arith.constant dense<0.000000e+00> : vector<64x8xf32>
    %132 = vector.multi_reduction <add>, %131, %cst_21 [2] : vector<64x8x8xf32> to vector<64x8xf32>
    %133 = vector.shape_cast %132 : vector<64x8xf32> to vector<64x8x1xf32>
    %134 = tpu.reciprocal %133 {approx = true} : vector<64x8x1xf32> -> vector<64x8x1xf32>
    %135 = vector.broadcast %134 : vector<64x8x1xf32> to vector<64x8x8xf32>
    %136 = arith.mulf %131, %135 : vector<64x8x8xf32>
    "tpu.trace_start"() <{level = 10 : i32, message = "bqk,bkd->bqd"}> : () -> ()
    %cst_22 = arith.constant dense<0.000000e+00> : vector<64x8x8xf32>
    %137 = tpu.matmul %136, %125, %cst_22 {dimension_numbers = #tpu.dot_dimension_numbers<[2], [1], [1], [2], [0, 0, 0, 1, 1, 2], [0], [0]>} : vector<64x8x8xf32>, vector<64x8x8xf32>, vector<64x8x8xf32> -> vector<64x8x8xf32>
    "tpu.trace_stop"() : () -> ()
    %138 = vector.extract_strided_slice %137 {offsets = [0, 0, 0], sizes = [8, 8, 8], strides = [1, 1, 1]} : vector<64x8x8xf32> to vector<8x8x8xf32>
    %139 = vector.extract_strided_slice %137 {offsets = [8, 0, 0], sizes = [8, 8, 8], strides = [1, 1, 1]} : vector<64x8x8xf32> to vector<8x8x8xf32>
    %140 = vector.extract_strided_slice %137 {offsets = [16, 0, 0], sizes = [8, 8, 8], strides = [1, 1, 1]} : vector<64x8x8xf32> to vector<8x8x8xf32>
    %141 = vector.extract_strided_slice %137 {offsets = [24, 0, 0], sizes = [8, 8, 8], strides = [1, 1, 1]} : vector<64x8x8xf32> to vector<8x8x8xf32>
    %142 = tpu.concatenate %138, %139, %140, %141 in 2 : vector<8x8x8xf32>, vector<8x8x8xf32>, vector<8x8x8xf32>, vector<8x8x8xf32> -> vector<8x8x32xf32>
    %143 = vector.extract_strided_slice %137 {offsets = [32, 0, 0], sizes = [8, 8, 8], strides = [1, 1, 1]} : vector<64x8x8xf32> to vector<8x8x8xf32>
    %144 = vector.extract_strided_slice %137 {offsets = [40, 0, 0], sizes = [8, 8, 8], strides = [1, 1, 1]} : vector<64x8x8xf32> to vector<8x8x8xf32>
    %145 = vector.extract_strided_slice %137 {offsets = [48, 0, 0], sizes = [8, 8, 8], strides = [1, 1, 1]} : vector<64x8x8xf32> to vector<8x8x8xf32>
    %146 = vector.extract_strided_slice %137 {offsets = [56, 0, 0], sizes = [8, 8, 8], strides = [1, 1, 1]} : vector<64x8x8xf32> to vector<8x8x8xf32>
    %147 = tpu.concatenate %143, %144, %145, %146 in 2 : vector<8x8x8xf32>, vector<8x8x8xf32>, vector<8x8x8xf32>, vector<8x8x8xf32> -> vector<8x8x32xf32>
    %148 = tpu.concatenate %142, %147 in 1 : vector<8x8x32xf32>, vector<8x8x32xf32> -> vector<8x16x32xf32>
    %149 = vector.shape_cast %148 : vector<8x16x32xf32> to vector<128x32xf32>
    %150 = vector.shape_cast %98 : vector<8x16x32xf32> to vector<128x32xf32>
    %151 = tpu.concatenate %149, %150 in 1 : vector<128x32xf32>, vector<128x32xf32> -> vector<128x64xf32>
    %c0_23 = arith.constant 0 : index
    %c0_24 = arith.constant 0 : index
    %152 = vector.load %arg6[%c0_23, %c0_24] : memref<64x32xf32, #tpu.memory_space<vmem>>, vector<64x32xf32>
    %cst_25 = arith.constant dense<0.000000e+00> : vector<128x32xf32>
    %153 = tpu.matmul %151, %152, %cst_25 {dimension_numbers = #tpu.dot_dimension_numbers<[1], [0], [0], [1], [0, 0, 1, 1], [], []>} : vector<128x64xf32>, vector<64x32xf32>, vector<128x32xf32> -> vector<128x32xf32>
    %c0_26 = arith.constant 0 : index
    %c0_27 = arith.constant 0 : index
    %154 = vector.load %arg7[%c0_26, %c0_27] : memref<1x32xf32, #tpu.memory_space<vmem>>, vector<1x32xf32>
    %155 = vector.broadcast %154 : vector<1x32xf32> to vector<128x32xf32>
    %156 = arith.addf %153, %155 : vector<128x32xf32>
    %157 = arith.addf %1, %156 : vector<128x32xf32>
    %cst_28 = arith.constant dense<0.000000e+00> : vector<128xf32>
    %158 = vector.multi_reduction <add>, %157, %cst_28 [1] : vector<128x32xf32> to vector<128xf32>
    %159 = vector.shape_cast %158 : vector<128xf32> to vector<128x1xf32>
    %cst_29 = arith.constant 3.200000e+01 : f32
    %160 = vector.broadcast %cst_29 : f32 to vector<128x1xf32>
    %161 = arith.divf %159, %160 : vector<128x1xf32>
    %162 = vector.broadcast %161 : vector<128x1xf32> to vector<128x32xf32>
    %163 = arith.subf %157, %162 : vector<128x32xf32>
    %164 = arith.mulf %163, %163 : vector<128x32xf32>
    %cst_30 = arith.constant dense<0.000000e+00> : vector<128xf32>
    %165 = vector.multi_reduction <add>, %164, %cst_30 [1] : vector<128x32xf32> to vector<128xf32>
    %166 = vector.shape_cast %165 : vector<128xf32> to vector<128x1xf32>
    %cst_31 = arith.constant 3.200000e+01 : f32
    %167 = vector.broadcast %cst_31 : f32 to vector<128x1xf32>
    %168 = arith.divf %166, %167 : vector<128x1xf32>
    %169 = vector.broadcast %161 : vector<128x1xf32> to vector<128x32xf32>
    %170 = arith.subf %157, %169 : vector<128x32xf32>
    %cst_32 = arith.constant 9.99999974E-6 : f32
    %171 = vector.broadcast %cst_32 : f32 to vector<128x1xf32>
    %172 = arith.addf %168, %171 : vector<128x1xf32>
    %173 = math.rsqrt %172 : vector<128x1xf32>
    %174 = vector.broadcast %173 : vector<128x1xf32> to vector<128x32xf32>
    %175 = arith.mulf %170, %174 : vector<128x32xf32>
    %c0_33 = arith.constant 0 : index
    %c0_34 = arith.constant 0 : index
    %176 = vector.load %arg8[%c0_33, %c0_34] : memref<1x32xf32, #tpu.memory_space<vmem>>, vector<1x32xf32>
    %177 = vector.broadcast %176 : vector<1x32xf32> to vector<128x32xf32>
    %178 = arith.mulf %175, %177 : vector<128x32xf32>
    %c0_35 = arith.constant 0 : index
    %c0_36 = arith.constant 0 : index
    %179 = vector.load %arg9[%c0_35, %c0_36] : memref<1x32xf32, #tpu.memory_space<vmem>>, vector<1x32xf32>
    %180 = vector.broadcast %179 : vector<1x32xf32> to vector<128x32xf32>
    %181 = arith.addf %178, %180 : vector<128x32xf32>
    %c0_37 = arith.constant 0 : index
    %c0_38 = arith.constant 0 : index
    %182 = vector.load %arg10[%c0_37, %c0_38] : memref<32x128xf32, #tpu.memory_space<vmem>>, vector<32x128xf32>
    %cst_39 = arith.constant dense<0.000000e+00> : vector<128x128xf32>
    %183 = tpu.matmul %181, %182, %cst_39 {dimension_numbers = #tpu.dot_dimension_numbers<[1], [0], [0], [1], [0, 0, 1, 1], [], []>} : vector<128x32xf32>, vector<32x128xf32>, vector<128x128xf32> -> vector<128x128xf32>
    %c0_40 = arith.constant 0 : index
    %c0_41 = arith.constant 0 : index
    %184 = vector.load %arg11[%c0_40, %c0_41] : memref<1x128xf32, #tpu.memory_space<vmem>>, vector<1x128xf32>
    %185 = vector.broadcast %184 : vector<1x128xf32> to vector<128x128xf32>
    %186 = arith.addf %183, %185 : vector<128x128xf32>
    %187 = vector.extract_strided_slice %186 {offsets = [0, 0], sizes = [128, 64], strides = [1, 1]} : vector<128x128xf32> to vector<128x64xf32>
    %188 = vector.extract_strided_slice %186 {offsets = [0, 64], sizes = [128, 64], strides = [1, 1]} : vector<128x128xf32> to vector<128x64xf32>
    %cst_42 = arith.constant 5.000000e-01 : f32
    %189 = vector.broadcast %cst_42 : f32 to vector<128x64xf32>
    %190 = arith.mulf %189, %187 : vector<128x64xf32>
    %cst_43 = arith.constant 0.707106769 : f32
    %191 = vector.broadcast %cst_43 : f32 to vector<128x64xf32>
    %192 = arith.mulf %187, %191 : vector<128x64xf32>
    %193 = math.erf %192 : vector<128x64xf32>
    %cst_44 = arith.constant 1.000000e+00 : f32
    %194 = vector.broadcast %cst_44 : f32 to vector<128x64xf32>
    %195 = arith.addf %194, %193 : vector<128x64xf32>
    %196 = arith.mulf %190, %195 : vector<128x64xf32>
    %197 = arith.mulf %196, %188 : vector<128x64xf32>
    %c0_45 = arith.constant 0 : index
    %c0_46 = arith.constant 0 : index
    %198 = vector.load %arg12[%c0_45, %c0_46] : memref<64x32xf32, #tpu.memory_space<vmem>>, vector<64x32xf32>
    %cst_47 = arith.constant dense<0.000000e+00> : vector<128x32xf32>
    %199 = tpu.matmul %197, %198, %cst_47 {dimension_numbers = #tpu.dot_dimension_numbers<[1], [0], [0], [1], [0, 0, 1, 1], [], []>} : vector<128x64xf32>, vector<64x32xf32>, vector<128x32xf32> -> vector<128x32xf32>
    %c0_48 = arith.constant 0 : index
    %c0_49 = arith.constant 0 : index
    %200 = vector.load %arg13[%c0_48, %c0_49] : memref<1x32xf32, #tpu.memory_space<vmem>>, vector<1x32xf32>
    %201 = vector.broadcast %200 : vector<1x32xf32> to vector<128x32xf32>
    %202 = arith.addf %199, %201 : vector<128x32xf32>
    %203 = arith.addf %157, %202 : vector<128x32xf32>
    %204 = vector.shape_cast %203 : vector<128x32xf32> to vector<8x16x32xf32>
    %c0_50 = arith.constant 0 : index
    %c0_51 = arith.constant 0 : index
    %c0_52 = arith.constant 0 : index
    %205 = vector.load %arg14[%c0_50, %c0_51, %c0_52] : memref<8x16x32xf32, #tpu.memory_space<vmem>>, vector<8x16x32xf32>
    tpu.vector_store %arg14[%c0_50, %c0_51, %c0_52], %204 {strides = array<i32>} : memref<8x16x32xf32, #tpu.memory_space<vmem>>, vector<8x16x32xf32>,
    return
  }
  func.func @transform_0(%arg0: i32) -> (i32, i32, i32) {
    %c0_i32 = arith.constant 0 : i32
    %c0_i32_0 = arith.constant 0 : i32
    %c0_i32_1 = arith.constant 0 : i32
    return %arg0, %c0_i32, %c0_i32_0 : i32, i32, i32
  }
  func.func @transform_1(%arg0: i32) -> (i32, i32) {
    %c0_i32 = arith.constant 0 : i32
    %c0_i32_0 = arith.constant 0 : i32
    %c0_i32_1 = arith.constant 0 : i32
    return %c0_i32, %c0_i32_0 : i32, i32
  }
  func.func @transform_2(%arg0: i32) -> (i32, i32) {
    %c0_i32 = arith.constant 0 : i32
    %c0_i32_0 = arith.constant 0 : i32
    %c0_i32_1 = arith.constant 0 : i32
    return %c0_i32, %c0_i32_0 : i32, i32
  }
  func.func @transform_3(%arg0: i32) -> (i32, i32) {
    %c0_i32 = arith.constant 0 : i32
    %c0_i32_0 = arith.constant 0 : i32
    %c0_i32_1 = arith.constant 0 : i32
    return %c0_i32, %c0_i32_0 : i32, i32
  }
  func.func @transform_4(%arg0: i32) -> (i32, i32) {
    %c0_i32 = arith.constant 0 : i32
    %c0_i32_0 = arith.constant 0 : i32
    %c0_i32_1 = arith.constant 0 : i32
    return %c0_i32, %c0_i32_0 : i32, i32
  }
  func.func @transform_5(%arg0: i32) -> (i32, i32) {
    %c0_i32 = arith.constant 0 : i32
    %c0_i32_0 = arith.constant 0 : i32
    %c0_i32_1 = arith.constant 0 : i32
    return %c0_i32, %c0_i32_0 : i32, i32
  }
  func.func @transform_6(%arg0: i32) -> (i32, i32) {
    %c0_i32 = arith.constant 0 : i32
    %c0_i32_0 = arith.constant 0 : i32
    %c0_i32_1 = arith.constant 0 : i32
    return %c0_i32, %c0_i32_0 : i32, i32
  }
  func.func @transform_7(%arg0: i32) -> (i32, i32) {
    %c0_i32 = arith.constant 0 : i32
    %c0_i32_0 = arith.constant 0 : i32
    %c0_i32_1 = arith.constant 0 : i32
    return %c0_i32, %c0_i32_0 : i32, i32
  }
  func.func @transform_8(%arg0: i32) -> (i32, i32) {
    %c0_i32 = arith.constant 0 : i32
    %c0_i32_0 = arith.constant 0 : i32
    %c0_i32_1 = arith.constant 0 : i32
    return %c0_i32, %c0_i32_0 : i32, i32
  }
  func.func @transform_9(%arg0: i32) -> (i32, i32) {
    %c0_i32 = arith.constant 0 : i32
    %c0_i32_0 = arith.constant 0 : i32
    %c0_i32_1 = arith.constant 0 : i32
    return %c0_i32, %c0_i32_0 : i32, i32
  }
  func.func @transform_10(%arg0: i32) -> (i32, i32) {
    %c0_i32 = arith.constant 0 : i32
    %c0_i32_0 = arith.constant 0 : i32
    %c0_i32_1 = arith.constant 0 : i32
    return %c0_i32, %c0_i32_0 : i32, i32
  }
  func.func @transform_11(%arg0: i32) -> (i32, i32) {
    %c0_i32 = arith.constant 0 : i32
    %c0_i32_0 = arith.constant 0 : i32
    %c0_i32_1 = arith.constant 0 : i32
    return %c0_i32, %c0_i32_0 : i32, i32
  }
  func.func @transform_12(%arg0: i32) -> (i32, i32) {
    %c0_i32 = arith.constant 0 : i32
    %c0_i32_0 = arith.constant 0 : i32
    %c0_i32_1 = arith.constant 0 : i32
    return %c0_i32, %c0_i32_0 : i32, i32
  }
  func.func @transform_13(%arg0: i32) -> (i32, i32, i32) {
    %c0_i32 = arith.constant 0 : i32
    %c0_i32_0 = arith.constant 0 : i32
    %c0_i32_1 = arith.constant 0 : i32
    return %arg0, %c0_i32, %c0_i32_0 : i32, i32, i32
  }
}

</mosaic_0001>

<bundles_post_ra>
// kernel: tmsa_forward.1
= control target key start
LH: loop header
LB: loop body
LE: loop exit
PB: predicated region body
PF: predicated region fallthrough
CT: control target
= control target key end

     0   :  { %s23256_s25 = smov 0   ;;  %s28446_s0 = inlined_call_operand.vmem [shape: f32[16,16,32], index: 0, kind: input, shape index: {}]   ;;  %s28447_s1 = inlined_call_operand.vmem [shape: f32[1,32], index: 1, kind: input, shape index: {}]   ;;  %s28448_s2 = inlined_call_operand.vmem [shape: f32[1,32], index: 2, kind: input, shape index: {}]   ;;  %s28449_s3 = inlined_call_operand.vmem [shape: f32[32,192], index: 3, kind: input, shape index: {}]   ;;  %s28450_s4 = inlined_call_operand.vmem [shape: f32[1,192], index: 4, kind: input, shape index: {}]   ;;  %s28451_s5 = inlined_call_operand.vmem [shape: f32[64,32], index: 5, kind: input, shape index: {}]   ;;  %s28452_s6 = inlined_call_operand.vmem [shape: f32[1,32], index: 6, kind: input, shape index: {}]   ;;  %s28453_s7 = inlined_call_operand.vmem [shape: f32[1,32], index: 7, kind: input, shape index: {}]   ;;  %s28454_s8 = inlined_call_operand.vmem [shape: f32[1,32], index: 8, kind: input, shape index: {}]   ;;  %s28455_s9 = inlined_call_operand.vmem [shape: f32[32,128], index: 9, kind: input, shape index: {}]   ;;  %s28456_s10 = inlined_call_operand.vmem [shape: f32[1,128], index: 10, kind: input, shape index: {}]   ;;  %s28457_s11 = inlined_call_operand.vmem [shape: f32[64,32], index: 11, kind: input, shape index: {}]   ;;  %s28458_s12 = inlined_call_operand.vmem [shape: f32[1,32], index: 12, kind: input, shape index: {}]   ;;  %s28459_s13 = inlined_call_operand.vmem [shape: f32[16,16,32], index: 13, kind: output, shape index: {}]  }
   0x1 LB: > { %s19582_s26 = sadd.s32 4294967295, %s23173_s25   ;;  %p19586_p0 = scmp.ge.s32.totalorder %s23173_s25, 1  ;;  %s23173_s25 = sphi %s23256_s25, %s23_s25  }
   0x2   : > { %p389_p1 = scmp.lt.s32.totalorder %s23173_s25, 3 }
   0x4   : > { %p390_p2 = pnand %p19586_p0, %p389_p1 }
   0x6   : > { %393 = sbr.rel (%p390_p2) target bundleno = 4721 (0x1271), region = 72 }
   0xd   : > { %s19587_s27 = sshll.u32 %s19582_s26, 3  ;;  %vm465_vm0 = vcmask 261120   ;;  %vm1066_vm1 = vcmask 64512   ;;  %s23176_s24 = smov 104   ;;  %vm3847_vm3 = vcmask 130048   ;;  %vm23182_vm4 = vmmov 0  }
   0xe   : > { %p436_p3 = scmp.lt.s32.totalorder %s19587_s27, 15  ;;  %s23177_s26 = smov 120   ;;  %vm23785_vm2 = vmpackc.low %vm1066_vm1, %vm1066_vm1  ;;  %vm7560_vm5 = vcmask 195584   ;;  %vm18456_vm6 = vcmask 523264  }
   0xf   : > { %s23178_s29 = smov 32   ;;  %s23179_s30 = smov 112  }
  0x10   : > { %s29319_s27 = smov (!%p436_p3, %s19587_s27), 15  ;;  %s23180_s15 = smov 96  }
  0x11   : > { %s20050_s28 = sshll.u32 %s29319_s27, 4  ;;  %s23181_s16 = smov 64  }
  0x12   : > { %s23272_s14 = scalar_lea.vmem %s28446_s0, %s20050_s28  ;;  %s23183_s17 = smov 8  }
  0x13   : > { %v449_v0 = vld [vmem:[%s23272_s14] sm:$0xff]  ;;  %v451_v1 = vld [vmem:[%s23272_s14 + $0x10] sm:$0xff]  ;;  %v450_v2 = vld [vmem:[%s23272_s14 + $0x8] sm:$0xff]  ;;  %s23184_s18 = smov 16   ;;  %s23185_s19 = smov 24  }
  0x14   : > { %v466_v3 = vsel %vm465_vm0, %v449_v0, 0.0  ;;  %v472_v4 = vsel %vm465_vm0, %v451_v1, 0.0  ;;  %v452_v5 = vld [vmem:[%s23272_s14 + $0x18] sm:$0xff]  ;;  %v469_v6 = vsel %vm465_vm0, %v450_v2, 0.0  ;;  %v453_v8 = vld [vmem:[%s23272_s14 + $0x20] sm:$0xff]  ;;  %v454_v9 = vld [vmem:[%s23272_s14 + $0x28] sm:$0xff] }
  0x15   : > { %467 = vadd.xlane.f32.xlu0 %v466_v3  ;;  %473 = vadd.xlane.f32.xlu1 %v472_v4  ;;  %v475_v7 = vsel %vm465_vm0, %v452_v5, 0.0  ;;  %v478_v10 = vsel %vm465_vm0, %v453_v8, 0.0  ;;  %v481_v11 = vsel %vm465_vm0, %v454_v9, 0.0  ;;  %v23287_v12 = vld [vmem:[%s23272_s14 + $0x30] sm:$0xff]  ;;  %v23290_v13 = vld [vmem:[%s23272_s14 + $0x38] sm:$0xff]  ;;  %v23297_v16 = vld [vmem:[%s23272_s14 + $0x40] sm:$0xff] }
  0x16   : > { %v484_v14 = vsel %vm465_vm0, %v23287_v12, 0.0  ;;  %v487_v15 = vsel %vm465_vm0, %v23290_v13, 0.0  ;;  %v23300_v17 = vld [vmem:[%s23272_s14 + $0x48] sm:$0xff]  ;;  %v490_v18 = vsel %vm465_vm0, %v23297_v16, 0.0  ;;  %v23307_v20 = vld [vmem:[%s23272_s14 + $0x50] sm:$0xff]  ;;  %v23310_v21 = vld [vmem:[%s23272_s14 + $0x58] sm:$0xff] }
  0x17   : > { %v493_v19 = vsel %vm465_vm0, %v23300_v17, 0.0  ;;  %v496_v22 = vsel %vm465_vm0, %v23307_v20, 0.0  ;;  %v499_v23 = vsel %vm465_vm0, %v23310_v21, 0.0  ;;  %v23317_v24 = vld [vmem:[%s23272_s14 + $0x60] sm:$0xff]  ;;  %v23320_v25 = vld [vmem:[%s23272_s14 + $0x68] sm:$0xff]  ;;  %v23327_v28 = vld [vmem:[%s23272_s14 + $0x70] sm:$0xff] }
  0x18   : > { %v502_v26 = vsel %vm465_vm0, %v23317_v24, 0.0  ;;  %v505_v27 = vsel %vm465_vm0, %v23320_v25, 0.0  ;;  %v23330_v29 = vld [vmem:[%s23272_s14 + $0x78] sm:$0xff]  ;;  %v508_v30 = vsel %vm465_vm0, %v23327_v28, 0.0 }
  0x19   : > { %470 = vadd.xlane.f32.xlu0 %v469_v6  ;;  %476 = vadd.xlane.f32.xlu1 %v475_v7  ;;  %v511_v31 = vsel %vm465_vm0, %v23330_v29, 0.0 }
  0x1d   : > { %479 = vadd.xlane.f32.xlu0 %v478_v10  ;;  %482 = vadd.xlane.f32.xlu1 %v481_v11 }
  0x21   : > { %485 = vadd.xlane.f32.xlu0 %v484_v14  ;;  %488 = vadd.xlane.f32.xlu1 %v487_v15 }
  0x25   : > { %491 = vadd.xlane.f32.xlu0 %v490_v18  ;;  %494 = vadd.xlane.f32.xlu1 %v493_v19 }
  0x29   : > { %497 = vadd.xlane.f32.xlu0 %v496_v22  ;;  %500 = vadd.xlane.f32.xlu1 %v499_v23 }
  0x2d   : > { %503 = vadd.xlane.f32.xlu0 %v502_v26  ;;  %506 = vadd.xlane.f32.xlu1 %v505_v27 }
  0x31   : > { %509 = vadd.xlane.f32.xlu0 %v508_v30  ;;  %512 = vadd.xlane.f32.xlu1 %v511_v31 }
  0xa2   : > { %v468_v32 = vpop.xlane.xlu0 %467  ;;  %v474_v33 = vpop.xlane.xlu1 %473 }
  0xa3   : > { %v515_v34 = vmul.f32 0.03125, %v468_v32  ;;  %v517_v35 = vmul.f32 0.03125, %v474_v33 }
  0xa5   : > { %v23336_v36 = vsub.f32 %v449_v0, %v515_v34  ;;  %v23338_v37 = vsub.f32 %v451_v1, %v517_v35 }
  0xa6   : > { %v471_v38 = vpop.xlane.xlu0 %470  ;;  %v477_v39 = vpop.xlane.xlu1 %476 }
  0xa7   : > { %v516_v40 = vmul.f32 0.03125, %v471_v38  ;;  %v518_v41 = vmul.f32 0.03125, %v477_v39  ;;  %v547_v42 = vmul.f32 %v23336_v36, %v23336_v36  ;;  %v549_v43 = vmul.f32 %v23338_v37, %v23338_v37 }
  0xa9   : > { %v23344_v44 = vsub.f32 %v450_v2, %v516_v40  ;;  %v23346_v45 = vsub.f32 %v452_v5, %v518_v41  ;;  %v563_v46 = vsel %vm465_vm0, %v547_v42, 0.0  ;;  %v569_v49 = vsel %vm465_vm0, %v549_v43, 0.0 }
  0xaa   : > { %564 = vadd.xlane.f32.xlu0 %v563_v46  ;;  %v480_v47 = vpop.xlane.xlu0 %479  ;;  %v483_v48 = vpop.xlane.xlu1 %482 }
  0xab   : > { %v519_v50 = vmul.f32 0.03125, %v480_v47  ;;  %v520_v51 = vmul.f32 0.03125, %v483_v48  ;;  %v548_v52 = vmul.f32 %v23344_v44, %v23344_v44  ;;  %v550_v53 = vmul.f32 %v23346_v45, %v23346_v45 }
  0xad   : > { %v23354_v54 = vsub.f32 %v453_v8, %v519_v50  ;;  %v23356_v55 = vsub.f32 %v454_v9, %v520_v51  ;;  %v566_v56 = vsel %vm465_vm0, %v548_v52, 0.0  ;;  %v572_v59 = vsel %vm465_vm0, %v550_v53, 0.0  ;;  %v721_v53 = vld [vmem:[%s28449_s3] sm:$0xff] }
  0xae   : > { %570 = vadd.xlane.f32.xlu0 %v569_v49  ;;  %567 = vadd.xlane.f32.xlu1 %v566_v56  ;;  %v486_v57 = vpop.xlane.xlu0 %485  ;;  %v489_v58 = vpop.xlane.xlu1 %488  ;;  %v723_v56 = vld [vmem:[%s28449_s3 + $0x10] sm:$0xff] }
  0xaf   : > { %v521_v60 = vmul.f32 0.03125, %v486_v57  ;;  %v522_v61 = vmul.f32 0.03125, %v489_v58  ;;  %v551_v62 = vmul.f32 %v23354_v54, %v23354_v54  ;;  %v552_v63 = vmul.f32 %v23356_v55, %v23356_v55 }
  0xb0   : > { %v21834_v58 = vpack.c.bf16 %v723_v56, %v721_v53 }
  0xb1   : > { %v23365_v0 = vsub.f32 %v23287_v12, %v521_v60  ;;  %v23368_v1 = vsub.f32 %v23290_v13, %v522_v61  ;;  %v575_v2 = vsel %vm465_vm0, %v551_v62, 0.0  ;;  %v578_v5 = vsel %vm465_vm0, %v552_v63, 0.0  ;;  %v726_v60 = vld [vmem:[%s28449_s3 + $0x28] sm:$0xff]  ;;  %v728_v61 = vld [vmem:[%s28449_s3 + $0x38] sm:$0xff]  ;;  %v725_v63 = vld [vmem:[%s28449_s3 + $0x20] sm:$0xff] }
  0xb2   : > { %573 = vadd.xlane.f32.xlu1 %v572_v59  ;;  %576 = vadd.xlane.f32.xlu0 %v575_v2  ;;  %v492_v3 = vpop.xlane.xlu0 %491  ;;  %v495_v4 = vpop.xlane.xlu1 %494  ;;  %v21836_v62 = vpack.c.bf16 %v728_v61, %v726_v60  ;;  %v727_v2 = vld [vmem:[%s28449_s3 + $0x30] sm:$0xff] }
  0xb3   : > { %v523_v6 = vmul.f32 0.03125, %v492_v3  ;;  %v524_v7 = vmul.f32 0.03125, %v495_v4  ;;  %v553_v8 = vmul.f32 %v23365_v0, %v23365_v0  ;;  %v554_v9 = vmul.f32 %v23368_v1, %v23368_v1 }
  0xb4   : > { %v21838_v3 = vpack.c.bf16 %v727_v2, %v725_v63  ;;  %v28460_v4 = vmov 0.0  }
  0xb5   : > { %v23377_v10 = vsub.f32 %v23297_v16, %v523_v6  ;;  %v23380_v11 = vsub.f32 %v23300_v17, %v524_v7  ;;  %v581_v12 = vsel %vm465_vm0, %v553_v8, 0.0  ;;  %v584_v15 = vsel %vm465_vm0, %v554_v9, 0.0  ;;  %853 = vmatprep.mubr.f32.mxu0 %v28460_v4 }
  0xb6   : > { %579 = vadd.xlane.f32.xlu1 %v578_v5  ;;  %582 = vadd.xlane.f32.xlu0 %v581_v12  ;;  %v498_v13 = vpop.xlane.xlu0 %497  ;;  %v501_v14 = vpop.xlane.xlu1 %500 }
  0xb7   : > { %v525_v18 = vmul.f32 0.03125, %v498_v13  ;;  %v526_v19 = vmul.f32 0.03125, %v501_v14  ;;  %v555_v22 = vmul.f32 %v23377_v10, %v23377_v10  ;;  %v556_v16 = vmul.f32 %v23380_v11, %v23380_v11 }
  0xb9   : > { %v23389_v23 = vsub.f32 %v23307_v20, %v525_v18  ;;  %v23392_v17 = vsub.f32 %v23310_v21, %v526_v19  ;;  %v587_v26 = vsel %vm465_vm0, %v555_v22, 0.0  ;;  %v590_v31 = vsel %vm465_vm0, %v556_v16, 0.0 }
  0xba   : > { %585 = vadd.xlane.f32.xlu1 %v584_v15  ;;  %588 = vadd.xlane.f32.xlu0 %v587_v26  ;;  %v504_v27 = vpop.xlane.xlu0 %503  ;;  %v507_v30 = vpop.xlane.xlu1 %506 }
  0xbb   : > { %v527_v32 = vmul.f32 0.03125, %v504_v27  ;;  %v528_v33 = vmul.f32 0.03125, %v507_v30  ;;  %v557_v34 = vmul.f32 %v23389_v23, %v23389_v23  ;;  %v558_v20 = vmul.f32 %v23392_v17, %v23392_v17 }
  0xbd   : > { %v23401_v35 = vsub.f32 %v23317_v24, %v527_v32  ;;  %v23404_v21 = vsub.f32 %v23320_v25, %v528_v33  ;;  %v593_v38 = vsel %vm465_vm0, %v557_v34, 0.0  ;;  %v596_v41 = vsel %vm465_vm0, %v558_v20, 0.0 }
  0xbe   : > { %591 = vadd.xlane.f32.xlu1 %v590_v31  ;;  %594 = vadd.xlane.f32.xlu0 %v593_v38  ;;  %v510_v39 = vpop.xlane.xlu0 %509  ;;  %v513_v40 = vpop.xlane.xlu1 %512  ;;  %v23454_v38 = vld [vmem:[%s28447_s1] ss:$0 sm:$0xff] }
  0xbf   : > { %v529_v42 = vmul.f32 0.03125, %v510_v39  ;;  %v530_v43 = vmul.f32 0.03125, %v513_v40  ;;  %v559_v46 = vmul.f32 %v23401_v35, %v23401_v35  ;;  %v560_v24 = vmul.f32 %v23404_v21, %v23404_v21 }
  0xc1   : > { %v23413_v47 = vsub.f32 %v23327_v28, %v529_v42  ;;  %v23416_v25 = vsub.f32 %v23330_v29, %v530_v43  ;;  %v599_v48 = vsel %vm465_vm0, %v559_v46, 0.0  ;;  %v602_v49 = vsel %vm465_vm0, %v560_v24, 0.0  ;;  %v722_v28 = vld [vmem:[%s28449_s3 + $0x8] sm:$0xff]  ;;  %v724_v29 = vld [vmem:[%s28449_s3 + $0x18] sm:$0xff] }
  0xc2   : > { %597 = vadd.xlane.f32.xlu1 %v596_v41  ;;  %600 = vadd.xlane.f32.xlu0 %v599_v48  ;;  %v21832_v52 = vpack.c.bf16 %v724_v29, %v722_v28  ;;  %v23460_v41 = vld [vmem:[%s28448_s2] ss:$0 sm:$0xff] }
  0xc3   : > { %v561_v50 = vmul.f32 %v23413_v47, %v23413_v47  ;;  %v562_v51 = vmul.f32 %v23416_v25, %v23416_v25 }
  0xc4   : > { %21833 = vmatprep.subr.bf16.mxu0 %v21832_v52 }
  0xc5   : > { %v605_v57 = vsel %vm465_vm0, %v561_v50, 0.0  ;;  %v608_v59 = vsel %vm465_vm0, %v562_v51, 0.0  ;;  %21835 = vmatpush1.bf16.msra.mxu0 %v21834_v58 }
  0xc6   : > { %603 = vadd.xlane.f32.xlu1 %v602_v49  ;;  %606 = vadd.xlane.f32.xlu0 %v605_v57 }
  0xc7   : > { %21837 = vmatprep.subr.bf16.mxu0 %v21836_v62 }
  0xc9   : > { %21839 = vmatpush1.bf16.msra.mxu0 %v21838_v3 }
  0xca   : > { %609 = vadd.xlane.f32.xlu1 %v608_v59 }
 0x137   : > { %v565_v5 = vpop.xlane.xlu0 %564 }
 0x138   : > { %v611_v6 = vmul.f32 0.03125, %v565_v5 }
 0x13a   : > { %v627_v7 = vadd.f32 1e-05, %v611_v6 }
 0x13b   : > { %v568_v8 = vpop.xlane.xlu1 %567  ;;  %v571_v9 = vpop.xlane.xlu0 %570 }
 0x13c   : > { %22543 = vrsqrt.f32 %v627_v7  ;;  %v612_v12 = vmul.f32 0.03125, %v568_v8  ;;  %v613_v13 = vmul.f32 0.03125, %v571_v9 }
 0x13e   : > { %v628_v14 = vadd.f32 1e-05, %v612_v12  ;;  %v629_v15 = vadd.f32 1e-05, %v613_v13 }
 0x13f   : > { %v574_v18 = vpop.xlane.xlu1 %573  ;;  %v577_v19 = vpop.xlane.xlu0 %576 }
 0x140   : > { %22545 = vrsqrt.f32 %v628_v14  ;;  %v614_v22 = vmul.f32 0.03125, %v574_v18  ;;  %v615_v16 = vmul.f32 0.03125, %v577_v19 }
 0x141   : > { %22547 = vrsqrt.f32 %v629_v15 }
 0x142   : > { %v630_v26 = vadd.f32 1e-05, %v614_v22  ;;  %v631_v27 = vadd.f32 1e-05, %v615_v16 }
 0x143   : > { %v580_v30 = vpop.xlane.xlu1 %579  ;;  %v583_v31 = vpop.xlane.xlu0 %582 }
 0x144   : > { %22549 = vrsqrt.f32 %v630_v26  ;;  %v616_v32 = vmul.f32 0.03125, %v580_v30  ;;  %v617_v20 = vmul.f32 0.03125, %v583_v31 }
 0x145   : > { %22551 = vrsqrt.f32 %v631_v27 }
 0x146   : > { %v22544_v33 = vpop.eup %22543  ;;  %v632_v34 = vadd.f32 1e-05, %v616_v32  ;;  %v633_v46 = vadd.f32 1e-05, %v617_v20 }
 0x147   : > { %v586_v39 = vpop.xlane.xlu1 %585  ;;  %v659_v40 = vmul.f32 %v22544_v33, %v23336_v36  ;;  %v589_v49 = vpop.xlane.xlu0 %588 }
 0x148   : > { %22553 = vrsqrt.f32 %v632_v34  ;;  %v618_v24 = vmul.f32 0.03125, %v586_v39  ;;  %v619_v53 = vmul.f32 0.03125, %v589_v49 }
 0x149   : > { %v682_v42 = vmul.f32 %v23454_v38, %v659_v40  ;;  %22555 = vrsqrt.f32 %v633_v46 }
 0x14a   : > { %v22546_v43 = vpop.eup %22545  ;;  %v634_v52 = vadd.f32 1e-05, %v618_v24 }
 0x14b   : > { %v22548_v48 = vpop.eup %22547  ;;  %v705_v50 = vadd.f32 %v23460_v41, %v682_v42  ;;  %v660_v51 = vmul.f32 %v22546_v43, %v23344_v44  ;;  %v592_v56 = vpop.xlane.xlu1 %591 }
 0x14c   : > { %v661_v28 = vmul.f32 %v22548_v48, %v23338_v37  ;;  %22557 = vrsqrt.f32 %v634_v52  ;;  %v635_v37 = vadd.f32 1e-05, %v619_v53  ;;  %v620_v60 = vmul.f32 0.03125, %v592_v56  ;;  %v595_v61 = vpop.xlane.xlu0 %594 }
 0x14d   : > { %19595 = vmatmul.mubr.msk.f32.vlgmr.msra.gmra.mrb[0].mxu0 %vm465_vm0, %v705_v50  ;;  %v683_v36 = vmul.f32 %v23454_v38, %v660_v51  ;;  %v621_v5 = vmul.f32 0.03125, %v595_v61 }
 0x14e   : > { %v22550_v29 = vpop.eup %22549  ;;  %859 = vmatprep.mubr.f32.mxu0 %v28460_v4  ;;  %v684_v58 = vmul.f32 %v23454_v38, %v661_v28  ;;  %22559 = vrsqrt.f32 %v635_v37 }
 0x14f   : > { %v706_v57 = vadd.f32 %v23460_v41, %v683_v36  ;;  %v662_v59 = vmul.f32 %v22550_v29, %v23346_v45  ;;  %v22552_v44 = vpop.eup %22551  ;;  %v636_v45 = vadd.f32 1e-05, %v620_v60  ;;  %v598_v6 = vpop.xlane.xlu1 %597 }
 0x150   : > { %v707_v62 = vadd.f32 %v23460_v41, %v684_v58  ;;  %v663_v2 = vmul.f32 %v22552_v44, %v23354_v54  ;;  %v637_v54 = vadd.f32 1e-05, %v621_v5  ;;  %v622_v13 = vmul.f32 0.03125, %v598_v6  ;;  %v601_v14 = vpop.xlane.xlu0 %600 }
 0x151   : > { %19596 = vmatmul.mubr.msk.f32.gmra.mrb[2].mxu0 %vm465_vm0, %v706_v57  ;;  %v685_v63 = vmul.f32 %v23454_v38, %v662_v59  ;;  %22561 = vrsqrt.f32 %v636_v45  ;;  %v623_v16 = vmul.f32 0.03125, %v601_v14 }
 0x152   : > { %865 = vmatprep.mubr.f32.mxu0 %v28460_v4  ;;  %v22554_v3 = vpop.eup %22553  ;;  %v686_v8 = vmul.f32 %v23454_v38, %v663_v2  ;;  %22563 = vrsqrt.f32 %v637_v54 }
 0x153   : > { %v708_v7 = vadd.f32 %v23460_v41, %v685_v63  ;;  %v664_v9 = vmul.f32 %v22554_v3, %v23356_v55  ;;  %v22556_v12 = vpop.eup %22555  ;;  %v638_v55 = vadd.f32 1e-05, %v622_v13  ;;  %v604_v26 = vpop.xlane.xlu1 %603 }
 0x154   : > { %v709_v15 = vadd.f32 %v23460_v41, %v686_v8  ;;  %v665_v19 = vmul.f32 %v22556_v12, %v23365_v0  ;;  %v639_v0 = vadd.f32 1e-05, %v623_v16  ;;  %v624_v33 = vmul.f32 0.03125, %v604_v26  ;;  %v607_v34 = vpop.xlane.xlu0 %606 }
 0x155   : > { %19597 = vmatmul.mubr.msk.f32.gmra.mrb[4].mxu0 %vm465_vm0, %v707_v62  ;;  %v687_v18 = vmul.f32 %v23454_v38, %v664_v9  ;;  %22565 = vrsqrt.f32 %v638_v55  ;;  %v625_v43 = vmul.f32 0.03125, %v607_v34  ;;  %v731_v8 = vlaneseq }
 0x156   : > { %871 = vmatprep.mubr.f32.mxu0 %v28460_v4  ;;  %v22558_v22 = vpop.eup %22557  ;;  %v688_v30 = vmul.f32 %v23454_v38, %v665_v19  ;;  %22567 = vrsqrt.f32 %v639_v0 }
 0x157   : > { %v710_v27 = vadd.f32 %v23460_v41, %v687_v18  ;;  %v666_v31 = vmul.f32 %v22558_v22, %v23368_v1  ;;  %v640_v1 = vadd.f32 1e-05, %v624_v33  ;;  %v610_v46 = vpop.xlane.xlu1 %609  ;;  %v732_v9 = vshrl.u32 %v731_v8, 7 }
 0x158   : > { %v22560_v32 = vpop.eup %22559  ;;  %v711_v20 = vadd.f32 %v23460_v41, %v688_v30  ;;  %v626_v51 = vmul.f32 0.03125, %v610_v46 }
 0x159   : > { %19598 = vmatmul.mubr.msk.f32.gmra.mrb[6].mxu0 %vm465_vm0, %v708_v7  ;;  %v689_v39 = vmul.f32 %v23454_v38, %v666_v31  ;;  %v667_v40 = vmul.f32 %v22560_v32, %v23377_v10  ;;  %22569 = vrsqrt.f32 %v640_v1  ;;  %v641_v10 = vadd.f32 1e-05, %v625_v43 }
 0x15a   : > { %877 = vmatprep.mubr.f32.mxu0 %v28460_v4  ;;  %v642_v53 = vadd.f32 1e-05, %v626_v51  ;;  %v733_v12 = vsub.s32 0, %v732_v9  ;;  %v737_v14 = vsub.s32 1, %v732_v9 }
 0x15b   : > { %v22562_v42 = vpop.eup %22561  ;;  %v712_v24 = vadd.f32 %v23460_v41, %v689_v39  ;;  %v690_v48 = vmul.f32 %v23454_v38, %v667_v40  ;;  %22571 = vrsqrt.f32 %v641_v10 }
 0x15c   : > { %v668_v49 = vmul.f32 %v22562_v42, %v23380_v11  ;;  %v22564_v50 = vpop.eup %22563  ;;  %22573 = vrsqrt.f32 %v642_v53 }
 0x15d   : > { %19599 = vmatmul.mubr.msk.f32.gmra.mrb[8].mxu0 %vm465_vm0, %v709_v15  ;;  %v713_v28 = vadd.f32 %v23460_v41, %v690_v48  ;;  %v669_v29 = vmul.f32 %v22564_v50, %v23389_v23 }
 0x15e   : > { %883 = vmatprep.mubr.f32.mxu0 %v28460_v4  ;;  %v691_v36 = vmul.f32 %v23454_v38, %v668_v49 }
 0x15f   : > { %v22566_v52 = vpop.eup %22565  ;;  %v692_v56 = vmul.f32 %v23454_v38, %v669_v29 }
 0x160   : > { %v714_v11 = vadd.f32 %v23460_v41, %v691_v36  ;;  %v670_v57 = vmul.f32 %v22566_v52, %v23392_v17  ;;  %v22568_v58 = vpop.eup %22567 }
 0x161   : > { %19600 = vmatmul.mubr.msk.f32.gmra.mrb[10].mxu0 %vm465_vm0, %v710_v27  ;;  %v715_v23 = vadd.f32 %v23460_v41, %v692_v56  ;;  %v671_v44 = vmul.f32 %v22568_v58, %v23401_v35 }
 0x162   : > { %889 = vmatprep.mubr.f32.mxu0 %v28460_v4  ;;  %v693_v59 = vmul.f32 %v23454_v38, %v670_v57 }
 0x163   : > { %v22570_v37 = vpop.eup %22569  ;;  %v694_v17 = vmul.f32 %v23454_v38, %v671_v44 }
 0x164   : > { %v716_v60 = vadd.f32 %v23460_v41, %v693_v59  ;;  %v672_v61 = vmul.f32 %v22570_v37, %v23404_v21 }
 0x165   : > { %19601 = vmatmul.mubr.msk.f32.gmra.mrb[12].mxu0 %vm465_vm0, %v711_v20  ;;  %v22572_v62 = vpop.eup %22571  ;;  %v717_v63 = vadd.f32 %v23460_v41, %v694_v17 }
 0x166   : > { %895 = vmatprep.mubr.f32.mxu0 %v28460_v4  ;;  %v695_v35 = vmul.f32 %v23454_v38, %v672_v61  ;;  %v673_v2 = vmul.f32 %v22572_v62, %v23413_v47  ;;  %v22574_v3 = vpop.eup %22573 }
 0x167   : > { %v674_v5 = vmul.f32 %v22574_v3, %v23416_v25  ;;  %v729_v25 = vld [vmem:[%s28450_s4] sm:$0x3] }
 0x168   : > { %v718_v45 = vadd.f32 %v23460_v41, %v695_v35  ;;  %v696_v21 = vmul.f32 %v23454_v38, %v673_v2  ;;  %v23543_v54 = vrot.slane %v729_v25, %v733_v12  ;;  %v23549_v18 = vrot.slane %v729_v25, %v737_v14 }
 0x169   : > { %19602 = vmatmul.mubr.msk.f32.gmra.mrb[14].mxu0 %vm465_vm0, %v712_v24  ;;  %v697_v7 = vmul.f32 %v23454_v38, %v674_v5 }
 0x16a   : > { %901 = vmatprep.mubr.f32.mxu0 %v28460_v4  ;;  %v719_v6 = vadd.f32 %v23460_v41, %v696_v21 }
 0x16b   : > { %v720_v47 = vadd.f32 %v23460_v41, %v697_v7 }
 0x16d   : > { %19603 = vmatmul.mubr.msk.f32.gmra.mrb[16].mxu0 %vm465_vm0, %v713_v28 }
 0x16e   : > { %907 = vmatprep.mubr.f32.mxu0 %v28460_v4 }
 0x171   : > { %19604 = vmatmul.mubr.msk.f32.gmra.mrb[18].mxu0 %vm465_vm0, %v714_v11 }
 0x172   : > { %913 = vmatprep.mubr.f32.mxu0 %v28460_v4 }
 0x175   : > { %19605 = vmatmul.mubr.msk.f32.gmra.mrb[20].mxu0 %vm465_vm0, %v715_v23 }
 0x176   : > { %919 = vmatprep.mubr.f32.mxu0 %v28460_v4 }
 0x179   : > { %19606 = vmatmul.mubr.msk.f32.gmra.mrb[22].mxu0 %vm465_vm0, %v716_v60 }
 0x17a   : > { %925 = vmatprep.mubr.f32.mxu0 %v28460_v4 }
 0x17d   : > { %19607 = vmatmul.mubr.msk.f32.gmra.mrb[24].mxu0 %vm465_vm0, %v717_v63 }
 0x17e   : > { %931 = vmatprep.mubr.f32.mxu0 %v28460_v4 }
 0x181   : > { %19608 = vmatmul.mubr.msk.f32.gmra.mrb[26].mxu0 %vm465_vm0, %v718_v45 }
 0x182   : > { %937 = vmatprep.mubr.f32.mxu0 %v28460_v4 }
 0x185   : > { %19609 = vmatmul.mubr.msk.f32.gmra.mrb[28].mxu0 %vm465_vm0, %v719_v6 }
 0x186   : > { %943 = vmatprep.mubr.f32.mxu0 %v28460_v4 }
 0x189   : > { %19610 = vmatmul.mubr.msk.f32.gmra.mrb[30].mxu0 %vm465_vm0, %v720_v47 }
 0x220   : > { %v855_v13 = vpop.f32.mrb[0].mxu0 }
 0x221   : > { %v856_v38 = vadd.f32 %v855_v13, %v23543_v54  ;;  %v857_v15 = vpop.f32.mrb[1].mxu0 }
 0x222   : > { %v23557_v16 = vadd.f32 %v857_v15, %v23549_v18 }
 0x223   : > { %1030 = vrot.lane.b32.xlu0 %v856_v38, %s23176_s24  ;;  %966 = vrot.lane.b32.xlu1 %v856_v38, %s23177_s26 }
 0x224   : > { %20636 = vmatprep.mubr.msk.f32.mxu1 %vm1066_vm1, %v856_v38  ;;  %v861_v41 = vpop.f32.mrb[2].mxu0  ;;  %28655 = vst [vmem:[#allocation2_spill] sm:$0xff] %v23557_v16 }
 0x225   : > { %v23552_v19 = vadd.f32 %v861_v41, %v23543_v54  ;;  %v863_v22 = vpop.f32.mrb[3].mxu0 }
 0x226   : > { %v23598_v48 = vadd.f32 %v863_v22, %v23549_v18 }
 0x227   : > { %10121 = vrot.lane.b32.xlu0 %v856_v38, %s23178_s29  ;;  %998 = vrot.lane.b32.xlu1 %v856_v38, %s23179_s30  ;;  %v22223_v27 = vpack.i.bf16 %v23552_v19, %v856_v38 }
 0x228   : > { %v867_v55 = vpop.f32.mrb[4].mxu0  ;;  %28659 = vst [vmem:[#allocation6_spill] sm:$0xff] %v23598_v48 }
 0x229   : > { %v869_v26 = vpop.f32.mrb[5].mxu0  ;;  %v23621_v53 = vadd.f32 %v867_v55, %v23543_v54 }
 0x22a   : > { %v23585_v42 = vadd.f32 %v869_v26, %v23549_v18 }
 0x22b   : > { %22224 = vrot.lane.b32.xlu0 %v22223_v27, %s23180_s15  ;;  %7585 = vrot.lane.b32.xlu1 %v23557_v16, %s23177_s26 }
 0x22c   : > { %v873_v30 = vpop.f32.mrb[6].mxu0  ;;  %28657 = vst [vmem:[#allocation4_spill] sm:$0xff] %v23585_v42 }
 0x22d   : > { %v875_v31 = vpop.f32.mrb[7].mxu0  ;;  %v23624_v11 = vadd.f32 %v873_v30, %v23543_v54 }
 0x22e   : > { %v23657_v35 = vadd.f32 %v875_v31, %v23549_v18 }
 0x22f   : > { %1000 = vrot.lane.b32.xlu0 %v23552_v19, %s23179_s30  ;;  %7601 = vrot.lane.b32.xlu1 %v23557_v16, %s23179_s30  ;;  %v22233_v7 = vpack.i.bf16 %v23624_v11, %v23621_v53 }
 0x230   : > { %v23567_v32 = vpop.f32.mrb[8].mxu0  ;;  %28665 = vst [vmem:[#allocation12_spill] sm:$0xff] %v23657_v35 }
 0x231   : > { %v23569_v0 = vpop.f32.mrb[9].mxu0  ;;  %v23682_v9 = vadd.f32 %v23567_v32, %v23543_v54 }
 0x232   : > { %v23705_v22 = vadd.f32 %v23569_v0, %v23549_v18 }
 0x233   : > { %22229 = vrot.lane.b32.xlu0 %v22223_v27, %s23181_s16  ;;  %7617 = vrot.lane.b32.xlu1 %v23557_v16, %s23176_s24 }
 0x234   : > { %v885_v33 = vpop.f32.mrb[10].mxu0  ;;  %28670 = vst [vmem:[#allocation17_spill] sm:$0xff] %v23705_v22 }
 0x235   : > { %v23575_v34 = vadd.f32 %v885_v33, %v23543_v54  ;;  %v887_v20 = vpop.f32.mrb[11].mxu0 }
 0x236   : > { %v23578_v39 = vadd.f32 %v887_v20, %v23549_v18 }
 0x237   : > { %7689 = vrot.lane.b32.xlu0 %v23552_v19, %s23178_s29  ;;  %968 = vrot.lane.b32.xlu1 %v23552_v19, %s23177_s26 }
 0x238   : > { %28656 = vst [vmem:[#allocation3_spill] sm:$0xff] %v23578_v39  ;;  %v891_v40 = vpop.f32.mrb[12].mxu0 }
 0x239   : > { %v23588_v1 = vadd.f32 %v891_v40, %v23543_v54  ;;  %v893_v43 = vpop.f32.mrb[13].mxu0 }
 0x23a   : > { %v23591_v46 = vadd.f32 %v893_v43, %v23549_v18 }
 0x23b   : > { %1032 = vrot.lane.b32.xlu1 %v23552_v19, %s23176_s24  ;;  %7587 = vrot.lane.b32.xlu0 %v23585_v42, %s23177_s26 }
 0x23c   : > { %28658 = vst [vmem:[#allocation5_spill] sm:$0xff] %v23591_v46  ;;  %v897_v24 = vpop.f32.mrb[14].mxu0 }
 0x23d   : > { %v23601_v49 = vadd.f32 %v897_v24, %v23543_v54  ;;  %v899_v50 = vpop.f32.mrb[15].mxu0 }
 0x23e   : > { %v23604_v10 = vadd.f32 %v899_v50, %v23549_v18 }
 0x23f   : > { %7641 = vrot.lane.b32.xlu1 %v23598_v48, %s23177_s26  ;;  %7603 = vrot.lane.b32.xlu0 %v23585_v42, %s23179_s30 }
 0x240   : > { %28660 = vst [vmem:[#allocation7_spill] sm:$0xff] %v23604_v10  ;;  %v903_v51 = vpop.f32.mrb[16].mxu0 }
 0x241   : > { %v23611_v28 = vadd.f32 %v903_v51, %v23543_v54  ;;  %v905_v36 = vpop.f32.mrb[17].mxu0 }
 0x242   : > { %v23614_v29 = vadd.f32 %v905_v36, %v23549_v18 }
 0x243   : > { %7657 = vrot.lane.b32.xlu1 %v23598_v48, %s23179_s30  ;;  %7619 = vrot.lane.b32.xlu0 %v23585_v42, %s23176_s24 }
 0x244   : > { %28661 = vst [vmem:[#allocation8_spill] sm:$0xff] %v23614_v29  ;;  %v909_v52 = vpop.f32.mrb[18].mxu0 }
 0x245   : > { %v23627_v56 = vadd.f32 %v909_v52, %v23543_v54  ;;  %v911_v57 = vpop.f32.mrb[19].mxu0 }
 0x246   : > { %v23630_v58 = vadd.f32 %v911_v57, %v23549_v18 }
 0x247   : > { %972 = vrot.lane.b32.xlu0 %v23624_v11, %s23177_s26  ;;  %970 = vrot.lane.b32.xlu1 %v23621_v53, %s23177_s26  ;;  %v22263_v36 = vpack.i.bf16 %v23627_v56, %v23611_v28 }
 0x248   : > { %28662 = vst [vmem:[#allocation9_spill] sm:$0xff] %v23630_v58  ;;  %v915_v23 = vpop.f32.mrb[20].mxu0 }
 0x249   : > { %v23637_v59 = vadd.f32 %v915_v23, %v23543_v54  ;;  %v917_v44 = vpop.f32.mrb[21].mxu0 }
 0x24a   : > { %v23640_v37 = vadd.f32 %v917_v44, %v23549_v18 }
 0x24b   : > { %1004 = vrot.lane.b32.xlu0 %v23624_v11, %s23179_s30  ;;  %1002 = vrot.lane.b32.xlu1 %v23621_v53, %s23179_s30 }
 0x24c   : > { %28663 = vst [vmem:[#allocation10_spill] sm:$0xff] %v23640_v37  ;;  %v921_v60 = vpop.f32.mrb[22].mxu0 }
 0x24d   : > { %v23647_v17 = vadd.f32 %v921_v60, %v23543_v54  ;;  %v923_v61 = vpop.f32.mrb[23].mxu0 }
 0x24e   : > { %v23650_v62 = vadd.f32 %v923_v61, %v23549_v18 }
 0x24f   : > { %1036 = vrot.lane.b32.xlu0 %v23624_v11, %s23176_s24  ;;  %1034 = vrot.lane.b32.xlu1 %v23621_v53, %s23176_s24 }
 0x250   : > { %28664 = vst [vmem:[#allocation11_spill] sm:$0xff] %v23650_v62  ;;  %v927_v63 = vpop.f32.mrb[24].mxu0 }
 0x251   : > { %v23660_v2 = vadd.f32 %v927_v63, %v23543_v54  ;;  %v929_v3 = vpop.f32.mrb[25].mxu0 }
 0x252   : > { %v23663_v45 = vadd.f32 %v929_v3, %v23549_v18 }
 0x253   : > { %7643 = vrot.lane.b32.xlu0 %v23657_v35, %s23177_s26  ;;  %10197 = vrot.lane.b32.xlu1 %v23621_v53, %s23178_s29 }
 0x254   : > { %28666 = vst [vmem:[#allocation13_spill] sm:$0xff] %v23663_v45  ;;  %v933_v21 = vpop.f32.mrb[26].mxu0 }
 0x255   : > { %v23670_v5 = vadd.f32 %v933_v21, %v23543_v54  ;;  %v935_v6 = vpop.f32.mrb[27].mxu0 }
 0x256   : > { %v23675_v47 = vadd.f32 %v935_v6, %v23549_v18 }
 0x257   : > { %7659 = vrot.lane.b32.xlu0 %v23657_v35, %s23179_s30  ;;  %22234 = vrot.lane.b32.xlu1 %v22233_v7, %s23180_s15 }
 0x258   : > { %28667 = vst [vmem:[#allocation14_spill] sm:$0xff] %v23675_v47  ;;  %v939_v8 = vpop.f32.mrb[28].mxu0 }
 0x259   : > { %v23685_v12 = vadd.f32 %v939_v8, %v23543_v54  ;;  %v941_v25 = vpop.f32.mrb[29].mxu0 }
 0x25a   : > { %v23688_v13 = vadd.f32 %v941_v25, %v23549_v18 }
 0x25b   : > { %22239 = vrot.lane.b32.xlu1 %v22233_v7, %s23181_s16  ;;  %974 = vrot.lane.b32.xlu0 %v23682_v9, %s23177_s26 }
 0x25c   : > { %28668 = vst [vmem:[#allocation15_spill] sm:$0xff] %v23688_v13  ;;  %v945_v38 = vpop.f32.mrb[30].mxu0 }
 0x25d   : > { %v23694_v14 = vadd.f32 %v945_v38, %v23543_v54  ;;  %v947_v15 = vpop.f32.mrb[31].mxu0  ;;  %v22243_v54 = vpack.i.bf16 %v23575_v34, %v23682_v9 }
 0x25e   : > { %v23697_v41 = vadd.f32 %v947_v15, %v23549_v18  ;;  %v22253_v18 = vpack.i.bf16 %v23601_v49, %v23588_v1 }
 0x25f   : > { %7765 = vrot.lane.b32.xlu1 %v23624_v11, %s23178_s29  ;;  %1006 = vrot.lane.b32.xlu0 %v23682_v9, %s23179_s30 }
 0x260   : > { %28669 = vst [vmem:[#allocation16_spill] sm:$0xff] %v23697_v41 }
 0x263   : > { %7589 = vrot.lane.b32.xlu1 %v23705_v22, %s23177_s26  ;;  %1038 = vrot.lane.b32.xlu0 %v23682_v9, %s23176_s24 }
 0x267   : > { %7605 = vrot.lane.b32.xlu1 %v23705_v22, %s23179_s30  ;;  %10273 = vrot.lane.b32.xlu0 %v23682_v9, %s23178_s29 }
 0x26b   : > { %7621 = vrot.lane.b32.xlu1 %v23705_v22, %s23176_s24  ;;  %22244 = vrot.lane.b32.xlu0 %v22243_v54, %s23180_s15 }
 0x26f   : > { %976 = vrot.lane.b32.xlu1 %v23575_v34, %s23177_s26  ;;  %22249 = vrot.lane.b32.xlu0 %v22243_v54, %s23181_s16 }
 0x273   : > { %1008 = vrot.lane.b32.xlu1 %v23575_v34, %s23179_s30  ;;  %7841 = vrot.lane.b32.xlu0 %v23575_v34, %s23178_s29 }
 0x277   : > { %1040 = vrot.lane.b32.xlu1 %v23575_v34, %s23176_s24  ;;  %978 = vrot.lane.b32.xlu0 %v23588_v1, %s23177_s26 }
 0x27b   : > { %7645 = vrot.lane.b32.xlu1 %v23578_v39, %s23177_s26  ;;  %1010 = vrot.lane.b32.xlu0 %v23588_v1, %s23179_s30 }
 0x27f   : > { %7661 = vrot.lane.b32.xlu1 %v23578_v39, %s23179_s30  ;;  %7591 = vrot.lane.b32.xlu0 %v23591_v46, %s23177_s26 }
 0x283   : > { %1042 = vrot.lane.b32.xlu1 %v23588_v1, %s23176_s24  ;;  %7607 = vrot.lane.b32.xlu0 %v23591_v46, %s23179_s30 }
 0x287   : > { %10349 = vrot.lane.b32.xlu1 %v23588_v1, %s23178_s29  ;;  %7623 = vrot.lane.b32.xlu0 %v23591_v46, %s23176_s24 }
 0x28b   : > { %980 = vrot.lane.b32.xlu1 %v23601_v49, %s23177_s26  ;;  %1044 = vrot.lane.b32.xlu0 %v23601_v49, %s23176_s24 }
 0x28f   : > { %22254 = vrot.lane.b32.xlu1 %v22253_v18, %s23180_s15  ;;  %22259 = vrot.lane.b32.xlu0 %v22253_v18, %s23181_s16 }
 0x293   : > { %1012 = vrot.lane.b32.xlu1 %v23601_v49, %s23179_s30  ;;  %7647 = vrot.lane.b32.xlu0 %v23604_v10, %s23177_s26 }
 0x295   : > { %v23759_v55 = vpop.permute.xlu1 %966  ;;  %v23761_v26 = vpop.permute.xlu0 %1030 }
 0x296   : > { %28671 = vst [vmem:[#allocation18_spill] sm:$0xff] %v23761_v26  ;;  %20692 = vmatprep.mubr.msk.f32.mxu0 %vm1066_vm1, %v23759_v55 }
 0x297   : > { %7917 = vrot.lane.b32.xlu1 %v23601_v49, %s23178_s29  ;;  %7663 = vrot.lane.b32.xlu0 %v23604_v10, %s23179_s30 }
 0x299   : > { %v23769_v27 = vpop.permute.xlu1 %998  ;;  %v23771_v30 = vpop.permute.xlu0 %10121 }
 0x29a   : > { %28672 = vst [vmem:[#allocation19_spill] sm:$0xff] %v23771_v30 }
 0x29b   : > { %1046 = vrot.lane.b32.xlu0 %v23611_v28, %s23176_s24  ;;  %982 = vrot.lane.b32.xlu1 %v23611_v28, %s23177_s26 }
 0x29d   : > { %v23777_v31 = vpop.permute.xlu1 %7585  ;;  %v22225_v32 = vpop.permute.xlu0 %22224 }
 0x29e   : > { %28673 = vst [vmem:[#allocation20_spill] sm:$0xff] %v23777_v31  ;;  %v22227_v0 = vunpack.i.h.bf16 %v22225_v32  ;;  %v22226_v33 = vunpack.i.l.bf16 %v22225_v32 }
 0x29f   : > { %10425 = vrot.lane.b32.xlu0 %v23611_v28, %s23178_s29  ;;  %1014 = vrot.lane.b32.xlu1 %v23611_v28, %s23179_s30 }
 0x2a0   : > { %v21840_v40 = vpack.c.bf16 %v22227_v0, %v22226_v33  ;;  %v22273_v0 = vpack.i.bf16 %v23647_v17, %v23637_v59 }
 0x2a1   : > { %v23789_v43 = vpop.permute.xlu1 %7601  ;;  %v23791_v24 = vpop.permute.xlu0 %1000 }
 0x2a2   : > { %28676 = vst [vmem:[#allocation21_spill] sm:$0xff] %v23789_v43  ;;  %21842 = vmatprep.subr.msk.bf16.mxu1 %vm23785_vm2, %v21840_v40 }
 0x2a3   : > { %984 = vrot.lane.b32.xlu0 %v23627_v56, %s23177_s26  ;;  %7593 = vrot.lane.b32.xlu1 %v23614_v29, %s23177_s26 }
 0x2a4   : > { %21845 = vmatpush3.bf16.xpose.msk.msra.mxu1 %vm23785_vm2, %v21840_v40 }
 0x2a5   : > { %v23801_v50 = vpop.permute.xlu1 %7617  ;;  %v23803_v51 = vpop.permute.xlu0 %22229 }
 0x2a6   : > { %28677 = vst [vmem:[#allocation22_spill] sm:$0xff] %v23801_v50 }
 0x2a7   : > { %22264 = vrot.lane.b32.xlu0 %v22263_v36, %s23180_s15  ;;  %7609 = vrot.lane.b32.xlu1 %v23614_v29, %s23179_s30 }
 0x2a9   : > { %v23810_v52 = vpop.permute.xlu1 %968  ;;  %v23812_v57 = vpop.permute.xlu0 %7689 }
 0x2aa   : > { %28678 = vst [vmem:[#allocation23_spill] sm:$0xff] %v23812_v57 }
 0x2ab   : > { %20637 = vmatmul.mubr.msk.f32.vlgmr.msra.gmra.mrb[0].mxu1 %vm1066_vm1, %v23552_v19  ;;  %1016 = vrot.lane.b32.xlu0 %v23627_v56, %s23179_s30 }
 0x2ac   : > { %7625 = vrot.lane.b32.xlu1 %v23614_v29, %s23176_s24  ;;  %20643 = vmatprep.mubr.msk.f32.mxu1 %vm1066_vm1, %v23621_v53 }
 0x2ad   : > { %v23822_v23 = vpop.permute.xlu1 %1032  ;;  %v23824_v44 = vpop.permute.xlu0 %7587 }
 0x2ae   : > { %28679 = vst [vmem:[#allocation24_spill] sm:$0xff] %v23824_v44 }
 0x2af   : > { %7993 = vrot.lane.b32.xlu0 %v23627_v56, %s23178_s29 }
 0x2b0   : > { %1048 = vrot.lane.b32.xlu1 %v23627_v56, %s23176_s24 }
 0x2b1   : > { %v23830_v19 = vpop.permute.xlu1 %7641  ;;  %v23832_v60 = vpop.permute.xlu0 %7603 }
 0x2b2   : > { %28680 = vst [vmem:[#allocation25_spill] sm:$0xff] %v23830_v19  ;;  %28681 = vst [vmem:[#allocation26_spill] sm:$0xff] %v23832_v60 }
 0x2b3   : > { %7595 = vrot.lane.b32.xlu0 %v23640_v37, %s23177_s26 }
 0x2b4   : > { %22269 = vrot.lane.b32.xlu1 %v22263_v36, %s23181_s16 }
 0x2b5   : > { %v23837_v53 = vpop.permute.xlu1 %7657  ;;  %v23839_v61 = vpop.permute.xlu0 %7619 }
 0x2b6   : > { %28682 = vst [vmem:[#allocation27_spill] sm:$0xff] %v23837_v53  ;;  %28683 = vst [vmem:[#allocation28_spill] sm:$0xff] %v23839_v61  ;;  %v22283_v53 = vpack.i.bf16 %v23670_v5, %v23660_v2 }
 0x2b7   : > { %7611 = vrot.lane.b32.xlu0 %v23640_v37, %s23179_s30 }
 0x2b8   : > { %7649 = vrot.lane.b32.xlu1 %v23630_v58, %s23177_s26 }
 0x2b9   : > { %v23845_v63 = vpop.permute.xlu1 %970  ;;  %v23847_v3 = vpop.permute.xlu0 %972 }
 0x2ba   : > { %v22333_v44 = vpack.i.bf16 %v23847_v3, %v23845_v63 }
 0x2bb   : > { %7627 = vrot.lane.b32.xlu0 %v23640_v37, %s23176_s24 }
 0x2bc   : > { %986 = vrot.lane.b32.xlu1 %v23637_v59, %s23177_s26 }
 0x2bd   : > { %v23853_v21 = vpop.permute.xlu1 %1002  ;;  %v23855_v6 = vpop.permute.xlu0 %1004 }
 0x2bf   : > { %988 = vrot.lane.b32.xlu0 %v23647_v17, %s23177_s26 }
 0x2c0   : > { %1018 = vrot.lane.b32.xlu1 %v23637_v59, %s23179_s30 }
 0x2c1   : > { %v23861_v7 = vpop.permute.xlu1 %1034  ;;  %v23863_v8 = vpop.permute.xlu0 %1036 }
 0x2c2   : > { %28684 = vst [vmem:[#allocation29_spill] sm:$0xff] %v23861_v7 }
 0x2c3   : > { %1020 = vrot.lane.b32.xlu0 %v23647_v17, %s23179_s30 }
 0x2c4   : > { %1050 = vrot.lane.b32.xlu1 %v23637_v59, %s23176_s24 }
 0x2c5   : > { %v23869_v25 = vpop.permute.xlu1 %10197  ;;  %v23871_v38 = vpop.permute.xlu0 %7643 }
 0x2c6   : > { %28685 = vst [vmem:[#allocation30_spill] sm:$0xff] %v23869_v25  ;;  %28686 = vst [vmem:[#allocation31_spill] sm:$0xff] %v23871_v38 }
 0x2c7   : > { %1052 = vrot.lane.b32.xlu0 %v23647_v17, %s23176_s24 }
 0x2c8   : > { %10501 = vrot.lane.b32.xlu1 %v23637_v59, %s23178_s29 }
 0x2c9   : > { %v22235_v15 = vpop.permute.xlu1 %22234  ;;  %v23877_v54 = vpop.permute.xlu0 %7659 }
 0x2ca   : > { %28687 = vst [vmem:[#allocation32_spill] sm:$0xff] %v23877_v54  ;;  %v22237_v18 = vunpack.i.h.bf16 %v22235_v15  ;;  %v22236_v32 = vunpack.i.l.bf16 %v22235_v15 }
 0x2cb   : > { %7651 = vrot.lane.b32.xlu0 %v23650_v62, %s23177_s26 }
 0x2cc   : > { %v21846_v33 = vpack.c.bf16 %v22237_v18, %v22236_v32  ;;  %22274 = vrot.lane.b32.xlu1 %v22273_v0, %s23180_s15 }
 0x2cd   : > { %v23884_v40 = vpop.permute.xlu1 %22239  ;;  %v23886_v36 = vpop.permute.xlu0 %974 }
 0x2ce   : > { %21848 = vmatprep.subr.msk.bf16.mxu1 %vm23785_vm2, %v21846_v33 }
 0x2cf   : > { %990 = vrot.lane.b32.xlu0 %v23660_v2, %s23177_s26  ;;  %21851 = vmatpush3.bf16.xpose.msk.msra.mxu1 %vm23785_vm2, %v21846_v33 }
 0x2d0   : > { %22279 = vrot.lane.b32.xlu1 %v22273_v0, %s23181_s16 }
 0x2d1   : > { %v23895_v15 = vpop.permute.xlu1 %7765  ;;  %v23897_v18 = vpop.permute.xlu0 %1006 }
 0x2d2   : > { %28688 = vst [vmem:[#allocation33_spill] sm:$0xff] %v23895_v15 }
 0x2d3   : > { %1022 = vrot.lane.b32.xlu0 %v23660_v2, %s23179_s30 }
 0x2d4   : > { %8069 = vrot.lane.b32.xlu1 %v23647_v17, %s23178_s29 }
 0x2d5   : > { %v23903_v32 = vpop.permute.xlu1 %7589  ;;  %v23905_v4 = vpop.permute.xlu0 %1038 }
 0x2d6   : > { %28689 = vst [vmem:[#allocation34_spill] sm:$0xff] %v23903_v32  ;;  %28690 = vst [vmem:[#allocation35_spill] sm:$0xff] %v23905_v4  ;;  %20644 = vmatmul.mubr.msk.f32.vlgmr.msra.gmra.mrb[2].mxu1 %vm1066_vm1, %v23624_v11 }
 0x2d7   : > { %1054 = vrot.lane.b32.xlu0 %v23660_v2, %s23176_s24  ;;  %20650 = vmatprep.mubr.msk.f32.mxu1 %vm1066_vm1, %v23682_v9 }
 0x2d8   : > { %7597 = vrot.lane.b32.xlu1 %v23663_v45, %s23177_s26 }
 0x2d9   : > { %v23915_v0 = vpop.permute.xlu1 %7605  ;;  %v23917_v33 = vpop.permute.xlu0 %10273 }
 0x2da   : > { %28691 = vst [vmem:[#allocation36_spill] sm:$0xff] %v23915_v0  ;;  %28692 = vst [vmem:[#allocation37_spill] sm:$0xff] %v23917_v33 }
 0x2db   : > { %10577 = vrot.lane.b32.xlu0 %v23660_v2, %s23178_s29 }
 0x2dc   : > { %7613 = vrot.lane.b32.xlu1 %v23663_v45, %s23179_s30 }
 0x2dd   : > { %v23923_v11 = vpop.permute.xlu1 %7621  ;;  %v22245_v54 = vpop.permute.xlu0 %22244 }
 0x2de   : > { %28693 = vst [vmem:[#allocation38_spill] sm:$0xff] %v23923_v11  ;;  %v22247_v9 = vunpack.i.h.bf16 %v22245_v54  ;;  %v22246_v38 = vunpack.i.l.bf16 %v22245_v54 }
 0x2df   : > { %22284 = vrot.lane.b32.xlu0 %v22283_v53, %s23180_s15 }
 0x2e0   : > { %v21852_v19 = vpack.c.bf16 %v22247_v9, %v22246_v38  ;;  %7629 = vrot.lane.b32.xlu1 %v23663_v45, %s23176_s24 }
 0x2e1   : > { %v23930_v25 = vpop.permute.xlu1 %976  ;;  %v23932_v33 = vpop.permute.xlu0 %22249 }
 0x2e2   : > { %21854 = vmatprep.subr.msk.bf16.mxu1 %vm23785_vm2, %v21852_v19 }
 0x2e3   : > { %22289 = vrot.lane.b32.xlu0 %v22283_v53, %s23181_s16  ;;  %21857 = vmatpush3.bf16.xpose.msk.msra.mxu1 %vm23785_vm2, %v21852_v19 }
 0x2e4   : > { %992 = vrot.lane.b32.xlu1 %v23670_v5, %s23177_s26 }
 0x2e5   : > { %v23941_v54 = vpop.permute.xlu1 %1008  ;;  %v23943_v38 = vpop.permute.xlu0 %7841 }
 0x2e6   : > { %28694 = vst [vmem:[#allocation39_spill] sm:$0xff] %v23943_v38  ;;  %v22368_v29 = vpack.i.bf16 %v23941_v54, %v23897_v18 }
 0x2e7   : > { %8145 = vrot.lane.b32.xlu0 %v23670_v5, %s23178_s29 }
 0x2e8   : > { %1024 = vrot.lane.b32.xlu1 %v23670_v5, %s23179_s30 }
 0x2e9   : > { %v23949_v9 = vpop.permute.xlu1 %1040  ;;  %v23951_v30 = vpop.permute.xlu0 %978 }
 0x2ea   : > { %20651 = vmatmul.mubr.msk.f32.vlgmr.msra.gmra.mrb[4].mxu1 %vm1066_vm1, %v23575_v34 }
 0x2eb   : > { %994 = vrot.lane.b32.xlu0 %v23685_v12, %s23177_s26  ;;  %20657 = vmatprep.mubr.msk.f32.mxu1 %vm1066_vm1, %v23588_v1 }
 0x2ec   : > { %1056 = vrot.lane.b32.xlu1 %v23670_v5, %s23176_s24 }
 0x2ed   : > { %v23961_v19 = vpop.permute.xlu1 %7645  ;;  %v23963_v53 = vpop.permute.xlu0 %1010 }
 0x2ee   : > { %28695 = vst [vmem:[#allocation40_spill] sm:$0xff] %v23961_v19  ;;  %28696 = vst [vmem:[#allocation41_spill] sm:$0xff] %v23963_v53 }
 0x2ef   : > { %10653 = vrot.lane.b32.xlu0 %v23685_v12, %s23178_s29 }
 0x2f0   : > { %7653 = vrot.lane.b32.xlu1 %v23675_v47, %s23177_s26 }
 0x2f1   : > { %v23969_v34 = vpop.permute.xlu1 %7661  ;;  %v23971_v61 = vpop.permute.xlu0 %7591 }
 0x2f2   : > { %28697 = vst [vmem:[#allocation42_spill] sm:$0xff] %v23969_v34  ;;  %28698 = vst [vmem:[#allocation43_spill] sm:$0xff] %v23971_v61 }
 0x2f3   : > { %7599 = vrot.lane.b32.xlu0 %v23688_v13, %s23177_s26 }
 0x2f4   : > { %1026 = vrot.lane.b32.xlu1 %v23685_v12, %s23179_s30 }
 0x2f5   : > { %v23977_v1 = vpop.permute.xlu1 %1042  ;;  %v23979_v19 = vpop.permute.xlu0 %7607 }
 0x2f6   : > { %28699 = vst [vmem:[#allocation44_spill] sm:$0xff] %v23977_v1  ;;  %28700 = vst [vmem:[#allocation45_spill] sm:$0xff] %v23979_v19  ;;  %v22293_v19 = vpack.i.bf16 %v23694_v14, %v23685_v12 }
 0x2f7   : > { %7615 = vrot.lane.b32.xlu0 %v23688_v13, %s23179_s30 }
 0x2f8   : > { %1058 = vrot.lane.b32.xlu1 %v23685_v12, %s23176_s24 }
 0x2f9   : > { %v23985_v11 = vpop.permute.xlu1 %10349  ;;  %v23987_v34 = vpop.permute.xlu0 %7623 }
 0x2fa   : > { %28701 = vst [vmem:[#allocation46_spill] sm:$0xff] %v23985_v11  ;;  %28702 = vst [vmem:[#allocation47_spill] sm:$0xff] %v23987_v34 }
 0x2fb   : > { %7631 = vrot.lane.b32.xlu0 %v23688_v13, %s23176_s24 }
 0x2fc   : > { %996 = vrot.lane.b32.xlu1 %v23694_v14, %s23177_s26 }
 0x2fd   : > { %v23993_v50 = vpop.permute.xlu1 %980  ;;  %v23995_v60 = vpop.permute.xlu0 %1044 }
 0x2ff   : > { %1028 = vrot.lane.b32.xlu0 %v23694_v14, %s23179_s30 }
 0x300   : > { %22294 = vrot.lane.b32.xlu1 %v22293_v19, %s23180_s15 }
 0x301   : > { %v22255_v11 = vpop.permute.xlu1 %22254  ;;  %v24002_v34 = vpop.permute.xlu0 %22259 }
 0x302   : > { %28703 = vst [vmem:[#allocation48_spill] sm:$0xff] %v24002_v34  ;;  %v22257_v0 = vunpack.i.h.bf16 %v22255_v11  ;;  %v22256_v43 = vunpack.i.l.bf16 %v22255_v11 }
 0x303   : > { %1060 = vrot.lane.b32.xlu0 %v23694_v14, %s23176_s24 }
 0x304   : > { %v21858_v15 = vpack.c.bf16 %v22257_v0, %v22256_v43  ;;  %22299 = vrot.lane.b32.xlu1 %v22293_v19, %s23181_s16 }
 0x305   : > { %v24007_v38 = vpop.permute.xlu1 %1012  ;;  %v24009_v57 = vpop.permute.xlu0 %7647 }
 0x306   : > { %28704 = vst [vmem:[#allocation49_spill] sm:$0xff] %v24009_v57  ;;  %21860 = vmatprep.subr.msk.bf16.mxu1 %vm23785_vm2, %v21858_v15 }
 0x307   : > { %8221 = vrot.lane.b32.xlu0 %v23694_v14, %s23178_s29  ;;  %21863 = vmatpush3.bf16.xpose.msk.msra.mxu1 %vm23785_vm2, %v21858_v15  ;;  %v22303_v15 = vpack.i.bf16 %v23810_v52, %v23759_v55 }
 0x308   : > { %10729 = vrot.lane.b32.xlu1 %v23759_v55, %s23178_s29 }
 0x309   : > { %v24019_v11 = vpop.permute.xlu1 %7917  ;;  %v24021_v43 = vpop.permute.xlu0 %7663 }
 0x30a   : > { %28705 = vst [vmem:[#allocation50_spill] sm:$0xff] %v24019_v11  ;;  %28706 = vst [vmem:[#allocation51_spill] sm:$0xff] %v24021_v43  ;;  %v22308_v11 = vpack.i.bf16 %v23791_v24, %v23769_v27 }
 0x30b   : > { %7655 = vrot.lane.b32.xlu0 %v23697_v41, %s23177_s26 }
 0x30c   : > { %11337 = vrot.lane.b32.xlu1 %v23769_v27, %s23178_s29 }
 0x30d   : > { %v24027_v0 = vpop.permute.xlu1 %982  ;;  %v24029_v19 = vpop.permute.xlu0 %1046 }
 0x30e   : > { %28707 = vst [vmem:[#allocation52_spill] sm:$0xff] %v24029_v19  ;;  %20658 = vmatmul.mubr.msk.f32.vlgmr.msra.gmra.mrb[6].mxu1 %vm1066_vm1, %v23601_v49 }
 0x30f   : > { %22304 = vrot.lane.b32.xlu0 %v22303_v15, %s23180_s15  ;;  %20664 = vmatprep.mubr.msk.f32.mxu1 %vm1066_vm1, %v23611_v28  ;;  %v22313_v28 = vpack.i.bf16 %v23822_v23, %v23761_v26 }
 0x310   : > { %8297 = vrot.lane.b32.xlu1 %v23810_v52, %s23178_s29 }
 0x311   : > { %v24040_v43 = vpop.permute.xlu1 %1014  ;;  %v24042_v57 = vpop.permute.xlu0 %10425 }
 0x312   : > { %28708 = vst [vmem:[#allocation53_spill] sm:$0xff] %v24040_v43  ;;  %28709 = vst [vmem:[#allocation54_spill] sm:$0xff] %v24042_v57 }
 0x313   : > { %22309 = vrot.lane.b32.xlu0 %v22308_v11, %s23180_s15 }
 0x314   : > { %8905 = vrot.lane.b32.xlu1 %v23791_v24, %s23178_s29 }
 0x315   : > { %v24049_v49 = vpop.permute.xlu1 %7593  ;;  %v24051_v55 = vpop.permute.xlu0 %984 }
 0x316   : > { %28710 = vst [vmem:[#allocation55_spill] sm:$0xff] %v24049_v49 }
 0x317   : > { %22314 = vrot.lane.b32.xlu0 %v22313_v28, %s23180_s15 }
 0x318   : > { %9513 = vrot.lane.b32.xlu1 %v23822_v23, %s23178_s29 }
 0x319   : > { %v24058_v57 = vpop.permute.xlu1 %7609  ;;  %v22265_v61 = vpop.permute.xlu0 %22264 }
 0x31a   : > { %28711 = vst [vmem:[#allocation56_spill] sm:$0xff] %v24058_v57  ;;  %v22267_v32 = vunpack.i.h.bf16 %v22265_v61  ;;  %v22266_v13 = vunpack.i.l.bf16 %v22265_v61  ;;  %v22338_v57 = vpack.i.bf16 %v23855_v6, %v23853_v21 }
 0x31b   : > { %22319 = vrot.lane.b32.xlu0 %v22303_v15, %s23181_s16 }
 0x31c   : > { %v21864_v49 = vpack.c.bf16 %v22267_v32, %v22266_v13  ;;  %22334 = vrot.lane.b32.xlu1 %v22333_v44, %s23180_s15  ;;  %v22343_v32 = vpack.i.bf16 %v23863_v8, %v23861_v7 }
 0x31d   : > { %v24064_v45 = vpop.permute.xlu0 %1016 }
 0x31e   : > { %v24066_v31 = vpop.permute.xlu1 %7625  ;;  %21866 = vmatprep.subr.msk.bf16.mxu1 %vm23785_vm2, %v21864_v49 }
 0x31f   : > { %28712 = vst [vmem:[#allocation57_spill] sm:$0xff] %v24066_v31  ;;  %22324 = vrot.lane.b32.xlu0 %v22308_v11, %s23181_s16  ;;  %21869 = vmatpush3.bf16.xpose.msk.msra.mxu1 %vm23785_vm2, %v21864_v49 }
 0x320   : > { %22339 = vrot.lane.b32.xlu1 %v22338_v57, %s23180_s15 }
 0x321   : > { %v24076_v13 = vpop.permute.xlu0 %7993 }
 0x322   : > { %28713 = vst [vmem:[#allocation58_spill] sm:$0xff] %v24076_v13  ;;  %v24078_v61 = vpop.permute.xlu1 %1048  ;;  %v22388_v13 = vpack.i.bf16 %v23949_v9, %v23905_v4 }
 0x323   : > { %22329 = vrot.lane.b32.xlu0 %v22313_v28, %s23181_s16 }
 0x324   : > { %22344 = vrot.lane.b32.xlu1 %v22343_v32, %s23180_s15 }
 0x325   : > { %v24084_v15 = vpop.permute.xlu0 %7595 }
 0x326   : > { %28714 = vst [vmem:[#allocation59_spill] sm:$0xff] %v24084_v15  ;;  %v24086_v31 = vpop.permute.xlu1 %22269  ;;  %20665 = vmatmul.mubr.msk.f32.vlgmr.msra.gmra.mrb[8].mxu1 %vm1066_vm1, %v23627_v56 }
 0x327   : > { %28715 = vst [vmem:[#allocation60_spill] sm:$0xff] %v24086_v31  ;;  %10805 = vrot.lane.b32.xlu0 %v23845_v63, %s23178_s29  ;;  %20671 = vmatprep.mubr.msk.f32.mxu1 %vm1066_vm1, %v23637_v59 }
 0x328   : > { %22349 = vrot.lane.b32.xlu1 %v22333_v44, %s23181_s16 }
 0x329   : > { %v24095_v11 = vpop.permute.xlu0 %7611 }
 0x32a   : > { %28716 = vst [vmem:[#allocation61_spill] sm:$0xff] %v24095_v11  ;;  %v24097_v49 = vpop.permute.xlu1 %7649 }
 0x32b   : > { %28717 = vst [vmem:[#allocation62_spill] sm:$0xff] %v24097_v49  ;;  %11413 = vrot.lane.b32.xlu0 %v23853_v21, %s23178_s29 }
 0x32c   : > { %22354 = vrot.lane.b32.xlu1 %v22338_v57, %s23181_s16 }
 0x32d   : > { %v24102_v28 = vpop.permute.xlu0 %7627 }
 0x32e   : > { %28718 = vst [vmem:[#allocation63_spill] sm:$0xff] %v24102_v28  ;;  %v24104_v56 = vpop.permute.xlu1 %986  ;;  %v22363_v28 = vpack.i.bf16 %v23930_v25, %v23886_v36 }
 0x32f   : > { %8373 = vrot.lane.b32.xlu0 %v23847_v3, %s23178_s29 }
 0x330   : > { %22359 = vrot.lane.b32.xlu1 %v22343_v32, %s23181_s16 }
 0x331   : > { %v24109_v59 = vpop.permute.xlu0 %988 }
 0x332   : > { %v24111_v44 = vpop.permute.xlu1 %1018 }
 0x333   : > { %28719 = vst [vmem:[#allocation64_spill] sm:$0xff] %v24111_v44  ;;  %8981 = vrot.lane.b32.xlu0 %v23855_v6, %s23178_s29 }
 0x334   : > { %10881 = vrot.lane.b32.xlu1 %v23886_v36, %s23178_s29 }
 0x335   : > { %v24117_v57 = vpop.permute.xlu0 %1020 }
 0x336   : > { %v24119_v49 = vpop.permute.xlu1 %1050 }
 0x337   : > { %28720 = vst [vmem:[#allocation65_spill] sm:$0xff] %v24119_v49  ;;  %9589 = vrot.lane.b32.xlu0 %v23863_v8, %s23178_s29 }
 0x338   : > { %11489 = vrot.lane.b32.xlu1 %v23897_v18, %s23178_s29 }
 0x339   : > { %v24125_v32 = vpop.permute.xlu0 %1052 }
 0x33a   : > { %v24129_v11 = vpop.permute.xlu1 %10501 }
 0x33b   : > { %28721 = vst [vmem:[#allocation66_spill] sm:$0xff] %v24129_v11  ;;  %22364 = vrot.lane.b32.xlu0 %v22363_v28, %s23180_s15 }
 0x33c   : > { %22389 = vrot.lane.b32.xlu1 %v22388_v13, %s23181_s16 }
 0x33d   : > { %v24135_v15 = vpop.permute.xlu0 %7651 }
 0x33e   : > { %28722 = vst [vmem:[#allocation67_spill] sm:$0xff] %v24135_v15  ;;  %v22275_v37 = vpop.permute.xlu1 %22274 }
 0x33f   : > { %v22277_v42 = vunpack.i.h.bf16 %v22275_v37  ;;  %v22276_v46 = vunpack.i.l.bf16 %v22275_v37  ;;  %22369 = vrot.lane.b32.xlu0 %v22368_v29, %s23180_s15 }
 0x340   : > { %8449 = vrot.lane.b32.xlu1 %v23930_v25, %s23178_s29 }
 0x341   : > { %v21870_v11 = vpack.c.bf16 %v22277_v42, %v22276_v46  ;;  %v24142_v22 = vpop.permute.xlu0 %990 }
 0x342   : > { %v24144_v16 = vpop.permute.xlu1 %22279 }
 0x343   : > { %28723 = vst [vmem:[#allocation68_spill] sm:$0xff] %v24144_v16  ;;  %21872 = vmatprep.subr.msk.bf16.mxu1 %vm23785_vm2, %v21870_v11  ;;  %22374 = vrot.lane.b32.xlu0 %v22388_v13, %s23180_s15  ;;  %v22393_v13 = vpack.i.bf16 %v23993_v50, %v23951_v30 }
 0x344   : > { %9057 = vrot.lane.b32.xlu1 %v23941_v54, %s23178_s29  ;;  %21875 = vmatpush3.bf16.xpose.msk.msra.mxu1 %vm23785_vm2, %v21870_v11 }
 0x345   : > { %v24153_v37 = vpop.permute.xlu0 %1022 }
 0x346   : > { %28724 = vst [vmem:[#allocation69_spill] sm:$0xff] %v24153_v37  ;;  %v24155_v15 = vpop.permute.xlu1 %8069 }
 0x347   : > { %28725 = vst [vmem:[#allocation70_spill] sm:$0xff] %v24155_v15  ;;  %22379 = vrot.lane.b32.xlu0 %v22363_v28, %s23181_s16 }
 0x348   : > { %9665 = vrot.lane.b32.xlu1 %v23949_v9, %s23178_s29 }
 0x349   : > { %v24160_v42 = vpop.permute.xlu0 %1054 }
 0x34a   : > { %28726 = vst [vmem:[#allocation71_spill] sm:$0xff] %v24160_v42  ;;  %v24162_v46 = vpop.permute.xlu1 %7597 }
 0x34b   : > { %28727 = vst [vmem:[#allocation72_spill] sm:$0xff] %v24162_v46  ;;  %20672 = vmatmul.mubr.msk.f32.vlgmr.msra.gmra.mrb[10].mxu1 %vm1066_vm1, %v23647_v17  ;;  %22384 = vrot.lane.b32.xlu0 %v22368_v29, %s23181_s16  ;;  %v22398_v46 = vpack.i.bf16 %v24007_v38, %v23963_v53 }
 0x34c   : > { %22394 = vrot.lane.b32.xlu1 %v22393_v13, %s23180_s15  ;;  %20678 = vmatprep.mubr.msk.f32.mxu1 %vm1066_vm1, %v23660_v2  ;;  %v22403_v2 = vpack.i.bf16 %v23995_v60, %v23977_v1 }
 0x34d   : > { %v24172_v11 = vpop.permute.xlu0 %10577 }
 0x34e   : > { %28728 = vst [vmem:[#allocation73_spill] sm:$0xff] %v24172_v11  ;;  %v24174_v28 = vpop.permute.xlu1 %7613 }
 0x34f   : > { %28729 = vst [vmem:[#allocation74_spill] sm:$0xff] %v24174_v28  ;;  %10957 = vrot.lane.b32.xlu0 %v23951_v30, %s23178_s29 }
 0x350   : > { %22399 = vrot.lane.b32.xlu1 %v22398_v46, %s23180_s15 }
 0x351   : > { %v22285_v17 = vpop.permute.xlu0 %22284 }
 0x352   : > { %v24181_v15 = vpop.permute.xlu1 %7629  ;;  %v22287_v29 = vunpack.i.h.bf16 %v22285_v17  ;;  %v22286_v10 = vunpack.i.l.bf16 %v22285_v17 }
 0x353   : > { %28730 = vst [vmem:[#allocation75_spill] sm:$0xff] %v24181_v15  ;;  %8525 = vrot.lane.b32.xlu0 %v23993_v50, %s23178_s29  ;;  %v22423_v15 = vpack.i.bf16 %v24051_v55, %v24027_v0 }
 0x354   : > { %v21876_v11 = vpack.c.bf16 %v22287_v29, %v22286_v10  ;;  %22404 = vrot.lane.b32.xlu1 %v22403_v2, %s23180_s15 }
 0x355   : > { %v24188_v28 = vpop.permute.xlu0 %22289 }
 0x356   : > { %28731 = vst [vmem:[#allocation76_spill] sm:$0xff] %v24188_v28  ;;  %v24190_v39 = vpop.permute.xlu1 %992  ;;  %21878 = vmatprep.subr.msk.bf16.mxu1 %vm23785_vm2, %v21876_v11 }
 0x357   : > { %9133 = vrot.lane.b32.xlu0 %v24007_v38, %s23178_s29  ;;  %21881 = vmatpush3.bf16.xpose.msk.msra.mxu1 %vm23785_vm2, %v21876_v11  ;;  %v22483_v31 = vpack.i.bf16 %v24190_v39, %v24142_v22 }
 0x358   : > { %22409 = vrot.lane.b32.xlu1 %v22393_v13, %s23181_s16 }
 0x359   : > { %v24199_v17 = vpop.permute.xlu0 %8145 }
 0x35a   : > { %28732 = vst [vmem:[#allocation77_spill] sm:$0xff] %v24199_v17  ;;  %v24201_v10 = vpop.permute.xlu1 %1024  ;;  %v22433_v17 = vpack.i.bf16 %v24078_v61, %v24029_v19 }
 0x35b   : > { %9741 = vrot.lane.b32.xlu0 %v23995_v60, %s23178_s29 }
 0x35c   : > { %22414 = vrot.lane.b32.xlu1 %v22398_v46, %s23181_s16  ;;  %v22428_v46 = vpack.i.bf16 %v24064_v45, %v24040_v43 }
 0x35d   : > { %v24206_v29 = vpop.permute.xlu0 %994 }
 0x35e   : > { %v24210_v48 = vpop.permute.xlu1 %1056  ;;  %20679 = vmatmul.mubr.msk.f32.vlgmr.msra.gmra.mrb[12].mxu1 %vm1066_vm1, %v23670_v5 }
 0x35f   : > { %22424 = vrot.lane.b32.xlu0 %v22423_v15, %s23180_s15  ;;  %20685 = vmatprep.mubr.msk.f32.mxu1 %vm1066_vm1, %v23685_v12 }
 0x360   : > { %22419 = vrot.lane.b32.xlu1 %v22403_v2, %s23181_s16 }
 0x361   : > { %v24218_v13 = vpop.permute.xlu0 %10653 }
 0x362   : > { %28733 = vst [vmem:[#allocation78_spill] sm:$0xff] %v24218_v13  ;;  %v24222_v11 = vpop.permute.xlu1 %7653 }
 0x363   : > { %28734 = vst [vmem:[#allocation79_spill] sm:$0xff] %v24222_v11  ;;  %22429 = vrot.lane.b32.xlu0 %v22428_v46, %s23180_s15 }
 0x364   : > { %11033 = vrot.lane.b32.xlu1 %v24027_v0, %s23178_s29 }
 0x365   : > { %v24227_v5 = vpop.permute.xlu0 %7599 }
 0x366   : > { %28735 = vst [vmem:[#allocation80_spill] sm:$0xff] %v24227_v5  ;;  %v24231_v12 = vpop.permute.xlu1 %1026 }
 0x367   : > { %28736 = vst [vmem:[#allocation81_spill] sm:$0xff] %v24231_v12  ;;  %22434 = vrot.lane.b32.xlu0 %v22433_v17, %s23180_s15 }
 0x368   : > { %8601 = vrot.lane.b32.xlu1 %v24051_v55, %s23178_s29 }
 0x369   : > { %v24236_v2 = vpop.permute.xlu0 %7615 }
 0x36a   : > { %28737 = vst [vmem:[#allocation82_spill] sm:$0xff] %v24236_v2  ;;  %v24238_v11 = vpop.permute.xlu1 %1058  ;;  %v22453_v2 = vpack.i.bf16 %v24109_v59, %v24104_v56 }
 0x36b   : > { %28738 = vst [vmem:[#allocation83_spill] sm:$0xff] %v24238_v11  ;;  %22439 = vrot.lane.b32.xlu0 %v22423_v15, %s23181_s16 }
 0x36c   : > { %9209 = vrot.lane.b32.xlu1 %v24064_v45, %s23178_s29 }
 0x36d   : > { %v24243_v13 = vpop.permute.xlu0 %7631 }
 0x36e   : > { %28739 = vst [vmem:[#allocation84_spill] sm:$0xff] %v24243_v13  ;;  %v24245_v5 = vpop.permute.xlu1 %996 }
 0x36f   : > { %22444 = vrot.lane.b32.xlu0 %v22428_v46, %s23181_s16  ;;  %v22458_v46 = vpack.i.bf16 %v24117_v57, %v24111_v44 }
 0x370   : > { %9817 = vrot.lane.b32.xlu1 %v24078_v61, %s23178_s29 }
 0x371   : > { %v24250_v35 = vpop.permute.xlu0 %1028 }
 0x372   : > { %v22295_v47 = vpop.permute.xlu1 %22294 }
 0x373   : > { %v22297_v41 = vunpack.i.h.bf16 %v22295_v47  ;;  %v22296_v15 = vunpack.i.l.bf16 %v22295_v47  ;;  %22449 = vrot.lane.b32.xlu0 %v22433_v17, %s23181_s16  ;;  %v22463_v17 = vpack.i.bf16 %v24125_v32, %v24119_v49 }
 0x374   : > { %22454 = vrot.lane.b32.xlu1 %v22453_v2, %s23180_s15 }
 0x375   : > { %v21882_v13 = vpack.c.bf16 %v22297_v41, %v22296_v15  ;;  %v24256_v58 = vpop.permute.xlu0 %1060 }
 0x376   : > { %28740 = vst [vmem:[#allocation85_spill] sm:$0xff] %v24256_v58  ;;  %v24258_v62 = vpop.permute.xlu1 %22299 }
 0x377   : > { %28741 = vst [vmem:[#allocation86_spill] sm:$0xff] %v24258_v62  ;;  %21884 = vmatprep.subr.msk.bf16.mxu1 %vm23785_vm2, %v21882_v13  ;;  %11109 = vrot.lane.b32.xlu0 %v24104_v56, %s23178_s29 }
 0x378   : > { %22459 = vrot.lane.b32.xlu1 %v22458_v46, %s23180_s15  ;;  %21887 = vmatpush3.bf16.xpose.msk.msra.mxu1 %vm23785_vm2, %v21882_v13 }
 0x379   : > { %v24269_v47 = vpop.permute.xlu0 %8221 }
 0x37a   : > { %28742 = vst [vmem:[#allocation87_spill] sm:$0xff] %v24269_v47  ;;  %v24271_v41 = vpop.permute.xlu1 %10729 }
 0x37b   : > { %28743 = vst [vmem:[#allocation88_spill] sm:$0xff] %v24271_v41  ;;  %8677 = vrot.lane.b32.xlu0 %v24109_v59, %s23178_s29 }
 0x37c   : > { %22464 = vrot.lane.b32.xlu1 %v22463_v17, %s23180_s15 }
 0x37d   : > { %v24278_v15 = vpop.permute.xlu0 %7655 }
 0x37e   : > { %28744 = vst [vmem:[#allocation89_spill] sm:$0xff] %v24278_v15  ;;  %v24280_v62 = vpop.permute.xlu1 %11337  ;;  %v24282_v28 = vpop.f32.mrb[0].mxu1 }
 0x37f   : > { %28745 = vst [vmem:[#allocation90_spill] sm:$0xff] %v24280_v62  ;;  %v24284_v16 = vpop.f32.mrb[1].mxu1  ;;  %20686 = vmatmul.mubr.msk.f32.vlgmr.msra.gmra.mrb[14].mxu1 %vm1066_vm1, %v23694_v14  ;;  %9285 = vrot.lane.b32.xlu0 %v24117_v57, %s23178_s29 }
 0x380   : > { %22469 = vrot.lane.b32.xlu1 %v22453_v2, %s23181_s16  ;;  %20699 = vmatprep.mubr.msk.f32.mxu1 %vm1066_vm1, %v23845_v63  ;;  %v22488_v63 = vpack.i.bf16 %v24201_v10, %v24153_v37 }
 0x381   : > { %v22305_v13 = vpop.permute.xlu0 %22304 }
 0x382   : > { %v24293_v41 = vpop.permute.xlu1 %8297  ;;  %v22307_v15 = vunpack.i.h.bf16 %v22305_v13  ;;  %v22306_v62 = vunpack.i.l.bf16 %v22305_v13  ;;  %v22493_v13 = vpack.i.bf16 %v24210_v48, %v24160_v42 }
 0x383   : > { %28746 = vst [vmem:[#allocation91_spill] sm:$0xff] %v24293_v41  ;;  %9893 = vrot.lane.b32.xlu0 %v24125_v32, %s23178_s29 }
 0x384   : > { %v21888_v47 = vpack.c.bf16 %v22307_v15, %v22306_v62  ;;  %22474 = vrot.lane.b32.xlu1 %v22458_v46, %s23181_s16 }
 0x385   : > { %v24298_v14 = vpop.permute.xlu0 %22309 }
 0x386   : > { %v24302_v2 = vpop.permute.xlu1 %8905  ;;  %21890 = vmatprep.subr.msk.bf16.mxu0 %vm23785_vm2, %v21888_v47 }
 0x387   : > { %28747 = vst [vmem:[#allocation92_spill] sm:$0xff] %v24302_v2  ;;  %22484 = vrot.lane.b32.xlu0 %v22483_v31, %s23180_s15  ;;  %21893 = vmatpush3.bf16.xpose.msk.msra.mxu0 %vm23785_vm2, %v21888_v47 }
 0x388   : > { %22479 = vrot.lane.b32.xlu1 %v22463_v17, %s23181_s16 }
 0x389   : > { %v24310_v62 = vpop.permute.xlu0 %22314 }
 0x38a   : > { %v24314_v46 = vpop.permute.xlu1 %9513 }
 0x38b   : > { %28748 = vst [vmem:[#allocation93_spill] sm:$0xff] %v24314_v46  ;;  %22489 = vrot.lane.b32.xlu0 %v22488_v63, %s23180_s15 }
 0x38c   : > { %11185 = vrot.lane.b32.xlu1 %v24142_v22, %s23178_s29 }
 0x38d   : > { %v24319_v15 = vpop.permute.xlu0 %22319 }
 0x38e   : > { %28749 = vst [vmem:[#allocation94_spill] sm:$0xff] %v24319_v15  ;;  %v22335_v47 = vpop.permute.xlu1 %22334  ;;  %20693 = vmatmul.mubr.msk.f32.vlgmr.msra.gmra.mrb[32].mxu0 %vm1066_vm1, %v23810_v52 }
 0x38f   : > { %v22337_v17 = vunpack.i.h.bf16 %v22335_v47  ;;  %v22336_v2 = vunpack.i.l.bf16 %v22335_v47  ;;  %22494 = vrot.lane.b32.xlu0 %v22493_v13, %s23180_s15  ;;  %20706 = vmatprep.mubr.msk.f32.mxu0 %vm1066_vm1, %v23886_v36 }
 0x390   : > { %8753 = vrot.lane.b32.xlu1 %v24190_v39, %s23178_s29 }
 0x391   : > { %v21894_v46 = vpack.c.bf16 %v22337_v17, %v22336_v2  ;;  %v24330_v41 = vpop.permute.xlu0 %22324  ;;  %v22518_v17 = vpack.i.bf16 %v24250_v35, %v24231_v12 }
 0x392   : > { %28750 = vst [vmem:[#allocation95_spill] sm:$0xff] %v24330_v41  ;;  %v24332_v15 = vpop.permute.xlu1 %22339 }
 0x393   : > { %21896 = vmatprep.subr.msk.bf16.mxu1 %vm23785_vm2, %v21894_v46  ;;  %22499 = vrot.lane.b32.xlu0 %v22483_v31, %s23181_s16  ;;  %v22513_v31 = vpack.i.bf16 %v24245_v5, %v24206_v29 }
 0x394   : > { %9361 = vrot.lane.b32.xlu1 %v24201_v10, %s23178_s29  ;;  %21899 = vmatpush3.bf16.xpose.msk.msra.mxu1 %vm23785_vm2, %v21894_v46 }
 0x395   : > { %v24341_v52 = vpop.permute.xlu0 %22329 }
 0x396   : > { %28751 = vst [vmem:[#allocation96_spill] sm:$0xff] %v24341_v52  ;;  %v24343_v36 = vpop.permute.xlu1 %22344 }
 0x397   : > { %22504 = vrot.lane.b32.xlu0 %v22488_v63, %s23181_s16 }
 0x398   : > { %9969 = vrot.lane.b32.xlu1 %v24210_v48, %s23178_s29 }
 0x399   : > { %v24348_v2 = vpop.permute.xlu0 %10805 }
 0x39a   : > { %28752 = vst [vmem:[#allocation97_spill] sm:$0xff] %v24348_v2  ;;  %v24350_v47 = vpop.permute.xlu1 %22349  ;;  %v22523_v2 = vpack.i.bf16 %v24256_v58, %v24238_v11 }
 0x39b   : > { %28753 = vst [vmem:[#allocation98_spill] sm:$0xff] %v24350_v47  ;;  %20700 = vmatmul.mubr.msk.f32.vlgmr.msra.gmra.mrb[16].mxu1 %vm1066_vm1, %v23847_v3  ;;  %22509 = vrot.lane.b32.xlu0 %v22493_v13, %s23181_s16 }
 0x39c   : > { %22514 = vrot.lane.b32.xlu1 %v22513_v31, %s23180_s15  ;;  %20713 = vmatprep.mubr.msk.f32.mxu1 %vm1066_vm1, %v23951_v30 }
 0x39d   : > { %v24360_v63 = vpop.permute.xlu0 %11413 }
 0x39e   : > { %28754 = vst [vmem:[#allocation99_spill] sm:$0xff] %v24360_v63  ;;  %v24362_v46 = vpop.permute.xlu1 %22354 }
 0x39f   : > { %28755 = vst [vmem:[#allocation100_spill] sm:$0xff] %v24362_v46  ;;  %11261 = vrot.lane.b32.xlu0 %v24206_v29, %s23178_s29 }
 0x3a0   : > { %22519 = vrot.lane.b32.xlu1 %v22518_v17, %s23180_s15 }
 0x3a1   : > { %v24369_v3 = vpop.permute.xlu0 %8373 }
 0x3a2   : > { %28756 = vst [vmem:[#allocation101_spill] sm:$0xff] %v24369_v3  ;;  %v24371_v13 = vpop.permute.xlu1 %22359 }
 0x3a3   : > { %28757 = vst [vmem:[#allocation102_spill] sm:$0xff] %v24371_v13  ;;  %8829 = vrot.lane.b32.xlu0 %v24245_v5, %s23178_s29 }
 0x3a4   : > { %22524 = vrot.lane.b32.xlu1 %v22523_v2, %s23180_s15 }
 0x3a5   : > { %v24378_v30 = vpop.permute.xlu0 %8981 }
 0x3a6   : > { %28758 = vst [vmem:[#allocation103_spill] sm:$0xff] %v24378_v30  ;;  %v24380_v63 = vpop.permute.xlu1 %10881 }
 0x3a7   : > { %28759 = vst [vmem:[#allocation104_spill] sm:$0xff] %v24380_v63  ;;  %9437 = vrot.lane.b32.xlu0 %v24250_v35, %s23178_s29 }
 0x3a8   : > { %22529 = vrot.lane.b32.xlu1 %v22513_v31, %s23181_s16 }
 0x3a9   : > { %v24385_v3 = vpop.permute.xlu0 %9589  ;;  %v24387_v13 = vpop.f32.mrb[2].mxu1 }
 0x3aa   : > { %28760 = vst [vmem:[#allocation105_spill] sm:$0xff] %v24385_v3  ;;  %28761 = vst [vmem:[#allocation106_spill] sm:$0xff] %v24387_v13  ;;  %v24389_v52 = vpop.permute.xlu1 %11489  ;;  %v24391_v46 = vpop.f32.mrb[3].mxu1 }
 0x3ab   : > { %28762 = vst [vmem:[#allocation107_spill] sm:$0xff] %v24389_v52 }
 0x3ac   : > { %22534 = vrot.lane.b32.xlu1 %v22518_v17, %s23181_s16 }
 0x3ad   : > { %v22365_v41 = vpop.permute.xlu0 %22364 }
 0x3ae   : > { %v24394_v47 = vpop.permute.xlu1 %22389  ;;  %v22367_v30 = vunpack.i.h.bf16 %v22365_v41  ;;  %v22366_v63 = vunpack.i.l.bf16 %v22365_v41 }
 0x3af   : > { %28763 = vst [vmem:[#allocation108_spill] sm:$0xff] %v24394_v47 }
 0x3b0   : > { %v21900_v34 = vpack.c.bf16 %v22367_v30, %v22366_v63  ;;  %22539 = vrot.lane.b32.xlu1 %v22523_v2, %s23181_s16 }
 0x3b1   : > { %v24397_v11 = vpop.permute.xlu0 %22369 }
 0x3b2   : > { %v24399_v31 = vpop.permute.xlu1 %8449  ;;  %21902 = vmatprep.subr.msk.bf16.mxu0 %vm23785_vm2, %v21900_v34 }
 0x3b3   : > { %28764 = vst [vmem:[#allocation109_spill] sm:$0xff] %v24399_v31  ;;  %21905 = vmatpush3.bf16.xpose.msk.msra.mxu0 %vm23785_vm2, %v21900_v34 }
 0x3b4   : > { %10045 = vrot.lane.b32.xlu1 %v24256_v58, %s23178_s29 }
 0x3b5   : > { %v24407_v17 = vpop.permute.xlu0 %22374 }
 0x3b6   : > { %v24409_v52 = vpop.permute.xlu1 %9057 }
 0x3b7   : > { %28765 = vst [vmem:[#allocation110_spill] sm:$0xff] %v24409_v52 }
 0x3b9   : > { %v24411_v41 = vpop.permute.xlu0 %22379 }
 0x3ba   : > { %28766 = vst [vmem:[#allocation111_spill] sm:$0xff] %v24411_v41  ;;  %v24413_v2 = vpop.permute.xlu1 %9665  ;;  %20707 = vmatmul.mubr.msk.f32.vlgmr.msra.gmra.mrb[34].mxu0 %vm1066_vm1, %v23930_v25 }
 0x3bb   : > { %28767 = vst [vmem:[#allocation112_spill] sm:$0xff] %v24413_v2  ;;  %20720 = vmatprep.mubr.msk.f32.mxu0 %vm1066_vm1, %v24027_v0  ;;  %v3848_v0 = vsel %vm3847_vm3, %v24284_v16, -inf }
 0x3bd   : > { %v24419_v63 = vpop.permute.xlu0 %22384  ;;  %v24421_v34 = vpop.f32.mrb[4].mxu1 }
 0x3be   : > { %28768 = vst [vmem:[#allocation113_spill] sm:$0xff] %v24419_v63  ;;  %v22395_v30 = vpop.permute.xlu1 %22394  ;;  %v24423_v3 = vpop.f32.mrb[5].mxu1 }
 0x3bf   : > { %28769 = vst [vmem:[#allocation114_spill] sm:$0xff] %v24423_v3  ;;  %v22397_v31 = vunpack.i.h.bf16 %v22395_v30  ;;  %v22396_v47 = vunpack.i.l.bf16 %v22395_v30 }
 0x3c1   : > { %v21906_v52 = vpack.c.bf16 %v22397_v31, %v22396_v47  ;;  %v24425_v58 = vpop.permute.xlu0 %10957  ;;  %v3857_v31 = vsel %vm3847_vm3, %v24387_v13, -inf }
 0x3c2   : > { %28770 = vst [vmem:[#allocation115_spill] sm:$0xff] %v24425_v58  ;;  %v24427_v41 = vpop.permute.xlu1 %22399  ;;  %v3854_v58 = vsel %vm3847_vm3, %v24391_v46, -inf }
 0x3c3   : > { %21908 = vmatprep.subr.msk.bf16.mxu1 %vm23785_vm2, %v21906_v52 }
 0x3c4   : > { %21911 = vmatpush3.bf16.xpose.msk.msra.mxu1 %vm23785_vm2, %v21906_v52 }
 0x3c5   : > { %v24433_v25 = vpop.permute.xlu0 %8525 }
 0x3c6   : > { %28771 = vst [vmem:[#allocation116_spill] sm:$0xff] %v24433_v25  ;;  %v24437_v2 = vpop.permute.xlu1 %22404  ;;  %3849 = vmax.xlane.f32.xlu0 %v3848_v0  ;;  %v3860_v25 = vsel %vm3847_vm3, %v24423_v3, -inf }
 0x3c9   : > { %v24439_v47 = vpop.permute.xlu0 %9133 }
 0x3ca   : > { %28772 = vst [vmem:[#allocation117_spill] sm:$0xff] %v24439_v47  ;;  %v24443_v30 = vpop.permute.xlu1 %22409  ;;  %3858 = vmax.xlane.f32.xlu0 %v3857_v31 }
 0x3cb   : > { %28773 = vst [vmem:[#allocation118_spill] sm:$0xff] %v24443_v30  ;;  %20714 = vmatmul.mubr.msk.f32.vlgmr.msra.gmra.mrb[18].mxu1 %vm1066_vm1, %v23993_v50 }
 0x3cc   : > { %20727 = vmatprep.mubr.msk.f32.mxu1 %vm1066_vm1, %v24104_v56 }
 0x3cd   : > { %v24449_v52 = vpop.permute.xlu0 %9741 }
 0x3ce   : > { %28774 = vst [vmem:[#allocation119_spill] sm:$0xff] %v24449_v52  ;;  %v24453_v0 = vpop.permute.xlu1 %22414  ;;  %3855 = vmax.xlane.f32.xlu0 %v3854_v58  ;;  %v3851_v58 = vsel %vm3847_vm3, %v24282_v28, -inf }
 0x3cf   : > { %28775 = vst [vmem:[#allocation120_spill] sm:$0xff] %v24453_v0 }
 0x3d1   : > { %v22425_v47 = vpop.permute.xlu0 %22424 }
 0x3d2   : > { %v24457_v63 = vpop.permute.xlu1 %22419  ;;  %v22427_v31 = vunpack.i.h.bf16 %v22425_v47  ;;  %v22426_v30 = vunpack.i.l.bf16 %v22425_v47  ;;  %3861 = vmax.xlane.f32.xlu0 %v3860_v25  ;;  %v3863_v25 = vsel %vm3847_vm3, %v24421_v34, -inf }
 0x3d3   : > { %28776 = vst [vmem:[#allocation121_spill] sm:$0xff] %v24457_v63 }
 0x3d4   : > { %v21912_v50 = vpack.c.bf16 %v22427_v31, %v22426_v30 }
 0x3d5   : > { %v24459_v13 = vpop.permute.xlu0 %22429 }
 0x3d6   : > { %v24461_v56 = vpop.permute.xlu1 %11033  ;;  %21914 = vmatprep.subr.msk.bf16.mxu0 %vm23785_vm2, %v21912_v50 }
 0x3d7   : > { %28777 = vst [vmem:[#allocation122_spill] sm:$0xff] %v24461_v56  ;;  %21917 = vmatpush3.bf16.xpose.msk.msra.mxu0 %vm23785_vm2, %v21912_v50 }
 0x3d8   : > { %3852 = vmax.xlane.f32.xlu1 %v3851_v58 }
 0x3d9   : > { %v24469_v52 = vpop.permute.xlu0 %22434 }
 0x3da   : > { %v24471_v63 = vpop.permute.xlu1 %8601 }
 0x3db   : > { %28778 = vst [vmem:[#allocation123_spill] sm:$0xff] %v24471_v63 }
 0x3dc   : > { %3864 = vmax.xlane.f32.xlu1 %v3863_v25 }
 0x3dd   : > { %v24475_v47 = vpop.permute.xlu0 %22439 }
 0x3de   : > { %28779 = vst [vmem:[#allocation124_spill] sm:$0xff] %v24475_v47  ;;  %v24477_v30 = vpop.permute.xlu1 %9209  ;;  %20721 = vmatmul.mubr.msk.f32.vlgmr.msra.gmra.mrb[36].mxu0 %vm1066_vm1, %v24051_v55 }
 0x3df   : > { %28780 = vst [vmem:[#allocation125_spill] sm:$0xff] %v24477_v30  ;;  %20734 = vmatprep.mubr.msk.f32.mxu0 %vm1066_vm1, %v24142_v22 }
 0x3e1   : > { %v24483_v31 = vpop.permute.xlu0 %22444  ;;  %v24485_v50 = vpop.f32.mrb[6].mxu1 }
 0x3e2   : > { %28781 = vst [vmem:[#allocation126_spill] sm:$0xff] %v24483_v31  ;;  %28782 = vst [vmem:[#allocation127_spill] sm:$0xff] %v24485_v50  ;;  %v24487_v58 = vpop.permute.xlu1 %9817  ;;  %v24489_v56 = vpop.f32.mrb[7].mxu1  ;;  %v3869_v25 = vsel %vm3847_vm3, %v24485_v50, -inf }
 0x3e3   : > { %28783 = vst [vmem:[#allocation128_spill] sm:$0xff] %v24487_v58  ;;  %28784 = vst [vmem:[#allocation129_spill] sm:$0xff] %v24489_v56  ;;  %3870 = vmax.xlane.f32.xlu0 %v3869_v25  ;;  %v3866_v55 = vsel %vm3847_vm3, %v24489_v56, -inf }
 0x3e5   : > { %v24493_v63 = vpop.permute.xlu0 %22449 }
 0x3e6   : > { %28785 = vst [vmem:[#allocation130_spill] sm:$0xff] %v24493_v63  ;;  %v22455_v30 = vpop.permute.xlu1 %22454 }
 0x3e7   : > { %v22457_v0 = vunpack.i.h.bf16 %v22455_v30  ;;  %v22456_v22 = vunpack.i.l.bf16 %v22455_v30  ;;  %3867 = vmax.xlane.f32.xlu0 %v3866_v55 }
 0x3e9   : > { %v21918_v31 = vpack.c.bf16 %v22457_v0, %v22456_v22  ;;  %v24497_v47 = vpop.permute.xlu0 %11109 }
 0x3ea   : > { %28786 = vst [vmem:[#allocation131_spill] sm:$0xff] %v24497_v47  ;;  %v24499_v3 = vpop.permute.xlu1 %22459  ;;  %v22311_v47 = vunpack.i.l.bf16 %v24298_v14 }
 0x3eb   : > { %21920 = vmatprep.subr.msk.bf16.mxu1 %vm23785_vm2, %v21918_v31 }
 0x3ec   : > { %21923 = vmatpush3.bf16.xpose.msk.msra.mxu1 %vm23785_vm2, %v21918_v31  ;;  %v22312_v31 = vunpack.i.h.bf16 %v24298_v14 }
 0x3ed   : > { %v24505_v25 = vpop.permute.xlu0 %8677 }
 0x3ee   : > { %28787 = vst [vmem:[#allocation132_spill] sm:$0xff] %v24505_v25  ;;  %v24507_v58 = vpop.permute.xlu1 %22464 }
 0x3f1   : > { %v24509_v63 = vpop.permute.xlu0 %9285 }
 0x3f2   : > { %28788 = vst [vmem:[#allocation133_spill] sm:$0xff] %v24509_v63  ;;  %v24511_v56 = vpop.permute.xlu1 %22469 }
 0x3f3   : > { %28789 = vst [vmem:[#allocation134_spill] sm:$0xff] %v24511_v56  ;;  %20728 = vmatmul.mubr.msk.f32.vlgmr.msra.gmra.mrb[20].mxu1 %vm1066_vm1, %v24109_v59 }
 0x3f4   : > { %20741 = vmatprep.mubr.msk.f32.mxu1 %vm1066_vm1, %v24206_v29 }
 0x3f5   : > { %v24517_v0 = vpop.permute.xlu0 %9893 }
 0x3f6   : > { %28790 = vst [vmem:[#allocation135_spill] sm:$0xff] %v24517_v0  ;;  %v24519_v30 = vpop.permute.xlu1 %22474  ;;  %v21936_v0 = vpack.c.bf16 %v22312_v31, %v22311_v47 }
 0x3f7   : > { %28791 = vst [vmem:[#allocation136_spill] sm:$0xff] %v24519_v30 }
 0x3f9   : > { %v22485_v55 = vpop.permute.xlu0 %22484  ;;  %v24522_v22 = vpop.f32.mrb[8].mxu1 }
 0x3fa   : > { %v24525_v63 = vpop.permute.xlu1 %22479  ;;  %v22487_v25 = vunpack.i.h.bf16 %v22485_v55  ;;  %v22486_v56 = vunpack.i.l.bf16 %v22485_v55  ;;  %v24527_v50 = vpop.f32.mrb[9].mxu1  ;;  %v3875_v59 = vsel %vm3847_vm3, %v24522_v22, -inf  ;;  %v22372_v55 = vunpack.i.h.bf16 %v24397_v11 }
 0x3fb   : > { %28792 = vst [vmem:[#allocation137_spill] sm:$0xff] %v24525_v63  ;;  %3876 = vmax.xlane.f32.xlu1 %v3875_v59  ;;  %v3872_v14 = vsel %vm3847_vm3, %v24527_v50, -inf  ;;  %v22432_v59 = vunpack.i.h.bf16 %v24459_v13 }
 0x3fc   : > { %v21924_v29 = vpack.c.bf16 %v22487_v25, %v22486_v56  ;;  %v22371_v56 = vunpack.i.l.bf16 %v24397_v11  ;;  %v22431_v11 = vunpack.i.l.bf16 %v24459_v13 }
 0x3fe   : > { %v24531_v30 = vpop.permute.xlu1 %11185  ;;  %21926 = vmatprep.subr.msk.bf16.mxu0 %vm23785_vm2, %v21924_v29  ;;  %v21948_v25 = vpack.c.bf16 %v22372_v55, %v22371_v56  ;;  %v22490_v56 = vpop.permute.xlu0 %22489 }
 0x3ff   : > { %28793 = vst [vmem:[#allocation138_spill] sm:$0xff] %v24531_v30  ;;  %21929 = vmatpush3.bf16.xpose.msk.msra.mxu0 %vm23785_vm2, %v21924_v29  ;;  %3873 = vmax.xlane.f32.xlu1 %v3872_v14  ;;  %v21960_v14 = vpack.c.bf16 %v22432_v59, %v22431_v11  ;;  %v22492_v59 = vunpack.i.h.bf16 %v22490_v56  ;;  %v22491_v11 = vunpack.i.l.bf16 %v22490_v56 }
 0x400   : > { %21938 = vmatprep.subr.msk.bf16.mxu0 %vm23785_vm2, %v21936_v0 }
 0x402   : > { %v24543_v47 = vpop.permute.xlu1 %8753 }
 0x403   : > { %28794 = vst [vmem:[#allocation139_spill] sm:$0xff] %v24543_v47  ;;  %v28813_v47 = vld [vmem:[#allocation129_spill] sm:$0xff] }
 0x406   : > { %v24545_v31 = vpop.permute.xlu1 %9361  ;;  %20735 = vmatmul.mubr.msk.f32.vlgmr.msra.gmra.mrb[38].mxu0 %vm1066_vm1, %v24190_v39  ;;  %v22342_v39 = vunpack.i.h.bf16 %v24332_v15 }
 0x407   : > { %28795 = vst [vmem:[#allocation140_spill] sm:$0xff] %v24545_v31  ;;  %21941 = vmatpush3.bf16.xpose.msk.msra.mxu0 %vm23785_vm2, %v21936_v0  ;;  %20748 = vmatprep.mubr.msk.f32.mxu0 %vm1066_vm1, %v23769_v27  ;;  %v22341_v0 = vunpack.i.l.bf16 %v24332_v15  ;;  %v21972_v15 = vpack.c.bf16 %v22492_v59, %v22491_v11  ;;  %v22437_v59 = vunpack.i.h.bf16 %v24469_v52  ;;  %v22436_v11 = vunpack.i.l.bf16 %v24469_v52 }
 0x408   : > { %21950 = vmatprep.subr.msk.bf16.mxu0 %vm23785_vm2, %v21948_v25  ;;  %v22346_v52 = vunpack.i.l.bf16 %v24343_v36 }
 0x40a   : > { %v24557_v29 = vpop.permute.xlu1 %9969 }
 0x40b   : > { %28796 = vst [vmem:[#allocation141_spill] sm:$0xff] %v24557_v29 }
 0x40e   : > { %v22515_v55 = vpop.permute.xlu1 %22514  ;;  %20749 = vmatmul.mubr.msk.f32.vlgmr.msra.gmra.mrb[40].mxu0 %vm1066_vm1, %v23791_v24  ;;  %v21942_v24 = vpack.c.bf16 %v22342_v39, %v22341_v0  ;;  %v22376_v0 = vunpack.i.l.bf16 %v24407_v17 }
 0x40f   : > { %v22517_v27 = vunpack.i.h.bf16 %v22515_v55  ;;  %v22516_v30 = vunpack.i.l.bf16 %v22515_v55  ;;  %21953 = vmatpush3.bf16.xpose.msk.msra.mxu0 %vm23785_vm2, %v21948_v25  ;;  %20762 = vmatprep.mubr.msk.f32.mxu0 %vm1066_vm1, %v23897_v18  ;;  %v22402_v18 = vunpack.i.h.bf16 %v24427_v41  ;;  %v22317_v25 = vunpack.i.h.bf16 %v24310_v62 }
 0x410   : > { %21962 = vmatprep.subr.msk.bf16.mxu0 %vm23785_vm2, %v21960_v14  ;;  %v22316_v55 = vunpack.i.l.bf16 %v24310_v62  ;;  %v22462_v62 = vunpack.i.h.bf16 %v24499_v3 }
 0x411   : > { %v21930_v13 = vpack.c.bf16 %v22517_v27, %v22516_v30  ;;  %v22401_v30 = vunpack.i.l.bf16 %v24427_v41 }
 0x412   : > { %v22520_v56 = vpop.permute.xlu1 %22519 }
 0x413   : > { %21932 = vmatprep.subr.msk.bf16.mxu1 %vm23785_vm2, %v21930_v13  ;;  %v21954_v39 = vpack.c.bf16 %v22402_v18, %v22401_v30  ;;  %v22495_v18 = vpop.permute.xlu0 %22494 }
 0x414   : > { %21935 = vmatpush3.bf16.xpose.msk.msra.mxu1 %vm23785_vm2, %v21930_v13  ;;  %v22497_v30 = vunpack.i.h.bf16 %v22495_v18 }
 0x415   : > { %21944 = vmatprep.subr.msk.bf16.mxu1 %vm23785_vm2, %v21942_v24 }
 0x416   : > { %20763 = vmatmul.mubr.msk.f32.vlgmr.msra.gmra.mrb[42].mxu0 %vm1066_vm1, %v23941_v54  ;;  %v21984_v54 = vpack.c.bf16 %v22317_v25, %v22316_v55  ;;  %v22496_v25 = vunpack.i.l.bf16 %v22495_v18 }
 0x417   : > { %21965 = vmatpush3.bf16.xpose.msk.msra.mxu0 %vm23785_vm2, %v21960_v14  ;;  %20776 = vmatprep.mubr.msk.f32.mxu0 %vm1066_vm1, %v24040_v43  ;;  %v22461_v14 = vunpack.i.l.bf16 %v24499_v3 }
 0x418   : > { %21974 = vmatprep.subr.msk.bf16.mxu0 %vm23785_vm2, %v21972_v15 }
 0x419   : > { %v21966_v3 = vpack.c.bf16 %v22462_v62, %v22461_v14  ;;  %v22406_v62 = vunpack.i.l.bf16 %v24437_v2  ;;  %v22232_v14 = vunpack.i.h.bf16 %v23803_v51 }
 0x41b   : > { %20742 = vmatmul.mubr.msk.f32.vlgmr.msra.gmra.mrb[22].mxu1 %vm1066_vm1, %v24245_v5 }
 0x41c   : > { %21947 = vmatpush3.bf16.xpose.msk.msra.mxu1 %vm23785_vm2, %v21942_v24  ;;  %20755 = vmatprep.mubr.msk.f32.mxu1 %vm1066_vm1, %v23853_v21 }
 0x41d   : > { %21956 = vmatprep.subr.msk.bf16.mxu1 %vm23785_vm2, %v21954_v39 }
 0x41e   : > { %v24595_v41 = vpop.f32.mrb[10].mxu1  ;;  %20777 = vmatmul.mubr.msk.f32.vlgmr.msra.gmra.mrb[44].mxu0 %vm1066_vm1, %v24064_v45  ;;  %v22377_v45 = vunpack.i.h.bf16 %v24407_v17  ;;  %v22522_v17 = vunpack.i.h.bf16 %v22520_v56 }
 0x41f   : > { %v24601_v5 = vpop.f32.mrb[11].mxu1  ;;  %21977 = vmatpush3.bf16.xpose.msk.msra.mxu0 %vm23785_vm2, %v21972_v15  ;;  %20790 = vmatprep.mubr.msk.f32.mxu0 %vm1066_vm1, %v24153_v37  ;;  %v3881_v21 = vsel %vm3847_vm3, %v24595_v41, -inf  ;;  %v22347_v15 = vunpack.i.h.bf16 %v24343_v36 }
 0x420   : > { %3882 = vmax.xlane.f32.xlu0 %v3881_v21  ;;  %21986 = vmatprep.subr.msk.bf16.mxu0 %vm23785_vm2, %v21984_v54  ;;  %v3878_v27 = vsel %vm3847_vm3, %v24601_v5, -inf  ;;  %v21996_v13 = vpack.c.bf16 %v22377_v45, %v22376_v0  ;;  %v22467_v45 = vunpack.i.h.bf16 %v24507_v58  ;;  %v22251_v0 = vunpack.i.l.bf16 %v23932_v33 }
 0x421   : > { %v21990_v36 = vpack.c.bf16 %v22347_v15, %v22346_v52 }
 0x423   : > { %20756 = vmatmul.mubr.msk.f32.vlgmr.msra.gmra.mrb[24].mxu1 %vm1066_vm1, %v23855_v6  ;;  %v22521_v6 = vunpack.i.l.bf16 %v22520_v56 }
 0x424   : > { %21959 = vmatpush3.bf16.xpose.msk.msra.mxu1 %vm23785_vm2, %v21954_v39  ;;  %20769 = vmatprep.mubr.msk.f32.mxu1 %vm1066_vm1, %v23963_v53  ;;  %v22020_v39 = vpack.c.bf16 %v22497_v30, %v22496_v25 }
 0x425   : > { %3879 = vmax.xlane.f32.xlu0 %v3878_v27  ;;  %21968 = vmatprep.subr.msk.bf16.mxu1 %vm23785_vm2, %v21966_v3  ;;  %v21978_v24 = vpack.c.bf16 %v22522_v17, %v22521_v6  ;;  %v22241_v27 = vunpack.i.l.bf16 %v23884_v40 }
 0x426   : > { %20791 = vmatmul.mubr.msk.f32.vlgmr.msra.gmra.mrb[46].mxu0 %vm1066_vm1, %v24201_v10  ;;  %v22008_v10 = vpack.c.bf16 %v22437_v59, %v22436_v11  ;;  %v28797_v59 = vld [vmem:[#allocation83_spill] sm:$0xff] }
 0x427   : > { %21989 = vmatpush3.bf16.xpose.msk.msra.mxu0 %vm23785_vm2, %v21984_v54  ;;  %20804 = vmatprep.mubr.msk.f32.mxu0 %vm1066_vm1, %v23761_v26  ;;  %v22407_v54 = vunpack.i.h.bf16 %v24437_v2 }
 0x428   : > { %21998 = vmatprep.subr.msk.bf16.mxu0 %vm23785_vm2, %v21996_v13 }
 0x429   : > { %v22002_v21 = vpack.c.bf16 %v22407_v54, %v22406_v62 }
 0x42b   : > { %20770 = vmatmul.mubr.msk.f32.vlgmr.msra.gmra.mrb[26].mxu1 %vm1066_vm1, %v24007_v38 }
 0x42c   : > { %21971 = vmatpush3.bf16.xpose.msk.msra.mxu1 %vm23785_vm2, %v21966_v3  ;;  %20783 = vmatprep.mubr.msk.f32.mxu1 %vm1066_vm1, %v24111_v44 }
 0x42d   : > { %21980 = vmatprep.subr.msk.bf16.mxu1 %vm23785_vm2, %v21978_v24 }
 0x42e   : > { %20805 = vmatmul.mubr.msk.f32.vlgmr.msra.gmra.mrb[48].mxu0 %vm1066_vm1, %v23822_v23 }
 0x42f   : > { %22001 = vmatpush3.bf16.xpose.msk.msra.mxu0 %vm23785_vm2, %v21996_v13  ;;  %20818 = vmatprep.mubr.msk.f32.mxu0 %vm1066_vm1, %v23905_v4 }
 0x430   : > { %22010 = vmatprep.subr.msk.bf16.mxu0 %vm23785_vm2, %v22008_v10 }
 0x431   : > { %v24651_v38 = vpop.f32.mrb[12].mxu1 }
 0x432   : > { %v24653_v55 = vpop.f32.mrb[13].mxu1  ;;  %v3887_v23 = vsel %vm3847_vm3, %v24651_v38, -inf }
 0x433   : > { %20784 = vmatmul.mubr.msk.f32.vlgmr.msra.gmra.mrb[28].mxu1 %vm1066_vm1, %v24117_v57  ;;  %3888 = vmax.xlane.f32.xlu1 %v3887_v23  ;;  %v3884_v57 = vsel %vm3847_vm3, %v24653_v55, -inf }
 0x434   : > { %21983 = vmatpush3.bf16.xpose.msk.msra.mxu1 %vm23785_vm2, %v21978_v24  ;;  %20797 = vmatprep.mubr.msk.f32.mxu1 %vm1066_vm1, %v24231_v12 }
 0x435   : > { %21992 = vmatprep.subr.msk.bf16.mxu1 %vm23785_vm2, %v21990_v36 }
 0x436   : > { %20819 = vmatmul.mubr.msk.f32.vlgmr.msra.gmra.mrb[50].mxu0 %vm1066_vm1, %v23949_v9  ;;  %v22231_v9 = vunpack.i.l.bf16 %v23803_v51  ;;  %v22466_v51 = vunpack.i.l.bf16 %v24507_v58 }
 0x437   : > { %22013 = vmatpush3.bf16.xpose.msk.msra.mxu0 %vm23785_vm2, %v22008_v10  ;;  %20832 = vmatprep.mubr.msk.f32.mxu0 %vm1066_vm1, %v24029_v19 }
 0x438   : > { %3885 = vmax.xlane.f32.xlu1 %v3884_v57  ;;  %22022 = vmatprep.subr.msk.bf16.mxu0 %vm23785_vm2, %v22020_v39  ;;  %v22032_v2 = vpack.c.bf16 %v22232_v14, %v22231_v9  ;;  %v22014_v3 = vpack.c.bf16 %v22467_v45, %v22466_v51  ;;  %v24765_v9 = vpop.permute.xlu0 %22499 }
 0x43b   : > { %20798 = vmatmul.mubr.msk.f32.vlgmr.msra.gmra.mrb[30].mxu1 %vm1066_vm1, %v24250_v35  ;;  %v22252_v35 = vunpack.i.h.bf16 %v23932_v33 }
 0x43c   : > { %21995 = vmatpush3.bf16.xpose.msk.msra.mxu1 %vm23785_vm2, %v21990_v36  ;;  %20811 = vmatprep.mubr.msk.f32.mxu1 %vm1066_vm1, %v23861_v7  ;;  %v24771_v45 = vpop.permute.xlu0 %22504 }
 0x43d   : > { %22004 = vmatprep.subr.msk.bf16.mxu1 %vm23785_vm2, %v22002_v21  ;;  %v24707_v58 = vpack.c.bf16 %v22252_v35, %v22251_v0  ;;  %28803 = vst [vmem:[#allocation143_spill] sm:$0xff] %v24771_v45 }
 0x43e   : > { %20833 = vmatmul.mubr.msk.f32.vlgmr.msra.gmra.mrb[52].mxu0 %vm1066_vm1, %v24078_v61  ;;  %v22525_v61 = vpop.permute.xlu1 %22524 }
 0x43f   : > { %22025 = vmatpush3.bf16.xpose.msk.msra.mxu0 %vm23785_vm2, %v22020_v39  ;;  %20846 = vmatprep.mubr.msk.f32.mxu0 %vm1066_vm1, %v24160_v42  ;;  %v22527_v33 = vunpack.i.h.bf16 %v22525_v61  ;;  %v22526_v56 = vunpack.i.l.bf16 %v22525_v61 }
 0x440   : > { %22033 = vmatprep.subr.bf16.mxu0 %v22032_v2  ;;  %v24775_v35 = vpop.permute.xlu0 %22509 }
 0x441   : > { %28805 = vst [vmem:[#allocation145_spill] sm:$0xff] %v24775_v35 }
 0x442   : > { %v24757_v54 = vpop.permute.xlu1 %22529 }
 0x443   : > { %20812 = vmatmul.mubr.msk.f32.vlgmr.msra.gmra.mrb[32].mxu1 %vm1066_vm1, %v23863_v8  ;;  %v22026_v8 = vpack.c.bf16 %v22527_v33, %v22526_v56 }
 0x444   : > { %22007 = vmatpush3.bf16.xpose.msk.msra.mxu1 %vm23785_vm2, %v22002_v21  ;;  %20825 = vmatprep.mubr.msk.f32.mxu1 %vm1066_vm1, %v23977_v1 }
 0x445   : > { %22016 = vmatprep.subr.msk.bf16.mxu1 %vm23785_vm2, %v22014_v3 }
 0x446   : > { %20847 = vmatmul.mubr.msk.f32.vlgmr.msra.gmra.mrb[54].mxu0 %vm1066_vm1, %v24210_v48  ;;  %v22242_v48 = vunpack.i.h.bf16 %v23884_v40  ;;  %v28798_v40 = vld [vmem:[#allocation48_spill] sm:$0xff]  ;;  %v24767_v21 = vpop.permute.xlu1 %22534 }
 0x447   : > { %22035 = vmatpush3.bf16.msra.mxu0 %v22032_v2  ;;  %v22262_v11 = vunpack.i.h.bf16 %v28798_v40  ;;  %v22261_v24 = vunpack.i.l.bf16 %v28798_v40  ;;  %28800 = vst [vmem:[#allocation48_spill] sm:$0xff] %v24757_v54  ;;  %28802 = vst [vmem:[#allocation142_spill] sm:$0xff] %v24767_v21 }
 0x448   : > { %22041 = vmatprep.subr.bf16.mxu0 %v24707_v58  ;;  %v22036_v6 = vpack.c.bf16 %v22242_v48, %v22241_v27 }
 0x449   : > { %v24738_v15 = vpack.c.bf16 %v22262_v11, %v22261_v24 }
 0x44a   : > { %v24773_v51 = vpop.permute.xlu1 %22539 }
 0x44b   : > { %20826 = vmatmul.mubr.msk.f32.vlgmr.msra.gmra.mrb[34].mxu1 %vm1066_vm1, %v23995_v60  ;;  %28804 = vst [vmem:[#allocation144_spill] sm:$0xff] %v24773_v51 }
 0x44c   : > { %22019 = vmatpush3.bf16.xpose.msk.msra.mxu1 %vm23785_vm2, %v22014_v3  ;;  %20839 = vmatprep.mubr.msk.f32.mxu1 %vm1066_vm1, %v24119_v49 }
 0x44d   : > { %22028 = vmatprep.subr.msk.bf16.mxu1 %vm23785_vm2, %v22026_v8 }
 0x44e   : > { %v24777_v0 = vpop.permute.xlu1 %10045 }
 0x44f   : > { %28806 = vst [vmem:[#allocation146_spill] sm:$0xff] %v24777_v0 }
 0x452   : > { %v24720_v13 = vpop.f32.mrb[14].mxu1 }
 0x453   : > { %v24722_v17 = vpop.f32.mrb[15].mxu1  ;;  %20840 = vmatmul.mubr.msk.f32.vlgmr.msra.gmra.mrb[36].mxu1 %vm1066_vm1, %v24125_v32  ;;  %v3893_v60 = vsel %vm3847_vm3, %v24720_v13, -inf  ;;  %v28799_v32 = vld [vmem:[#allocation85_spill] sm:$0xff] }
 0x454   : > { %22031 = vmatpush3.bf16.xpose.msk.msra.mxu1 %vm23785_vm2, %v22026_v8  ;;  %20853 = vmatprep.mubr.msk.f32.mxu1 %vm1066_vm1, %v28797_v59  ;;  %v3890_v10 = vsel %vm3847_vm3, %v24722_v17, -inf  ;;  %28801 = vst [vmem:[#allocation85_spill] sm:$0xff] %v24765_v9  ;;  %v24785_v8 = vpop.permute.xlu0 %11261 }
 0x455   : > { %3894 = vmax.xlane.f32.xlu0 %v3893_v60  ;;  %22037 = vmatprep.subr.bf16.mxu1 %v22036_v6  ;;  %28807 = vst [vmem:[#allocation147_spill] sm:$0xff] %v24785_v8 }
 0x458   : > { %v24790_v60 = vpop.permute.xlu0 %8829 }
 0x459   : > { %3891 = vmax.xlane.f32.xlu0 %v3890_v10  ;;  %28808 = vst [vmem:[#allocation148_spill] sm:$0xff] %v24790_v60 }
 0x45b   : > { %20854 = vmatmul.mubr.msk.f32.vlgmr.msra.gmra.mrb[38].mxu1 %vm1066_vm1, %v28799_v32 }
 0x45c   : > { %22039 = vmatpush3.bf16.msra.mxu1 %v22036_v6  ;;  %v24792_v40 = vpop.permute.xlu0 %9437 }
 0x45d   : > { %22045 = vmatprep.subr.bf16.mxu1 %v24738_v15  ;;  %28809 = vst [vmem:[#allocation149_spill] sm:$0xff] %v24792_v40 }
 0x460   : > { %v3850_v32 = vpop.xlane.xlu0 %3849 }
 0x461   : > { %v24741_v20 = vpop.f32.mrb[32].mxu0 }
 0x462   : > { %v24743_v52 = vpop.f32.mrb[33].mxu0  ;;  %v3899_v18 = vsel %vm3847_vm3, %v24741_v20, -inf }
 0x463   : > { %3900 = vmax.xlane.f32.xlu1 %v3899_v18  ;;  %v3896_v30 = vsel %vm3847_vm3, %v24743_v52, -inf }
 0x465   : > { %v3853_v56 = vpop.xlane.xlu1 %3852 }
 0x466   : > { %v4041_v27 = vsub.f32 %v24282_v28, %v3853_v56  ;;  %v3859_v28 = vpop.xlane.xlu0 %3858 }
 0x467   : > { %3897 = vmax.xlane.f32.xlu1 %v3896_v30 }
 0x468   : > { %v4106_v6 = vmul.f32 1.442695, %v4041_v27 }
 0x46a   : > { %22575 = vpow2.f32 %v4106_v6  ;;  %v3856_v56 = vpop.xlane.xlu0 %3855 }
 0x46b   : > { %v4042_v27 = vsub.f32 %v24391_v46, %v3856_v56 }
 0x46d   : > { %v4108_v6 = vmul.f32 1.442695, %v4042_v27  ;;  %v28811_v27 = vld [vmem:[#allocation114_spill] sm:$0xff] }
 0x46e   : > { %v24749_v25 = vpop.f32.mrb[16].mxu1  ;;  %v3862_v56 = vpop.xlane.xlu0 %3861 }
 0x46f   : > { %v24751_v23 = vpop.f32.mrb[17].mxu1  ;;  %v3905_v36 = vsel %vm3847_vm3, %v24749_v25, -inf }
 0x470   : > { %3906 = vmax.xlane.f32.xlu0 %v3905_v36  ;;  %v3902_v39 = vsel %vm3847_vm3, %v24751_v23, -inf  ;;  %v4040_v36 = vsub.f32 %v24284_v16, %v3850_v32 }
 0x474   : > { %3903 = vmax.xlane.f32.xlu0 %v3902_v39  ;;  %v24802_v30 = vpop.eup %22575 }
 0x475   : > { %v4235_v39 = vsel %vm3847_vm3, %v24802_v30, 0.0 }
 0x48d   : > { %v24759_v62 = vpop.f32.mrb[34].mxu0 }
 0x48e   : > { %v24761_v57 = vpop.f32.mrb[35].mxu0  ;;  %v3911_v14 = vsel %vm3847_vm3, %v24759_v62, -inf }
 0x48f   : > { %3912 = vmax.xlane.f32.xlu1 %v3911_v14  ;;  %v3908_v2 = vsel %vm3847_vm3, %v24761_v57, -inf  ;;  %v4104_v14 = vmul.f32 1.442695, %v4040_v36 }
 0x491   : > { %22577 = vpow2.f32 %v4104_v14 }
 0x493   : > { %3909 = vmax.xlane.f32.xlu1 %v3908_v2  ;;  %v28810_v2 = vld [vmem:[#allocation106_spill] sm:$0xff] }
 0x49e   : > { %v24779_v3 = vpop.f32.mrb[18].mxu1 }
 0x49f   : > { %v24781_v61 = vpop.f32.mrb[19].mxu1  ;;  %v3917_v33 = vsel %vm3847_vm3, %v24779_v3, -inf }
 0x4a0   : > { %3918 = vmax.xlane.f32.xlu0 %v3917_v33  ;;  %v3914_v48 = vsel %vm3847_vm3, %v24781_v61, -inf  ;;  %v4043_v33 = vsub.f32 %v28810_v2, %v3859_v28  ;;  %v24817_v28 = vpop.eup %22577 }
 0x4a1   : > { %v4232_v46 = vsel %vm3847_vm3, %v24817_v28, 0.0 }
 0x4a4   : > { %3915 = vmax.xlane.f32.xlu0 %v3914_v48  ;;  %v4110_v48 = vmul.f32 1.442695, %v4043_v33 }
 0x4a6   : > { %22579 = vpow2.f32 %v4110_v48 }
 0x4a7   : > { %22581 = vpow2.f32 %v4108_v6  ;;  %v4044_v6 = vsub.f32 %v28811_v27, %v3862_v56  ;;  %v3871_v56 = vpop.xlane.xlu0 %3870 }
 0x4a9   : > { %v4112_v0 = vmul.f32 1.442695, %v4044_v6 }
 0x4b0   : > { %v24821_v36 = vpop.eup %22579 }
 0x4b1   : > { %v24794_v11 = vpop.f32.mrb[36].mxu0  ;;  %v4241_v14 = vsel %vm3847_vm3, %v24821_v36, 0.0  ;;  %v24825_v2 = vpop.eup %22581 }
 0x4b2   : > { %v24796_v24 = vpop.f32.mrb[37].mxu0  ;;  %v3923_v10 = vsel %vm3847_vm3, %v24794_v11, -inf  ;;  %v4238_v48 = vsel %vm3847_vm3, %v24825_v2, 0.0 }
 0x4b3   : > { %3924 = vmax.xlane.f32.xlu1 %v3923_v10  ;;  %v3920_v18 = vsel %vm3847_vm3, %v24796_v24, -inf }
 0x4b7   : > { %3921 = vmax.xlane.f32.xlu1 %v3920_v18 }
 0x4bb   : > { %4236 = vadd.xlane.f32.xlu1 %v4235_v39  ;;  %v3865_v39 = vpop.xlane.xlu1 %3864 }
 0x4bc   : > { %v4045_v33 = vsub.f32 %v24421_v34, %v3865_v39 }
 0x4bf   : > { %v3877_v27 = vpop.xlane.xlu1 %3876 }
 0x4c0   : > { %v4049_v31 = vsub.f32 %v24522_v22, %v3877_v27 }
 0x4c2   : > { %v4122_v21 = vmul.f32 1.442695, %v4049_v31 }
 0x4c6   : > { %v24809_v10 = vpop.f32.mrb[20].mxu1 }
 0x4c7   : > { %v24811_v18 = vpop.f32.mrb[21].mxu1  ;;  %v3929_v16 = vsel %vm3847_vm3, %v24809_v10, -inf }
 0x4c8   : > { %3930 = vmax.xlane.f32.xlu0 %v3929_v16  ;;  %v3926_v32 = vsel %vm3847_vm3, %v24811_v18, -inf  ;;  %v4114_v16 = vmul.f32 1.442695, %v4045_v33 }
 0x4ca   : > { %22583 = vpow2.f32 %v4114_v16  ;;  %v28812_v16 = vld [vmem:[#allocation127_spill] sm:$0xff] }
 0x4cb   : > { %22585 = vpow2.f32 %v4112_v0  ;;  %v4047_v0 = vsub.f32 %v28812_v16, %v3871_v56 }
 0x4cc   : > { %3927 = vmax.xlane.f32.xlu0 %v3926_v32 }
 0x4cd   : > { %v4118_v60 = vmul.f32 1.442695, %v4047_v0 }
 0x4cf   : > { %22587 = vpow2.f32 %v4118_v60 }
 0x4d0   : > { %4233 = vadd.xlane.f32.xlu0 %v4232_v46  ;;  %22589 = vpow2.f32 %v4122_v21 }
 0x4d4   : > { %4242 = vadd.xlane.f32.xlu0 %v4241_v14 }
 0x4d8   : > { %4239 = vadd.xlane.f32.xlu0 %v4238_v48 }
 0x4d9   : > { %v24831_v32 = vpop.f32.mrb[38].mxu0 }
 0x4da   : > { %v24833_v46 = vpop.f32.mrb[39].mxu0  ;;  %v3935_v8 = vsel %vm3847_vm3, %v24831_v32, -inf }
 0x4db   : > { %3936 = vmax.xlane.f32.xlu1 %v3935_v8  ;;  %v3932_v34 = vsel %vm3847_vm3, %v24833_v46, -inf  ;;  %v24847_v8 = vpop.eup %22583 }
 0x4dc   : > { %v4247_v29 = vsel %vm3847_vm3, %v24847_v8, 0.0  ;;  %v24856_v40 = vpop.eup %22585 }
 0x4dd   : > { %v4244_v56 = vsel %vm3847_vm3, %v24856_v40, 0.0 }
 0x4df   : > { %3933 = vmax.xlane.f32.xlu1 %v3932_v34 }
 0x4e1   : > { %v24839_v39 = vpop.f32.mrb[40].mxu0 }
 0x4e2   : > { %v24841_v14 = vpop.f32.mrb[41].mxu0  ;;  %v3947_v33 = vsel %vm3847_vm3, %v24839_v39, -inf }
 0x4e3   : > { %3948 = vmax.xlane.f32.xlu1 %v3947_v33  ;;  %v3944_v48 = vsel %vm3847_vm3, %v24841_v14, -inf  ;;  %v3868_v33 = vpop.xlane.xlu0 %3867 }
 0x4e4   : > { %v4046_v51 = vsub.f32 %v28813_v47, %v3868_v33 }
 0x4e6   : > { %v4116_v47 = vmul.f32 1.442695, %v4046_v51 }
 0x4e7   : > { %3945 = vmax.xlane.f32.xlu1 %v3944_v48  ;;  %v3874_v48 = vpop.xlane.xlu1 %3873 }
 0x4e8   : > { %22591 = vpow2.f32 %v4116_v47  ;;  %v24893_v47 = vpop.eup %22587 }
 0x4e9   : > { %v24849_v6 = vpop.f32.mrb[42].mxu0 }
 0x4ea   : > { %v24852_v34 = vpop.f32.mrb[43].mxu0  ;;  %v3959_v0 = vsel %vm3847_vm3, %v24849_v6, -inf }
 0x4eb   : > { %4248 = vadd.xlane.f32.xlu1 %v4247_v29  ;;  %v4048_v29 = vsub.f32 %v24527_v50, %v3874_v48  ;;  %v3956_v50 = vsel %vm3847_vm3, %v24852_v34, -inf  ;;  %v3889_v59 = vpop.xlane.xlu1 %3888 }
 0x4ec   : > { %v4053_v7 = vsub.f32 %v24651_v38, %v3889_v59 }
 0x4ee   : > { %v24860_v63 = vpop.f32.mrb[22].mxu1  ;;  %v4130_v43 = vmul.f32 1.442695, %v4053_v7 }
 0x4ef   : > { %v24864_v16 = vpop.f32.mrb[23].mxu1  ;;  %4245 = vadd.xlane.f32.xlu1 %v4244_v56  ;;  %v3941_v35 = vsel %vm3847_vm3, %v24860_v63, -inf  ;;  %v4120_v56 = vmul.f32 1.442695, %v4048_v29  ;;  %v3886_v37 = vpop.xlane.xlu1 %3885 }
 0x4f0   : > { %3942 = vmax.xlane.f32.xlu0 %v3941_v35  ;;  %v3938_v33 = vsel %vm3847_vm3, %v24864_v16, -inf }
 0x4f1   : > { %v24869_v22 = vpop.f32.mrb[44].mxu0  ;;  %22593 = vpow2.f32 %v4120_v56 }
 0x4f2   : > { %v24871_v27 = vpop.f32.mrb[45].mxu0  ;;  %v3971_v21 = vsel %vm3847_vm3, %v24869_v22, -inf }
 0x4f3   : > { %3960 = vmax.xlane.f32.xlu1 %v3959_v0  ;;  %v3883_v0 = vpop.xlane.xlu0 %3882  ;;  %v3968_v56 = vsel %vm3847_vm3, %v24871_v27, -inf }
 0x4f4   : > { %3939 = vmax.xlane.f32.xlu0 %v3938_v33 }
 0x4f6   : > { %v24877_v31 = vpop.f32.mrb[24].mxu1 }
 0x4f7   : > { %v24881_v35 = vpop.f32.mrb[25].mxu1  ;;  %3957 = vmax.xlane.f32.xlu1 %v3956_v50  ;;  %v3953_v51 = vsel %vm3847_vm3, %v24877_v31, -inf  ;;  %v24899_v50 = vpop.eup %22589 }
 0x4f8   : > { %3954 = vmax.xlane.f32.xlu0 %v3953_v51  ;;  %v3950_v29 = vsel %vm3847_vm3, %v24881_v35, -inf  ;;  %28814 = vst [vmem:[#allocation106_spill] sm:$0xff] %v24899_v50  ;;  %v24905_v45 = vpop.eup %22591  ;;  %v4259_v19 = vsel %vm3847_vm3, %v24899_v50, 0.0  ;;  %v3880_v4 = vpop.xlane.xlu0 %3879 }
 0x4f9   : > { %v24885_v60 = vpop.f32.mrb[46].mxu0  ;;  %v4050_v26 = vsub.f32 %v24601_v5, %v3880_v4 }
 0x4fa   : > { %v24887_v48 = vpop.f32.mrb[47].mxu0  ;;  %v3983_v59 = vsel %vm3847_vm3, %v24885_v60, -inf }
 0x4fb   : > { %3972 = vmax.xlane.f32.xlu1 %v3971_v21  ;;  %v4253_v21 = vsel %vm3847_vm3, %v24893_v47, 0.0  ;;  %v24914_v1 = vpop.eup %22593  ;;  %v4124_v4 = vmul.f32 1.442695, %v4050_v26 }
 0x4fc   : > { %3951 = vmax.xlane.f32.xlu0 %v3950_v29  ;;  %v4051_v29 = vsub.f32 %v24595_v41, %v3883_v0  ;;  %v4256_v0 = vsel %vm3847_vm3, %v24914_v1, 0.0 }
 0x4fe   : > { %v24895_v33 = vpop.f32.mrb[26].mxu1 }
 0x4ff   : > { %v24901_v51 = vpop.f32.mrb[27].mxu1  ;;  %3969 = vmax.xlane.f32.xlu1 %v3968_v56  ;;  %v4250_v56 = vsel %vm3847_vm3, %v24905_v45, 0.0 }
 0x500   : > { %4254 = vadd.xlane.f32.xlu0 %v4253_v21  ;;  %v4126_v21 = vmul.f32 1.442695, %v4051_v29  ;;  %v3962_v29 = vsel %vm3847_vm3, %v24901_v51, -inf }
 0x501   : > { %v24907_v42 = vpop.f32.mrb[48].mxu0 }
 0x502   : > { %28815 = vst [vmem:[#allocation114_spill] sm:$0xff] %v24907_v42  ;;  %v24910_v49 = vpop.f32.mrb[49].mxu0  ;;  %22595 = vpow2.f32 %v4126_v21 }
 0x503   : > { %28816 = vst [vmem:[#allocation127_spill] sm:$0xff] %v24910_v49  ;;  %4260 = vadd.xlane.f32.xlu1 %v4259_v19  ;;  %v3965_v19 = vsel %vm3847_vm3, %v24895_v33, -inf  ;;  %22597 = vpow2.f32 %v4130_v43  ;;  %v3995_v43 = vsel %vm3847_vm3, %v24907_v42, -inf  ;;  %v3901_v42 = vpop.xlane.xlu1 %3900 }
 0x504   : > { %4251 = vadd.xlane.f32.xlu0 %v4250_v56  ;;  %v4052_v56 = vsub.f32 %v24653_v55, %v3886_v37  ;;  %22599 = vpow2.f32 %v4124_v4  ;;  %v3980_v37 = vsel %vm3847_vm3, %v24887_v48, -inf }
 0x506   : > { %v24920_v41 = vpop.f32.mrb[28].mxu1 }
 0x507   : > { %v24924_v12 = vpop.f32.mrb[29].mxu1  ;;  %4257 = vadd.xlane.f32.xlu1 %v4256_v0  ;;  %v4128_v0 = vmul.f32 1.442695, %v4052_v56  ;;  %v3977_v26 = vsel %vm3847_vm3, %v24920_v41, -inf }
 0x508   : > { %28817 = vst [vmem:[#allocation129_spill] sm:$0xff] %v24924_v12  ;;  %3966 = vmax.xlane.f32.xlu0 %v3965_v19  ;;  %v3974_v56 = vsel %vm3847_vm3, %v24924_v12, -inf }
 0x509   : > { %v24929_v38 = vpop.f32.mrb[50].mxu0  ;;  %22601 = vpow2.f32 %v4128_v0  ;;  %v3992_v0 = vsel %vm3847_vm3, %v24910_v49, -inf }
 0x50a   : > { %v24931_v5 = vpop.f32.mrb[51].mxu0 }
 0x50b   : > { %28818 = vst [vmem:[#allocation150_spill] sm:$0xff] %v24931_v5  ;;  %3984 = vmax.xlane.f32.xlu1 %v3983_v59  ;;  %v3895_v59 = vpop.xlane.xlu0 %3894 }
 0x50c   : > { %3963 = vmax.xlane.f32.xlu0 %v3962_v29  ;;  %v24953_v4 = vpop.eup %22595 }
 0x50d   : > { %28821 = vst [vmem:[#allocation153_spill] sm:$0xff] %v24953_v4 }
 0x50e   : > { %v24937_v7 = vpop.f32.mrb[30].mxu1 }
 0x50f   : > { %v24941_v55 = vpop.f32.mrb[31].mxu1  ;;  %3981 = vmax.xlane.f32.xlu1 %v3980_v37  ;;  %v24959_v37 = vpop.eup %22597 }
 0x510   : > { %3978 = vmax.xlane.f32.xlu0 %v3977_v26  ;;  %28823 = vst [vmem:[#allocation155_spill] sm:$0xff] %v24959_v37  ;;  %v24965_v44 = vpop.eup %22599  ;;  %v4271_v9 = vsel %vm3847_vm3, %v24959_v37, 0.0  ;;  %v3892_v50 = vpop.xlane.xlu0 %3891  ;;  %v3989_v37 = vsel %vm3847_vm3, %v24937_v7, -inf }
 0x511   : > { %v24945_v21 = vpop.f32.mrb[52].mxu0  ;;  %28825 = vst [vmem:[#allocation157_spill] sm:$0xff] %v24965_v44 }
 0x512   : > { %28819 = vst [vmem:[#allocation151_spill] sm:$0xff] %v24945_v21  ;;  %v24947_v19 = vpop.f32.mrb[53].mxu0 }
 0x513   : > { %28820 = vst [vmem:[#allocation152_spill] sm:$0xff] %v24947_v19  ;;  %3996 = vmax.xlane.f32.xlu1 %v3995_v43  ;;  %v4265_v43 = vsel %vm3847_vm3, %v24953_v4, 0.0  ;;  %v24974_v49 = vpop.eup %22601 }
 0x514   : > { %3975 = vmax.xlane.f32.xlu0 %v3974_v56  ;;  %v4055_v56 = vsub.f32 %v24720_v13, %v3895_v59  ;;  %28826 = vst [vmem:[#allocation158_spill] sm:$0xff] %v24974_v49  ;;  %v4268_v13 = vsel %vm3847_vm3, %v24974_v49, 0.0 }
 0x516   : > { %v24955_v29 = vpop.f32.mrb[32].mxu1  ;;  %v4134_v4 = vmul.f32 1.442695, %v4055_v56  ;;  %v4007_v56 = vsel %vm3847_vm3, %v24929_v38, -inf }
 0x517   : > { %28822 = vst [vmem:[#allocation154_spill] sm:$0xff] %v24955_v29  ;;  %v24961_v26 = vpop.f32.mrb[33].mxu1  ;;  %3993 = vmax.xlane.f32.xlu1 %v3992_v0  ;;  %v4262_v0 = vsel %vm3847_vm3, %v24965_v44, 0.0 }
 0x518   : > { %28824 = vst [vmem:[#allocation156_spill] sm:$0xff] %v24961_v26  ;;  %4266 = vadd.xlane.f32.xlu0 %v4265_v43  ;;  %v4054_v43 = vsub.f32 %v24722_v17, %v3892_v50  ;;  %22603 = vpow2.f32 %v4134_v4  ;;  %v3986_v17 = vsel %vm3847_vm3, %v24941_v55, -inf  ;;  %v4001_v4 = vsel %vm3847_vm3, %v24955_v29, -inf }
 0x519   : > { %v24967_v53 = vpop.f32.mrb[54].mxu0 }
 0x51a   : > { %v24970_v54 = vpop.f32.mrb[55].mxu0 }
 0x51b   : > { %4272 = vadd.xlane.f32.xlu1 %v4271_v9  ;;  %v4132_v9 = vmul.f32 1.442695, %v4054_v43  ;;  %v4057_v43 = vsub.f32 %v24741_v20, %v3901_v42  ;;  %v4016_v42 = vsel %vm3847_vm3, %v24947_v19, -inf }
 0x51c   : > { %4263 = vadd.xlane.f32.xlu0 %v4262_v0  ;;  %v4004_v0 = vsel %vm3847_vm3, %v24931_v5, -inf }
 0x51d   : > { %22605 = vpow2.f32 %v4132_v9  ;;  %v3998_v9 = vsel %vm3847_vm3, %v24961_v26, -inf }
 0x51e   : > { %v24979_v12 = vpop.f32.mrb[34].mxu1 }
 0x51f   : > { %v24983_v59 = vpop.f32.mrb[35].mxu1  ;;  %4269 = vadd.xlane.f32.xlu1 %v4268_v13 }
 0x520   : > { %3990 = vmax.xlane.f32.xlu0 %v3989_v37  ;;  %v3898_v37 = vpop.xlane.xlu1 %3897 }
 0x521   : > { %v4056_v5 = vsub.f32 %v24743_v52, %v3898_v37 }
 0x522   : > { %v25004_v49 = vpop.eup %22603 }
 0x523   : > { %4008 = vmax.xlane.f32.xlu1 %v4007_v56  ;;  %v3907_v56 = vpop.xlane.xlu0 %3906  ;;  %28827 = vst [vmem:[#allocation159_spill] sm:$0xff] %v25004_v49 }
 0x524   : > { %3987 = vmax.xlane.f32.xlu0 %v3986_v17  ;;  %v4019_v17 = vsel %vm3847_vm3, %v24945_v21, -inf  ;;  %v3913_v44 = vpop.xlane.xlu1 %3912 }
 0x526   : > { %v24991_v50 = vpop.f32.mrb[36].mxu1 }
 0x527   : > { %v24995_v13 = vpop.f32.mrb[37].mxu1  ;;  %4005 = vmax.xlane.f32.xlu1 %v4004_v0  ;;  %v4138_v0 = vmul.f32 1.442695, %v4057_v43  ;;  %v3904_v26 = vpop.xlane.xlu0 %3903  ;;  %v4061_v43 = vsub.f32 %v24759_v62, %v3913_v44  ;;  %v4025_v37 = vsel %vm3847_vm3, %v24991_v50, -inf  ;;  %v4013_v44 = vsel %vm3847_vm3, %v24979_v12, -inf }
 0x528   : > { %4002 = vmax.xlane.f32.xlu0 %v4001_v4  ;;  %v4277_v4 = vsel %vm3847_vm3, %v25004_v49, 0.0  ;;  %v3910_v52 = vpop.xlane.xlu1 %3909 }
 0x529   : > { %22607 = vpow2.f32 %v4138_v0  ;;  %v4146_v49 = vmul.f32 1.442695, %v4061_v43  ;;  %v4060_v21 = vsub.f32 %v24761_v57, %v3910_v52 }
 0x52b   : > { %4020 = vmax.xlane.f32.xlu1 %v4019_v17  ;;  %v25015_v17 = vpop.eup %22605  ;;  %v4144_v62 = vmul.f32 1.442695, %v4060_v21 }
 0x52c   : > { %3999 = vmax.xlane.f32.xlu0 %v3998_v9  ;;  %v4136_v9 = vmul.f32 1.442695, %v4056_v5  ;;  %v4274_v19 = vsel %vm3847_vm3, %v25015_v17, 0.0  ;;  %v4031_v5 = vsel %vm3847_vm3, %v24967_v53, -inf }
 0x52e   : > { %v25007_v29 = vpop.f32.mrb[38].mxu1  ;;  %22609 = vpow2.f32 %v4136_v9 }
 0x52f   : > { %v25011_v20 = vpop.f32.mrb[39].mxu1  ;;  %4017 = vmax.xlane.f32.xlu1 %v4016_v42  ;;  %v3919_v42 = vpop.xlane.xlu0 %3918  ;;  %22611 = vpow2.f32 %v4146_v49  ;;  %v4037_v57 = vsel %vm3847_vm3, %v25007_v29, -inf }
 0x530   : > { %4278 = vadd.xlane.f32.xlu0 %v4277_v4  ;;  %v4059_v4 = vsub.f32 %v24749_v25, %v3907_v56  ;;  %v4063_v0 = vsub.f32 %v24779_v3, %v3919_v42  ;;  %v4010_v56 = vsel %vm3847_vm3, %v24983_v59, -inf  ;;  %22613 = vpow2.f32 %v4144_v62 }
 0x532   : > { %v4150_v43 = vmul.f32 1.442695, %v4063_v0 }
 0x533   : > { %4026 = vmax.xlane.f32.xlu1 %v4025_v37  ;;  %v4142_v37 = vmul.f32 1.442695, %v4059_v4  ;;  %v3916_v9 = vpop.xlane.xlu0 %3915  ;;  %v25032_v25 = vpop.eup %22607 }
 0x534   : > { %4275 = vadd.xlane.f32.xlu0 %v4274_v19  ;;  %v4058_v19 = vsub.f32 %v24751_v23, %v3904_v26  ;;  %v4062_v49 = vsub.f32 %v24781_v61, %v3916_v9  ;;  %v4283_v23 = vsel %vm3847_vm3, %v25032_v25, 0.0  ;;  %v4022_v26 = vsel %vm3847_vm3, %v24995_v13, -inf }
 0x535   : > { %22615 = vpow2.f32 %v4142_v37  ;;  %v4034_v9 = vsel %vm3847_vm3, %v25011_v20, -inf }
 0x536   : > { %v4140_v3 = vmul.f32 1.442695, %v4058_v19  ;;  %22617 = vpow2.f32 %v4150_v43  ;;  %v4148_v42 = vmul.f32 1.442695, %v4062_v49 }
 0x537   : > { %4032 = vmax.xlane.f32.xlu1 %v4031_v5 }
 0x538   : > { %4014 = vmax.xlane.f32.xlu0 %v4013_v44  ;;  %v25039_v21 = vpop.eup %22609  ;;  %22619 = vpow2.f32 %v4140_v3  ;;  %v4028_v44 = vsel %vm3847_vm3, %v24970_v54, -inf }
 0x539   : > { %v4280_v61 = vsel %vm3847_vm3, %v25039_v21, 0.0  ;;  %v25046_v5 = vpop.eup %22611  ;;  %22621 = vpow2.f32 %v4148_v42 }
 0x53a   : > { %v4295_v19 = vsel %vm3847_vm3, %v25046_v5, 0.0 }
 0x53b   : > { %4038 = vmax.xlane.f32.xlu1 %v4037_v57 }
 0x53c   : > { %4011 = vmax.xlane.f32.xlu0 %v4010_v56 }
 0x53f   : > { %4284 = vadd.xlane.f32.xlu1 %v4283_v23 }
 0x540   : > { %4023 = vmax.xlane.f32.xlu0 %v4022_v26  ;;  %v3925_v52 = vpop.xlane.xlu1 %3924 }
 0x541   : > { %v4065_v4 = vsub.f32 %v24794_v11, %v3925_v52  ;;  %v25053_v11 = vpop.eup %22613 }
 0x542   : > { %v25057_v57 = vpop.eup %22615  ;;  %v4292_v43 = vsel %vm3847_vm3, %v25053_v11, 0.0 }
 0x543   : > { %4281 = vadd.xlane.f32.xlu1 %v4280_v61  ;;  %v4154_v0 = vmul.f32 1.442695, %v4065_v4  ;;  %v25061_v49 = vpop.eup %22617 }
 0x544   : > { %4029 = vmax.xlane.f32.xlu0 %v4028_v44  ;;  %v3922_v62 = vpop.xlane.xlu1 %3921  ;;  %v25065_v3 = vpop.eup %22619  ;;  %v4301_v23 = vsel %vm3847_vm3, %v25061_v49, 0.0 }
 0x545   : > { %v4064_v37 = vsub.f32 %v24796_v24, %v3922_v62  ;;  %22623 = vpow2.f32 %v4154_v0  ;;  %v4289_v24 = vsel %vm3847_vm3, %v25057_v57, 0.0  ;;  %v25069_v26 = vpop.eup %22621  ;;  %v4286_v52 = vsel %vm3847_vm3, %v25065_v3, 0.0 }
 0x546   : > { %v4298_v42 = vsel %vm3847_vm3, %v25069_v26, 0.0 }
 0x547   : > { %4296 = vadd.xlane.f32.xlu1 %v4295_v19  ;;  %v4152_v56 = vmul.f32 1.442695, %v4064_v37 }
 0x548   : > { %4035 = vmax.xlane.f32.xlu0 %v4034_v9  ;;  %v4237_v9 = vpop.xlane.xlu1 %4236 }
 0x549   : > { %22625 = vpow2.f32 %v4152_v56 }
 0x54b   : > { %4293 = vadd.xlane.f32.xlu1 %v4292_v43 }
 0x54c   : > { %4290 = vadd.xlane.f32.xlu0 %v4289_v24 }
 0x54f   : > { %4302 = vadd.xlane.f32.xlu1 %v4301_v23  ;;  %v25075_v4 = vpop.eup %22623 }
 0x550   : > { %4287 = vadd.xlane.f32.xlu0 %v4286_v52  ;;  %v4307_v62 = vsel %vm3847_vm3, %v25075_v4, 0.0 }
 0x553   : > { %4299 = vadd.xlane.f32.xlu1 %v4298_v42  ;;  %v25080_v0 = vpop.eup %22625 }
 0x554   : > { %v4304_v43 = vsel %vm3847_vm3, %v25080_v0, 0.0 }
 0x555   : > { %v3931_v61 = vpop.xlane.xlu0 %3930 }
 0x556   : > { %v4067_v44 = vsub.f32 %v24809_v10, %v3931_v61 }
 0x557   : > { %4308 = vadd.xlane.f32.xlu1 %v4307_v62 }
 0x558   : > { %v4158_v37 = vmul.f32 1.442695, %v4067_v44 }
 0x559   : > { %v3928_v19 = vpop.xlane.xlu0 %3927 }
 0x55a   : > { %22627 = vpow2.f32 %v4158_v37  ;;  %v4066_v56 = vsub.f32 %v24811_v18, %v3928_v19  ;;  %v28829_v19 = vld [vmem:[#allocation60_spill] sm:$0xff] }
 0x55b   : > { %4305 = vadd.xlane.f32.xlu1 %v4304_v43  ;;  %22629 = vrcp.f32 %v4237_v9  ;;  %v22272_v9 = vunpack.i.h.bf16 %v28829_v19 }
 0x55c   : > { %v4156_v24 = vmul.f32 1.442695, %v4066_v56  ;;  %v22271_v56 = vunpack.i.l.bf16 %v28829_v19 }
 0x55d   : > { %v4234_v23 = vpop.xlane.xlu0 %4233 }
 0x55e   : > { %22631 = vpow2.f32 %v4156_v24  ;;  %v25101_v19 = vpack.c.bf16 %v22272_v9, %v22271_v56 }
 0x55f   : > { %22633 = vrcp.f32 %v4234_v23 }
 0x561   : > { %v4243_v10 = vpop.xlane.xlu0 %4242 }
 0x562   : > { %22635 = vrcp.f32 %v4243_v10 }
 0x564   : > { %v25085_v52 = vpop.eup %22627 }
 0x565   : > { %28828 = vst [vmem:[#allocation160_spill] sm:$0xff] %v25085_v52  ;;  %v4240_v42 = vpop.xlane.xlu0 %4239  ;;  %v4313_v61 = vsel %vm3847_vm3, %v25085_v52, 0.0  ;;  %v22630_v18 = vpop.eup %22629 }
 0x566   : > { %22637 = vrcp.f32 %v4240_v42  ;;  %4314 = vadd.xlane.f32.xlu0 %v4313_v61  ;;  %v4489_v42 = vmul.f32 %v22630_v18, %v24802_v30 }
 0x568   : > { %v25089_v44 = vpop.eup %22631  ;;  %v3937_v62 = vpop.xlane.xlu1 %3936 }
 0x569   : > { %v22634_v37 = vpop.eup %22633  ;;  %v4069_v43 = vsub.f32 %v24831_v32, %v3937_v62  ;;  %v4310_v24 = vsel %vm3847_vm3, %v25089_v44, 0.0 }
 0x56a   : > { %4311 = vadd.xlane.f32.xlu0 %v4310_v24  ;;  %v4488_v23 = vmul.f32 %v22634_v37, %v24817_v28  ;;  %v28830_v37 = vld [vmem:[#allocation68_spill] sm:$0xff] }
 0x56b   : > { %v4162_v10 = vmul.f32 1.442695, %v4069_v43  ;;  %v22282_v43 = vunpack.i.h.bf16 %v28830_v37  ;;  %v22281_v30 = vunpack.i.l.bf16 %v28830_v37 }
 0x56c   : > { %20860 = vmatprep.mubr.msk.f32.mxu0 %vm3847_vm3, %v4488_v23  ;;  %v3934_v61 = vpop.xlane.xlu1 %3933  ;;  %v22636_v32 = vpop.eup %22635 }
 0x56d   : > { %22639 = vpow2.f32 %v4162_v10  ;;  %20861 = vmatmul.mubr.msk.f32.vlgmr.msra.gmra.mrb[56].mxu0 %vm3847_vm3, %v4489_v42  ;;  %v4068_v52 = vsub.f32 %v24833_v46, %v3934_v61  ;;  %v4491_v23 = vmul.f32 %v22636_v32, %v24821_v36  ;;  %v25111_v46 = vpack.c.bf16 %v22282_v43, %v22281_v30 }
 0x56e   : > { %22043 = vmatpush3.bf16.msra.mxu0 %v24707_v58 }
 0x56f   : > { %v4160_v62 = vmul.f32 1.442695, %v4068_v52  ;;  %22049 = vmatprep.subr.bf16.mxu0 %v25101_v19 }
 0x570   : > { %v22638_v28 = vpop.eup %22637  ;;  %v3949_v18 = vpop.xlane.xlu1 %3948 }
 0x571   : > { %22641 = vpow2.f32 %v4160_v62  ;;  %v4490_v24 = vmul.f32 %v22638_v28, %v24825_v2  ;;  %v4073_v36 = vsub.f32 %v24839_v39, %v3949_v18 }
 0x573   : > { %20867 = vmatprep.mubr.msk.f32.mxu1 %vm3847_vm3, %v4490_v24  ;;  %v4170_v62 = vmul.f32 1.442695, %v4073_v36 }
 0x574   : > { %20868 = vmatmul.mubr.msk.f32.vlgmr.msra.gmra.mrb[40].mxu1 %vm3847_vm3, %v4491_v23  ;;  %v3946_v58 = vpop.xlane.xlu1 %3945 }
 0x575   : > { %22047 = vmatpush3.bf16.msra.mxu1 %v24738_v15  ;;  %v4072_v32 = vsub.f32 %v24841_v14, %v3946_v58  ;;  %v28831_v14 = vld [vmem:[#allocation76_spill] sm:$0xff] }
 0x576   : > { %22053 = vmatprep.subr.bf16.mxu1 %v25111_v46  ;;  %v22292_v58 = vunpack.i.h.bf16 %v28831_v14  ;;  %v22291_v36 = vunpack.i.l.bf16 %v28831_v14 }
 0x577   : > { %v25115_v52 = vpop.eup %22639  ;;  %v4168_v39 = vmul.f32 1.442695, %v4072_v32 }
 0x578   : > { %v4249_v9 = vpop.xlane.xlu1 %4248  ;;  %v4319_v56 = vsel %vm3847_vm3, %v25115_v52, 0.0 }
 0x579   : > { %4320 = vadd.xlane.f32.xlu0 %v4319_v56  ;;  %22643 = vrcp.f32 %v4249_v9 }
 0x57b   : > { %v25119_v2 = vpop.eup %22641 }
 0x57c   : > { %v4246_v10 = vpop.xlane.xlu1 %4245  ;;  %v4316_v42 = vsel %vm3847_vm3, %v25119_v2, 0.0 }
 0x57d   : > { %22645 = vrcp.f32 %v4246_v10  ;;  %v3943_v15 = vpop.xlane.xlu0 %3942  ;;  %4317 = vadd.xlane.f32.xlu1 %v4316_v42 }
 0x57e   : > { %v4071_v61 = vsub.f32 %v24860_v63, %v3943_v15 }
 0x580   : > { %v4166_v28 = vmul.f32 1.442695, %v4071_v61  ;;  %v3961_v37 = vpop.xlane.xlu1 %3960 }
 0x581   : > { %v3940_v43 = vpop.xlane.xlu0 %3939  ;;  %v4077_v18 = vsub.f32 %v24849_v6, %v3961_v37  ;;  %v25138_v37 = vpack.c.bf16 %v22292_v58, %v22291_v36 }
 0x582   : > { %22647 = vpow2.f32 %v4166_v28  ;;  %v4070_v30 = vsub.f32 %v24864_v16, %v3940_v43 }
 0x583   : > { %22649 = vpow2.f32 %v4170_v62  ;;  %v22644_v56 = vpop.eup %22643  ;;  %v4178_v42 = vmul.f32 1.442695, %v4077_v18 }
 0x584   : > { %v4164_v24 = vmul.f32 1.442695, %v4070_v30  ;;  %v3958_v23 = vpop.xlane.xlu1 %3957  ;;  %v4493_v28 = vmul.f32 %v22644_v56, %v24847_v8 }
 0x585   : > { %v3955_v9 = vpop.xlane.xlu0 %3954  ;;  %v4076_v16 = vsub.f32 %v24852_v34, %v3958_v23 }
 0x586   : > { %22651 = vpow2.f32 %v4164_v24  ;;  %v4075_v63 = vsub.f32 %v24877_v31, %v3955_v9 }
 0x587   : > { %v22646_v10 = vpop.eup %22645  ;;  %22653 = vpow2.f32 %v4168_v39  ;;  %v4176_v34 = vmul.f32 1.442695, %v4076_v16 }
 0x588   : > { %v4174_v15 = vmul.f32 1.442695, %v4075_v63  ;;  %v3973_v61 = vpop.xlane.xlu1 %3972  ;;  %v4492_v6 = vmul.f32 %v22646_v10, %v24856_v40 }
 0x589   : > { %v4081_v32 = vsub.f32 %v24869_v22, %v3973_v61  ;;  %v3952_v62 = vpop.xlane.xlu0 %3951 }
 0x58a   : > { %22655 = vpow2.f32 %v4174_v15  ;;  %v4074_v31 = vsub.f32 %v24881_v35, %v3952_v62  ;;  %20874 = vmatprep.mubr.msk.f32.mxu0 %vm3847_vm3, %v4492_v6 }
 0x58b   : > { %20875 = vmatmul.mubr.msk.f32.vlgmr.msra.gmra.mrb[58].mxu0 %vm3847_vm3, %v4493_v28  ;;  %22657 = vpow2.f32 %v4178_v42  ;;  %v4186_v22 = vmul.f32 1.442695, %v4081_v32 }
 0x58c   : > { %v25140_v43 = vpop.eup %22647  ;;  %v4172_v30 = vmul.f32 1.442695, %v4074_v31  ;;  %22051 = vmatpush3.bf16.msra.mxu0 %v25101_v19  ;;  %v3970_v40 = vpop.xlane.xlu1 %3969 }
 0x58d   : > { %22057 = vmatprep.subr.bf16.mxu0 %v25138_v37  ;;  %v4255_v8 = vpop.xlane.xlu0 %4254  ;;  %v4325_v35 = vsel %vm3847_vm3, %v25140_v43, 0.0  ;;  %v25146_v39 = vpop.eup %22649  ;;  %v4080_v19 = vsub.f32 %v24871_v27, %v3970_v40 }
 0x58e   : > { %22659 = vpow2.f32 %v4172_v30  ;;  %4326 = vadd.xlane.f32.xlu0 %v4325_v35  ;;  %v4331_v63 = vsel %vm3847_vm3, %v25146_v39, 0.0  ;;  %v28832_v35 = vld [vmem:[#allocation86_spill] sm:$0xff] }
 0x58f   : > { %22661 = vpow2.f32 %v4176_v34  ;;  %v4184_v58 = vmul.f32 1.442695, %v4080_v19 }
 0x590   : > { %v25148_v18 = vpop.eup %22651  ;;  %v4261_v24 = vpop.xlane.xlu1 %4260  ;;  %22663 = vpow2.f32 %v4186_v22 }
 0x591   : > { %v25150_v23 = vpop.eup %22653  ;;  %v4252_v9 = vpop.xlane.xlu0 %4251  ;;  %v4322_v56 = vsel %vm3847_vm3, %v25148_v18, 0.0  ;;  %22665 = vrcp.f32 %v4255_v8 }
 0x592   : > { %4323 = vadd.xlane.f32.xlu1 %v4322_v56  ;;  %4332 = vadd.xlane.f32.xlu0 %v4331_v63  ;;  %22667 = vrcp.f32 %v4252_v9  ;;  %v4328_v42 = vsel %vm3847_vm3, %v25150_v23, 0.0  ;;  %v22301_v56 = vunpack.i.l.bf16 %v28832_v35 }
 0x593   : > { %22669 = vrcp.f32 %v4261_v24 }
 0x594   : > { %v25157_v10 = vpop.eup %22655  ;;  %v4258_v14 = vpop.xlane.xlu1 %4257 }
 0x595   : > { %22671 = vrcp.f32 %v4258_v14  ;;  %v3967_v36 = vpop.xlane.xlu0 %3966  ;;  %v4337_v27 = vsel %vm3847_vm3, %v25157_v10, 0.0  ;;  %v25163_v16 = vpop.eup %22657 }
 0x596   : > { %v4079_v15 = vsub.f32 %v24895_v33, %v3967_v36  ;;  %4338 = vadd.xlane.f32.xlu1 %v4337_v27  ;;  %4329 = vadd.xlane.f32.xlu0 %v4328_v42  ;;  %22673 = vpow2.f32 %v4184_v58  ;;  %v4343_v34 = vsel %vm3847_vm3, %v25163_v16, 0.0 }
 0x598   : > { %v25166_v61 = vpop.eup %22659  ;;  %v4182_v6 = vmul.f32 1.442695, %v4079_v15  ;;  %v3985_v32 = vpop.xlane.xlu1 %3984 }
 0x599   : > { %v4085_v62 = vsub.f32 %v24885_v60, %v3985_v32  ;;  %v3964_v28 = vpop.xlane.xlu0 %3963  ;;  %v4334_v31 = vsel %vm3847_vm3, %v25166_v61, 0.0  ;;  %v25173_v30 = vpop.eup %22661  ;;  %v22302_v60 = vunpack.i.h.bf16 %v28832_v35  ;;  %v28833_v32 = vld [vmem:[#allocation94_spill] sm:$0xff] }
 0x59a   : > { %22675 = vpow2.f32 %v4182_v6  ;;  %v4078_v33 = vsub.f32 %v24901_v51, %v3964_v28  ;;  %4335 = vadd.xlane.f32.xlu1 %v4334_v31  ;;  %4344 = vadd.xlane.f32.xlu0 %v4343_v34  ;;  %v25176_v40 = vpop.eup %22663  ;;  %v4340_v51 = vsel %vm3847_vm3, %v25173_v30, 0.0  ;;  %v22321_v28 = vunpack.i.l.bf16 %v28833_v32 }
 0x59b   : > { %v4194_v22 = vmul.f32 1.442695, %v4085_v62  ;;  %v22666_v8 = vpop.eup %22665  ;;  %v22322_v62 = vunpack.i.h.bf16 %v28833_v32 }
 0x59c   : > { %v4180_v24 = vmul.f32 1.442695, %v4078_v33  ;;  %v3982_v19 = vpop.xlane.xlu1 %3981  ;;  %v22668_v9 = vpop.eup %22667  ;;  %v4495_v6 = vmul.f32 %v22666_v8, %v24893_v47  ;;  %v4355_v47 = vsel %vm3847_vm3, %v25176_v40, 0.0  ;;  %v28835_v8 = vld [vmem:[#allocation129_spill] sm:$0xff] }
 0x59d   : > { %22677 = vpow2.f32 %v4194_v22  ;;  %v4084_v63 = vsub.f32 %v24887_v48, %v3982_v19  ;;  %v3979_v14 = vpop.xlane.xlu0 %3978  ;;  %v22670_v58 = vpop.eup %22669  ;;  %v4494_v27 = vmul.f32 %v22668_v9, %v24905_v45  ;;  %v25192_v45 = vpack.c.bf16 %v22302_v60, %v22301_v56 }
 0x59e   : > { %22679 = vpow2.f32 %v4180_v24  ;;  %v4083_v36 = vsub.f32 %v24920_v41, %v3979_v14  ;;  %4341 = vadd.xlane.f32.xlu0 %v4340_v51  ;;  %v28834_v41 = vld [vmem:[#allocation114_spill] sm:$0xff]  ;;  %v25206_v14 = vpack.c.bf16 %v22322_v62, %v22321_v28 }
 0x59f   : > { %v22672_v42 = vpop.eup %22671  ;;  %v4192_v15 = vmul.f32 1.442695, %v4084_v63  ;;  %20881 = vmatprep.mubr.msk.f32.mxu1 %vm3847_vm3, %v4494_v27  ;;  %v28836_v24 = vld [vmem:[#allocation106_spill] sm:$0xff] }
 0x5a0   : > { %v4190_v48 = vmul.f32 1.442695, %v4083_v36  ;;  %v3997_v31 = vpop.xlane.xlu1 %3996  ;;  %v4496_v34 = vmul.f32 %v22672_v42, %v24914_v1  ;;  %20882 = vmatmul.mubr.msk.f32.vlgmr.msra.gmra.mrb[42].mxu1 %vm3847_vm3, %v4495_v6  ;;  %v4497_v19 = vmul.f32 %v22670_v58, %v28836_v24  ;;  %v25199_v1 = vpop.eup %22673 }
 0x5a1   : > { %22681 = vpow2.f32 %v4192_v15  ;;  %v4089_v33 = vsub.f32 %v28834_v41, %v3997_v31  ;;  %v3976_v22 = vpop.xlane.xlu0 %3975  ;;  %22055 = vmatpush3.bf16.msra.mxu1 %v25111_v46  ;;  %v28837_v46 = vld [vmem:[#allocation127_spill] sm:$0xff]  ;;  %v4352_v27 = vsel %vm3847_vm3, %v25199_v1, 0.0 }
 0x5a2   : > { %22683 = vpow2.f32 %v4190_v48  ;;  %v4082_v35 = vsub.f32 %v28835_v8, %v3976_v22  ;;  %4356 = vadd.xlane.f32.xlu0 %v4355_v47  ;;  %22061 = vmatprep.subr.bf16.mxu1 %v25192_v45 }
 0x5a3   : > { %v4202_v9 = vmul.f32 1.442695, %v4089_v33  ;;  %20888 = vmatprep.mubr.msk.f32.mxu0 %vm3847_vm3, %v4496_v34 }
 0x5a4   : > { %v25203_v60 = vpop.eup %22675  ;;  %v4188_v56 = vmul.f32 1.442695, %v4082_v35  ;;  %20889 = vmatmul.mubr.msk.f32.vlgmr.msra.gmra.mrb[60].mxu0 %vm3847_vm3, %v4497_v19  ;;  %v3994_v63 = vpop.xlane.xlu1 %3993 }
 0x5a5   : > { %22685 = vpow2.f32 %v4202_v9  ;;  %22059 = vmatpush3.bf16.msra.mxu0 %v25138_v37  ;;  %v4088_v51 = vsub.f32 %v28837_v46, %v3994_v63  ;;  %v4267_v58 = vpop.xlane.xlu0 %4266  ;;  %v4349_v36 = vsel %vm3847_vm3, %v25203_v60, 0.0 }
 0x5a6   : > { %22687 = vpow2.f32 %v4188_v56  ;;  %22065 = vmatprep.subr.bf16.mxu0 %v25206_v14  ;;  %4350 = vadd.xlane.f32.xlu1 %v4349_v36 }
 0x5a7   : > { %v25215_v42 = vpop.eup %22677  ;;  %v4200_v15 = vmul.f32 1.442695, %v4088_v51  ;;  %4353 = vadd.xlane.f32.xlu0 %v4352_v27 }
 0x5a8   : > { %v25217_v6 = vpop.eup %22679  ;;  %v4273_v37 = vpop.xlane.xlu1 %4272  ;;  %v4367_v32 = vsel %vm3847_vm3, %v25215_v42, 0.0 }
 0x5a9   : > { %22689 = vpow2.f32 %v4200_v15  ;;  %v4264_v62 = vpop.xlane.xlu0 %4263  ;;  %v4346_v28 = vsel %vm3847_vm3, %v25217_v6, 0.0 }
 0x5aa   : > { %22691 = vrcp.f32 %v4267_v58  ;;  %4347 = vadd.xlane.f32.xlu1 %v4346_v28 }
 0x5ab   : > { %v25223_v48 = vpop.eup %22681  ;;  %22693 = vrcp.f32 %v4264_v62  ;;  %4368 = vadd.xlane.f32.xlu0 %v4367_v32 }
 0x5ac   : > { %v25225_v31 = vpop.eup %22683  ;;  %22695 = vrcp.f32 %v4273_v37  ;;  %v4270_v34 = vpop.xlane.xlu1 %4269  ;;  %v4364_v41 = vsel %vm3847_vm3, %v25223_v48, 0.0 }
 0x5ad   : > { %22697 = vrcp.f32 %v4270_v34  ;;  %v3991_v33 = vpop.xlane.xlu0 %3990  ;;  %v4361_v22 = vsel %vm3847_vm3, %v25225_v31, 0.0  ;;  %v28841_v34 = vld [vmem:[#allocation150_spill] sm:$0xff] }
 0x5ae   : > { %v4087_v47 = vsub.f32 %v24937_v7, %v3991_v33  ;;  %4362 = vadd.xlane.f32.xlu1 %v4361_v22  ;;  %v28842_v22 = vld [vmem:[#allocation154_spill] sm:$0xff] }
 0x5af   : > { %v25232_v8 = vpop.eup %22685  ;;  %4365 = vadd.xlane.f32.xlu0 %v4364_v41 }
 0x5b0   : > { %28838 = vst [vmem:[#allocation60_spill] sm:$0xff] %v25232_v8  ;;  %v25234_v35 = vpop.eup %22687  ;;  %v4198_v24 = vmul.f32 1.442695, %v4087_v47  ;;  %v4009_v19 = vpop.xlane.xlu1 %4008  ;;  %v4379_v9 = vsel %vm3847_vm3, %v25232_v8, 0.0  ;;  %v28845_v8 = vld [vmem:[#allocation153_spill] sm:$0xff] }
 0x5b1   : > { %v4093_v56 = vsub.f32 %v24929_v38, %v4009_v19  ;;  %v3988_v63 = vpop.xlane.xlu0 %3987  ;;  %v4358_v46 = vsel %vm3847_vm3, %v25234_v35, 0.0  ;;  %v28840_v38 = vld [vmem:[#allocation98_spill] sm:$0xff] }
 0x5b2   : > { %22699 = vpow2.f32 %v4198_v24  ;;  %v4086_v7 = vsub.f32 %v24941_v55, %v3988_v63  ;;  %4359 = vadd.xlane.f32.xlu1 %v4358_v46  ;;  %v22352_v62 = vunpack.i.h.bf16 %v28840_v38  ;;  %v22351_v28 = vunpack.i.l.bf16 %v28840_v38  ;;  %v28843_v24 = vld [vmem:[#allocation157_spill] sm:$0xff] }
 0x5b3   : > { %v25242_v51 = vpop.eup %22689  ;;  %v4210_v58 = vmul.f32 1.442695, %v4093_v56  ;;  %4380 = vadd.xlane.f32.xlu0 %v4379_v9  ;;  %v28844_v56 = vld [vmem:[#allocation111_spill] sm:$0xff] }
 0x5b4   : > { %28839 = vst [vmem:[#allocation68_spill] sm:$0xff] %v25242_v51  ;;  %v22692_v36 = vpop.eup %22691  ;;  %v4196_v27 = vmul.f32 1.442695, %v4086_v7  ;;  %v4006_v15 = vpop.xlane.xlu1 %4005  ;;  %v4376_v37 = vsel %vm3847_vm3, %v25242_v51, 0.0  ;;  %v22382_v63 = vunpack.i.h.bf16 %v28844_v56  ;;  %v22381_v46 = vunpack.i.l.bf16 %v28844_v56 }
 0x5b5   : > { %v22694_v32 = vpop.eup %22693  ;;  %22701 = vpow2.f32 %v4210_v58  ;;  %v4092_v41 = vsub.f32 %v28841_v34, %v4006_v15  ;;  %v4003_v55 = vpop.xlane.xlu0 %4002  ;;  %v4499_v51 = vmul.f32 %v22692_v36, %v28845_v8  ;;  %v28846_v15 = vld [vmem:[#allocation158_spill] sm:$0xff]  ;;  %v28849_v8 = vld [vmem:[#allocation156_spill] sm:$0xff] }
 0x5b6   : > { %v22696_v33 = vpop.eup %22695  ;;  %22703 = vpow2.f32 %v4196_v27  ;;  %v4091_v47 = vsub.f32 %v28842_v22, %v4003_v55  ;;  %v4498_v19 = vmul.f32 %v22694_v32, %v28843_v24  ;;  %v28847_v27 = vld [vmem:[#allocation151_spill] sm:$0xff]  ;;  %v25258_v55 = vpack.c.bf16 %v22352_v62, %v22351_v28 }
 0x5b7   : > { %v22698_v9 = vpop.eup %22697  ;;  %v4208_v7 = vmul.f32 1.442695, %v4092_v41  ;;  %4377 = vadd.xlane.f32.xlu0 %v4376_v37  ;;  %v28848_v24 = vld [vmem:[#allocation155_spill] sm:$0xff] }
 0x5b8   : > { %v4206_v38 = vmul.f32 1.442695, %v4091_v47  ;;  %20895 = vmatprep.mubr.msk.f32.mxu1 %vm3847_vm3, %v4498_v19  ;;  %v4021_v58 = vpop.xlane.xlu1 %4020  ;;  %v4500_v34 = vmul.f32 %v22698_v9, %v28846_v15  ;;  %v4501_v56 = vmul.f32 %v22696_v33, %v28848_v24  ;;  %v28850_v33 = vld [vmem:[#allocation152_spill] sm:$0xff] }
 0x5b9   : > { %22705 = vpow2.f32 %v4208_v7  ;;  %20896 = vmatmul.mubr.msk.f32.vlgmr.msra.gmra.mrb[44].mxu1 %vm3847_vm3, %v4499_v51  ;;  %v4097_v32 = vsub.f32 %v28847_v27, %v4021_v58  ;;  %v4000_v22 = vpop.xlane.xlu0 %3999  ;;  %v25266_v51 = vpack.c.bf16 %v22382_v63, %v22381_v46 }
 0x5ba   : > { %22707 = vpow2.f32 %v4206_v38  ;;  %22063 = vmatpush3.bf16.msra.mxu1 %v25192_v45  ;;  %v4090_v36 = vsub.f32 %v28849_v8, %v4000_v22  ;;  %20902 = vmatprep.mubr.msk.f32.mxu0 %vm3847_vm3, %v4500_v34 }
 0x5bb   : > { %v4218_v37 = vmul.f32 1.442695, %v4097_v32  ;;  %22069 = vmatprep.subr.bf16.mxu1 %v25258_v55  ;;  %20903 = vmatmul.mubr.msk.f32.vlgmr.msra.gmra.mrb[62].mxu0 %vm3847_vm3, %v4501_v56 }
 0x5bc   : > { %v25268_v41 = vpop.eup %22699  ;;  %v4204_v62 = vmul.f32 1.442695, %v4090_v36  ;;  %22067 = vmatpush3.bf16.msra.mxu0 %v25206_v14  ;;  %v4018_v28 = vpop.xlane.xlu1 %4017 }
 0x5bd   : > { %22709 = vpow2.f32 %v4218_v37  ;;  %v4096_v45 = vsub.f32 %v28850_v33, %v4018_v28  ;;  %22073 = vmatprep.subr.bf16.mxu0 %v25266_v51  ;;  %v4279_v47 = vpop.xlane.xlu0 %4278  ;;  %v4373_v19 = vsel %vm3847_vm3, %v25268_v41, 0.0 }
 0x5be   : > { %22711 = vpow2.f32 %v4204_v62  ;;  %4374 = vadd.xlane.f32.xlu1 %v4373_v19 }
 0x5bf   : > { %v25275_v9 = vpop.eup %22701  ;;  %v4216_v63 = vmul.f32 1.442695, %v4096_v45  ;;  %22713 = vrcp.f32 %v4279_v47 }
 0x5c0   : > { %v25277_v46 = vpop.eup %22703  ;;  %v4027_v7 = vpop.xlane.xlu1 %4026  ;;  %v4391_v14 = vsel %vm3847_vm3, %v25275_v9, 0.0 }
 0x5c1   : > { %22715 = vpow2.f32 %v4216_v63  ;;  %v4276_v38 = vpop.xlane.xlu0 %4275  ;;  %v4099_v58 = vsub.f32 %v24991_v50, %v4027_v7  ;;  %v4370_v15 = vsel %vm3847_vm3, %v25277_v46, 0.0  ;;  %4392 = vadd.xlane.f32.xlu0 %v4391_v14 }
 0x5c2   : > { %22717 = vrcp.f32 %v4276_v38  ;;  %4371 = vadd.xlane.f32.xlu1 %v4370_v15  ;;  %v28851_v15 = vld [vmem:[#allocation118_spill] sm:$0xff] }
 0x5c3   : > { %v25284_v34 = vpop.eup %22705  ;;  %v4222_v27 = vmul.f32 1.442695, %v4099_v58 }
 0x5c4   : > { %v25286_v32 = vpop.eup %22707  ;;  %v4033_v22 = vpop.xlane.xlu1 %4032  ;;  %v4388_v24 = vsel %vm3847_vm3, %v25284_v34, 0.0 }
 0x5c5   : > { %22719 = vpow2.f32 %v4222_v27  ;;  %v4015_v56 = vpop.xlane.xlu0 %4014  ;;  %v4101_v8 = vsub.f32 %v24967_v53, %v4033_v22  ;;  %v4385_v50 = vsel %vm3847_vm3, %v25286_v32, 0.0  ;;  %4389 = vadd.xlane.f32.xlu0 %v4388_v24  ;;  %v22412_v27 = vunpack.i.h.bf16 %v28851_v15 }
 0x5c6   : > { %v4095_v36 = vsub.f32 %v24979_v12, %v4015_v56  ;;  %4386 = vadd.xlane.f32.xlu1 %v4385_v50  ;;  %v22411_v22 = vunpack.i.l.bf16 %v28851_v15 }
 0x5c7   : > { %v25294_v37 = vpop.eup %22709  ;;  %v4226_v62 = vmul.f32 1.442695, %v4101_v8 }
 0x5c8   : > { %v25296_v28 = vpop.eup %22711  ;;  %v4214_v33 = vmul.f32 1.442695, %v4095_v36  ;;  %v4039_v45 = vpop.xlane.xlu1 %4038  ;;  %v4403_v47 = vsel %vm3847_vm3, %v25294_v37, 0.0  ;;  %v28852_v36 = vld [vmem:[#allocation159_spill] sm:$0xff] }
 0x5c9   : > { %22721 = vpow2.f32 %v4226_v62  ;;  %v4012_v19 = vpop.xlane.xlu0 %4011  ;;  %v4103_v53 = vsub.f32 %v25007_v29, %v4039_v45  ;;  %v4382_v63 = vsel %vm3847_vm3, %v25296_v28, 0.0  ;;  %4404 = vadd.xlane.f32.xlu0 %v4403_v47  ;;  %v22714_v12 = vpop.eup %22713  ;;  %v25317_v47 = vpack.c.bf16 %v22412_v27, %v22411_v22 }
 0x5ca   : > { %22723 = vpow2.f32 %v4214_v33  ;;  %v4094_v7 = vsub.f32 %v24983_v59, %v4012_v19  ;;  %4383 = vadd.xlane.f32.xlu1 %v4382_v63  ;;  %v4503_v62 = vmul.f32 %v22714_v12, %v28852_v36  ;;  %v28853_v36 = vld [vmem:[#allocation124_spill] sm:$0xff] }
 0x5cb   : > { %v25304_v14 = vpop.eup %22715  ;;  %v4230_v38 = vmul.f32 1.442695, %v4103_v53 }
 0x5cc   : > { %v22718_v58 = vpop.eup %22717  ;;  %v4212_v24 = vmul.f32 1.442695, %v4094_v7  ;;  %v4285_v56 = vpop.xlane.xlu1 %4284  ;;  %v4400_v29 = vsel %vm3847_vm3, %v25304_v14, 0.0 }
 0x5cd   : > { %22725 = vpow2.f32 %v4230_v38  ;;  %v4024_v8 = vpop.xlane.xlu0 %4023  ;;  %4401 = vadd.xlane.f32.xlu0 %v4400_v29  ;;  %v4502_v50 = vmul.f32 %v22718_v58, %v25015_v17 }
 0x5ce   : > { %22727 = vpow2.f32 %v4212_v24  ;;  %v4098_v59 = vsub.f32 %v24995_v13, %v4024_v8 }
 0x5cf   : > { %v25313_v33 = vpop.eup %22719  ;;  %20909 = vmatprep.mubr.msk.f32.mxu1 %vm3847_vm3, %v4502_v50  ;;  %22729 = vrcp.f32 %v4285_v56 }
 0x5d0   : > { %v4220_v45 = vmul.f32 1.442695, %v4098_v59  ;;  %20910 = vmatmul.mubr.msk.f32.vlgmr.msra.gmra.mrb[46].mxu1 %vm3847_vm3, %v4503_v62  ;;  %v4282_v19 = vpop.xlane.xlu1 %4281  ;;  %v4409_v53 = vsel %vm3847_vm3, %v25313_v33, 0.0  ;;  %v22442_v62 = vunpack.i.h.bf16 %v28853_v36 }
 0x5d1   : > { %22071 = vmatpush3.bf16.msra.mxu1 %v25258_v55  ;;  %v4030_v17 = vpop.xlane.xlu0 %4029  ;;  %22731 = vrcp.f32 %v4282_v19  ;;  %4410 = vadd.xlane.f32.xlu0 %v4409_v53 }
 0x5d2   : > { %22733 = vpow2.f32 %v4220_v45  ;;  %22077 = vmatprep.subr.bf16.mxu1 %v25317_v47  ;;  %v4100_v13 = vsub.f32 %v24970_v54, %v4030_v17  ;;  %v22441_v45 = vunpack.i.l.bf16 %v28853_v36 }
 0x5d3   : > { %v25324_v63 = vpop.eup %22721 }
 0x5d4   : > { %v25326_v12 = vpop.eup %22723  ;;  %v4224_v7 = vmul.f32 1.442695, %v4100_v13  ;;  %v4297_v38 = vpop.xlane.xlu1 %4296  ;;  %v4415_v58 = vsel %vm3847_vm3, %v25324_v63, 0.0 }
 0x5d5   : > { %v4036_v15 = vpop.xlane.xlu0 %4035  ;;  %v4397_v55 = vsel %vm3847_vm3, %v25326_v12, 0.0  ;;  %4416 = vadd.xlane.f32.xlu0 %v4415_v58  ;;  %v22080_v58 = vpack.c.bf16 %v22442_v62, %v22441_v45 }
 0x5d6   : > { %22735 = vpow2.f32 %v4224_v7  ;;  %v4102_v27 = vsub.f32 %v25011_v20, %v4036_v15  ;;  %4398 = vadd.xlane.f32.xlu1 %v4397_v55 }
 0x5d7   : > { %v25333_v22 = vpop.eup %22725  ;;  %22737 = vrcp.f32 %v4297_v38 }
 0x5d8   : > { %v25335_v54 = vpop.eup %22727  ;;  %v4228_v24 = vmul.f32 1.442695, %v4102_v27  ;;  %v4294_v56 = vpop.xlane.xlu1 %4293  ;;  %v4421_v29 = vsel %vm3847_vm3, %v25333_v22, 0.0 }
 0x5d9   : > { %22739 = vrcp.f32 %v4294_v56  ;;  %v4291_v8 = vpop.xlane.xlu0 %4290  ;;  %v4394_v50 = vsel %vm3847_vm3, %v25335_v54, 0.0  ;;  %4422 = vadd.xlane.f32.xlu0 %v4421_v29  ;;  %v22730_v59 = vpop.eup %22729 }
 0x5da   : > { %22741 = vpow2.f32 %v4228_v24  ;;  %4395 = vadd.xlane.f32.xlu1 %v4394_v50  ;;  %v4505_v38 = vmul.f32 %v22730_v59, %v25032_v25  ;;  %v28854_v24 = vld [vmem:[#allocation85_spill] sm:$0xff] }
 0x5db   : > { %v22732_v20 = vpop.eup %22731  ;;  %22743 = vrcp.f32 %v4291_v8  ;;  %v22502_v56 = vunpack.i.h.bf16 %v28854_v24  ;;  %v22501_v29 = vunpack.i.l.bf16 %v28854_v24 }
 0x5dc   : > { %v25343_v19 = vpop.eup %22733  ;;  %v4303_v53 = vpop.xlane.xlu1 %4302  ;;  %v4504_v17 = vmul.f32 %v22732_v20, %v25039_v21 }
 0x5dd   : > { %v4288_v13 = vpop.xlane.xlu0 %4287  ;;  %v4406_v7 = vsel %vm3847_vm3, %v25343_v19, 0.0  ;;  %v22088_v62 = vpack.c.bf16 %v22502_v56, %v22501_v29 }
 0x5de   : > { %22745 = vrcp.f32 %v4288_v13  ;;  %4407 = vadd.xlane.f32.xlu1 %v4406_v7  ;;  %20916 = vmatprep.mubr.msk.f32.mxu0 %vm3847_vm3, %v4504_v17 }
 0x5df   : > { %20917 = vmatmul.mubr.msk.f32.vlgmr.msra.gmra.mrb[64].mxu0 %vm3847_vm3, %v4505_v38  ;;  %22747 = vrcp.f32 %v4303_v53  ;;  %v28855_v53 = vld [vmem:[#allocation134_spill] sm:$0xff] }
 0x5e0   : > { %v25351_v15 = vpop.eup %22735  ;;  %22075 = vmatpush3.bf16.msra.mxu0 %v25266_v51  ;;  %v4300_v21 = vpop.xlane.xlu1 %4299  ;;  %v22472_v17 = vunpack.i.h.bf16 %v28855_v53  ;;  %v22471_v13 = vunpack.i.l.bf16 %v28855_v53 }
 0x5e1   : > { %22081 = vmatprep.subr.bf16.mxu0 %v22080_v58  ;;  %22749 = vrcp.f32 %v4300_v21  ;;  %v4412_v55 = vsel %vm3847_vm3, %v25351_v15, 0.0  ;;  %v22738_v27 = vpop.eup %22737 }
 0x5e2   : > { %4413 = vadd.xlane.f32.xlu1 %v4412_v55  ;;  %v4509_v20 = vmul.f32 %v22738_v27, %v25046_v5  ;;  %v28856_v55 = vld [vmem:[#allocation48_spill] sm:$0xff]  ;;  %v22084_v24 = vpack.c.bf16 %v22472_v17, %v22471_v13 }
 0x5e3   : > { %v22740_v25 = vpop.eup %22739  ;;  %v22532_v27 = vunpack.i.h.bf16 %v28856_v55  ;;  %v28861_v13 = vld [vmem:[#allocation64_spill] sm:$0xff] }
 0x5e4   : > { %v25358_v8 = vpop.eup %22741  ;;  %v4309_v50 = vpop.xlane.xlu1 %4308  ;;  %v4508_v59 = vmul.f32 %v22740_v25, %v25053_v11  ;;  %v22531_v25 = vunpack.i.l.bf16 %v28856_v55 }
 0x5e5   : > { %v4418_v51 = vsel %vm3847_vm3, %v25358_v8, 0.0  ;;  %v22744_v36 = vpop.eup %22743  ;;  %22751 = vrcp.f32 %v4309_v50 }
 0x5e6   : > { %4419 = vadd.xlane.f32.xlu1 %v4418_v51  ;;  %20930 = vmatprep.mubr.msk.f32.mxu0 %vm3847_vm3, %v4508_v59  ;;  %v4507_v38 = vmul.f32 %v22744_v36, %v25057_v57  ;;  %v28857_v57 = vld [vmem:[#allocation41_spill] sm:$0xff]  ;;  %v22092_v56 = vpack.c.bf16 %v22532_v27, %v22531_v25  ;;  %v28858_v59 = vld [vmem:[#allocation95_spill] sm:$0xff] }
 0x5e7   : > { %20931 = vmatmul.mubr.msk.f32.vlgmr.msra.gmra.mrb[66].mxu0 %vm3847_vm3, %v4509_v20  ;;  %v22327_v51 = vunpack.i.h.bf16 %v28858_v59  ;;  %v28859_v20 = vld [vmem:[#allocation11_spill] sm:$0xff]  ;;  %v28867_v27 = vld [vmem:[#allocation69_spill] sm:$0xff] }
 0x5e8   : > { %v22746_v45 = vpop.eup %22745  ;;  %22083 = vmatpush3.bf16.msra.mxu0 %v22080_v58  ;;  %v4306_v11 = vpop.xlane.xlu1 %4305 }
 0x5e9   : > { %22089 = vmatprep.subr.bf16.mxu0 %v22088_v62  ;;  %22753 = vrcp.f32 %v4306_v11  ;;  %v4506_v7 = vmul.f32 %v22746_v45, %v25065_v3  ;;  %v22748_v5 = vpop.eup %22747  ;;  %v28860_v45 = vld [vmem:[#allocation9_spill] sm:$0xff]  ;;  %v28864_v11 = vld [vmem:[#allocation14_spill] sm:$0xff] }
 0x5ea   : > { %v4511_v3 = vmul.f32 %v22748_v5, %v25061_v49 }
 0x5eb   : > { %v22750_v21 = vpop.eup %22749  ;;  %20923 = vmatprep.mubr.msk.f32.mxu1 %vm3847_vm3, %v4506_v7  ;;  %v28865_v7 = vld [vmem:[#allocation81_spill] sm:$0xff] }
 0x5ec   : > { %20924 = vmatmul.mubr.msk.f32.vlgmr.msra.gmra.mrb[48].mxu1 %vm3847_vm3, %v4507_v38  ;;  %v4510_v58 = vmul.f32 %v22750_v21, %v25069_v26  ;;  %v22326_v26 = vunpack.i.l.bf16 %v28858_v59  ;;  %v28866_v21 = vld [vmem:[#allocation100_spill] sm:$0xff] }
 0x5ed   : > { %22079 = vmatpush3.bf16.msra.mxu1 %v25317_v47  ;;  %v22356_v55 = vunpack.i.l.bf16 %v28866_v21 }
 0x5ee   : > { %22085 = vmatprep.subr.bf16.mxu1 %v22084_v24  ;;  %20937 = vmatprep.mubr.msk.f32.mxu1 %vm3847_vm3, %v4510_v58  ;;  %v22096_v17 = vpack.c.bf16 %v22327_v51, %v22326_v26  ;;  %v28869_v58 = vld [vmem:[#allocation160_spill] sm:$0xff]  ;;  %v28872_v51 = vld [vmem:[#allocation18_spill] sm:$0xff]  ;;  %v28873_v26 = vld [vmem:[#allocation7_spill] sm:$0xff] }
 0x5ef   : > { %11565 = vrot.lane.b32.xlu0 %v28857_v57, %s23178_s29  ;;  %v22752_v29 = vpop.eup %22751 }
 0x5f0   : > { %20938 = vmatmul.mubr.msk.f32.vlgmr.msra.gmra.mrb[50].mxu1 %vm3847_vm3, %v4511_v3  ;;  %v4513_v36 = vmul.f32 %v22752_v29, %v25075_v4  ;;  %v28863_v4 = vld [vmem:[#allocation16_spill] sm:$0xff]  ;;  %v28870_v29 = vld [vmem:[#allocation6_spill] sm:$0xff] }
 0x5f1   : > { %22087 = vmatpush3.bf16.msra.mxu1 %v22084_v24  ;;  %v28868_v24 = vld [vmem:[#allocation12_spill] sm:$0xff] }
 0x5f2   : > { %22093 = vmatprep.subr.bf16.mxu1 %v22092_v56 }
 0x5f3   : > { %v22754_v50 = vpop.eup %22753  ;;  %v4315_v47 = vpop.xlane.xlu0 %4314  ;;  %7667 = vrot.lane.b32.xlu0 %v28859_v20, %s23179_s30 }
 0x5f4   : > { %v4512_v49 = vmul.f32 %v22754_v50, %v25080_v0  ;;  %22755 = vrcp.f32 %v4315_v47  ;;  %v28862_v0 = vld [vmem:[#allocation53_spill] sm:$0xff]  ;;  %v28875_v47 = vld [vmem:[#allocation35_spill] sm:$0xff] }
 0x5f6   : > { %20944 = vmatprep.mubr.msk.f32.mxu0 %vm3847_vm3, %v4512_v49 }
 0x5f7   : > { %7665 = vrot.lane.b32.xlu1 %v28860_v45, %s23179_s30  ;;  %v4312_v53 = vpop.xlane.xlu0 %4311  ;;  %20945 = vmatmul.mubr.msk.f32.vlgmr.msra.gmra.mrb[68].mxu0 %vm3847_vm3, %v4513_v36 }
 0x5f8   : > { %22757 = vrcp.f32 %v4312_v53  ;;  %22091 = vmatpush3.bf16.msra.mxu0 %v22088_v62  ;;  %11717 = vrot.lane.b32.xlu0 %v28861_v13, %s23178_s29  ;;  %v22357_v62 = vunpack.i.h.bf16 %v28866_v21  ;;  %v28876_v53 = vld [vmem:[#allocation113_spill] sm:$0xff] }
 0x5f9   : > { %22097 = vmatprep.subr.bf16.mxu0 %v22096_v17  ;;  %v22387_v13 = vunpack.i.h.bf16 %v28876_v53 }
 0x5fa   : > { %v25411_v57 = vpack.c.bf16 %v22357_v62, %v22356_v55  ;;  %v28878_v62 = vld [vmem:[#allocation52_spill] sm:$0xff] }
 0x5fb   : > { %11641 = vrot.lane.b32.xlu1 %v28862_v0, %s23178_s29  ;;  %v22386_v0 = vunpack.i.l.bf16 %v28876_v53  ;;  %v28885_v53 = vld [vmem:[#allocation120_spill] sm:$0xff] }
 0x5fc   : > { %7671 = vrot.lane.b32.xlu0 %v28863_v4, %s23179_s30 }
 0x5fd   : > { %v22104_v21 = vpack.c.bf16 %v22387_v13, %v22386_v0  ;;  %v22417_v13 = vunpack.i.h.bf16 %v28885_v53  ;;  %v22416_v0 = vunpack.i.l.bf16 %v28885_v53  ;;  %v28891_v53 = vld [vmem:[#allocation136_spill] sm:$0xff] }
 0x5fe   : > { %v22756_v5 = vpop.eup %22755 }
 0x5ff   : > { %7669 = vrot.lane.b32.xlu1 %v28864_v11, %s23179_s30  ;;  %v4515_v3 = vmul.f32 %v22756_v5, %v28869_v58  ;;  %v28877_v5 = vld [vmem:[#allocation44_spill] sm:$0xff] }
 0x600   : > { %11869 = vrot.lane.b32.xlu0 %v28865_v7, %s23178_s29 }
 0x602   : > { %v22758_v38 = vpop.eup %22757 }
 0x603   : > { %11793 = vrot.lane.b32.xlu1 %v28867_v27, %s23178_s29  ;;  %v4514_v25 = vmul.f32 %v22758_v38, %v25089_v44  ;;  %v28871_v44 = vld [vmem:[#allocation3_spill] sm:$0xff] }
 0x604   : > { %7675 = vrot.lane.b32.xlu0 %v28868_v24, %s23176_s24 }
 0x605   : > { %20951 = vmatprep.mubr.msk.f32.mxu1 %vm3847_vm3, %v4514_v25  ;;  %v28880_v25 = vld [vmem:[#allocation2_spill] sm:$0xff] }
 0x606   : > { %20952 = vmatmul.mubr.msk.f32.vlgmr.msra.gmra.mrb[52].mxu1 %vm3847_vm3, %v4515_v3  ;;  %v4321_v50 = vpop.xlane.xlu0 %4320 }
 0x607   : > { %22095 = vmatpush3.bf16.msra.mxu1 %v22092_v56  ;;  %7673 = vrot.lane.b32.xlu1 %v28870_v29, %s23176_s24  ;;  %22759 = vrcp.f32 %v4321_v50  ;;  %v28874_v56 = vld [vmem:[#allocation29_spill] sm:$0xff] }
 0x608   : > { %22101 = vmatprep.subr.bf16.mxu1 %v25411_v57  ;;  %7677 = vrot.lane.b32.xlu0 %v28871_v44, %s23176_s24  ;;  %v28882_v50 = vld [vmem:[#allocation17_spill] sm:$0xff] }
 0x60a   : > { %v4318_v59 = vpop.xlane.xlu1 %4317 }
 0x60b   : > { %22761 = vrcp.f32 %v4318_v59  ;;  %11945 = vrot.lane.b32.xlu1 %v28872_v51, %s23178_s29  ;;  %v28883_v51 = vld [vmem:[#allocation83_spill] sm:$0xff] }
 0x60c   : > { %7679 = vrot.lane.b32.xlu0 %v28873_v26, %s23176_s24 }
 0x60f   : > { %12021 = vrot.lane.b32.xlu1 %v28874_v56, %s23178_s29 }
 0x610   : > { %7681 = vrot.lane.b32.xlu0 %v28860_v45, %s23176_s24 }
 0x611   : > { %v22760_v49 = vpop.eup %22759 }
 0x612   : > { %v4517_v38 = vmul.f32 %v22760_v49, %v25115_v52  ;;  %v28879_v52 = vld [vmem:[#allocation65_spill] sm:$0xff] }
 0x613   : > { %12097 = vrot.lane.b32.xlu1 %v28875_v47, %s23178_s29  ;;  %v28884_v47 = vld [vmem:[#allocation5_spill] sm:$0xff] }
 0x614   : > { %7683 = vrot.lane.b32.xlu0 %v28859_v20, %s23176_s24 }
 0x615   : > { %v22762_v36 = vpop.eup %22761 }
 0x616   : > { %v4516_v7 = vmul.f32 %v22762_v36, %v25119_v2 }
 0x617   : > { %12173 = vrot.lane.b32.xlu1 %v28877_v5, %s23178_s29 }
 0x618   : > { %7685 = vrot.lane.b32.xlu0 %v28864_v11, %s23176_s24  ;;  %20958 = vmatprep.mubr.msk.f32.mxu0 %vm3847_vm3, %v4516_v7  ;;  %v28886_v7 = vld [vmem:[#allocation4_spill] sm:$0xff] }
 0x619   : > { %20959 = vmatmul.mubr.msk.f32.vlgmr.msra.gmra.mrb[70].mxu0 %vm3847_vm3, %v4517_v38 }
 0x61a   : > { %22099 = vmatpush3.bf16.msra.mxu0 %v22096_v17  ;;  %v28881_v17 = vld [vmem:[#allocation71_spill] sm:$0xff] }
 0x61b   : > { %12249 = vrot.lane.b32.xlu1 %v28878_v62, %s23178_s29  ;;  %22105 = vmatprep.subr.bf16.mxu0 %v22104_v21  ;;  %v4327_v55 = vpop.xlane.xlu0 %4326  ;;  %v28887_v62 = vld [vmem:[#allocation10_spill] sm:$0xff] }
 0x61c   : > { %7687 = vrot.lane.b32.xlu0 %v28863_v4, %s23176_s24  ;;  %22763 = vrcp.f32 %v4327_v55  ;;  %s28393_s24 = scalar_lea.vmem %s28459_s13, %s20050_s28 }
 0x61f   : > { %v4324_v2 = vpop.xlane.xlu1 %4323  ;;  %12325 = vrot.lane.b32.xlu1 %v28879_v52, %s23178_s29  ;;  %v4333_v27 = vpop.xlane.xlu0 %4332  ;;  %v22108_v52 = vpack.c.bf16 %v22417_v13, %v22416_v0  ;;  %v22477_v13 = vunpack.i.h.bf16 %v28891_v53  ;;  %v22476_v0 = vunpack.i.l.bf16 %v28891_v53 }
 0x620   : > { %22765 = vrcp.f32 %v4324_v2  ;;  %13257 = vrot.lane.b32.xlu0 %v28880_v25, %s23180_s15 }
 0x621   : > { %22767 = vrcp.f32 %v4333_v27 }
 0x623   : > { %v4339_v58 = vpop.xlane.xlu1 %4338  ;;  %12401 = vrot.lane.b32.xlu1 %v28881_v17, %s23178_s29  ;;  %v4330_v3 = vpop.xlane.xlu0 %4329 }
 0x624   : > { %13409 = vrot.lane.b32.xlu0 %v28882_v50, %s23180_s15  ;;  %22769 = vrcp.f32 %v4330_v3 }
 0x625   : > { %22771 = vrcp.f32 %v4339_v58  ;;  %v28888_v58 = vld [vmem:[#allocation126_spill] sm:$0xff] }
 0x626   : > { %v22764_v49 = vpop.eup %22763  ;;  %v22447_v17 = vunpack.i.h.bf16 %v28888_v58  ;;  %v22446_v3 = vunpack.i.l.bf16 %v28888_v58 }
 0x627   : > { %v4336_v59 = vpop.xlane.xlu1 %4335  ;;  %12477 = vrot.lane.b32.xlu1 %v28883_v51, %s23178_s29  ;;  %v4345_v56 = vpop.xlane.xlu0 %4344  ;;  %v4519_v55 = vmul.f32 %v22764_v49, %v25140_v43  ;;  %v28890_v43 = vld [vmem:[#allocation20_spill] sm:$0xff] }
 0x628   : > { %22773 = vrcp.f32 %v4336_v59  ;;  %13485 = vrot.lane.b32.xlu0 %v28884_v47, %s23180_s15 }
 0x629   : > { %22775 = vrcp.f32 %v4345_v56 }
 0x62a   : > { %v22766_v36 = vpop.eup %22765 }
 0x62b   : > { %13333 = vrot.lane.b32.xlu1 %v28886_v7, %s23180_s15  ;;  %v4342_v5 = vpop.xlane.xlu0 %4341  ;;  %v4518_v38 = vmul.f32 %v22766_v36, %v25148_v18  ;;  %v22768_v2 = vpop.eup %22767  ;;  %v28889_v18 = vld [vmem:[#allocation8_spill] sm:$0xff] }
 0x62c   : > { %22777 = vrcp.f32 %v4342_v5  ;;  %13637 = vrot.lane.b32.xlu0 %v28887_v62, %s23180_s15  ;;  %v4521_v49 = vmul.f32 %v22768_v2, %v25146_v39  ;;  %v28892_v5 = vld [vmem:[#allocation13_spill] sm:$0xff]  ;;  %v28893_v39 = vld [vmem:[#allocation24_spill] sm:$0xff] }
 0x62d   : > { %20965 = vmatprep.mubr.msk.f32.mxu1 %vm3847_vm3, %v4518_v38  ;;  %v22112_v38 = vpack.c.bf16 %v22447_v17, %v22446_v3  ;;  %v28895_v3 = vld [vmem:[#allocation15_spill] sm:$0xff] }
 0x62e   : > { %20966 = vmatmul.mubr.msk.f32.vlgmr.msra.gmra.mrb[54].mxu1 %vm3847_vm3, %v4519_v55  ;;  %v22770_v27 = vpop.eup %22769 }
 0x62f   : > { %22103 = vmatpush3.bf16.msra.mxu1 %v25411_v57  ;;  %13561 = vrot.lane.b32.xlu1 %v28889_v18, %s23180_s15  ;;  %v4357_v59 = vpop.xlane.xlu0 %4356  ;;  %v4520_v51 = vmul.f32 %v22770_v27, %v25150_v23  ;;  %v22772_v56 = vpop.eup %22771 }
 0x630   : > { %22109 = vmatprep.subr.bf16.mxu1 %v22108_v52  ;;  %13865 = vrot.lane.b32.xlu0 %v28890_v43, %s23180_s15  ;;  %22779 = vrcp.f32 %v4357_v59  ;;  %v4523_v2 = vmul.f32 %v22772_v56, %v25157_v10  ;;  %v28896_v56 = vld [vmem:[#allocation55_spill] sm:$0xff] }
 0x631   : > { %20972 = vmatprep.mubr.msk.f32.mxu0 %vm3847_vm3, %v4520_v51  ;;  %v28894_v51 = vld [vmem:[#allocation143_spill] sm:$0xff] }
 0x632   : > { %v22774_v36 = vpop.eup %22773  ;;  %20973 = vmatmul.mubr.msk.f32.vlgmr.msra.gmra.mrb[72].mxu0 %vm3847_vm3, %v4521_v49  ;;  %v22507_v49 = vunpack.i.h.bf16 %v28894_v51  ;;  %v22506_v17 = vunpack.i.l.bf16 %v28894_v51 }
 0x633   : > { %v4351_v57 = vpop.xlane.xlu1 %4350  ;;  %13713 = vrot.lane.b32.xlu1 %v28892_v5, %s23180_s15  ;;  %v4522_v55 = vmul.f32 %v22774_v36, %v25166_v61  ;;  %22107 = vmatpush3.bf16.msra.mxu0 %v22104_v21  ;;  %v22776_v27 = vpop.eup %22775  ;;  %v22116_v61 = vpack.c.bf16 %v22477_v13, %v22476_v0  ;;  %v28897_v13 = vld [vmem:[#allocation34_spill] sm:$0xff]  ;;  %v28898_v0 = vld [vmem:[#allocation59_spill] sm:$0xff] }
 0x634   : > { %v4354_v23 = vpop.xlane.xlu0 %4353  ;;  %13941 = vrot.lane.b32.xlu0 %v28893_v39, %s23180_s15  ;;  %22113 = vmatprep.subr.bf16.mxu0 %v22112_v38  ;;  %v4525_v36 = vmul.f32 %v22776_v27, %v25163_v16  ;;  %v22120_v53 = vpack.c.bf16 %v22507_v49, %v22506_v17  ;;  %v28899_v16 = vld [vmem:[#allocation96_spill] sm:$0xff] }
 0x635   : > { %22781 = vrcp.f32 %v4354_v23  ;;  %20979 = vmatprep.mubr.msk.f32.mxu1 %vm3847_vm3, %v4522_v55  ;;  %v22332_v23 = vunpack.i.h.bf16 %v28899_v16 }
 0x636   : > { %v22778_v58 = vpop.eup %22777  ;;  %20980 = vmatmul.mubr.msk.f32.vlgmr.msra.gmra.mrb[56].mxu1 %vm3847_vm3, %v4523_v2  ;;  %22783 = vrcp.f32 %v4351_v57  ;;  %v22331_v2 = vunpack.i.l.bf16 %v28899_v16 }
 0x637   : > { %22111 = vmatpush3.bf16.msra.mxu1 %v22108_v52  ;;  %v4348_v21 = vpop.xlane.xlu1 %4347  ;;  %13789 = vrot.lane.b32.xlu1 %v28895_v3, %s23180_s15  ;;  %v4524_v10 = vmul.f32 %v22778_v58, %v25173_v30 }
 0x638   : > { %22785 = vrcp.f32 %v4348_v21  ;;  %22117 = vmatprep.subr.bf16.mxu1 %v22116_v61  ;;  %v4369_v59 = vpop.xlane.xlu0 %4368  ;;  %14169 = vrot.lane.b32.xlu0 %v28896_v56, %s23180_s15  ;;  %v22128_v16 = vpack.c.bf16 %v22332_v23, %v22331_v2 }
 0x639   : > { %20986 = vmatprep.mubr.msk.f32.mxu0 %vm3847_vm3, %v4524_v10  ;;  %22787 = vrcp.f32 %v4369_v59 }
 0x63a   : > { %20987 = vmatmul.mubr.msk.f32.vlgmr.msra.gmra.mrb[74].mxu0 %vm3847_vm3, %v4525_v36  ;;  %v22780_v57 = vpop.eup %22779  ;;  %v28903_v36 = vld [vmem:[#allocation142_spill] sm:$0xff] }
 0x63b   : > { %22115 = vmatpush3.bf16.msra.mxu0 %v22112_v38  ;;  %v4363_v52 = vpop.xlane.xlu1 %4362  ;;  %14017 = vrot.lane.b32.xlu1 %v28897_v13, %s23180_s15  ;;  %v28900_v38 = vld [vmem:[#allocation43_spill] sm:$0xff]  ;;  %v4529_v10 = vmul.f32 %v22780_v57, %v25176_v40 }
 0x63c   : > { %22121 = vmatprep.subr.bf16.mxu0 %v22120_v53  ;;  %v4366_v30 = vpop.xlane.xlu0 %4365  ;;  %14245 = vrot.lane.b32.xlu0 %v28898_v0, %s23180_s15 }
 0x63d   : > { %22789 = vrcp.f32 %v4366_v30  ;;  %v22537_v30 = vunpack.i.h.bf16 %v28903_v36 }
 0x63e   : > { %22791 = vrcp.f32 %v4363_v52  ;;  %v22536_v52 = vunpack.i.l.bf16 %v28903_v36 }
 0x63f   : > { %v22782_v55 = vpop.eup %22781  ;;  %v4360_v27 = vpop.xlane.xlu1 %4359  ;;  %14093 = vrot.lane.b32.xlu1 %v28900_v38, %s23180_s15 }
 0x640   : > { %v25505_v58 = vpop.f32.mrb[56].mxu0  ;;  %22793 = vrcp.f32 %v4360_v27  ;;  %v4381_v51 = vpop.xlane.xlu0 %4380  ;;  %v4528_v49 = vmul.f32 %v22782_v55, %v25199_v1  ;;  %v22124_v57 = vpack.c.bf16 %v22537_v30, %v22536_v52 }
 0x641   : > { %28901 = vst [vmem:[#allocation76_spill] sm:$0xff] %v25505_v58  ;;  %v22784_v17 = vpop.eup %22783  ;;  %v25508_v21 = vpop.f32.mrb[57].mxu0  ;;  %22795 = vrcp.f32 %v4381_v51 }
 0x642   : > { %28902 = vst [vmem:[#allocation86_spill] sm:$0xff] %v25508_v21  ;;  %v22786_v59 = vpop.eup %22785  ;;  %21000 = vmatprep.mubr.msk.f32.mxu0 %vm3847_vm3, %v4528_v49  ;;  %v4527_v55 = vmul.f32 %v22784_v17, %v25203_v60  ;;  %v28904_v49 = vld [vmem:[#allocation108_spill] sm:$0xff]  ;;  %v29019_v21 = vld [vmem:[#allocation27_spill] sm:$0xff] }
 0x643   : > { %21001 = vmatmul.mubr.msk.f32.vlgmr.msra.gmra.mrb[76].mxu0 %vm3847_vm3, %v4529_v10  ;;  %v4526_v27 = vmul.f32 %v22786_v59, %v25217_v6  ;;  %v22788_v40 = vpop.eup %22787  ;;  %v22392_v58 = vunpack.i.h.bf16 %v28904_v49  ;;  %v22391_v23 = vunpack.i.l.bf16 %v28904_v49  ;;  %v28907_v10 = vld [vmem:[#allocation102_spill] sm:$0xff] }
 0x644   : > { %22123 = vmatpush3.bf16.msra.mxu0 %v22120_v53  ;;  %v4378_v1 = vpop.xlane.xlu0 %4377  ;;  %v4533_v51 = vmul.f32 %v22788_v40, %v25215_v42  ;;  %v22362_v59 = vunpack.i.h.bf16 %v28907_v10  ;;  %v22361_v30 = vunpack.i.l.bf16 %v28907_v10 }
 0x645   : > { %22129 = vmatprep.subr.bf16.mxu0 %v22128_v16  ;;  %22797 = vrcp.f32 %v4378_v1  ;;  %20993 = vmatprep.mubr.msk.f32.mxu1 %vm3847_vm3, %v4526_v27  ;;  %v22136_v52 = vpack.c.bf16 %v22392_v58, %v22391_v23 }
 0x646   : > { %20994 = vmatmul.mubr.msk.f32.vlgmr.msra.gmra.mrb[58].mxu1 %vm3847_vm3, %v4527_v55 }
 0x647   : > { %v22790_v36 = vpop.eup %22789  ;;  %22119 = vmatpush3.bf16.msra.mxu1 %v22116_v61  ;;  %v25521_v6 = vpop.f32.mrb[40].mxu1 }
 0x648   : > { %28905 = vst [vmem:[#allocation94_spill] sm:$0xff] %v25521_v6  ;;  %22125 = vmatprep.subr.bf16.mxu1 %v22124_v57  ;;  %v25523_v53 = vpop.f32.mrb[41].mxu1  ;;  %v4532_v60 = vmul.f32 %v22790_v36, %v25223_v48  ;;  %v22792_v2 = vpop.eup %22791  ;;  %v22132_v48 = vpack.c.bf16 %v22362_v59, %v22361_v30  ;;  %v28908_v36 = vld [vmem:[#allocation130_spill] sm:$0xff]  ;;  %v29016_v6 = vld [vmem:[#allocation67_spill] sm:$0xff] }
 0x649   : > { %28906 = vst [vmem:[#allocation114_spill] sm:$0xff] %v25523_v53  ;;  %v4531_v1 = vmul.f32 %v22792_v2, %v25225_v31  ;;  %v22452_v49 = vunpack.i.h.bf16 %v28908_v36  ;;  %v29018_v53 = vld [vmem:[#allocation131_spill] sm:$0xff] }
 0x64a   : > { %v22794_v17 = vpop.eup %22793  ;;  %21014 = vmatprep.mubr.msk.f32.mxu0 %vm3847_vm3, %v4532_v60  ;;  %v22451_v60 = vunpack.i.l.bf16 %v28908_v36 }
 0x64b   : > { %21015 = vmatmul.mubr.msk.f32.vlgmr.msra.gmra.mrb[78].mxu0 %vm3847_vm3, %v4533_v51  ;;  %v4375_v61 = vpop.xlane.xlu1 %4374  ;;  %v4530_v27 = vmul.f32 %v22794_v17, %v25234_v35  ;;  %v22796_v42 = vpop.eup %22795  ;;  %v28909_v35 = vld [vmem:[#allocation68_spill] sm:$0xff] }
 0x64c   : > { %22131 = vmatpush3.bf16.msra.mxu0 %v22128_v16  ;;  %22799 = vrcp.f32 %v4375_v61  ;;  %v28910_v16 = vld [vmem:[#allocation60_spill] sm:$0xff]  ;;  %v22144_v17 = vpack.c.bf16 %v22452_v49, %v22451_v60  ;;  %v28911_v61 = vld [vmem:[#allocation121_spill] sm:$0xff] }
 0x64d   : > { %22137 = vmatprep.subr.bf16.mxu0 %v22136_v52  ;;  %21007 = vmatprep.mubr.msk.f32.mxu1 %vm3847_vm3, %v4530_v27  ;;  %v4537_v23 = vmul.f32 %v22796_v42, %v28910_v16  ;;  %v22422_v27 = vunpack.i.h.bf16 %v28911_v61  ;;  %v28912_v49 = vld [vmem:[#allocation145_spill] sm:$0xff] }
 0x64e   : > { %21008 = vmatmul.mubr.msk.f32.vlgmr.msra.gmra.mrb[60].mxu1 %vm3847_vm3, %v4531_v1  ;;  %v4393_v55 = vpop.xlane.xlu0 %4392  ;;  %v22421_v1 = vunpack.i.l.bf16 %v28911_v61  ;;  %v22512_v60 = vunpack.i.h.bf16 %v28912_v49 }
 0x64f   : > { %v22798_v40 = vpop.eup %22797  ;;  %22127 = vmatpush3.bf16.msra.mxu1 %v22124_v57  ;;  %v4372_v58 = vpop.xlane.xlu1 %4371 }
 0x650   : > { %22801 = vrcp.f32 %v4372_v58  ;;  %22133 = vmatprep.subr.bf16.mxu1 %v22132_v48  ;;  %v4536_v31 = vmul.f32 %v22798_v40, %v28909_v35  ;;  %v22511_v58 = vunpack.i.l.bf16 %v28912_v49 }
 0x651   : > { %22803 = vrcp.f32 %v4393_v55 }
 0x652   : > { %21028 = vmatprep.mubr.msk.f32.mxu0 %vm3847_vm3, %v4536_v31  ;;  %v4390_v2 = vpop.xlane.xlu0 %4389  ;;  %v22140_v31 = vpack.c.bf16 %v22422_v27, %v22421_v1 }
 0x653   : > { %21029 = vmatmul.mubr.msk.f32.vlgmr.msra.gmra.mrb[80].mxu0 %vm3847_vm3, %v4537_v23  ;;  %v4387_v51 = vpop.xlane.xlu1 %4386  ;;  %22805 = vrcp.f32 %v4390_v2  ;;  %v22152_v2 = vpack.c.bf16 %v22512_v60, %v22511_v58 }
 0x654   : > { %22139 = vmatpush3.bf16.msra.mxu0 %v22136_v52  ;;  %22807 = vrcp.f32 %v4387_v51 }
 0x655   : > { %22145 = vmatprep.subr.bf16.mxu0 %v22144_v17 }
 0x656   : > { %v4405_v10 = vpop.xlane.xlu0 %4404  ;;  %v22800_v59 = vpop.eup %22799 }
 0x657   : > { %v4384_v57 = vpop.xlane.xlu1 %4383  ;;  %v4535_v36 = vmul.f32 %v22800_v59, %v25268_v41 }
 0x658   : > { %22809 = vrcp.f32 %v4384_v57 }
 0x659   : > { %22811 = vrcp.f32 %v4405_v10  ;;  %v28915_v10 = vld [vmem:[#allocation137_spill] sm:$0xff] }
 0x65a   : > { %v22802_v30 = vpop.eup %22801  ;;  %v4402_v42 = vpop.xlane.xlu0 %4401  ;;  %v22482_v57 = vunpack.i.h.bf16 %v28915_v10  ;;  %v22481_v59 = vunpack.i.l.bf16 %v28915_v10 }
 0x65b   : > { %22813 = vrcp.f32 %v4402_v42  ;;  %v4534_v55 = vmul.f32 %v22802_v30, %v25277_v46  ;;  %v22804_v40 = vpop.eup %22803 }
 0x65c   : > { %v4541_v46 = vmul.f32 %v22804_v40, %v25275_v9  ;;  %v22148_v1 = vpack.c.bf16 %v22482_v57, %v22481_v59  ;;  %v28916_v40 = vmov 0.0  }
 0x65d   : > { %v22806_v52 = vpop.eup %22805  ;;  %21021 = vmatprep.mubr.msk.f32.mxu1 %vm3847_vm3, %v4534_v55 }
 0x65e   : > { %21022 = vmatmul.mubr.msk.f32.vlgmr.msra.gmra.mrb[62].mxu1 %vm3847_vm3, %v4535_v36  ;;  %v25549_v35 = vpop.f32.mrb[58].mxu0  ;;  %v4540_v16 = vmul.f32 %v22806_v52, %v25284_v34  ;;  %v22808_v41 = vpop.eup %22807 }
 0x65f   : > { %28913 = vst [vmem:[#allocation129_spill] sm:$0xff] %v25549_v35  ;;  %22135 = vmatpush3.bf16.msra.mxu1 %v22132_v48  ;;  %v25552_v23 = vpop.f32.mrb[59].mxu0  ;;  %v4411_v61 = vpop.xlane.xlu0 %4410  ;;  %v4539_v9 = vmul.f32 %v22808_v41, %v25286_v32  ;;  %v29014_v35 = vld [vmem:[#allocation115_spill] sm:$0xff] }
 0x660   : > { %28914 = vst [vmem:[#allocation106_spill] sm:$0xff] %v25552_v23  ;;  %22141 = vmatprep.subr.bf16.mxu1 %v22140_v31  ;;  %21042 = vmatprep.mubr.msk.f32.mxu0 %vm3847_vm3, %v4540_v16  ;;  %v29015_v23 = vld [vmem:[#allocation79_spill] sm:$0xff] }
 0x661   : > { %21043 = vmatmul.mubr.msk.f32.vlgmr.msra.gmra.mrb[82].mxu0 %vm3847_vm3, %v4541_v46 }
 0x662   : > { %v22810_v51 = vpop.eup %22809  ;;  %22147 = vmatpush3.bf16.msra.mxu0 %v22144_v17 }
 0x663   : > { %v4399_v30 = vpop.xlane.xlu1 %4398  ;;  %22153 = vmatprep.subr.bf16.mxu0 %v22152_v2  ;;  %v4538_v34 = vmul.f32 %v22810_v51, %v25296_v28  ;;  %v22812_v48 = vpop.eup %22811 }
 0x664   : > { %22815 = vrcp.f32 %v4399_v30  ;;  %v4545_v17 = vmul.f32 %v22812_v48, %v25294_v37  ;;  %v4417_v32 = vpop.xlane.xlu0 %4416  ;;  %v28917_v37 = vld [vmem:[#allocation144_spill] sm:$0xff] }
 0x665   : > { %v22814_v27 = vpop.eup %22813  ;;  %21035 = vmatprep.mubr.msk.f32.mxu1 %vm3847_vm3, %v4538_v34  ;;  %v22542_v60 = vunpack.i.h.bf16 %v28917_v37  ;;  %v22541_v58 = vunpack.i.l.bf16 %v28917_v37 }
 0x666   : > { %21036 = vmatmul.mubr.msk.f32.vlgmr.msra.gmra.mrb[64].mxu1 %vm3847_vm3, %v4539_v9  ;;  %v4544_v42 = vmul.f32 %v22814_v27, %v25304_v14 }
 0x667   : > { %22143 = vmatpush3.bf16.msra.mxu1 %v22140_v31  ;;  %v4396_v55 = vpop.xlane.xlu1 %4395  ;;  %v22156_v57 = vpack.c.bf16 %v22542_v60, %v22541_v58  ;;  %v28950_v60 = vld [vmem:[#allocation110_spill] sm:$0xff]  ;;  %v28951_v58 = vld [vmem:[#allocation103_spill] sm:$0xff] }
 0x668   : > { %22817 = vrcp.f32 %v4396_v55  ;;  %22149 = vmatprep.subr.bf16.mxu1 %v22148_v1  ;;  %21056 = vmatprep.mubr.msk.f32.mxu0 %vm3847_vm3, %v4544_v42  ;;  %v4423_v36 = vpop.xlane.xlu0 %4422  ;;  %v28933_v42 = vld [vmem:[#allocation91_spill] sm:$0xff] }
 0x669   : > { %21057 = vmatmul.mubr.msk.f32.vlgmr.msra.gmra.mrb[84].mxu0 %vm3847_vm3, %v4545_v17  ;;  %22819 = vrcp.f32 %v4411_v61  ;;  %v28934_v55 = vld [vmem:[#allocation87_spill] sm:$0xff]  ;;  %v28941_v17 = vld [vmem:[#allocation132_spill] sm:$0xff] }
 0x66a   : > { %22155 = vmatpush3.bf16.msra.mxu0 %v22152_v2 }
 0x66b   : > { %v4408_v28 = vpop.xlane.xlu1 %4407  ;;  %21080 = vmatprep.subr.mxu0 %v28916_v40 }
 0x66c   : > { %22821 = vrcp.f32 %v4408_v28  ;;  %v28944_v28 = vld [vmem:[#allocation92_spill] sm:$0xff] }
 0x66d   : > { %22823 = vrcp.f32 %v4417_v32  ;;  %v28942_v32 = vld [vmem:[#allocation21_spill] sm:$0xff] }
 0x66e   : > { %v22816_v52 = vpop.eup %22815 }
 0x66f   : > { %v4414_v14 = vpop.xlane.xlu1 %4413  ;;  %v4543_v41 = vmul.f32 %v22816_v52, %v25326_v12 }
 0x670   : > { %22825 = vrcp.f32 %v4414_v14  ;;  %v28945_v14 = vld [vmem:[#allocation148_spill] sm:$0xff] }
 0x671   : > { %22827 = vrcp.f32 %v4423_v36  ;;  %v28946_v36 = vld [vmem:[#allocation36_spill] sm:$0xff] }
 0x672   : > { %v22818_v49 = vpop.eup %22817 }
 0x673   : > { %v4420_v31 = vpop.xlane.xlu1 %4419  ;;  %v4542_v16 = vmul.f32 %v22818_v49, %v25335_v54  ;;  %v25571_v46 = vpop.f32.mrb[42].mxu1  ;;  %v28948_v49 = vld [vmem:[#allocation26_spill] sm:$0xff] }
 0x674   : > { %28918 = vst [vmem:[#allocation127_spill] sm:$0xff] %v25571_v46  ;;  %22829 = vrcp.f32 %v4420_v31  ;;  %v22820_v2 = vpop.eup %22819  ;;  %v25574_v51 = vpop.f32.mrb[43].mxu1  ;;  %v28952_v31 = vld [vmem:[#allocation56_spill] sm:$0xff] }
 0x675   : > { %28919 = vst [vmem:[#allocation98_spill] sm:$0xff] %v25574_v51  ;;  %21049 = vmatprep.mubr.msk.f32.mxu1 %vm3847_vm3, %v4542_v16  ;;  %v4547_v34 = vmul.f32 %v22820_v2, %v25313_v33  ;;  %v28953_v16 = vld [vmem:[#allocation45_spill] sm:$0xff]  ;;  %v29013_v51 = vld [vmem:[#allocation122_spill] sm:$0xff] }
 0x676   : > { %v22822_v10 = vpop.eup %22821  ;;  %21050 = vmatmul.mubr.msk.f32.vlgmr.msra.gmra.mrb[66].mxu1 %vm3847_vm3, %v4543_v41  ;;  %v28954_v41 = vld [vmem:[#allocation125_spill] sm:$0xff] }
 0x677   : > { %22151 = vmatpush3.bf16.msra.mxu1 %v22148_v1  ;;  %v25578_v59 = vpop.f32.mrb[60].mxu0  ;;  %v4546_v30 = vmul.f32 %v22822_v10, %v25343_v19  ;;  %v22824_v12 = vpop.eup %22823  ;;  %v28931_v1 = vld [vmem:[#allocation70_spill] sm:$0xff]  ;;  %v28955_v2 = vld [vmem:[#allocation117_spill] sm:$0xff] }
 0x678   : > { %28920 = vst [vmem:[#allocation150_spill] sm:$0xff] %v25578_v59  ;;  %22157 = vmatprep.subr.bf16.mxu1 %v22156_v57  ;;  %v25581_v54 = vpop.f32.mrb[61].mxu0  ;;  %v4549_v9 = vmul.f32 %v22824_v12, %v25324_v63  ;;  %v28956_v10 = vld [vmem:[#allocation74_spill] sm:$0xff]  ;;  %v29009_v59 = vld [vmem:[#allocation49_spill] sm:$0xff] }
 0x679   : > { %28921 = vst [vmem:[#allocation154_spill] sm:$0xff] %v25581_v54  ;;  %21063 = vmatprep.mubr.msk.f32.mxu1 %vm3847_vm3, %v4546_v30  ;;  %v28958_v30 = vld [vmem:[#allocation140_spill] sm:$0xff]  ;;  %v28960_v12 = vld [vmem:[#allocation22_spill] sm:$0xff] }
 0x67a   : > { %v22826_v48 = vpop.eup %22825  ;;  %21064 = vmatmul.mubr.msk.f32.vlgmr.msra.gmra.mrb[68].mxu1 %vm3847_vm3, %v4547_v34  ;;  %v28959_v34 = vld [vmem:[#allocation133_spill] sm:$0xff] }
 0x67b   : > { %22159 = vmatpush3.bf16.msra.mxu1 %v22156_v57  ;;  %v4548_v61 = vmul.f32 %v22826_v48, %v25351_v15  ;;  %v22828_v27 = vpop.eup %22827  ;;  %v28922_v15 = vld [vmem:[#allocation23_spill] sm:$0xff]  ;;  %v28957_v57 = vld [vmem:[#allocation61_spill] sm:$0xff]  ;;  %v28961_v48 = vld [vmem:[#allocation82_spill] sm:$0xff] }
 0x67c   : > { %21085 = vmatprep.subr.mxu1 %v28916_v40  ;;  %v4551_v63 = vmul.f32 %v22828_v27, %v25333_v22  ;;  %v28923_v22 = vld [vmem:[#allocation39_spill] sm:$0xff]  ;;  %v28964_v27 = vld [vmem:[#allocation149_spill] sm:$0xff] }
 0x67d   : > { %21070 = vmatprep.mubr.msk.f32.mxu0 %vm3847_vm3, %v4548_v61  ;;  %v28962_v61 = vld [vmem:[#allocation93_spill] sm:$0xff] }
 0x67e   : > { %v22830_v19 = vpop.eup %22829  ;;  %21071 = vmatmul.mubr.msk.f32.vlgmr.msra.gmra.mrb[86].mxu0 %vm3847_vm3, %v4549_v9 }
 0x67f   : > { %21081 = vmatpush3.xpose.msk.msra.mxu0 %vm1066_vm1, %v28880_v25  ;;  %v4550_v33 = vmul.f32 %v22830_v19, %v25358_v8  ;;  %21082 = vmatprep.mubr.msk.f32.mxu0 %vm23182_vm4, %v28916_v40  ;;  %v28924_v8 = vld [vmem:[#allocation33_spill] sm:$0xff]  ;;  %v28925_v25 = vld [vmem:[#allocation58_spill] sm:$0xff] }
 0x680   : > { %21090 = vmatprep.subr.mxu0 %v28916_v40  ;;  %v28965_v19 = vld [vmem:[#allocation38_spill] sm:$0xff] }
 0x681   : > { %21077 = vmatprep.mubr.msk.f32.mxu1 %vm3847_vm3, %v4550_v33 }
 0x682   : > { %21078 = vmatmul.mubr.msk.f32.vlgmr.msra.gmra.mrb[70].mxu1 %vm3847_vm3, %v4551_v63  ;;  %21083 = vmatmul.mubr.msk.f32.vlgmr.msra.gmra.mrb[88].mxu0 %vm1066_vm1, %v28922_v15  ;;  %v28967_v63 = vld [vmem:[#allocation28_spill] sm:$0xff]  ;;  %v25792_v15 = vpop.permute.xlu1 %7665 }
 0x683   : > { %21091 = vmatpush3.xpose.msk.msra.mxu0 %vm1066_vm1, %v28882_v50  ;;  %21087 = vmatprep.mubr.msk.f32.mxu1 %vm23182_vm4, %v28916_v40  ;;  %v28926_v50 = vld [vmem:[#allocation50_spill] sm:$0xff]  ;;  %28968 = vst [vmem:[#allocation118_spill] sm:$0xff] %v25792_v15 }
 0x684   : > { %21086 = vmatpush3.xpose.msk.msra.mxu1 %vm1066_vm1, %v28886_v7  ;;  %21092 = vmatprep.mubr.msk.f32.mxu0 %vm23182_vm4, %v28916_v40 }
 0x685   : > { %21100 = vmatprep.subr.mxu0 %v28916_v40  ;;  %21095 = vmatprep.subr.mxu1 %v28916_v40 }
 0x686   : > { %21093 = vmatmul.mubr.msk.f32.vlgmr.msra.gmra.mrb[90].mxu0 %vm1066_vm1, %v28923_v22  ;;  %v25797_v22 = vpop.permute.xlu0 %11565 }
 0x687   : > { %21088 = vmatmul.mubr.msk.f32.vlgmr.msra.gmra.mrb[72].mxu1 %vm1066_vm1, %v28924_v8  ;;  %21101 = vmatpush3.xpose.msk.msra.mxu0 %vm1066_vm1, %v28889_v18  ;;  %v28929_v18 = vld [vmem:[#allocation77_spill] sm:$0xff]  ;;  %v28969_v8 = vld [vmem:[#allocation112_spill] sm:$0xff] }
 0x688   : > { %21096 = vmatpush3.xpose.msk.msra.mxu1 %vm1066_vm1, %v28884_v47  ;;  %21097 = vmatprep.mubr.msk.f32.mxu1 %vm23182_vm4, %v28916_v40 }
 0x689   : > { %21102 = vmatprep.mubr.msk.f32.mxu0 %vm23182_vm4, %v28916_v40  ;;  %21110 = vmatprep.subr.mxu0 %v28916_v40 }
 0x68a   : > { %21103 = vmatmul.mubr.msk.f32.vlgmr.msra.gmra.mrb[92].mxu0 %vm1066_vm1, %v28925_v25  ;;  %21105 = vmatprep.subr.mxu1 %v28916_v40  ;;  %v28970_v25 = vld [vmem:[#allocation105_spill] sm:$0xff] }
 0x68b   : > { %21098 = vmatmul.mubr.msk.f32.vlgmr.msra.gmra.mrb[74].mxu1 %vm1066_vm1, %v28926_v50  ;;  %21111 = vmatpush3.xpose.msk.msra.mxu0 %vm1066_vm1, %v28892_v5  ;;  %v28971_v50 = vld [vmem:[#allocation57_spill] sm:$0xff] }
 0x68c   : > { %v25632_v47 = vpop.f32.mrb[44].mxu1  ;;  %21106 = vmatpush3.xpose.msk.msra.mxu1 %vm1066_vm1, %v28887_v62  ;;  %21107 = vmatprep.mubr.msk.f32.mxu1 %vm23182_vm4, %v28916_v40 }
 0x68d   : > { %28927 = vst [vmem:[#allocation157_spill] sm:$0xff] %v25632_v47  ;;  %v25638_v7 = vpop.f32.mrb[45].mxu1  ;;  %21112 = vmatprep.mubr.msk.f32.mxu0 %vm23182_vm4, %v28916_v40  ;;  %21120 = vmatprep.subr.mxu0 %v28916_v40  ;;  %v29005_v47 = vld [vmem:[#allocation31_spill] sm:$0xff] }
 0x68e   : > { %28928 = vst [vmem:[#allocation111_spill] sm:$0xff] %v25638_v7  ;;  %21113 = vmatmul.mubr.msk.f32.vlgmr.msra.gmra.mrb[94].mxu0 %vm1066_vm1, %v28929_v18  ;;  %21115 = vmatprep.subr.mxu1 %v28916_v40  ;;  %v25646_v5 = vpop.f32.mrb[62].mxu0  ;;  %v28972_v18 = vld [vmem:[#allocation47_spill] sm:$0xff]  ;;  %v29008_v7 = vld [vmem:[#allocation62_spill] sm:$0xff] }
 0x68f   : > { %28930 = vst [vmem:[#allocation153_spill] sm:$0xff] %v25646_v5  ;;  %21108 = vmatmul.mubr.msk.f32.vlgmr.msra.gmra.mrb[76].mxu1 %vm1066_vm1, %v28931_v1  ;;  %21121 = vmatpush3.xpose.msk.msra.mxu0 %vm1066_vm1, %v28890_v43  ;;  %v25652_v62 = vpop.f32.mrb[63].mxu0  ;;  %v28935_v43 = vld [vmem:[#allocation109_spill] sm:$0xff]  ;;  %v28973_v1 = vld [vmem:[#allocation128_spill] sm:$0xff] }
 0x690   : > { %28932 = vst [vmem:[#allocation158_spill] sm:$0xff] %v25652_v62  ;;  %21116 = vmatpush3.xpose.msk.msra.mxu1 %vm1066_vm1, %v28895_v3  ;;  %21117 = vmatprep.mubr.msk.f32.mxu1 %vm23182_vm4, %v28916_v40  ;;  %v28936_v3 = vld [vmem:[#allocation101_spill] sm:$0xff]  ;;  %v29003_v5 = vld [vmem:[#allocation40_spill] sm:$0xff] }
 0x691   : > { %21122 = vmatprep.mubr.msk.f32.mxu0 %vm23182_vm4, %v28916_v40  ;;  %21130 = vmatprep.subr.mxu0 %v28916_v40 }
 0x692   : > { %21123 = vmatmul.mubr.msk.f32.vlgmr.msra.gmra.mrb[96].mxu0 %vm1066_vm1, %v28933_v42  ;;  %21125 = vmatprep.subr.mxu1 %v28916_v40 }
 0x693   : > { %21118 = vmatmul.mubr.msk.f32.vlgmr.msra.gmra.mrb[78].mxu1 %vm1066_vm1, %v28934_v55  ;;  %21131 = vmatpush3.xpose.msk.msra.mxu0 %vm1066_vm1, %v28897_v13  ;;  %v28938_v13 = vld [vmem:[#allocation116_spill] sm:$0xff]  ;;  %v25818_v55 = vpop.permute.xlu1 %11641 }
 0x694   : > { %21126 = vmatpush3.xpose.msk.msra.mxu1 %vm1066_vm1, %v28893_v39  ;;  %21127 = vmatprep.mubr.msk.f32.mxu1 %vm23182_vm4, %v28916_v40  ;;  %v28937_v39 = vld [vmem:[#allocation123_spill] sm:$0xff] }
 0x695   : > { %21132 = vmatprep.mubr.msk.f32.mxu0 %vm23182_vm4, %v28916_v40  ;;  %21140 = vmatprep.subr.mxu0 %v28916_v40 }
 0x696   : > { %21133 = vmatmul.mubr.msk.f32.vlgmr.msra.gmra.mrb[98].mxu0 %vm1066_vm1, %v28935_v43  ;;  %21135 = vmatprep.subr.mxu1 %v28916_v40  ;;  %v28975_v43 = vld [vmem:[#allocation119_spill] sm:$0xff] }
 0x697   : > { %21128 = vmatmul.mubr.msk.f32.vlgmr.msra.gmra.mrb[80].mxu1 %vm1066_vm1, %v28936_v3  ;;  %21141 = vmatpush3.xpose.msk.msra.mxu0 %vm1066_vm1, %v28896_v56  ;;  %v28939_v56 = vld [vmem:[#allocation72_spill] sm:$0xff]  ;;  %v28976_v3 = vld [vmem:[#allocation75_spill] sm:$0xff] }
 0x698   : > { %21136 = vmatpush3.xpose.msk.msra.mxu1 %vm1066_vm1, %v28900_v38  ;;  %21137 = vmatprep.mubr.msk.f32.mxu1 %vm23182_vm4, %v28916_v40  ;;  %v28940_v38 = vld [vmem:[#allocation139_spill] sm:$0xff] }
 0x699   : > { %21142 = vmatprep.mubr.msk.f32.mxu0 %vm23182_vm4, %v28916_v40  ;;  %21150 = vmatprep.subr.mxu0 %v28916_v40 }
 0x69a   : > { %21143 = vmatmul.mubr.msk.f32.vlgmr.msra.gmra.mrb[100].mxu0 %vm1066_vm1, %v28937_v39  ;;  %21145 = vmatprep.subr.mxu1 %v28916_v40 }
 0x69b   : > { %21138 = vmatmul.mubr.msk.f32.vlgmr.msra.gmra.mrb[82].mxu1 %vm1066_vm1, %v28938_v13  ;;  %21151 = vmatpush3.xpose.msk.msra.mxu0 %vm1066_vm1, %v28939_v56  ;;  %v25826_v13 = vpop.permute.xlu0 %7667 }
 0x69c   : > { %21146 = vmatpush3.xpose.msk.msra.mxu1 %vm1066_vm1, %v28898_v0  ;;  %21147 = vmatprep.mubr.msk.f32.mxu1 %vm23182_vm4, %v28916_v40  ;;  %v28943_v0 = vld [vmem:[#allocation80_spill] sm:$0xff]  ;;  %28978 = vst [vmem:[#allocation85_spill] sm:$0xff] %v25826_v13 }
 0x69d   : > { %21152 = vmatprep.mubr.msk.f32.mxu0 %vm23182_vm4, %v28916_v40  ;;  %21160 = vmatprep.subr.mxu0 %v28916_v40 }
 0x69e   : > { %21153 = vmatmul.mubr.msk.f32.vlgmr.msra.gmra.mrb[102].mxu0 %vm1066_vm1, %v28940_v38  ;;  %21155 = vmatprep.subr.mxu1 %v28916_v40  ;;  %v28979_v38 = vld [vmem:[#allocation63_spill] sm:$0xff] }
 0x69f   : > { %21148 = vmatmul.mubr.msk.f32.vlgmr.msra.gmra.mrb[84].mxu1 %vm1066_vm1, %v28941_v17  ;;  %21161 = vmatpush3.xpose.msk.msra.mxu0 %vm1066_vm1, %v28942_v32  ;;  %v28980_v17 = vld [vmem:[#allocation141_spill] sm:$0xff] }
 0x6a0   : > { %21156 = vmatpush3.xpose.msk.msra.mxu1 %vm1066_vm1, %v28943_v0  ;;  %21157 = vmatprep.mubr.msk.f32.mxu1 %vm23182_vm4, %v28916_v40 }
 0x6a1   : > { %21162 = vmatprep.mubr.msk.f32.mxu0 %vm23182_vm4, %v28916_v40  ;;  %21170 = vmatprep.subr.mxu0 %v28916_v40 }
 0x6a2   : > { %21163 = vmatmul.mubr.msk.f32.vlgmr.msra.gmra.mrb[104].mxu0 %vm1066_vm1, %v28944_v28  ;;  %21165 = vmatprep.subr.mxu1 %v28916_v40  ;;  %v28981_v28 = vld [vmem:[#allocation135_spill] sm:$0xff] }
 0x6a3   : > { %21158 = vmatmul.mubr.msk.f32.vlgmr.msra.gmra.mrb[86].mxu1 %vm1066_vm1, %v28945_v14  ;;  %21171 = vmatpush3.xpose.msk.msra.mxu0 %vm1066_vm1, %v28946_v36  ;;  %v25724_v52 = vpop.f32.mrb[46].mxu1 }
 0x6a4   : > { %28947 = vst [vmem:[#allocation151_spill] sm:$0xff] %v25724_v52  ;;  %21166 = vmatpush3.xpose.msk.msra.mxu1 %vm1066_vm1, %v28948_v49  ;;  %v25728_v37 = vpop.f32.mrb[47].mxu1  ;;  %21167 = vmatprep.mubr.msk.f32.mxu1 %vm23182_vm4, %v28916_v40  ;;  %v29000_v52 = vld [vmem:[#allocation25_spill] sm:$0xff] }
 0x6a5   : > { %28949 = vst [vmem:[#allocation155_spill] sm:$0xff] %v25728_v37  ;;  %21172 = vmatprep.mubr.msk.f32.mxu0 %vm23182_vm4, %v28916_v40  ;;  %21180 = vmatprep.subr.mxu0 %v28916_v40  ;;  %v29002_v37 = vld [vmem:[#allocation78_spill] sm:$0xff] }
 0x6a6   : > { %21173 = vmatmul.mubr.msk.f32.vlgmr.msra.gmra.mrb[106].mxu0 %vm1066_vm1, %v28950_v60  ;;  %21175 = vmatprep.subr.mxu1 %v28916_v40  ;;  %v28983_v60 = vld [vmem:[#allocation84_spill] sm:$0xff] }
 0x6a7   : > { %21168 = vmatmul.mubr.msk.f32.vlgmr.msra.gmra.mrb[88].mxu1 %vm1066_vm1, %v28951_v58  ;;  %21181 = vmatpush3.xpose.msk.msra.mxu0 %vm1066_vm1, %v28952_v31 }
 0x6a8   : > { %21176 = vmatpush3.xpose.msk.msra.mxu1 %vm1066_vm1, %v28953_v16  ;;  %21177 = vmatprep.mubr.msk.f32.mxu1 %vm23182_vm4, %v28916_v40 }
 0x6a9   : > { %21182 = vmatprep.mubr.msk.f32.mxu0 %vm23182_vm4, %v28916_v40  ;;  %21190 = vmatprep.subr.mxu0 %v28916_v40 }
 0x6aa   : > { %21183 = vmatmul.mubr.msk.f32.vlgmr.msra.gmra.mrb[108].mxu0 %vm1066_vm1, %v28954_v41  ;;  %21185 = vmatprep.subr.mxu1 %v28916_v40  ;;  %v25850_v41 = vpop.permute.xlu1 %7669 }
 0x6ab   : > { %21178 = vmatmul.mubr.msk.f32.vlgmr.msra.gmra.mrb[90].mxu1 %vm1066_vm1, %v28955_v2  ;;  %21191 = vmatpush3.xpose.msk.msra.mxu0 %vm1066_vm1, %v28956_v10  ;;  %28985 = vst [vmem:[#allocation41_spill] sm:$0xff] %v25850_v41  ;;  %v25855_v2 = vpop.permute.xlu0 %11717 }
 0x6ac   : > { %21186 = vmatpush3.xpose.msk.msra.mxu1 %vm1066_vm1, %v28957_v57  ;;  %21187 = vmatprep.mubr.msk.f32.mxu1 %vm23182_vm4, %v28916_v40 }
 0x6ad   : > { %21192 = vmatprep.mubr.msk.f32.mxu0 %vm23182_vm4, %v28916_v40  ;;  %21200 = vmatprep.subr.mxu0 %v28916_v40 }
 0x6ae   : > { %21193 = vmatmul.mubr.msk.f32.vlgmr.msra.gmra.mrb[110].mxu0 %vm1066_vm1, %v28958_v30  ;;  %21195 = vmatprep.subr.mxu1 %v28916_v40  ;;  %v28986_v30 = vld [vmem:[#allocation19_spill] sm:$0xff] }
 0x6af   : > { %21188 = vmatmul.mubr.msk.f32.vlgmr.msra.gmra.mrb[92].mxu1 %vm1066_vm1, %v28959_v34  ;;  %21201 = vmatpush3.xpose.msk.msra.mxu0 %vm1066_vm1, %v28960_v12  ;;  %v28987_v34 = vld [vmem:[#allocation146_spill] sm:$0xff] }
 0x6b0   : > { %21196 = vmatpush3.xpose.msk.msra.mxu1 %vm1066_vm1, %v28961_v48  ;;  %21197 = vmatprep.mubr.msk.f32.mxu1 %vm23182_vm4, %v28916_v40 }
 0x6b1   : > { %21202 = vmatprep.mubr.msk.f32.mxu0 %vm23182_vm4, %v28916_v40  ;;  %21210 = vmatprep.subr.mxu0 %v28916_v40 }
 0x6b2   : > { %21203 = vmatmul.mubr.msk.f32.vlgmr.msra.gmra.mrb[112].mxu0 %vm1066_vm1, %v28962_v61  ;;  %21205 = vmatprep.subr.mxu1 %v28916_v40  ;;  %v25780_v9 = vpop.f32.mrb[64].mxu0 }
 0x6b3   : > { %28963 = vst [vmem:[#allocation156_spill] sm:$0xff] %v25780_v9  ;;  %21198 = vmatmul.mubr.msk.f32.vlgmr.msra.gmra.mrb[94].mxu1 %vm1066_vm1, %v28964_v27  ;;  %21211 = vmatpush3.xpose.msk.msra.mxu0 %vm1066_vm1, %v28965_v19  ;;  %v25786_v33 = vpop.f32.mrb[65].mxu0 }
 0x6b4   : > { %28966 = vst [vmem:[#allocation152_spill] sm:$0xff] %v25786_v33  ;;  %21206 = vmatpush3.xpose.msk.msra.mxu1 %vm1066_vm1, %v28967_v63  ;;  %21207 = vmatprep.mubr.msk.f32.mxu1 %vm23182_vm4, %v28916_v40 }
 0x6b5   : > { %21212 = vmatprep.mubr.msk.f32.mxu0 %vm23182_vm4, %v28916_v40  ;;  %21220 = vmatprep.subr.mxu0 %v28916_v40 }
 0x6b6   : > { %21213 = vmatmul.mubr.msk.f32.vlgmr.msra.gmra.mrb[114].mxu0 %vm1066_vm1, %v28969_v8  ;;  %21215 = vmatprep.subr.mxu1 %v28916_v40  ;;  %v28990_v8 = vld [vmem:[#allocation37_spill] sm:$0xff] }
 0x6b7   : > { %21208 = vmatmul.mubr.msk.f32.vlgmr.msra.gmra.mrb[96].mxu1 %vm1066_vm1, %v28970_v25  ;;  %21221 = vmatpush3.xpose.msk.msra.mxu0 %vm1066_vm1, %v28971_v50  ;;  %v25878_v25 = vpop.permute.xlu1 %11793 }
 0x6b8   : > { %21216 = vmatpush3.xpose.msk.msra.mxu1 %vm1066_vm1, %v28972_v18  ;;  %21217 = vmatprep.mubr.msk.f32.mxu1 %vm23182_vm4, %v28916_v40 }
 0x6b9   : > { %21222 = vmatprep.mubr.msk.f32.mxu0 %vm23182_vm4, %v28916_v40  ;;  %21230 = vmatprep.subr.mxu0 %v28916_v40 }
 0x6ba   : > { %21223 = vmatmul.mubr.msk.f32.vlgmr.msra.gmra.mrb[116].mxu0 %vm1066_vm1, %v28973_v1  ;;  %21225 = vmatprep.subr.mxu1 %v28916_v40  ;;  %v25816_v42 = vpop.f32.mrb[66].mxu0  ;;  %v28991_v1 = vld [vmem:[#allocation30_spill] sm:$0xff] }
 0x6bb   : > { %28974 = vst [vmem:[#allocation159_spill] sm:$0xff] %v25816_v42  ;;  %21218 = vmatmul.mubr.msk.f32.vlgmr.msra.gmra.mrb[98].mxu1 %vm1066_vm1, %v28975_v43  ;;  %21231 = vmatpush3.xpose.msk.msra.mxu0 %vm1066_vm1, %v28976_v3  ;;  %v25824_v39 = vpop.f32.mrb[67].mxu0  ;;  %v25884_v43 = vpop.permute.xlu0 %7671 }
 0x6bc   : > { %28977 = vst [vmem:[#allocation124_spill] sm:$0xff] %v25824_v39  ;;  %21226 = vmatpush3.xpose.msk.msra.mxu1 %vm1066_vm1, %v28979_v38  ;;  %21227 = vmatprep.mubr.msk.f32.mxu1 %vm23182_vm4, %v28916_v40  ;;  %28992 = vst [vmem:[#allocation53_spill] sm:$0xff] %v25884_v43 }
 0x6bd   : > { %21232 = vmatprep.mubr.msk.f32.mxu0 %vm23182_vm4, %v28916_v40  ;;  %21240 = vmatprep.subr.mxu0 %v28916_v40 }
 0x6be   : > { %21233 = vmatmul.mubr.msk.f32.vlgmr.msra.gmra.mrb[118].mxu0 %vm1066_vm1, %v28980_v17  ;;  %21235 = vmatprep.subr.mxu1 %v28916_v40  ;;  %v28993_v17 = vld [vmem:[#allocation54_spill] sm:$0xff] }
 0x6bf   : > { %21228 = vmatmul.mubr.msk.f32.vlgmr.msra.gmra.mrb[100].mxu1 %vm1066_vm1, %v28981_v28  ;;  %21241 = vmatpush3.xpose.msk.msra.mxu0 %vm1066_vm1, %v28870_v29  ;;  %v25842_v14 = vpop.f32.mrb[48].mxu1 }
 0x6c0   : > { %28982 = vst [vmem:[#allocation134_spill] sm:$0xff] %v25842_v14  ;;  %21236 = vmatpush3.xpose.msk.msra.mxu1 %vm1066_vm1, %v28983_v60  ;;  %v25846_v58 = vpop.f32.mrb[49].mxu1  ;;  %21237 = vmatprep.mubr.msk.f32.mxu1 %vm23182_vm4, %v28916_v40  ;;  %v29029_v14 = vld [vmem:[#allocation51_spill] sm:$0xff] }
 0x6c1   : > { %28984 = vst [vmem:[#allocation48_spill] sm:$0xff] %v25846_v58  ;;  %21242 = vmatprep.mubr.msk.f32.mxu0 %vm23182_vm4, %v28916_v40  ;;  %21250 = vmatprep.subr.mxu0 %v28916_v40 }
 0x6c2   : > { %21243 = vmatmul.mubr.msk.f32.vlgmr.msra.gmra.mrb[120].mxu0 %vm1066_vm1, %v28986_v30  ;;  %21245 = vmatprep.subr.mxu1 %v28916_v40  ;;  %v28995_v30 = vld [vmem:[#allocation46_spill] sm:$0xff] }
 0x6c3   : > { %21238 = vmatmul.mubr.msk.f32.vlgmr.msra.gmra.mrb[102].mxu1 %vm1066_vm1, %v28987_v34  ;;  %21251 = vmatpush3.xpose.msk.msra.mxu0 %vm1066_vm1, %v28871_v44  ;;  %v25864_v61 = vpop.f32.mrb[50].mxu1 }
 0x6c4   : > { %28988 = vst [vmem:[#allocation95_spill] sm:$0xff] %v25864_v61  ;;  %21246 = vmatpush3.xpose.msk.msra.mxu1 %vm1066_vm1, %v28868_v24  ;;  %v25868_v27 = vpop.f32.mrb[51].mxu1  ;;  %21247 = vmatprep.mubr.msk.f32.mxu1 %vm23182_vm4, %v28916_v40  ;;  %v29024_v61 = vld [vmem:[#allocation42_spill] sm:$0xff] }
 0x6c5   : > { %28989 = vst [vmem:[#allocation64_spill] sm:$0xff] %v25868_v27  ;;  %21252 = vmatprep.mubr.msk.f32.mxu0 %vm23182_vm4, %v28916_v40  ;;  %21260 = vmatprep.subr.mxu0 %v28916_v40 }
 0x6c6   : > { %21253 = vmatmul.mubr.msk.f32.vlgmr.msra.gmra.mrb[122].mxu0 %vm1066_vm1, %v28990_v8  ;;  %21255 = vmatprep.subr.mxu1 %v28916_v40  ;;  %v25908_v8 = vpop.permute.xlu1 %7673 }
 0x6c7   : > { %21248 = vmatmul.mubr.msk.f32.vlgmr.msra.gmra.mrb[104].mxu1 %vm1066_vm1, %v28991_v1  ;;  %21261 = vmatpush3.xpose.msk.msra.mxu0 %vm1066_vm1, %v28860_v45  ;;  %28997 = vst [vmem:[#allocation69_spill] sm:$0xff] %v25908_v8  ;;  %v25913_v1 = vpop.permute.xlu0 %11869 }
 0x6c8   : > { %21256 = vmatpush3.xpose.msk.msra.mxu1 %vm1066_vm1, %v28873_v26  ;;  %21257 = vmatprep.mubr.msk.f32.mxu1 %vm23182_vm4, %v28916_v40 }
 0x6c9   : > { %21262 = vmatprep.mubr.msk.f32.mxu0 %vm23182_vm4, %v28916_v40  ;;  %21270 = vmatprep.subr.mxu0 %v28916_v40 }
 0x6ca   : > { %21263 = vmatmul.mubr.msk.f32.vlgmr.msra.gmra.mrb[124].mxu0 %vm1066_vm1, %v28993_v17  ;;  %21265 = vmatprep.subr.mxu1 %v28916_v40  ;;  %v25896_v28 = vpop.f32.mrb[68].mxu0  ;;  %v28998_v17 = vld [vmem:[#allocation73_spill] sm:$0xff] }
 0x6cb   : > { %28994 = vst [vmem:[#allocation81_spill] sm:$0xff] %v25896_v28  ;;  %21258 = vmatmul.mubr.msk.f32.vlgmr.msra.gmra.mrb[106].mxu1 %vm1066_vm1, %v28995_v30  ;;  %21271 = vmatpush3.xpose.msk.msra.mxu0 %vm1066_vm1, %v28864_v11  ;;  %v25902_v34 = vpop.f32.mrb[69].mxu0  ;;  %v28999_v30 = vld [vmem:[#allocation66_spill] sm:$0xff]  ;;  %v25938_v62 = vpop.permute.xlu0 %7675  ;;  %v29021_v28 = vld [vmem:[#allocation89_spill] sm:$0xff] }
 0x6cc   : > { %28996 = vst [vmem:[#allocation100_spill] sm:$0xff] %v25902_v34  ;;  %21266 = vmatpush3.xpose.msk.msra.mxu1 %vm1066_vm1, %v28859_v20  ;;  %21267 = vmatprep.mubr.msk.f32.mxu1 %vm23182_vm4, %v28916_v40  ;;  %29004 = vst [vmem:[#allocation160_spill] sm:$0xff] %v25938_v62  ;;  %v29027_v34 = vld [vmem:[#allocation107_spill] sm:$0xff] }
 0x6cd   : > { %21272 = vmatprep.mubr.msk.f32.mxu0 %vm23182_vm4, %v28916_v40  ;;  %21280 = vmatprep.subr.mxu0 %v28916_v40 }
 0x6ce   : > { %21273 = vmatmul.mubr.msk.f32.vlgmr.msra.gmra.mrb[126].mxu0 %vm1066_vm1, %v28998_v17  ;;  %21275 = vmatprep.subr.mxu1 %v28916_v40  ;;  %v29001_v17 = vld [vmem:[#allocation88_spill] sm:$0xff] }
 0x6cf   : > { %21268 = vmatmul.mubr.msk.f32.vlgmr.msra.gmra.mrb[108].mxu1 %vm1066_vm1, %v28999_v30  ;;  %21281 = vmatpush3.xpose.msk.msra.mxu0 %vm1066_vm1, %v29000_v52  ;;  %v25932_v30 = vpop.permute.xlu1 %11945 }
 0x6d0   : > { %21276 = vmatpush3.xpose.msk.msra.mxu1 %vm1066_vm1, %v28863_v4  ;;  %21277 = vmatprep.mubr.msk.f32.mxu1 %vm23182_vm4, %v28916_v40 }
 0x6d1   : > { %21282 = vmatprep.mubr.msk.f32.mxu0 %vm23182_vm4, %v28916_v40  ;;  %21290 = vmatprep.subr.mxu0 %v28916_v40 }
 0x6d2   : > { %21283 = vmatmul.mubr.msk.f32.vlgmr.msra.gmra.mrb[128].mxu0 %vm1066_vm1, %v29001_v17  ;;  %21285 = vmatprep.subr.mxu1 %v28916_v40  ;;  %v29006_v17 = vld [vmem:[#allocation104_spill] sm:$0xff] }
 0x6d3   : > { %21278 = vmatmul.mubr.msk.f32.vlgmr.msra.gmra.mrb[110].mxu1 %vm1066_vm1, %v29002_v37  ;;  %21291 = vmatpush3.xpose.msk.msra.mxu0 %vm1066_vm1, %v29003_v5  ;;  %v29007_v37 = vld [vmem:[#allocation97_spill] sm:$0xff]  ;;  %v25958_v54 = vpop.permute.xlu1 %12021 }
 0x6d4   : > { %21286 = vmatpush3.xpose.msk.msra.mxu1 %vm1066_vm1, %v29005_v47  ;;  %21287 = vmatprep.mubr.msk.f32.mxu1 %vm23182_vm4, %v28916_v40 }
 0x6d5   : > { %21292 = vmatprep.mubr.msk.f32.mxu0 %vm23182_vm4, %v28916_v40  ;;  %21300 = vmatprep.subr.mxu0 %v28916_v40 }
 0x6d6   : > { %21293 = vmatmul.mubr.msk.f32.vlgmr.msra.gmra.mrb[130].mxu0 %vm1066_vm1, %v29006_v17  ;;  %21295 = vmatprep.subr.mxu1 %v28916_v40  ;;  %v25965_v17 = vpop.permute.xlu0 %7677 }
 0x6d7   : > { %21288 = vmatmul.mubr.msk.f32.vlgmr.msra.gmra.mrb[112].mxu1 %vm1066_vm1, %v29007_v37  ;;  %21301 = vmatpush3.xpose.msk.msra.mxu0 %vm1066_vm1, %v29008_v7  ;;  %29011 = vst [vmem:[#allocation29_spill] sm:$0xff] %v25965_v17 }
 0x6d8   : > { %21296 = vmatpush3.xpose.msk.msra.mxu1 %vm1066_vm1, %v29009_v59  ;;  %21297 = vmatprep.mubr.msk.f32.mxu1 %vm23182_vm4, %v28916_v40 }
 0x6d9   : > { %v25960_v46 = vpop.f32.mrb[52].mxu1  ;;  %21302 = vmatprep.mubr.msk.f32.mxu0 %vm23182_vm4, %v28916_v40  ;;  %21310 = vmatprep.subr.mxu0 %v28916_v40 }
 0x6da   : > { %29010 = vst [vmem:[#allocation18_spill] sm:$0xff] %v25960_v46  ;;  %v25967_v37 = vpop.f32.mrb[53].mxu1  ;;  %21303 = vmatmul.mubr.msk.f32.vlgmr.msra.gmra.mrb[132].mxu0 %vm1066_vm1, %v29013_v51  ;;  %21305 = vmatprep.subr.mxu1 %v28916_v40  ;;  %v29017_v51 = vld [vmem:[#allocation138_spill] sm:$0xff]  ;;  %v25990_v46 = vpop.permute.xlu0 %7679 }
 0x6db   : > { %29012 = vst [vmem:[#allocation35_spill] sm:$0xff] %v25967_v37  ;;  %21298 = vmatmul.mubr.msk.f32.vlgmr.msra.gmra.mrb[114].mxu1 %vm1066_vm1, %v29014_v35  ;;  %21311 = vmatpush3.xpose.msk.msra.mxu0 %vm1066_vm1, %v29015_v23  ;;  %v12098_v35 = vpop.permute.xlu1 %12097  ;;  %29020 = vst [vmem:[#allocation113_spill] sm:$0xff] %v25990_v46  ;;  %v29025_v37 = vld [vmem:[#allocation32_spill] sm:$0xff] }
 0x6dc   : > { %21306 = vmatpush3.xpose.msk.msra.mxu1 %vm1066_vm1, %v29016_v6  ;;  %21307 = vmatprep.mubr.msk.f32.mxu1 %vm23182_vm4, %v28916_v40 }
 0x6dd   : > { %21312 = vmatprep.mubr.msk.f32.mxu0 %vm23182_vm4, %v28916_v40  ;;  %21320 = vmatprep.subr.mxu0 %v28916_v40 }
 0x6de   : > { %21313 = vmatmul.mubr.msk.f32.vlgmr.msra.gmra.mrb[134].mxu0 %vm1066_vm1, %v29017_v51  ;;  %21315 = vmatprep.subr.mxu1 %v28916_v40  ;;  %v29022_v51 = vld [vmem:[#allocation90_spill] sm:$0xff] }
 0x6df   : > { %21308 = vmatmul.mubr.msk.f32.vlgmr.msra.gmra.mrb[116].mxu1 %vm1066_vm1, %v29018_v53  ;;  %21321 = vmatpush3.xpose.msk.msra.mxu0 %vm1066_vm1, %v29019_v21  ;;  %v29023_v53 = vld [vmem:[#allocation147_spill] sm:$0xff]  ;;  %v12174_v42 = vpop.permute.xlu1 %12173 }
 0x6e0   : > { %21316 = vmatpush3.xpose.msk.msra.mxu1 %vm1066_vm1, %v29021_v28  ;;  %21317 = vmatprep.mubr.msk.f32.mxu1 %vm23182_vm4, %v28916_v40 }
 0x6e1   : > { %21322 = vmatprep.mubr.msk.f32.mxu0 %vm23182_vm4, %v28916_v40  ;;  %21330 = vmatprep.subr.mxu0 %v28916_v40 }
 0x6e2   : > { %21323 = vmatmul.mubr.msk.f32.vlgmr.msra.gmra.mrb[136].mxu0 %vm1066_vm1, %v29022_v51  ;;  %21325 = vmatprep.subr.mxu1 %v28916_v40  ;;  %v26013_v51 = vpop.permute.xlu0 %7681 }
 0x6e3   : > { %21318 = vmatmul.mubr.msk.f32.vlgmr.msra.gmra.mrb[118].mxu1 %vm1066_vm1, %v29023_v53  ;;  %21331 = vmatpush3.xpose.msk.msra.mxu0 %vm1066_vm1, %v29024_v61  ;;  %29026 = vst [vmem:[#allocation44_spill] sm:$0xff] %v26013_v51  ;;  %v29028_v53 = vld [vmem:[#allocation99_spill] sm:$0xff] }
 0x6e4   : > { %21326 = vmatpush3.xpose.msk.msra.mxu1 %vm1066_vm1, %v29025_v37  ;;  %21327 = vmatprep.mubr.msk.f32.mxu1 %vm23182_vm4, %v28916_v40 }
 0x6e5   : > { %21332 = vmatprep.mubr.msk.f32.mxu0 %vm23182_vm4, %v28916_v40  ;;  %21340 = vmatprep.subr.mxu0 %v28916_v40 }
 0x6e6   : > { %21333 = vmatmul.mubr.msk.f32.vlgmr.msra.gmra.mrb[138].mxu0 %vm1066_vm1, %v29027_v34  ;;  %21335 = vmatprep.subr.mxu1 %v28916_v40  ;;  %v12250_v34 = vpop.permute.xlu1 %12249 }
 0x6e7   : > { %21328 = vmatmul.mubr.msk.f32.vlgmr.msra.gmra.mrb[120].mxu1 %vm1066_vm1, %v29028_v53  ;;  %21341 = vmatpush3.xpose.msk.msra.mxu0 %vm1066_vm1, %v25792_v15  ;;  %v26036_v53 = vpop.permute.xlu0 %7683 }
 0x6e8   : > { %21336 = vmatpush3.xpose.msk.msra.mxu1 %vm1066_vm1, %v29029_v14  ;;  %21337 = vmatprep.mubr.msk.f32.mxu1 %vm23182_vm4, %v28916_v40  ;;  %29030 = vst [vmem:[#allocation52_spill] sm:$0xff] %v26036_v53 }
 0x6e9   : > { %21342 = vmatprep.mubr.msk.f32.mxu0 %vm23182_vm4, %v28916_v40  ;;  %21350 = vmatprep.subr.mxu0 %v28916_v40 }
 0x6ea   : > { %21343 = vmatmul.mubr.msk.f32.vlgmr.msra.gmra.mrb[140].mxu0 %vm1066_vm1, %v25818_v55  ;;  %21345 = vmatprep.subr.mxu1 %v28916_v40 }
 0x6eb   : > { %21338 = vmatmul.mubr.msk.f32.vlgmr.msra.gmra.mrb[122].mxu1 %vm1066_vm1, %v25797_v22  ;;  %21351 = vmatpush3.xpose.msk.msra.mxu0 %vm1066_vm1, %v25850_v41  ;;  %v12326_v22 = vpop.permute.xlu1 %12325 }
 0x6ec   : > { %21346 = vmatpush3.xpose.msk.msra.mxu1 %vm1066_vm1, %v25826_v13  ;;  %v26040_v27 = vpop.f32.mrb[70].mxu0  ;;  %21347 = vmatprep.mubr.msk.f32.mxu1 %vm23182_vm4, %v28916_v40 }
 0x6ed   : > { %29031 = vst [vmem:[#allocation65_spill] sm:$0xff] %v26040_v27  ;;  %21352 = vmatprep.mubr.msk.f32.mxu0 %vm23182_vm4, %v28916_v40  ;;  %21360 = vmatprep.subr.mxu0 %v28916_v40  ;;  %v26047_v55 = vpop.f32.mrb[71].mxu0 }
 0x6ee   : > { %29032 = vst [vmem:[#allocation2_spill] sm:$0xff] %v26047_v55  ;;  %21353 = vmatmul.mubr.msk.f32.vlgmr.msra.gmra.mrb[142].mxu0 %vm1066_vm1, %v25878_v25  ;;  %21355 = vmatprep.subr.mxu1 %v28916_v40  ;;  %v26063_v25 = vpop.permute.xlu0 %7685 }
 0x6ef   : > { %21348 = vmatmul.mubr.msk.f32.vlgmr.msra.gmra.mrb[124].mxu1 %vm1066_vm1, %v25855_v2  ;;  %21361 = vmatpush3.xpose.msk.msra.mxu0 %vm1066_vm1, %v25908_v8  ;;  %29033 = vst [vmem:[#allocation71_spill] sm:$0xff] %v26063_v25  ;;  %v12402_v2 = vpop.permute.xlu1 %12401 }
 0x6f0   : > { %21356 = vmatpush3.xpose.msk.msra.mxu1 %vm1066_vm1, %v25884_v43  ;;  %21357 = vmatprep.mubr.msk.f32.mxu1 %vm23182_vm4, %v28916_v40 }
 0x6f1   : > { %21362 = vmatprep.mubr.msk.f32.mxu0 %vm23182_vm4, %v28916_v40  ;;  %21370 = vmatprep.subr.mxu0 %v28916_v40 }
 0x6f2   : > { %21363 = vmatmul.mubr.msk.f32.vlgmr.msra.gmra.mrb[144].mxu0 %vm1066_vm1, %v25932_v30  ;;  %21365 = vmatprep.subr.mxu1 %v28916_v40 }
 0x6f3   : > { %21358 = vmatmul.mubr.msk.f32.vlgmr.msra.gmra.mrb[126].mxu1 %vm1066_vm1, %v25913_v1  ;;  %21371 = vmatpush3.xpose.msk.msra.mxu0 %vm1066_vm1, %v25965_v17  ;;  %v26085_v1 = vpop.permute.xlu0 %7687 }
 0x6f4   : > { %21366 = vmatpush3.xpose.msk.msra.mxu1 %vm1066_vm1, %v25938_v62  ;;  %21367 = vmatprep.mubr.msk.f32.mxu1 %vm23182_vm4, %v28916_v40  ;;  %29034 = vst [vmem:[#allocation17_spill] sm:$0xff] %v26085_v1 }
 0x6f5   : > { %21372 = vmatprep.mubr.msk.f32.mxu0 %vm23182_vm4, %v28916_v40  ;;  %21380 = vmatprep.subr.mxu0 %v28916_v40 }
 0x6f6   : > { %21373 = vmatmul.mubr.msk.f32.vlgmr.msra.gmra.mrb[146].mxu0 %vm1066_vm1, %v12098_v35  ;;  %21375 = vmatprep.subr.mxu1 %v28916_v40 }
 0x6f7   : > { %21368 = vmatmul.mubr.msk.f32.vlgmr.msra.gmra.mrb[128].mxu1 %vm1066_vm1, %v25958_v54  ;;  %21381 = vmatpush3.xpose.msk.msra.mxu0 %vm1066_vm1, %v26013_v51  ;;  %v12478_v54 = vpop.permute.xlu1 %12477  ;;  %v13258_v30 = vpop.permute.xlu0 %13257 }
 0x6f8   : > { %21376 = vmatpush3.xpose.msk.msra.mxu1 %vm1066_vm1, %v25990_v46  ;;  %21377 = vmatprep.mubr.msk.f32.mxu1 %vm23182_vm4, %v28916_v40 }
 0x6f9   : > { %21382 = vmatprep.mubr.msk.f32.mxu0 %vm23182_vm4, %v28916_v40  ;;  %21390 = vmatprep.subr.mxu0 %v28916_v40 }
 0x6fa   : > { %21383 = vmatmul.mubr.msk.f32.vlgmr.msra.gmra.mrb[148].mxu0 %vm1066_vm1, %v12250_v34  ;;  %21385 = vmatprep.subr.mxu1 %v28916_v40 }
 0x6fb   : > { %21378 = vmatmul.mubr.msk.f32.vlgmr.msra.gmra.mrb[130].mxu1 %vm1066_vm1, %v12174_v42  ;;  %21391 = vmatpush3.xpose.msk.msra.mxu0 %vm1066_vm1, %v26063_v25  ;;  %v13334_v34 = vpop.permute.xlu1 %13333 }
 0x6fc   : > { %21386 = vmatpush3.xpose.msk.msra.mxu1 %vm1066_vm1, %v26036_v53  ;;  %21387 = vmatprep.mubr.msk.f32.mxu1 %vm23182_vm4, %v28916_v40 }
 0x6fd   : > { %21392 = vmatprep.mubr.msk.f32.mxu0 %vm23182_vm4, %v28916_v40  ;;  %21400 = vmatprep.subr.mxu0 %v28916_v40 }
 0x6fe   : > { %21393 = vmatmul.mubr.msk.f32.vlgmr.msra.gmra.mrb[150].mxu0 %vm1066_vm1, %v12402_v2  ;;  %21395 = vmatprep.subr.mxu1 %v28916_v40 }
 0x6ff   : > { %21388 = vmatmul.mubr.msk.f32.vlgmr.msra.gmra.mrb[132].mxu1 %vm1066_vm1, %v12326_v22  ;;  %21401 = vmatpush3.msra.mxu0 %v13258_v30 }
 0x700   : > { %21396 = vmatpush3.xpose.msk.msra.mxu1 %vm1066_vm1, %v26085_v1  ;;  %21397 = vmatprep.mubr.msk.f32.mxu1 %vm23182_vm4, %v28916_v40 }
 0x701   : > { %v26113_v42 = vpop.f32.mrb[54].mxu1  ;;  %21405 = vmatprep.subr.mxu1 %v28916_v40  ;;  %21402 = vmatprep.mubr.msk.f32.mxu0 %vm23182_vm4, %v28916_v40 }
 0x702   : > { %29035 = vst [vmem:[#allocation83_spill] sm:$0xff] %v26113_v42  ;;  %v26118_v35 = vpop.f32.mrb[55].mxu1  ;;  %21410 = vmatprep.subr.mxu0 %v28916_v40 }
 0x703   : > { %29036 = vst [vmem:[#allocation5_spill] sm:$0xff] %v26118_v35  ;;  %21398 = vmatmul.mubr.msk.f32.vlgmr.msra.gmra.mrb[134].mxu1 %vm1066_vm1, %v12478_v54 }
 0x704   : > { %21406 = vmatpush3.msra.mxu1 %v13334_v34  ;;  %21407 = vmatprep.mubr.msk.f32.mxu1 %vm23182_vm4, %v28916_v40 }
 0x705   : > { %21415 = vmatprep.subr.mxu1 %v28916_v40  ;;  %v26125_v22 = vpop.f32.mrb[72].mxu0 }
 0x706   : > { %29037 = vst [vmem:[#allocation120_spill] sm:$0xff] %v26125_v22  ;;  %v26127_v2 = vpop.f32.mrb[73].mxu0 }
 0x707   : > { %29038 = vst [vmem:[#allocation4_spill] sm:$0xff] %v26127_v2 }
 0x709   : > { %v26129_v30 = vpop.f32.mrb[56].mxu1 }
 0x70a   : > { %29039 = vst [vmem:[#allocation10_spill] sm:$0xff] %v26129_v30  ;;  %v26131_v42 = vpop.f32.mrb[57].mxu1 }
 0x70b   : > { %29040 = vst [vmem:[#allocation126_spill] sm:$0xff] %v26131_v42 }
 0x70d   : > { %v26133_v27 = vpop.f32.mrb[74].mxu0 }
 0x70e   : > { %29041 = vst [vmem:[#allocation8_spill] sm:$0xff] %v26133_v27  ;;  %v26135_v35 = vpop.f32.mrb[75].mxu0 }
 0x70f   : > { %29042 = vst [vmem:[#allocation20_spill] sm:$0xff] %v26135_v35 }
 0x716   : > { %v26137_v55 = vpop.f32.mrb[76].mxu0 }
 0x717   : > { %29043 = vst [vmem:[#allocation136_spill] sm:$0xff] %v26137_v55  ;;  %v26139_v54 = vpop.f32.mrb[77].mxu0 }
 0x718   : > { %29044 = vst [vmem:[#allocation13_spill] sm:$0xff] %v26139_v54 }
 0x719   : > { %v26141_v34 = vpop.f32.mrb[58].mxu1 }
 0x71a   : > { %29045 = vst [vmem:[#allocation24_spill] sm:$0xff] %v26141_v34  ;;  %v26143_v53 = vpop.f32.mrb[59].mxu1 }
 0x71b   : > { %29046 = vst [vmem:[#allocation143_spill] sm:$0xff] %v26143_v53 }
 0x71e   : > { %v26145_v39 = vpop.f32.mrb[78].mxu0 }
 0x71f   : > { %29047 = vst [vmem:[#allocation15_spill] sm:$0xff] %v26145_v39  ;;  %v26147_v22 = vpop.f32.mrb[79].mxu0 }
 0x720   : > { %29048 = vst [vmem:[#allocation55_spill] sm:$0xff] %v26147_v22 }
 0x721   : > { %v26149_v58 = vpop.f32.mrb[60].mxu1 }
 0x722   : > { %29049 = vst [vmem:[#allocation34_spill] sm:$0xff] %v26149_v58  ;;  %v26151_v30 = vpop.f32.mrb[61].mxu1 }
 0x723   : > { %29050 = vst [vmem:[#allocation59_spill] sm:$0xff] %v26151_v30 }
 0x726   : > { %v26153_v42 = vpop.f32.mrb[80].mxu0 }
 0x727   : > { %29051 = vst [vmem:[#allocation96_spill] sm:$0xff] %v26153_v42  ;;  %v26155_v27 = vpop.f32.mrb[81].mxu0 }
 0x728   : > { %29052 = vst [vmem:[#allocation43_spill] sm:$0xff] %v26155_v27 }
 0x731   : > { %v26157_v35 = vpop.f32.mrb[62].mxu1 }
 0x732   : > { %29053 = vst [vmem:[#allocation142_spill] sm:$0xff] %v26157_v35  ;;  %v26159_v55 = vpop.f32.mrb[63].mxu1 }
 0x733   : > { %29054 = vst [vmem:[#allocation108_spill] sm:$0xff] %v26159_v55 }
 0x734   : > { %v26161_v54 = vpop.f32.mrb[82].mxu0 }
 0x735   : > { %29055 = vst [vmem:[#allocation102_spill] sm:$0xff] %v26161_v54  ;;  %v26163_v34 = vpop.f32.mrb[83].mxu0 }
 0x736   : > { %29056 = vst [vmem:[#allocation130_spill] sm:$0xff] %v26163_v34 }
 0x739   : > { %v26165_v53 = vpop.f32.mrb[64].mxu1 }
 0x73a   : > { %29057 = vst [vmem:[#allocation68_spill] sm:$0xff] %v26165_v53  ;;  %v26167_v39 = vpop.f32.mrb[65].mxu1 }
 0x73b   : > { %29058 = vst [vmem:[#allocation60_spill] sm:$0xff] %v26167_v39 }
 0x73c   : > { %v26169_v22 = vpop.f32.mrb[84].mxu0 }
 0x73d   : > { %29059 = vst [vmem:[#allocation121_spill] sm:$0xff] %v26169_v22  ;;  %v26171_v58 = vpop.f32.mrb[85].mxu0 }
 0x73e   : > { %29060 = vst [vmem:[#allocation145_spill] sm:$0xff] %v26171_v58 }
 0x749   : > { %v26173_v30 = vpop.f32.mrb[66].mxu1 }
 0x74a   : > { %29061 = vst [vmem:[#allocation137_spill] sm:$0xff] %v26173_v30  ;;  %v26175_v42 = vpop.f32.mrb[67].mxu1 }
 0x74b   : > { %29062 = vst [vmem:[#allocation144_spill] sm:$0xff] %v26175_v42 }
 0x74d   : > { %v26177_v27 = vpop.f32.mrb[68].mxu1 }
 0x74e   : > { %29063 = vst [vmem:[#allocation23_spill] sm:$0xff] %v26177_v27  ;;  %v26179_v35 = vpop.f32.mrb[69].mxu1 }
 0x74f   : > { %29064 = vst [vmem:[#allocation39_spill] sm:$0xff] %v26179_v35 }
 0x751   : > { %v26181_v55 = vpop.f32.mrb[86].mxu0 }
 0x752   : > { %29065 = vst [vmem:[#allocation33_spill] sm:$0xff] %v26181_v55  ;;  %v26183_v54 = vpop.f32.mrb[87].mxu0 }
 0x753   : > { %29066 = vst [vmem:[#allocation58_spill] sm:$0xff] %v26183_v54 }
 0x755   : > { %v26185_v34 = vpop.f32.mrb[70].mxu1  ;;  %v26187_v53 = vpop.f32.mrb[88].mxu0 }
 0x756   : > { %29067 = vst [vmem:[#allocation50_spill] sm:$0xff] %v26185_v34  ;;  %v26189_v39 = vpop.f32.mrb[71].mxu1  ;;  %v21084_v22 = vpop.f32.mrb[89].mxu0  ;;  %v12553_v30 = vsel %vm1066_vm1, %v26187_v53, -inf }
 0x757   : > { %29068 = vst [vmem:[#allocation77_spill] sm:$0xff] %v26189_v39  ;;  %12554 = vmax.xlane.f32.xlu0 %v12553_v30 }
 0x759   : > { %v26193_v58 = vpop.f32.mrb[90].mxu0 }
 0x75a   : > { %v26195_v27 = vpop.f32.mrb[72].mxu1  ;;  %v21094_v35 = vpop.f32.mrb[91].mxu0  ;;  %v12559_v55 = vsel %vm1066_vm1, %v26193_v58, -inf }
 0x75b   : > { %v21089_v54 = vpop.f32.mrb[73].mxu1  ;;  %12560 = vmax.xlane.f32.xlu0 %v12559_v55  ;;  %v12556_v34 = vsel %vm1066_vm1, %v26195_v27, -inf }
 0x75c   : > { %12557 = vmax.xlane.f32.xlu1 %v12556_v34 }
 0x75d   : > { %v26201_v39 = vpop.f32.mrb[92].mxu0 }
 0x75e   : > { %v26203_v22 = vpop.f32.mrb[74].mxu1  ;;  %v21104_v42 = vpop.f32.mrb[93].mxu0  ;;  %v12565_v30 = vsel %vm1066_vm1, %v26201_v39, -inf }
 0x75f   : > { %v21099_v2 = vpop.f32.mrb[75].mxu1  ;;  %12566 = vmax.xlane.f32.xlu0 %v12565_v30  ;;  %v12562_v55 = vsel %vm1066_vm1, %v26203_v22, -inf }
 0x761   : > { %v26207_v35 = vpop.f32.mrb[94].mxu0 }
 0x762   : > { %v26209_v9 = vpop.f32.mrb[76].mxu1  ;;  %v21114_v54 = vpop.f32.mrb[95].mxu0  ;;  %v12571_v30 = vsel %vm1066_vm1, %v26207_v35, -inf }
 0x763   : > { %v21109_v33 = vpop.f32.mrb[77].mxu1  ;;  %12563 = vmax.xlane.f32.xlu0 %v12562_v55  ;;  %v12568_v34 = vsel %vm1066_vm1, %v26209_v9, -inf }
 0x764   : > { %12569 = vmax.xlane.f32.xlu1 %v12568_v34 }
 0x765   : > { %v26215_v42 = vpop.f32.mrb[96].mxu0 }
 0x766   : > { %v26217_v1 = vpop.f32.mrb[78].mxu1  ;;  %v21124_v2 = vpop.f32.mrb[97].mxu0  ;;  %v12577_v34 = vsel %vm1066_vm1, %v26215_v42, -inf }
 0x767   : > { %v21119_v25 = vpop.f32.mrb[79].mxu1  ;;  %12572 = vmax.xlane.f32.xlu0 %v12571_v30  ;;  %v12574_v54 = vsel %vm1066_vm1, %v26217_v1, -inf }
 0x768   : > { %12575 = vmax.xlane.f32.xlu1 %v12574_v54 }
 0x769   : > { %v26223_v33 = vpop.f32.mrb[98].mxu0 }
 0x76a   : > { %v26225_v55 = vpop.f32.mrb[80].mxu1  ;;  %v21134_v51 = vpop.f32.mrb[99].mxu0  ;;  %v12583_v54 = vsel %vm1066_vm1, %v26223_v33, -inf }
 0x76b   : > { %v21129_v46 = vpop.f32.mrb[81].mxu1  ;;  %12578 = vmax.xlane.f32.xlu0 %v12577_v34  ;;  %v12580_v2 = vsel %vm1066_vm1, %v26225_v55, -inf }
 0x76c   : > { %12581 = vmax.xlane.f32.xlu1 %v12580_v2 }
 0x76d   : > { %v26231_v25 = vpop.f32.mrb[100].mxu0 }
 0x76e   : > { %v26233_v30 = vpop.f32.mrb[82].mxu1  ;;  %v21144_v8 = vpop.f32.mrb[101].mxu0  ;;  %v12589_v2 = vsel %vm1066_vm1, %v26231_v25, -inf }
 0x76f   : > { %v21139_v17 = vpop.f32.mrb[83].mxu1  ;;  %12584 = vmax.xlane.f32.xlu0 %v12583_v54  ;;  %v12586_v51 = vsel %vm1066_vm1, %v26233_v30, -inf }
 0x770   : > { %12587 = vmax.xlane.f32.xlu1 %v12586_v51 }
 0x771   : > { %v26239_v46 = vpop.f32.mrb[102].mxu0 }
 0x772   : > { %v26241_v34 = vpop.f32.mrb[84].mxu1  ;;  %v21154_v43 = vpop.f32.mrb[103].mxu0  ;;  %v12595_v51 = vsel %vm1066_vm1, %v26239_v46, -inf }
 0x773   : > { %v21149_v62 = vpop.f32.mrb[85].mxu1  ;;  %12590 = vmax.xlane.f32.xlu0 %v12589_v2  ;;  %v12592_v8 = vsel %vm1066_vm1, %v26241_v34, -inf }
 0x774   : > { %12593 = vmax.xlane.f32.xlu1 %v12592_v8 }
 0x775   : > { %v26247_v17 = vpop.f32.mrb[104].mxu0 }
 0x776   : > { %v26249_v54 = vpop.f32.mrb[86].mxu1  ;;  %v21164_v14 = vpop.f32.mrb[105].mxu0  ;;  %v12601_v8 = vsel %vm1066_vm1, %v26247_v17, -inf }
 0x777   : > { %v21159_v41 = vpop.f32.mrb[87].mxu1  ;;  %12596 = vmax.xlane.f32.xlu0 %v12595_v51  ;;  %v12598_v43 = vsel %vm1066_vm1, %v26249_v54, -inf }
 0x778   : > { %12599 = vmax.xlane.f32.xlu1 %v12598_v43 }
 0x779   : > { %v26255_v62 = vpop.f32.mrb[106].mxu0 }
 0x77a   : > { %v26257_v2 = vpop.f32.mrb[88].mxu1  ;;  %v21174_v13 = vpop.f32.mrb[107].mxu0  ;;  %v12607_v43 = vsel %vm1066_vm1, %v26255_v62, -inf }
 0x77b   : > { %v21169_v15 = vpop.f32.mrb[89].mxu1  ;;  %12602 = vmax.xlane.f32.xlu0 %v12601_v8  ;;  %v12604_v14 = vsel %vm1066_vm1, %v26257_v2, -inf }
 0x77c   : > { %12605 = vmax.xlane.f32.xlu1 %v12604_v14 }
 0x77d   : > { %v26263_v41 = vpop.f32.mrb[108].mxu0 }
 0x77e   : > { %v26265_v51 = vpop.f32.mrb[90].mxu1  ;;  %v21184_v28 = vpop.f32.mrb[109].mxu0  ;;  %v12613_v14 = vsel %vm1066_vm1, %v26263_v41, -inf }
 0x77f   : > { %v21179_v61 = vpop.f32.mrb[91].mxu1  ;;  %12608 = vmax.xlane.f32.xlu0 %v12607_v43  ;;  %v12610_v13 = vsel %vm1066_vm1, %v26265_v51, -inf }
 0x780   : > { %12611 = vmax.xlane.f32.xlu1 %v12610_v13 }
 0x781   : > { %v26271_v15 = vpop.f32.mrb[110].mxu0 }
 0x782   : > { %v26273_v8 = vpop.f32.mrb[92].mxu1  ;;  %v21194_v37 = vpop.f32.mrb[111].mxu0  ;;  %v12619_v13 = vsel %vm1066_vm1, %v26271_v15, -inf }
 0x783   : > { %v21189_v21 = vpop.f32.mrb[93].mxu1  ;;  %12614 = vmax.xlane.f32.xlu0 %v12613_v14  ;;  %v12616_v28 = vsel %vm1066_vm1, %v26273_v8, -inf }
 0x784   : > { %12617 = vmax.xlane.f32.xlu1 %v12616_v28 }
 0x785   : > { %v26279_v61 = vpop.f32.mrb[112].mxu0 }
 0x786   : > { %v26281_v43 = vpop.f32.mrb[94].mxu1  ;;  %v21204_v7 = vpop.f32.mrb[113].mxu0  ;;  %v12625_v28 = vsel %vm1066_vm1, %v26279_v61, -inf }
 0x787   : > { %v21199_v23 = vpop.f32.mrb[95].mxu1  ;;  %12620 = vmax.xlane.f32.xlu0 %v12619_v13  ;;  %v12622_v37 = vsel %vm1066_vm1, %v26281_v43, -inf }
 0x788   : > { %12623 = vmax.xlane.f32.xlu1 %v12622_v37 }
 0x789   : > { %v26287_v21 = vpop.f32.mrb[114].mxu0 }
 0x78a   : > { %v26289_v14 = vpop.f32.mrb[96].mxu1  ;;  %v21214_v6 = vpop.f32.mrb[115].mxu0  ;;  %v12631_v37 = vsel %vm1066_vm1, %v26287_v21, -inf }
 0x78b   : > { %v21209_v59 = vpop.f32.mrb[97].mxu1  ;;  %12626 = vmax.xlane.f32.xlu0 %v12625_v28  ;;  %v12628_v7 = vsel %vm1066_vm1, %v26289_v14, -inf }
 0x78c   : > { %12629 = vmax.xlane.f32.xlu1 %v12628_v7 }
 0x78d   : > { %v26295_v23 = vpop.f32.mrb[116].mxu0 }
 0x78e   : > { %v26297_v13 = vpop.f32.mrb[98].mxu1  ;;  %v21224_v5 = vpop.f32.mrb[117].mxu0  ;;  %v12637_v7 = vsel %vm1066_vm1, %v26295_v23, -inf }
 0x78f   : > { %v21219_v47 = vpop.f32.mrb[99].mxu1  ;;  %12632 = vmax.xlane.f32.xlu0 %v12631_v37  ;;  %v12634_v6 = vsel %vm1066_vm1, %v26297_v13, -inf }
 0x790   : > { %12635 = vmax.xlane.f32.xlu1 %v12634_v6 }
 0x791   : > { %v26303_v59 = vpop.f32.mrb[118].mxu0 }
 0x792   : > { %v26305_v28 = vpop.f32.mrb[100].mxu1  ;;  %v21234_v52 = vpop.f32.mrb[119].mxu0  ;;  %v12643_v6 = vsel %vm1066_vm1, %v26303_v59, -inf }
 0x793   : > { %v21229_v4 = vpop.f32.mrb[101].mxu1  ;;  %12638 = vmax.xlane.f32.xlu0 %v12637_v7  ;;  %v12640_v5 = vsel %vm1066_vm1, %v26305_v28, -inf }
 0x794   : > { %12641 = vmax.xlane.f32.xlu1 %v12640_v5 }
 0x795   : > { %v26311_v47 = vpop.f32.mrb[120].mxu0 }
 0x796   : > { %v26313_v37 = vpop.f32.mrb[102].mxu1  ;;  %v21244_v11 = vpop.f32.mrb[121].mxu0  ;;  %v12649_v5 = vsel %vm1066_vm1, %v26311_v47, -inf }
 0x797   : > { %29069 = vst [vmem:[#allocation70_spill] sm:$0xff] %v26313_v37  ;;  %v21239_v20 = vpop.f32.mrb[103].mxu1  ;;  %12644 = vmax.xlane.f32.xlu0 %v12643_v6  ;;  %v12646_v52 = vsel %vm1066_vm1, %v26313_v37, -inf }
 0x798   : > { %12647 = vmax.xlane.f32.xlu1 %v12646_v52 }
 0x799   : > { %v26319_v4 = vpop.f32.mrb[122].mxu0 }
 0x79a   : > { %29070 = vst [vmem:[#allocation91_spill] sm:$0xff] %v26319_v4  ;;  %v26321_v7 = vpop.f32.mrb[104].mxu1  ;;  %v21254_v45 = vpop.f32.mrb[123].mxu0  ;;  %v12655_v52 = vsel %vm1066_vm1, %v26319_v4, -inf }
 0x79b   : > { %29071 = vst [vmem:[#allocation87_spill] sm:$0xff] %v26321_v7  ;;  %v21249_v26 = vpop.f32.mrb[105].mxu1  ;;  %12650 = vmax.xlane.f32.xlu0 %v12649_v5  ;;  %v12652_v11 = vsel %vm1066_vm1, %v26321_v7, -inf }
 0x79c   : > { %12653 = vmax.xlane.f32.xlu1 %v12652_v11 }
 0x79d   : > { %v26327_v20 = vpop.f32.mrb[124].mxu0 }
 0x79e   : > { %29072 = vst [vmem:[#allocation109_spill] sm:$0xff] %v26327_v20  ;;  %v26329_v6 = vpop.f32.mrb[106].mxu1  ;;  %v21264_v44 = vpop.f32.mrb[125].mxu0  ;;  %v12661_v11 = vsel %vm1066_vm1, %v26327_v20, -inf }
 0x79f   : > { %29073 = vst [vmem:[#allocation101_spill] sm:$0xff] %v26329_v6  ;;  %v21259_v24 = vpop.f32.mrb[107].mxu1  ;;  %12656 = vmax.xlane.f32.xlu0 %v12655_v52  ;;  %v12658_v45 = vsel %vm1066_vm1, %v26329_v6, -inf }
 0x7a0   : > { %12659 = vmax.xlane.f32.xlu1 %v12658_v45 }
 0x7a1   : > { %v26335_v26 = vpop.f32.mrb[126].mxu0 }
 0x7a2   : > { %29074 = vst [vmem:[#allocation123_spill] sm:$0xff] %v26335_v26  ;;  %v26337_v5 = vpop.f32.mrb[108].mxu1  ;;  %v21274_v29 = vpop.f32.mrb[127].mxu0  ;;  %v12667_v45 = vsel %vm1066_vm1, %v26335_v26, -inf }
 0x7a3   : > { %29075 = vst [vmem:[#allocation116_spill] sm:$0xff] %v26337_v5  ;;  %v21269_v60 = vpop.f32.mrb[109].mxu1  ;;  %12662 = vmax.xlane.f32.xlu0 %v12661_v11  ;;  %v12664_v44 = vsel %vm1066_vm1, %v26337_v5, -inf }
 0x7a4   : > { %12665 = vmax.xlane.f32.xlu1 %v12664_v44 }
 0x7a5   : > { %v26343_v24 = vpop.f32.mrb[128].mxu0 }
 0x7a6   : > { %29076 = vst [vmem:[#allocation72_spill] sm:$0xff] %v26343_v24  ;;  %v26345_v52 = vpop.f32.mrb[110].mxu1  ;;  %v21284_v3 = vpop.f32.mrb[129].mxu0  ;;  %v12673_v44 = vsel %vm1066_vm1, %v26343_v24, -inf }
 0x7a7   : > { %29077 = vst [vmem:[#allocation139_spill] sm:$0xff] %v26345_v52  ;;  %v21279_v38 = vpop.f32.mrb[111].mxu1  ;;  %12668 = vmax.xlane.f32.xlu0 %v12667_v45  ;;  %v12670_v29 = vsel %vm1066_vm1, %v26345_v52, -inf }
 0x7a8   : > { %12671 = vmax.xlane.f32.xlu1 %v12670_v29 }
 0x7a9   : > { %v26351_v60 = vpop.f32.mrb[130].mxu0 }
 0x7aa   : > { %29078 = vst [vmem:[#allocation132_spill] sm:$0xff] %v26351_v60  ;;  %v26353_v11 = vpop.f32.mrb[112].mxu1  ;;  %v21294_v50 = vpop.f32.mrb[131].mxu0  ;;  %v12679_v29 = vsel %vm1066_vm1, %v26351_v60, -inf }
 0x7ab   : > { %29079 = vst [vmem:[#allocation21_spill] sm:$0xff] %v26353_v11  ;;  %v21289_v18 = vpop.f32.mrb[113].mxu1  ;;  %12674 = vmax.xlane.f32.xlu0 %v12673_v44  ;;  %v12676_v3 = vsel %vm1066_vm1, %v26353_v11, -inf }
 0x7ac   : > { %12677 = vmax.xlane.f32.xlu1 %v12676_v3 }
 0x7ad   : > { %v26359_v38 = vpop.f32.mrb[132].mxu0 }
 0x7ae   : > { %29080 = vst [vmem:[#allocation80_spill] sm:$0xff] %v26359_v38  ;;  %v26361_v45 = vpop.f32.mrb[114].mxu1  ;;  %v21304_v52 = vpop.f32.mrb[133].mxu0  ;;  %v12685_v3 = vsel %vm1066_vm1, %v26359_v38, -inf }
 0x7af   : > { %29081 = vst [vmem:[#allocation92_spill] sm:$0xff] %v26361_v45  ;;  %v21299_v19 = vpop.f32.mrb[115].mxu1  ;;  %12680 = vmax.xlane.f32.xlu0 %v12679_v29  ;;  %v12682_v50 = vsel %vm1066_vm1, %v26361_v45, -inf  ;;  %v26383_v38 = vpop.permute.xlu0 %13409 }
 0x7b0   : > { %12683 = vmax.xlane.f32.xlu1 %v12682_v50 }
 0x7b1   : > { %v26367_v18 = vpop.f32.mrb[134].mxu0 }
 0x7b2   : > { %29082 = vst [vmem:[#allocation148_spill] sm:$0xff] %v26367_v18  ;;  %v26369_v44 = vpop.f32.mrb[116].mxu1  ;;  %v21314_v11 = vpop.f32.mrb[135].mxu0  ;;  %v12691_v52 = vsel %vm1066_vm1, %v26367_v18, -inf }
 0x7b3   : > { %29083 = vst [vmem:[#allocation36_spill] sm:$0xff] %v26369_v44  ;;  %v21309_v24 = vpop.f32.mrb[117].mxu1  ;;  %12686 = vmax.xlane.f32.xlu0 %v12685_v3  ;;  %v12688_v11 = vsel %vm1066_vm1, %v26369_v44, -inf  ;;  %v26401_v63 = vpop.permute.xlu0 %13485 }
 0x7b4   : > { %12692 = vmax.xlane.f32.xlu1 %v12691_v52 }
 0x7b5   : > { %v26375_v19 = vpop.f32.mrb[136].mxu0 }
 0x7b6   : > { %29084 = vst [vmem:[#allocation26_spill] sm:$0xff] %v26375_v19  ;;  %v26377_v29 = vpop.f32.mrb[118].mxu1  ;;  %v21324_v45 = vpop.f32.mrb[137].mxu0  ;;  %v12697_v50 = vsel %vm1066_vm1, %v26375_v19, -inf }
 0x7b7   : > { %29085 = vst [vmem:[#allocation110_spill] sm:$0xff] %v26377_v29  ;;  %v21319_v60 = vpop.f32.mrb[119].mxu1  ;;  %12689 = vmax.xlane.f32.xlu0 %v12688_v11  ;;  %v12694_v45 = vsel %vm1066_vm1, %v26377_v29, -inf }
 0x7b8   : > { %12698 = vmax.xlane.f32.xlu1 %v12697_v50 }
 0x7b9   : > { %v26385_v18 = vpop.f32.mrb[138].mxu0 }
 0x7ba   : > { %29086 = vst [vmem:[#allocation103_spill] sm:$0xff] %v26385_v18  ;;  %v26387_v24 = vpop.f32.mrb[120].mxu1  ;;  %v21334_v3 = vpop.f32.mrb[139].mxu0  ;;  %v12703_v52 = vsel %vm1066_vm1, %v26385_v18, -inf }
 0x7bb   : > { %29087 = vst [vmem:[#allocation125_spill] sm:$0xff] %v26387_v24  ;;  %v21329_v19 = vpop.f32.mrb[121].mxu1  ;;  %12695 = vmax.xlane.f32.xlu0 %v12694_v45  ;;  %v12700_v3 = vsel %vm1066_vm1, %v26387_v24, -inf  ;;  %v26411_v24 = vpop.permute.xlu0 %13637 }
 0x7bc   : > { %12704 = vmax.xlane.f32.xlu1 %v12703_v52 }
 0x7bd   : > { %v26393_v44 = vpop.f32.mrb[140].mxu0 }
 0x7be   : > { %29088 = vst [vmem:[#allocation117_spill] sm:$0xff] %v26393_v44  ;;  %v26395_v60 = vpop.f32.mrb[122].mxu1  ;;  %v21344_v50 = vpop.f32.mrb[141].mxu0  ;;  %v12709_v11 = vsel %vm1066_vm1, %v26393_v44, -inf }
 0x7bf   : > { %29089 = vst [vmem:[#allocation140_spill] sm:$0xff] %v26395_v60  ;;  %v21339_v18 = vpop.f32.mrb[123].mxu1  ;;  %12701 = vmax.xlane.f32.xlu0 %v12700_v3  ;;  %v12706_v50 = vsel %vm1066_vm1, %v26395_v60, -inf }
 0x7c0   : > { %12710 = vmax.xlane.f32.xlu1 %v12709_v11 }
 0x7c1   : > { %v26403_v29 = vpop.f32.mrb[142].mxu0 }
 0x7c2   : > { %29090 = vst [vmem:[#allocation133_spill] sm:$0xff] %v26403_v29  ;;  %v26405_v19 = vpop.f32.mrb[124].mxu1  ;;  %v21354_v52 = vpop.f32.mrb[143].mxu0  ;;  %v12715_v45 = vsel %vm1066_vm1, %v26403_v29, -inf }
 0x7c3   : > { %29091 = vst [vmem:[#allocation93_spill] sm:$0xff] %v26405_v19  ;;  %v21349_v44 = vpop.f32.mrb[125].mxu1  ;;  %12707 = vmax.xlane.f32.xlu0 %v12706_v50  ;;  %v12712_v52 = vsel %vm1066_vm1, %v26405_v19, -inf  ;;  %v26431_v19 = vpop.permute.xlu1 %13561 }
 0x7c4   : > { %12716 = vmax.xlane.f32.xlu1 %v12715_v45 }
 0x7c5   : > { %v26413_v5 = vpop.f32.mrb[144].mxu0 }
 0x7c6   : > { %29092 = vst [vmem:[#allocation149_spill] sm:$0xff] %v26413_v5  ;;  %v26415_v18 = vpop.f32.mrb[126].mxu1  ;;  %v21364_v11 = vpop.f32.mrb[145].mxu0  ;;  %v12721_v3 = vsel %vm1066_vm1, %v26413_v5, -inf }
 0x7c7   : > { %29093 = vst [vmem:[#allocation112_spill] sm:$0xff] %v26415_v18  ;;  %v21359_v29 = vpop.f32.mrb[127].mxu1  ;;  %12713 = vmax.xlane.f32.xlu0 %v12712_v52  ;;  %v12718_v50 = vsel %vm1066_vm1, %v26415_v18, -inf  ;;  %v26429_v5 = vpop.permute.xlu0 %13865 }
 0x7c8   : > { %12722 = vmax.xlane.f32.xlu1 %v12721_v3  ;;  %v26445_v26 = vpop.permute.xlu1 %13713 }
 0x7c9   : > { %v26421_v60 = vpop.f32.mrb[146].mxu0 }
 0x7ca   : > { %29094 = vst [vmem:[#allocation105_spill] sm:$0xff] %v26421_v60  ;;  %v26423_v44 = vpop.f32.mrb[128].mxu1  ;;  %v21374_v45 = vpop.f32.mrb[147].mxu0 }
 0x7cb   : > { %29095 = vst [vmem:[#allocation128_spill] sm:$0xff] %v26423_v44  ;;  %v21369_v12 = vpop.f32.mrb[129].mxu1  ;;  %12719 = vmax.xlane.f32.xlu0 %v12718_v50  ;;  %v12724_v11 = vsel %vm1066_vm1, %v26423_v44, -inf  ;;  %v12727_v45 = vsel %vm1066_vm1, %v26421_v60, -inf  ;;  %v26449_v6 = vpop.permute.xlu0 %13941 }
 0x7cc   : > { %12725 = vmax.xlane.f32.xlu1 %v12724_v11 }
 0x7cd   : > { %v26433_v29 = vpop.f32.mrb[148].mxu0 }
 0x7ce   : > { %29096 = vst [vmem:[#allocation119_spill] sm:$0xff] %v26433_v29  ;;  %v26435_v3 = vpop.f32.mrb[130].mxu1  ;;  %v21384_v52 = vpop.f32.mrb[149].mxu0  ;;  %v12733_v12 = vsel %vm1066_vm1, %v26433_v29, -inf }
 0x7cf   : > { %29097 = vst [vmem:[#allocation141_spill] sm:$0xff] %v26435_v3  ;;  %v21379_v50 = vpop.f32.mrb[131].mxu1  ;;  %12728 = vmax.xlane.f32.xlu0 %v12727_v45  ;;  %v12730_v52 = vsel %vm1066_vm1, %v26435_v3, -inf }
 0x7d0   : > { %12734 = vmax.xlane.f32.xlu1 %v12733_v12  ;;  %v26455_v12 = vpop.permute.xlu1 %13789  ;;  %v26457_v50 = vpop.permute.xlu0 %14169 }
 0x7d1   : > { %v26441_v44 = vpop.f32.mrb[150].mxu0 }
 0x7d2   : > { %29098 = vst [vmem:[#allocation135_spill] sm:$0xff] %v26441_v44  ;;  %v26443_v18 = vpop.f32.mrb[132].mxu1  ;;  %v21394_v11 = vpop.f32.mrb[151].mxu0  ;;  %v12739_v45 = vsel %vm1066_vm1, %v26441_v44, -inf }
 0x7d3   : > { %29099 = vst [vmem:[#allocation19_spill] sm:$0xff] %v26443_v18  ;;  %v21389_v48 = vpop.f32.mrb[133].mxu1 }
 0x7d4   : > { %12731 = vmax.xlane.f32.xlu1 %v12730_v52  ;;  %v12736_v48 = vsel %vm1066_vm1, %v26443_v18, -inf  ;;  %v26461_v11 = vpop.permute.xlu1 %14017  ;;  %v26465_v3 = vpop.permute.xlu0 %14245 }
 0x7d6   : > { %v26451_v60 = vpop.f32.mrb[134].mxu1 }
 0x7d7   : > { %29100 = vst [vmem:[#allocation146_spill] sm:$0xff] %v26451_v60  ;;  %v21399_v29 = vpop.f32.mrb[135].mxu1  ;;  %v12742_v52 = vsel %vm1066_vm1, %v26451_v60, -inf }
 0x7d8   : > { %12740 = vmax.xlane.f32.xlu1 %v12739_v45  ;;  %v26467_v10 = vpop.permute.xlu1 %14093 }
 0x7dc   : > { %12737 = vmax.xlane.f32.xlu1 %v12736_v48 }
 0x7e0   : > { %12743 = vmax.xlane.f32.xlu1 %v12742_v52 }
 0x7e4   : > { %v12555_v29 = vpop.xlane.xlu0 %12554 }
 0x7e5   : > { %v12745_v45 = vsub.f32 %v26187_v53, %v12555_v29 }
 0x7e7   : > { %v12809_v44 = vmul.f32 1.442695, %v12745_v45 }
 0x7e8   : > { %v12561_v20 = vpop.xlane.xlu0 %12560 }
 0x7e9   : > { %22831 = vpow2.f32 %v12809_v44  ;;  %v12558_v57 = vpop.xlane.xlu1 %12557  ;;  %v12747_v18 = vsub.f32 %v26193_v58, %v12561_v20 }
 0x7ea   : > { %v12746_v48 = vsub.f32 %v26195_v27, %v12558_v57 }
 0x7eb   : > { %v12813_v7 = vmul.f32 1.442695, %v12747_v18 }
 0x7ec   : > { %v12811_v31 = vmul.f32 1.442695, %v12746_v48  ;;  %v12567_v4 = vpop.xlane.xlu0 %12566 }
 0x7ed   : > { %22833 = vpow2.f32 %v12813_v7  ;;  %v12749_v60 = vsub.f32 %v26201_v39, %v12567_v4 }
 0x7ee   : > { %22835 = vpow2.f32 %v12811_v31 }
 0x7ef   : > { %v12817_v52 = vmul.f32 1.442695, %v12749_v60 }
 0x7f0   : > { %v12564_v16 = vpop.xlane.xlu0 %12563 }
 0x7f1   : > { %22837 = vpow2.f32 %v12817_v52  ;;  %v12570_v37 = vpop.xlane.xlu1 %12569  ;;  %v12748_v53 = vsub.f32 %v26203_v22, %v12564_v16 }
 0x7f2   : > { %v12750_v44 = vsub.f32 %v26209_v9, %v12570_v37 }
 0x7f3   : > { %v26475_v29 = vpop.eup %22831  ;;  %v12815_v58 = vmul.f32 1.442695, %v12748_v53 }
 0x7f4   : > { %v12819_v20 = vmul.f32 1.442695, %v12750_v44  ;;  %v12573_v57 = vpop.xlane.xlu0 %12572  ;;  %v12937_v27 = vsel %vm1066_vm1, %v26475_v29, 0.0 }
 0x7f5   : > { %22839 = vpow2.f32 %v12815_v58  ;;  %v12576_v7 = vpop.xlane.xlu1 %12575  ;;  %v12751_v31 = vsub.f32 %v26207_v35, %v12573_v57  ;;  %12938 = vadd.xlane.f32.xlu1 %v12937_v27 }
 0x7f6   : > { %v12752_v39 = vsub.f32 %v26217_v1, %v12576_v7  ;;  %22841 = vpow2.f32 %v12819_v20 }
 0x7f7   : > { %v26481_v4 = vpop.eup %22833  ;;  %v12821_v16 = vmul.f32 1.442695, %v12751_v31 }
 0x7f8   : > { %v26483_v9 = vpop.eup %22835  ;;  %v12823_v22 = vmul.f32 1.442695, %v12752_v39  ;;  %v12579_v37 = vpop.xlane.xlu0 %12578  ;;  %v12943_v60 = vsel %vm1066_vm1, %v26481_v4, 0.0 }
 0x7f9   : > { %22843 = vpow2.f32 %v12821_v16  ;;  %v12582_v18 = vpop.xlane.xlu1 %12581  ;;  %v12753_v45 = vsub.f32 %v26215_v42, %v12579_v37  ;;  %v12940_v35 = vsel %vm1066_vm1, %v26483_v9, 0.0  ;;  %12944 = vadd.xlane.f32.xlu1 %v12943_v60 }
 0x7fa   : > { %v12754_v1 = vsub.f32 %v26225_v55, %v12582_v18  ;;  %12941 = vadd.xlane.f32.xlu0 %v12940_v35  ;;  %22845 = vpow2.f32 %v12823_v22 }
 0x7fb   : > { %v26491_v48 = vpop.eup %22837  ;;  %v12825_v52 = vmul.f32 1.442695, %v12753_v45 }
 0x7fc   : > { %v12827_v53 = vmul.f32 1.442695, %v12754_v1  ;;  %v12585_v44 = vpop.xlane.xlu0 %12584  ;;  %v12949_v58 = vsel %vm1066_vm1, %v26491_v48, 0.0 }
 0x7fd   : > { %22847 = vpow2.f32 %v12825_v52  ;;  %v12588_v20 = vpop.xlane.xlu1 %12587  ;;  %v12755_v42 = vsub.f32 %v26223_v33, %v12585_v44  ;;  %12950 = vadd.xlane.f32.xlu1 %v12949_v58 }
 0x7fe   : > { %v12756_v57 = vsub.f32 %v26233_v30, %v12588_v20  ;;  %22849 = vpow2.f32 %v12827_v53 }
 0x7ff   : > { %v26497_v27 = vpop.eup %22839  ;;  %v12829_v55 = vmul.f32 1.442695, %v12755_v42 }
 0x800   : > { %v12831_v7 = vmul.f32 1.442695, %v12756_v57  ;;  %v12591_v31 = vpop.xlane.xlu0 %12590  ;;  %v12946_v39 = vsel %vm1066_vm1, %v26497_v27, 0.0  ;;  %v26501_v16 = vpop.eup %22841 }
 0x801   : > { %22851 = vpow2.f32 %v12829_v55  ;;  %v12594_v22 = vpop.xlane.xlu1 %12593  ;;  %v12757_v37 = vsub.f32 %v26231_v25, %v12591_v31  ;;  %12947 = vadd.xlane.f32.xlu0 %v12946_v39  ;;  %v12952_v45 = vsel %vm1066_vm1, %v26501_v16, 0.0 }
 0x802   : > { %22853 = vpow2.f32 %v12831_v7  ;;  %v12758_v30 = vsub.f32 %v26241_v34, %v12594_v22 }
 0x803   : > { %v26504_v33 = vpop.eup %22843  ;;  %v12833_v60 = vmul.f32 1.442695, %v12757_v37 }
 0x804   : > { %v12597_v18 = vpop.xlane.xlu0 %12596  ;;  %v12955_v35 = vsel %vm1066_vm1, %v26504_v33, 0.0  ;;  %v26511_v1 = vpop.eup %22845  ;;  %v12835_v44 = vmul.f32 1.442695, %v12758_v30 }
 0x805   : > { %22855 = vpow2.f32 %v12833_v60  ;;  %v12600_v52 = vpop.xlane.xlu1 %12599  ;;  %v12759_v25 = vsub.f32 %v26239_v46, %v12597_v18  ;;  %12953 = vadd.xlane.f32.xlu0 %v12952_v45  ;;  %12956 = vadd.xlane.f32.xlu1 %v12955_v35  ;;  %v12958_v42 = vsel %vm1066_vm1, %v26511_v1, 0.0 }
 0x806   : > { %v12760_v34 = vsub.f32 %v26249_v54, %v12600_v52 }
 0x807   : > { %v26514_v53 = vpop.eup %22847  ;;  %v12837_v58 = vmul.f32 1.442695, %v12759_v25 }
 0x808   : > { %v12603_v20 = vpop.xlane.xlu0 %12602  ;;  %v12961_v57 = vsel %vm1066_vm1, %v26514_v53, 0.0  ;;  %v26521_v55 = vpop.eup %22849  ;;  %v12839_v54 = vmul.f32 1.442695, %v12760_v34 }
 0x809   : > { %22857 = vpow2.f32 %v12837_v58  ;;  %v12606_v7 = vpop.xlane.xlu1 %12605  ;;  %v12761_v46 = vsub.f32 %v26247_v17, %v12603_v20  ;;  %12959 = vadd.xlane.f32.xlu0 %v12958_v42  ;;  %12962 = vadd.xlane.f32.xlu1 %v12961_v57  ;;  %v12964_v30 = vsel %vm1066_vm1, %v26521_v55, 0.0 }
 0x80a   : > { %22859 = vpow2.f32 %v12835_v44  ;;  %v12762_v39 = vsub.f32 %v26257_v2, %v12606_v7 }
 0x80b   : > { %v26524_v31 = vpop.eup %22851  ;;  %v12841_v22 = vmul.f32 1.442695, %v12761_v46 }
 0x80c   : > { %v12609_v37 = vpop.xlane.xlu0 %12608  ;;  %v12967_v60 = vsel %vm1066_vm1, %v26524_v31, 0.0  ;;  %v26531_v18 = vpop.eup %22853  ;;  %v12843_v2 = vmul.f32 1.442695, %v12762_v39 }
 0x80d   : > { %22861 = vpow2.f32 %v12841_v22  ;;  %v12612_v17 = vpop.xlane.xlu1 %12611  ;;  %v12763_v45 = vsub.f32 %v26255_v62, %v12609_v37  ;;  %12965 = vadd.xlane.f32.xlu0 %v12964_v30  ;;  %12968 = vadd.xlane.f32.xlu1 %v12967_v60  ;;  %v12970_v44 = vsel %vm1066_vm1, %v26531_v18, 0.0 }
 0x80e   : > { %22863 = vpow2.f32 %v12839_v54  ;;  %v12764_v42 = vsub.f32 %v26265_v51, %v12612_v17 }
 0x80f   : > { %v26534_v35 = vpop.eup %22855  ;;  %v12845_v52 = vmul.f32 1.442695, %v12763_v45 }
 0x810   : > { %v12615_v25 = vpop.xlane.xlu0 %12614  ;;  %v12973_v34 = vsel %vm1066_vm1, %v26534_v35, 0.0 }
 0x811   : > { %22865 = vpow2.f32 %v12845_v52  ;;  %v12618_v58 = vpop.xlane.xlu1 %12617  ;;  %v12765_v20 = vsub.f32 %v26263_v41, %v12615_v25  ;;  %12971 = vadd.xlane.f32.xlu0 %v12970_v44  ;;  %12974 = vadd.xlane.f32.xlu1 %v12973_v34  ;;  %v12847_v41 = vmul.f32 1.442695, %v12764_v42 }
 0x812   : > { %22867 = vpow2.f32 %v12843_v2  ;;  %v12766_v30 = vsub.f32 %v26273_v8, %v12618_v58 }
 0x813   : > { %v26541_v62 = vpop.eup %22857  ;;  %v12849_v57 = vmul.f32 1.442695, %v12765_v20 }
 0x814   : > { %v12621_v7 = vpop.xlane.xlu0 %12620  ;;  %v12979_v46 = vsel %vm1066_vm1, %v26541_v62, 0.0  ;;  %v26546_v54 = vpop.eup %22859  ;;  %v12851_v25 = vmul.f32 1.442695, %v12766_v30 }
 0x815   : > { %v12624_v39 = vpop.xlane.xlu1 %12623  ;;  %v12767_v22 = vsub.f32 %v26271_v15, %v12621_v7  ;;  %12980 = vadd.xlane.f32.xlu1 %v12979_v46  ;;  %22869 = vpow2.f32 %v12849_v57  ;;  %v12976_v51 = vsel %vm1066_vm1, %v26546_v54, 0.0 }
 0x816   : > { %v12768_v57 = vsub.f32 %v26281_v43, %v12624_v39 }
 0x817   : > { %v26549_v37 = vpop.eup %22861  ;;  %v12853_v60 = vmul.f32 1.442695, %v12767_v22 }
 0x818   : > { %v12627_v45 = vpop.xlane.xlu0 %12626  ;;  %v12985_v17 = vsel %vm1066_vm1, %v26549_v37, 0.0  ;;  %v26556_v2 = vpop.eup %22863  ;;  %v12855_v30 = vmul.f32 1.442695, %v12768_v57 }
 0x819   : > { %22871 = vpow2.f32 %v12853_v60  ;;  %v12630_v52 = vpop.xlane.xlu1 %12629  ;;  %12977 = vadd.xlane.f32.xlu1 %v12976_v51  ;;  %12986 = vadd.xlane.f32.xlu0 %v12985_v17  ;;  %v12769_v8 = vsub.f32 %v26279_v61, %v12627_v45  ;;  %v12982_v44 = vsel %vm1066_vm1, %v26556_v2, 0.0 }
 0x81a   : > { %22873 = vpow2.f32 %v12847_v41  ;;  %v12770_v60 = vsub.f32 %v26289_v14, %v12630_v52 }
 0x81b   : > { %v26558_v15 = vpop.eup %22865  ;;  %22875 = vpow2.f32 %v12851_v25  ;;  %v12857_v7 = vmul.f32 1.442695, %v12769_v8 }
 0x81c   : > { %v12991_v34 = vsel %vm1066_vm1, %v26558_v15, 0.0  ;;  %v26565_v58 = vpop.eup %22867  ;;  %v12633_v42 = vpop.xlane.xlu0 %12632  ;;  %v12859_v25 = vmul.f32 1.442695, %v12770_v60 }
 0x81d   : > { %v26567_v20 = vpop.xlane.xlu1 %12635  ;;  %12983 = vadd.xlane.f32.xlu1 %v12982_v44  ;;  %12992 = vadd.xlane.f32.xlu0 %v12991_v34  ;;  %v12988_v61 = vsel %vm1066_vm1, %v26565_v58, 0.0  ;;  %22877 = vpow2.f32 %v12857_v7 }
 0x81e   : > { %22879 = vpow2.f32 %v12855_v30 }
 0x81f   : > { %v26572_v46 = vpop.eup %22869  ;;  %22881 = vpow2.f32 %v12859_v25 }
 0x820   : > { %v12639_v45 = vpop.xlane.xlu0 %12638  ;;  %v12997_v51 = vsel %vm1066_vm1, %v26572_v46, 0.0 }
 0x821   : > { %v26574_v22 = vpop.xlane.xlu1 %12641  ;;  %12989 = vadd.xlane.f32.xlu0 %v12988_v61  ;;  %v12773_v8 = vsub.f32 %v26295_v23, %v12639_v45 }
 0x823   : > { %v26576_v41 = vpop.eup %22871  ;;  %v12865_v34 = vmul.f32 1.442695, %v12773_v8 }
 0x824   : > { %29101 = vst [vmem:[#allocation37_spill] sm:$0xff] %v26576_v41  ;;  %v13003_v43 = vsel %vm1066_vm1, %v26576_v41, 0.0  ;;  %v26583_v39 = vpop.eup %22873  ;;  %v12645_v23 = vpop.xlane.xlu0 %12644 }
 0x825   : > { %v26585_v17 = vpop.xlane.xlu1 %12647  ;;  %12998 = vadd.xlane.f32.xlu0 %v12997_v51  ;;  %13004 = vadd.xlane.f32.xlu1 %v13003_v43  ;;  %v12994_v14 = vsel %vm1066_vm1, %v26583_v39, 0.0  ;;  %v26590_v52 = vpop.eup %22875  ;;  %22883 = vpow2.f32 %v12865_v34 }
 0x826   : > { %29102 = vst [vmem:[#allocation30_spill] sm:$0xff] %v26590_v52  ;;  %v13000_v57 = vsel %vm1066_vm1, %v26590_v52, 0.0 }
 0x827   : > { %v26596_v7 = vpop.eup %22877 }
 0x828   : > { %29103 = vst [vmem:[#allocation54_spill] sm:$0xff] %v26596_v7  ;;  %v13009_v30 = vsel %vm1066_vm1, %v26596_v7, 0.0  ;;  %v26602_v60 = vpop.eup %22879  ;;  %v26610_v25 = vpop.xlane.xlu0 %12650 }
 0x829   : > { %v26592_v44 = vpop.xlane.xlu1 %12653  ;;  %12995 = vadd.xlane.f32.xlu0 %v12994_v14  ;;  %29104 = vst [vmem:[#allocation46_spill] sm:$0xff] %v26602_v60  ;;  %v13006_v51 = vsel %vm1066_vm1, %v26602_v60, 0.0  ;;  %v26608_v43 = vpop.eup %22881 }
 0x82a   : > { %29105 = vst [vmem:[#allocation73_spill] sm:$0xff] %v26608_v43  ;;  %v13012_v14 = vsel %vm1066_vm1, %v26608_v43, 0.0 }
 0x82d   : > { %v26598_v61 = vpop.xlane.xlu1 %12659  ;;  %13001 = vadd.xlane.f32.xlu0 %v13000_v57 }
 0x82f   : > { %v26618_v34 = vpop.eup %22883 }
 0x830   : > { %29107 = vst [vmem:[#allocation88_spill] sm:$0xff] %v26618_v34  ;;  %v13021_v7 = vsel %vm1066_vm1, %v26618_v34, 0.0 }
 0x831   : > { %v26604_v45 = vpop.xlane.xlu1 %12665  ;;  %13010 = vadd.xlane.f32.xlu0 %v13009_v30  ;;  %v26622_v30 = vpop.xlane.xlu0 %12656 }
 0x835   : > { %v26612_v8 = vpop.xlane.xlu1 %12671  ;;  %13007 = vadd.xlane.f32.xlu0 %v13006_v51  ;;  %v26628_v51 = vpop.xlane.xlu0 %12662 }
 0x836   : > { %29106 = vst [vmem:[#allocation66_spill] sm:$0xff] %v26612_v8  ;;  %14321 = vrot.lane.b32.xlu1 %v28939_v56, %s23180_s15  ;;  %v12771_v56 = vsub.f32 %v26287_v21, %v12633_v42 }
 0x839   : > { %v26620_v57 = vpop.xlane.xlu1 %12677  ;;  %13013 = vadd.xlane.f32.xlu0 %v13012_v14  ;;  %v26635_v8 = vpop.xlane.xlu0 %12668  ;;  %v12772_v14 = vsub.f32 %v26297_v13, %v26567_v20 }
 0x83a   : > { %29108 = vst [vmem:[#allocation78_spill] sm:$0xff] %v26620_v57  ;;  %v12861_v57 = vmul.f32 1.442695, %v12771_v56 }
 0x83b   : > { %v12863_v34 = vmul.f32 1.442695, %v12772_v14 }
 0x83c   : > { %22885 = vpow2.f32 %v12861_v57 }
 0x83d   : > { %v26626_v60 = vpop.xlane.xlu1 %12683  ;;  %13022 = vadd.xlane.f32.xlu0 %v13021_v7  ;;  %22887 = vpow2.f32 %v12863_v34  ;;  %v12775_v34 = vsub.f32 %v26303_v59, %v12645_v23 }
 0x83e   : > { %29109 = vst [vmem:[#allocation104_spill] sm:$0xff] %v26626_v60  ;;  %v26641_v60 = vpop.xlane.xlu0 %12674 }
 0x841   : > { %v26630_v41 = vpop.xlane.xlu1 %12692 }
 0x842   : > { %29110 = vst [vmem:[#allocation97_spill] sm:$0xff] %v26630_v41  ;;  %v26645_v41 = vpop.xlane.xlu0 %12680 }
 0x845   : > { %v26633_v43 = vpop.xlane.xlu1 %12698 }
 0x846   : > { %29111 = vst [vmem:[#allocation122_spill] sm:$0xff] %v26633_v43  ;;  %v26651_v42 = vpop.eup %22885  ;;  %v26653_v13 = vpop.xlane.xlu0 %12686 }
 0x847   : > { %29115 = vst [vmem:[#allocation90_spill] sm:$0xff] %v26651_v42  ;;  %v13015_v20 = vsel %vm1066_vm1, %v26651_v42, 0.0  ;;  %v26657_v57 = vpop.eup %22887 }
 0x848   : > { %v13018_v14 = vsel %vm1066_vm1, %v26657_v57, 0.0 }
 0x849   : > { %v26639_v52 = vpop.xlane.xlu1 %12704 }
 0x84a   : > { %29112 = vst [vmem:[#allocation115_spill] sm:$0xff] %v26639_v52 }
 0x84d   : > { %v26643_v7 = vpop.xlane.xlu1 %12710 }
 0x84e   : > { %29113 = vst [vmem:[#allocation138_spill] sm:$0xff] %v26643_v7 }
 0x851   : > { %v26649_v21 = vpop.xlane.xlu1 %12716 }
 0x852   : > { %29114 = vst [vmem:[#allocation131_spill] sm:$0xff] %v26649_v21  ;;  %v12869_v21 = vmul.f32 1.442695, %v12775_v34 }
 0x853   : > { %14397 = vrot.lane.b32.xlu0 %v28943_v0, %s23180_s15  ;;  %v26664_v0 = vpop.xlane.xlu0 %12689 }
 0x854   : > { %22889 = vpow2.f32 %v12869_v21 }
 0x855   : > { %v26659_v56 = vpop.xlane.xlu1 %12722 }
 0x856   : > { %29116 = vst [vmem:[#allocation147_spill] sm:$0xff] %v26659_v56 }
 0x857   : > { %v26668_v52 = vpop.xlane.xlu0 %12695 }
 0x859   : > { %v26666_v7 = vpop.xlane.xlu1 %12725 }
 0x85a   : > { %13016 = vadd.xlane.f32.xlu1 %v13015_v20  ;;  %29117 = vst [vmem:[#allocation107_spill] sm:$0xff] %v26666_v7 }
 0x85b   : > { %v26672_v42 = vpop.xlane.xlu0 %12701 }
 0x85c   : > { %29119 = vst [vmem:[#allocation161_spill] sm:$0xff] %v26672_v42 }
 0x85d   : > { %v26670_v43 = vpop.xlane.xlu1 %12734 }
 0x85e   : > { %13019 = vadd.xlane.f32.xlu1 %v13018_v14  ;;  %29118 = vst [vmem:[#allocation99_spill] sm:$0xff] %v26670_v43  ;;  %v26676_v20 = vpop.eup %22889 }
 0x85f   : > { %29121 = vst [vmem:[#allocation163_spill] sm:$0xff] %v26676_v20  ;;  %v26680_v59 = vpop.xlane.xlu0 %12707  ;;  %v13027_v23 = vsel %vm1066_vm1, %v26676_v20, 0.0 }
 0x860   : > { %29122 = vst [vmem:[#allocation164_spill] sm:$0xff] %v26680_v59 }
 0x861   : > { %v26674_v56 = vpop.xlane.xlu1 %12731 }
 0x862   : > { %29120 = vst [vmem:[#allocation162_spill] sm:$0xff] %v26674_v56  ;;  %v12774_v56 = vsub.f32 %v26305_v28, %v26574_v22 }
 0x863   : > { %v26686_v21 = vpop.xlane.xlu0 %12713 }
 0x865   : > { %v26684_v34 = vpop.xlane.xlu1 %12740 }
 0x866   : > { %29123 = vst [vmem:[#allocation165_spill] sm:$0xff] %v26684_v34 }
 0x867   : > { %v26692_v43 = vpop.xlane.xlu0 %12719 }
 0x869   : > { %v26688_v14 = vpop.xlane.xlu1 %12737 }
 0x86a   : > { %29124 = vst [vmem:[#allocation166_spill] sm:$0xff] %v26688_v14 }
 0x86b   : > { %v26696_v59 = vpop.xlane.xlu0 %12728 }
 0x86d   : > { %v26694_v7 = vpop.xlane.xlu1 %12743 }
 0x86e   : > { %29125 = vst [vmem:[#allocation167_spill] sm:$0xff] %v26694_v7 }
 0x86f   : > { %14473 = vrot.lane.b32.xlu1 %v28942_v32, %s23180_s15  ;;  %v12867_v32 = vmul.f32 1.442695, %v12774_v56 }
 0x872   : > { %13028 = vadd.xlane.f32.xlu0 %v13027_v23 }
 0x882   : > { %v12939_v42 = vpop.xlane.xlu1 %12938 }
 0x883   : > { %22891 = vrcp.f32 %v12939_v42 }
 0x884   : > { %22893 = vpow2.f32 %v12867_v32 }
 0x886   : > { %v12945_v20 = vpop.xlane.xlu1 %12944 }
 0x887   : > { %22895 = vrcp.f32 %v12945_v20  ;;  %v12942_v23 = vpop.xlane.xlu0 %12941 }
 0x888   : > { %22897 = vrcp.f32 %v12942_v23  ;;  %14549 = vrot.lane.b32.xlu0 %v28948_v49, %s23180_s15  ;;  %v12777_v49 = vsub.f32 %v26311_v47, %v26610_v25 }
 0x88a   : > { %v12951_v14 = vpop.xlane.xlu1 %12950  ;;  %v12873_v47 = vmul.f32 1.442695, %v12777_v49 }
 0x88b   : > { %22899 = vrcp.f32 %v12951_v14 }
 0x88d   : > { %v22892_v28 = vpop.eup %22891 }
 0x88e   : > { %v12948_v22 = vpop.xlane.xlu0 %12947  ;;  %v13193_v34 = vmul.f32 %v22892_v28, %v26475_v29  ;;  %v26701_v7 = vpop.eup %22893 }
 0x88f   : > { %22901 = vrcp.f32 %v12948_v22  ;;  %v13024_v29 = vsel %vm1066_vm1, %v26701_v7, 0.0 }
 0x890   : > { %21403 = vmatmul.mubr.msk.f32.vlgmr.msra.gmra.mrb[152].mxu0 %vm1066_vm1, %v13193_v34 }
 0x891   : > { %v22896_v42 = vpop.eup %22895  ;;  %21411 = vmatpush3.msra.mxu0 %v26383_v38  ;;  %21412 = vmatprep.mubr.msk.f32.mxu0 %vm23182_vm4, %v28916_v40 }
 0x892   : > { %v22898_v56 = vpop.eup %22897  ;;  %v12957_v20 = vpop.xlane.xlu1 %12956  ;;  %21420 = vmatprep.subr.mxu0 %v28916_v40  ;;  %v13195_v32 = vmul.f32 %v22896_v42, %v26481_v4 }
 0x893   : > { %v12954_v14 = vpop.xlane.xlu0 %12953  ;;  %22903 = vrcp.f32 %v12957_v20  ;;  %13025 = vadd.xlane.f32.xlu1 %v13024_v29  ;;  %v13194_v38 = vmul.f32 %v22898_v56, %v26483_v9 }
 0x894   : > { %22905 = vrcp.f32 %v12954_v14  ;;  %21413 = vmatmul.mubr.msk.f32.vlgmr.msra.gmra.mrb[154].mxu0 %vm1066_vm1, %v13195_v32 }
 0x895   : > { %v22900_v34 = vpop.eup %22899  ;;  %21408 = vmatmul.mubr.msk.f32.vlgmr.msra.gmra.mrb[136].mxu1 %vm1066_vm1, %v13194_v38  ;;  %21421 = vmatpush3.msra.mxu0 %v26431_v19 }
 0x896   : > { %21416 = vmatpush3.msra.mxu1 %v26401_v63  ;;  %v12963_v25 = vpop.xlane.xlu1 %12962  ;;  %21422 = vmatprep.mubr.msk.f32.mxu0 %vm23182_vm4, %v28916_v40  ;;  %v13197_v4 = vmul.f32 %v22900_v34, %v26491_v48 }
 0x897   : > { %v12960_v23 = vpop.xlane.xlu0 %12959  ;;  %22907 = vrcp.f32 %v12963_v25  ;;  %21430 = vmatprep.subr.mxu0 %v28916_v40  ;;  %21417 = vmatprep.mubr.msk.f32.mxu1 %vm23182_vm4, %v28916_v40 }
 0x898   : > { %22909 = vrcp.f32 %v12960_v23  ;;  %21423 = vmatmul.mubr.msk.f32.vlgmr.msra.gmra.mrb[156].mxu0 %vm1066_vm1, %v13197_v4  ;;  %21425 = vmatprep.subr.mxu1 %v28916_v40  ;;  %v29126_v23 = vld [vmem:[#allocation70_spill] sm:$0xff] }
 0x899   : > { %v22902_v19 = vpop.eup %22901  ;;  %21431 = vmatpush3.msra.mxu0 %v26445_v26  ;;  %21432 = vmatprep.mubr.msk.f32.mxu0 %vm23182_vm4, %v28916_v40  ;;  %22911 = vpow2.f32 %v12873_v47  ;;  %v12776_v4 = vsub.f32 %v29126_v23, %v26585_v17  ;;  %v29127_v17 = vld [vmem:[#allocation45_spill] sm:$0xff] }
 0x89a   : > { %v12969_v63 = vpop.xlane.xlu1 %12968  ;;  %v13196_v48 = vmul.f32 %v22902_v19, %v26497_v27  ;;  %21440 = vmatprep.subr.mxu0 %v28916_v40 }
 0x89b   : > { %v12966_v9 = vpop.xlane.xlu0 %12965  ;;  %22913 = vrcp.f32 %v12969_v63 }
 0x89c   : > { %22915 = vrcp.f32 %v12966_v9  ;;  %21418 = vmatmul.mubr.msk.f32.vlgmr.msra.gmra.mrb[138].mxu1 %vm1066_vm1, %v13196_v48  ;;  %v12871_v9 = vmul.f32 1.442695, %v12776_v4 }
 0x89d   : > { %v22904_v28 = vpop.eup %22903  ;;  %21426 = vmatpush3.msra.mxu1 %v26411_v24  ;;  %21427 = vmatprep.mubr.msk.f32.mxu1 %vm23182_vm4, %v28916_v40 }
 0x89e   : > { %v22906_v26 = vpop.eup %22905  ;;  %v12975_v22 = vpop.xlane.xlu1 %12974  ;;  %21435 = vmatprep.subr.mxu1 %v28916_v40  ;;  %v13199_v56 = vmul.f32 %v22904_v28, %v26504_v33 }
 0x89f   : > { %v12972_v42 = vpop.xlane.xlu0 %12971  ;;  %22917 = vrcp.f32 %v12975_v22  ;;  %v13198_v27 = vmul.f32 %v22906_v26, %v26501_v16  ;;  %v29128_v22 = vld [vmem:[#allocation91_spill] sm:$0xff] }
 0x8a0   : > { %22919 = vrcp.f32 %v12972_v42  ;;  %21433 = vmatmul.mubr.msk.f32.vlgmr.msra.gmra.mrb[158].mxu0 %vm1066_vm1, %v13199_v56  ;;  %v12779_v42 = vsub.f32 %v29128_v22, %v26622_v30 }
 0x8a1   : > { %v22908_v49 = vpop.eup %22907  ;;  %21428 = vmatmul.mubr.msk.f32.vlgmr.msra.gmra.mrb[140].mxu1 %vm1066_vm1, %v13198_v27  ;;  %21441 = vmatpush3.msra.mxu0 %v26429_v5 }
 0x8a2   : > { %v22910_v24 = vpop.eup %22909  ;;  %21436 = vmatpush3.msra.mxu1 %v26455_v12  ;;  %v12981_v20 = vpop.xlane.xlu1 %12980  ;;  %21437 = vmatprep.mubr.msk.f32.mxu1 %vm23182_vm4, %v28916_v40  ;;  %v13201_v33 = vmul.f32 %v22908_v49, %v26514_v53 }
 0x8a3   : > { %21442 = vmatprep.mubr.msk.f32.mxu0 %vm23182_vm4, %v28916_v40  ;;  %21445 = vmatprep.subr.mxu1 %v28916_v40  ;;  %v13200_v16 = vmul.f32 %v22910_v24, %v26511_v1  ;;  %v26749_v14 = vpop.eup %22911  ;;  %v12877_v24 = vmul.f32 1.442695, %v12779_v42 }
 0x8a4   : > { %21450 = vmatprep.subr.mxu0 %v28916_v40  ;;  %21443 = vmatmul.mubr.msk.f32.vlgmr.msra.gmra.mrb[160].mxu0 %vm1066_vm1, %v13201_v33 }
 0x8a5   : > { %v22914_v5 = vpop.eup %22913  ;;  %21451 = vmatpush3.msra.mxu0 %v26461_v11  ;;  %14625 = vrot.lane.b32.xlu1 %v28946_v36, %s23180_s15  ;;  %v13033_v11 = vsel %vm1066_vm1, %v26749_v14, 0.0 }
 0x8a6   : > { %v22916_v12 = vpop.eup %22915  ;;  %21438 = vmatmul.mubr.msk.f32.vlgmr.msra.gmra.mrb[142].mxu1 %vm1066_vm1, %v13200_v16  ;;  %v12978_v53 = vpop.xlane.xlu1 %12977  ;;  %21452 = vmatprep.mubr.msk.f32.mxu0 %vm23182_vm4, %v28916_v40  ;;  %v13203_v1 = vmul.f32 %v22914_v5, %v26524_v31  ;;  %v29129_v16 = vld [vmem:[#allocation56_spill] sm:$0xff] }
 0x8a7   : > { %v26757_v29 = vpop.xlane.xlu0 %12986  ;;  %21446 = vmatpush3.msra.mxu1 %v26449_v6  ;;  %22921 = vrcp.f32 %v12978_v53  ;;  %21460 = vmatprep.subr.mxu0 %v28916_v40  ;;  %v13202_v36 = vmul.f32 %v22916_v12, %v26521_v55  ;;  %v29130_v12 = vld [vmem:[#allocation87_spill] sm:$0xff] }
 0x8a8   : > { %13034 = vadd.xlane.f32.xlu0 %v13033_v11  ;;  %21447 = vmatprep.mubr.msk.f32.mxu1 %vm23182_vm4, %v28916_v40  ;;  %22923 = vrcp.f32 %v12981_v20  ;;  %v12778_v53 = vsub.f32 %v29130_v12, %v26592_v44 }
 0x8a9   : > { %v22918_v32 = vpop.eup %22917  ;;  %21455 = vmatprep.subr.mxu1 %v28916_v40  ;;  %21453 = vmatmul.mubr.msk.f32.vlgmr.msra.gmra.mrb[162].mxu0 %vm1066_vm1, %v13203_v1  ;;  %22925 = vpow2.f32 %v12871_v9 }
 0x8aa   : > { %v22920_v31 = vpop.eup %22919  ;;  %21448 = vmatmul.mubr.msk.f32.vlgmr.msra.gmra.mrb[144].mxu1 %vm1066_vm1, %v13202_v36  ;;  %21461 = vmatpush3.msra.mxu0 %v26457_v50  ;;  %v13205_v38 = vmul.f32 %v22918_v32, %v26534_v35  ;;  %v12984_v50 = vpop.xlane.xlu1 %12983  ;;  %v12875_v36 = vmul.f32 1.442695, %v12778_v53 }
 0x8ab   : > { %v26773_v6 = vpop.xlane.xlu0 %12992  ;;  %21456 = vmatpush3.msra.mxu1 %v26467_v10  ;;  %21457 = vmatprep.mubr.msk.f32.mxu1 %vm23182_vm4, %v28916_v40  ;;  %v13204_v55 = vmul.f32 %v22920_v31, %v26531_v18  ;;  %22927 = vrcp.f32 %v12984_v50 }
 0x8ac   : > { %21462 = vmatprep.mubr.msk.f32.mxu0 %vm23182_vm4, %v28916_v40  ;;  %21465 = vmatprep.subr.mxu1 %v28916_v40  ;;  %22929 = vpow2.f32 %v12877_v24 }
 0x8ad   : > { %21463 = vmatmul.mubr.msk.f32.vlgmr.msra.gmra.mrb[164].mxu0 %vm1066_vm1, %v13205_v38  ;;  %21470 = vmatprep.subr.mxu0 %v28916_v40  ;;  %22931 = vrcp.f32 %v26757_v29  ;;  %v29131_v29 = vld [vmem:[#allocation61_spill] sm:$0xff] }
 0x8ae   : > { %21458 = vmatmul.mubr.msk.f32.vlgmr.msra.gmra.mrb[146].mxu1 %vm1066_vm1, %v13204_v55  ;;  %21472 = vmatprep.mubr.msk.f32.mxu0 %vm23182_vm4, %v28916_v40  ;;  %22933 = vpow2.f32 %v12875_v36  ;;  %v29132_v38 = vld [vmem:[#allocation109_spill] sm:$0xff] }
 0x8af   : > { %v12990_v35 = vpop.xlane.xlu0 %12989  ;;  %21466 = vmatpush3.msra.mxu1 %v26465_v3  ;;  %21467 = vmatprep.mubr.msk.f32.mxu1 %vm23182_vm4, %v28916_v40  ;;  %v12781_v55 = vsub.f32 %v29132_v38, %v26628_v51  ;;  %v29139_v38 = vld [vmem:[#allocation28_spill] sm:$0xff] }
 0x8b0   : > { %21475 = vmatprep.subr.mxu1 %v28916_v40  ;;  %22935 = vrcp.f32 %v12990_v35  ;;  %v29133_v35 = vld [vmem:[#allocation74_spill] sm:$0xff] }
 0x8b1   : > { %v22922_v10 = vpop.eup %22921 }
 0x8b2   : > { %v26792_v18 = vpop.xlane.xlu1 %13004  ;;  %v13206_v47 = vmul.f32 %v22922_v10, %v26546_v54  ;;  %v22924_v25 = vpop.eup %22923 }
 0x8b3   : > { %v26794_v34 = vpop.xlane.xlu0 %12998  ;;  %v13207_v63 = vmul.f32 %v22924_v25, %v26541_v62  ;;  %v26817_v62 = vpop.eup %22925 }
 0x8b4   : > { %21468 = vmatmul.mubr.msk.f32.vlgmr.msra.gmra.mrb[148].mxu1 %vm1066_vm1, %v13206_v47  ;;  %v13030_v56 = vsel %vm1066_vm1, %v26817_v62, 0.0  ;;  %v12881_v47 = vmul.f32 1.442695, %v12781_v55 }
 0x8b5   : > { %21477 = vmatprep.mubr.msk.f32.mxu1 %vm23182_vm4, %v28916_v40  ;;  %v22928_v49 = vpop.eup %22927 }
 0x8b6   : > { %v14322_v3 = vpop.permute.xlu1 %14321  ;;  %v13208_v33 = vmul.f32 %v22928_v49, %v26556_v2  ;;  %v26832_v30 = vpop.eup %22929  ;;  %22937 = vpow2.f32 %v12881_v47 }
 0x8b7   : > { %v26802_v19 = vpop.xlane.xlu0 %12995  ;;  %21471 = vmatpush3.msra.mxu0 %v14322_v3  ;;  %v13039_v5 = vsel %vm1066_vm1, %v26832_v30, 0.0  ;;  %v22932_v11 = vpop.eup %22931  ;;  %22939 = vrcp.f32 %v26773_v6  ;;  %v29135_v6 = vld [vmem:[#allocation82_spill] sm:$0xff] }
 0x8b8   : > { %21473 = vmatmul.mubr.msk.f32.vlgmr.msra.gmra.mrb[166].mxu0 %vm1066_vm1, %v13207_v63  ;;  %21480 = vmatprep.subr.mxu0 %v28916_v40  ;;  %v13209_v31 = vmul.f32 %v22932_v11, %v26549_v37  ;;  %v26852_v44 = vpop.eup %22933 }
 0x8b9   : > { %21482 = vmatprep.mubr.msk.f32.mxu0 %vm23182_vm4, %v28916_v40  ;;  %v13036_v37 = vsel %vm1066_vm1, %v26852_v44, 0.0 }
 0x8ba   : > { %v22936_v10 = vpop.eup %22935 }
 0x8bb   : > { %v26809_v54 = vpop.xlane.xlu0 %13001  ;;  %v13210_v23 = vmul.f32 %v22936_v10, %v26565_v58  ;;  %v29134_v58 = vld [vmem:[#allocation101_spill] sm:$0xff] }
 0x8bc   : > { %v12780_v3 = vsub.f32 %v29134_v58, %v26598_v61 }
 0x8be   : > { %14701 = vrot.lane.b32.xlu0 %v29127_v17, %s23180_s15  ;;  %v12879_v17 = vmul.f32 1.442695, %v12780_v3 }
 0x8bf   : > { %v26813_v48 = vpop.xlane.xlu0 %13010 }
 0x8c0   : > { %v26865_v51 = vpop.eup %22937  ;;  %22941 = vpow2.f32 %v12879_v17 }
 0x8c1   : > { %v13045_v4 = vsel %vm1066_vm1, %v26865_v51, 0.0  ;;  %v22940_v9 = vpop.eup %22939  ;;  %22943 = vrcp.f32 %v26802_v19  ;;  %v29137_v19 = vld [vmem:[#allocation22_spill] sm:$0xff] }
 0x8c2   : > { %v13211_v42 = vmul.f32 %v22940_v9, %v26558_v15 }
 0x8c3   : > { %v26815_v28 = vpop.xlane.xlu0 %13007 }
 0x8c7   : > { %v26819_v26 = vpop.xlane.xlu0 %13013 }
 0x8c9   : > { %13031 = vadd.xlane.f32.xlu1 %v13030_v56  ;;  %v29136_v56 = vld [vmem:[#allocation123_spill] sm:$0xff] }
 0x8ca   : > { %v26884_v61 = vpop.eup %22941  ;;  %v12783_v49 = vsub.f32 %v29136_v56, %v26635_v8 }
 0x8cb   : > { %v26825_v27 = vpop.xlane.xlu0 %13022  ;;  %v13042_v15 = vsel %vm1066_vm1, %v26884_v61, 0.0 }
 0x8cc   : > { %v12885_v24 = vmul.f32 1.442695, %v12783_v49 }
 0x8ce   : > { %22945 = vpow2.f32 %v12885_v24 }
 0x8cf   : > { %v14398_v20 = vpop.permute.xlu0 %14397  ;;  %22947 = vrcp.f32 %v26794_v34 }
 0x8d0   : > { %21476 = vmatpush3.msra.mxu1 %v14398_v20 }
 0x8d1   : > { %21478 = vmatmul.mubr.msk.f32.vlgmr.msra.gmra.mrb[150].mxu1 %vm1066_vm1, %v13208_v33  ;;  %21485 = vmatprep.subr.mxu1 %v28916_v40  ;;  %v22944_v33 = vpop.eup %22943 }
 0x8d2   : > { %21487 = vmatprep.mubr.msk.f32.mxu1 %vm23182_vm4, %v28916_v40 }
 0x8d8   : > { %v26897_v8 = vpop.eup %22945 }
 0x8d9   : > { %v13051_v12 = vsel %vm1066_vm1, %v26897_v8, 0.0 }
 0x8da   : > { %14777 = vrot.lane.b32.xlu1 %v29129_v16, %s23180_s15 }
 0x8dd   : > { %13040 = vadd.xlane.f32.xlu0 %v13039_v5  ;;  %v13212_v5 = vmul.f32 %v22944_v33, %v26583_v39  ;;  %v29138_v39 = vld [vmem:[#allocation116_spill] sm:$0xff] }
 0x8de   : > { %v12782_v53 = vsub.f32 %v29138_v39, %v26604_v45 }
 0x8e0   : > { %v12883_v11 = vmul.f32 1.442695, %v12782_v53 }
 0x8e2   : > { %22949 = vpow2.f32 %v12883_v11 }
 0x8e3   : > { %22951 = vrcp.f32 %v26809_v54 }
 0x8e7   : > { %v26839_v2 = vpop.xlane.xlu1 %13016 }
 0x8eb   : > { %v26843_v1 = vpop.xlane.xlu1 %13019 }
 0x8ef   : > { %v14474_v32 = vpop.permute.xlu1 %14473 }
 0x8f0   : > { %21481 = vmatpush3.msra.mxu0 %v14474_v32  ;;  %v22948_v32 = vpop.eup %22947 }
 0x8f1   : > { %21483 = vmatmul.mubr.msk.f32.vlgmr.msra.gmra.mrb[168].mxu0 %vm1066_vm1, %v13209_v31  ;;  %21490 = vmatprep.subr.mxu0 %v28916_v40  ;;  %v26918_v34 = vpop.eup %22949 }
 0x8f2   : > { %21492 = vmatprep.mubr.msk.f32.mxu0 %vm23182_vm4, %v28916_v40  ;;  %v13048_v47 = vsel %vm1066_vm1, %v26918_v34, 0.0  ;;  %v22952_v58 = vpop.eup %22951 }
 0x8f3   : > { %14853 = vrot.lane.b32.xlu0 %v29131_v29, %s23180_s15  ;;  %v13213_v29 = vmul.f32 %v22948_v32, %v26572_v46  ;;  %v29140_v46 = vld [vmem:[#allocation72_spill] sm:$0xff] }
 0x8fe   : > { %13037 = vadd.xlane.f32.xlu1 %v13036_v37  ;;  %v12785_v37 = vsub.f32 %v29140_v46, %v26641_v60  ;;  %v29144_v60 = vld [vmem:[#allocation30_spill] sm:$0xff] }
 0x8ff   : > { %v26858_v50 = vpop.xlane.xlu0 %13028 }
 0x903   : > { %v14550_v25 = vpop.permute.xlu0 %14549 }
 0x904   : > { %21486 = vmatpush3.msra.mxu1 %v14550_v25 }
 0x905   : > { %21488 = vmatmul.mubr.msk.f32.vlgmr.msra.gmra.mrb[152].mxu1 %vm1066_vm1, %v13210_v23  ;;  %21495 = vmatprep.subr.mxu1 %v28916_v40 }
 0x906   : > { %21497 = vmatprep.mubr.msk.f32.mxu1 %vm23182_vm4, %v28916_v40 }
 0x90f   : > { %14929 = vrot.lane.b32.xlu1 %v29133_v35, %s23180_s15 }
 0x912   : > { %13046 = vadd.xlane.f32.xlu0 %v13045_v4  ;;  %v12889_v4 = vmul.f32 1.442695, %v12785_v37 }
 0x914   : > { %22953 = vpow2.f32 %v12889_v4 }
 0x915   : > { %22955 = vrcp.f32 %v26792_v18  ;;  %v29153_v18 = vld [vmem:[#allocation47_spill] sm:$0xff] }
 0x920   : > { %v26874_v63 = vpop.xlane.xlu1 %13025 }
 0x924   : > { %v14626_v22 = vpop.permute.xlu1 %14625 }
 0x925   : > { %21491 = vmatpush3.msra.mxu0 %v14626_v22  ;;  %v13214_v22 = vmul.f32 %v22952_v58, %v29144_v60 }
 0x926   : > { %21493 = vmatmul.mubr.msk.f32.vlgmr.msra.gmra.mrb[170].mxu0 %vm1066_vm1, %v13211_v42  ;;  %21500 = vmatprep.subr.mxu0 %v28916_v40 }
 0x927   : > { %21502 = vmatprep.mubr.msk.f32.mxu0 %vm23182_vm4, %v28916_v40 }
 0x928   : > { %15005 = vrot.lane.b32.xlu0 %v29135_v6, %s23180_s15 }
 0x933   : > { %13043 = vadd.xlane.f32.xlu1 %v13042_v15 }
 0x935   : > { %v26890_v20 = vpop.xlane.xlu0 %13034 }
 0x939   : > { %v14702_v16 = vpop.permute.xlu0 %14701 }
 0x93a   : > { %21496 = vmatpush3.msra.mxu1 %v14702_v16  ;;  %v26945_v16 = vpop.eup %22953 }
 0x93b   : > { %21498 = vmatmul.mubr.msk.f32.vlgmr.msra.gmra.mrb[154].mxu1 %vm1066_vm1, %v13212_v5  ;;  %21505 = vmatprep.subr.mxu1 %v28916_v40  ;;  %v13057_v53 = vsel %vm1066_vm1, %v26945_v16, 0.0 }
 0x93c   : > { %21507 = vmatprep.mubr.msk.f32.mxu1 %vm23182_vm4, %v28916_v40 }
 0x944   : > { %15081 = vrot.lane.b32.xlu1 %v29137_v19, %s23180_s15 }
 0x947   : > { %13052 = vadd.xlane.f32.xlu0 %v13051_v12  ;;  %v29149_v12 = vld [vmem:[#allocation38_spill] sm:$0xff] }
 0x956   : > { %v26906_v36 = vpop.xlane.xlu1 %13031 }
 0x95a   : > { %v14778_v31 = vpop.permute.xlu1 %14777 }
 0x95b   : > { %21501 = vmatpush3.msra.mxu0 %v14778_v31 }
 0x95c   : > { %21503 = vmatmul.mubr.msk.f32.vlgmr.msra.gmra.mrb[172].mxu0 %vm1066_vm1, %v13213_v29  ;;  %21510 = vmatprep.subr.mxu0 %v28916_v40 }
 0x95d   : > { %15157 = vrot.lane.b32.xlu0 %v29139_v38, %s23180_s15  ;;  %21512 = vmatprep.mubr.msk.f32.mxu0 %vm23182_vm4, %v28916_v40 }
 0x963   : > { %v26916_v45 = vpop.f32.mrb[152].mxu0 }
 0x964   : > { %v21404_v55 = vpop.f32.mrb[153].mxu0 }
 0x967   : > { %v26922_v10 = vpop.f32.mrb[154].mxu0 }
 0x968   : > { %29141 = vst [vmem:[#allocation70_spill] sm:$0xff] %v26922_v10  ;;  %13049 = vadd.xlane.f32.xlu1 %v13048_v47  ;;  %v26926_v25 = vpop.f32.mrb[136].mxu1  ;;  %v21414_v23 = vpop.f32.mrb[155].mxu0  ;;  %v29150_v47 = vld [vmem:[#allocation66_spill] sm:$0xff] }
 0x969   : > { %29142 = vst [vmem:[#allocation45_spill] sm:$0xff] %v26926_v25  ;;  %v21409_v35 = vpop.f32.mrb[137].mxu1  ;;  %v29151_v23 = vld [vmem:[#allocation139_spill] sm:$0xff] }
 0x96a   : > { %v26928_v54 = vpop.xlane.xlu0 %13040  ;;  %v12784_v35 = vsub.f32 %v29151_v23, %v29150_v47 }
 0x96b   : > { %v26930_v3 = vpop.f32.mrb[156].mxu0 }
 0x96c   : > { %29143 = vst [vmem:[#allocation91_spill] sm:$0xff] %v26930_v3  ;;  %v21424_v9 = vpop.f32.mrb[157].mxu0 }
 0x96d   : > { %v12887_v9 = vmul.f32 1.442695, %v12784_v35  ;;  %v29156_v35 = vld [vmem:[#allocation46_spill] sm:$0xff] }
 0x96e   : > { %v14854_v17 = vpop.permute.xlu0 %14853 }
 0x96f   : > { %21506 = vmatpush3.msra.mxu1 %v14854_v17  ;;  %v26933_v42 = vpop.f32.mrb[138].mxu1  ;;  %22957 = vpow2.f32 %v12887_v9  ;;  %v29157_v9 = vld [vmem:[#allocation57_spill] sm:$0xff] }
 0x970   : > { %29145 = vst [vmem:[#allocation56_spill] sm:$0xff] %v26933_v42  ;;  %21508 = vmatmul.mubr.msk.f32.vlgmr.msra.gmra.mrb[156].mxu1 %vm1066_vm1, %v13214_v22  ;;  %v21419_v6 = vpop.f32.mrb[139].mxu1  ;;  %21515 = vmatprep.subr.mxu1 %v28916_v40  ;;  %v22956_v22 = vpop.eup %22955  ;;  %22959 = vrcp.f32 %v26815_v28 }
 0x971   : > { %21517 = vmatprep.mubr.msk.f32.mxu1 %vm23182_vm4, %v28916_v40 }
 0x973   : > { %v26939_v56 = vpop.f32.mrb[158].mxu0 }
 0x974   : > { %29146 = vst [vmem:[#allocation87_spill] sm:$0xff] %v26939_v56  ;;  %v26941_v49 = vpop.f32.mrb[140].mxu1  ;;  %v21434_v15 = vpop.f32.mrb[159].mxu0 }
 0x975   : > { %29147 = vst [vmem:[#allocation61_spill] sm:$0xff] %v26941_v49  ;;  %v21429_v24 = vpop.f32.mrb[141].mxu1 }
 0x976   : > { %v29152_v24 = vld [vmem:[#allocation37_spill] sm:$0xff] }
 0x977   : > { %v26943_v33 = vpop.f32.mrb[160].mxu0 }
 0x978   : > { %v21444_v5 = vpop.f32.mrb[161].mxu0 }
 0x979   : > { %v26947_v19 = vpop.f32.mrb[142].mxu1  ;;  %15233 = vrot.lane.b32.xlu1 %v29149_v12, %s23180_s15  ;;  %v13215_v5 = vmul.f32 %v22956_v22, %v29152_v24  ;;  %v26978_v12 = vpop.eup %22957 }
 0x97a   : > { %29148 = vst [vmem:[#allocation109_spill] sm:$0xff] %v26947_v19  ;;  %v21439_v39 = vpop.f32.mrb[143].mxu1 }
 0x97b   : > { %v29154_v39 = vld [vmem:[#allocation132_spill] sm:$0xff] }
 0x97c   : > { %v26953_v11 = vpop.f32.mrb[162].mxu0  ;;  %13058 = vadd.xlane.f32.xlu0 %v13057_v53  ;;  %v12787_v53 = vsub.f32 %v29154_v39, %v26645_v41 }
 0x97d   : > { %v26955_v32 = vpop.f32.mrb[144].mxu1  ;;  %v21454_v31 = vpop.f32.mrb[163].mxu0 }
 0x97e   : > { %v21449_v29 = vpop.f32.mrb[145].mxu1  ;;  %v13054_v31 = vsel %vm1066_vm1, %v26978_v12, 0.0 }
 0x97f   : > { %v12893_v29 = vmul.f32 1.442695, %v12787_v53 }
 0x980   : > { %v26957_v38 = vpop.f32.mrb[164].mxu0 }
 0x981   : > { %v26959_v55 = vpop.f32.mrb[146].mxu1  ;;  %v21464_v46 = vpop.f32.mrb[165].mxu0  ;;  %22961 = vpow2.f32 %v12893_v29  ;;  %v29160_v29 = vld [vmem:[#allocation54_spill] sm:$0xff] }
 0x982   : > { %v21459_v37 = vpop.f32.mrb[147].mxu1  ;;  %22963 = vrcp.f32 %v26813_v48  ;;  %v29161_v48 = vld [vmem:[#allocation63_spill] sm:$0xff] }
 0x983   : > { %v22960_v37 = vpop.eup %22959 }
 0x987   : > { %v26964_v4 = vpop.f32.mrb[148].mxu1 }
 0x988   : > { %v21469_v58 = vpop.f32.mrb[149].mxu1 }
 0x989   : > { %v13216_v58 = vmul.f32 %v22960_v37, %v29156_v35 }
 0x98b   : > { %v26966_v17 = vpop.xlane.xlu1 %13037  ;;  %v26968_v60 = vpop.f32.mrb[166].mxu0 }
 0x98c   : > { %v21474_v6 = vpop.f32.mrb[167].mxu0  ;;  %v26993_v41 = vpop.eup %22961 }
 0x98d   : > { %v13063_v22 = vsel %vm1066_vm1, %v26993_v41, 0.0  ;;  %v29158_v6 = vld [vmem:[#allocation78_spill] sm:$0xff]  ;;  %v22964_v39 = vpop.eup %22963 }
 0x98e   : > { %v13217_v37 = vmul.f32 %v22964_v39, %v29160_v29  ;;  %v29163_v39 = vld [vmem:[#allocation73_spill] sm:$0xff]  ;;  %v29164_v29 = vld [vmem:[#allocation75_spill] sm:$0xff] }
 0x98f   : > { %v14930_v15 = vpop.permute.xlu1 %14929 }
 0x990   : > { %21511 = vmatpush3.msra.mxu0 %v14930_v15  ;;  %v29159_v15 = vld [vmem:[#allocation21_spill] sm:$0xff] }
 0x991   : > { %21513 = vmatmul.mubr.msk.f32.vlgmr.msra.gmra.mrb[174].mxu0 %vm1066_vm1, %v13215_v5  ;;  %21520 = vmatprep.subr.mxu0 %v28916_v40  ;;  %v12786_v24 = vsub.f32 %v29159_v15, %v29158_v6 }
 0x992   : > { %15309 = vrot.lane.b32.xlu0 %v29153_v18, %s23180_s15  ;;  %21522 = vmatprep.mubr.msk.f32.mxu0 %vm23182_vm4, %v28916_v40 }
 0x993   : > { %v12891_v5 = vmul.f32 1.442695, %v12786_v24 }
 0x995   : > { %22965 = vpow2.f32 %v12891_v5 }
 0x996   : > { %22967 = vrcp.f32 %v26819_v26 }
 0x99d   : > { %13055 = vadd.xlane.f32.xlu1 %v13054_v31 }
 0x99f   : > { %v26984_v46 = vpop.xlane.xlu0 %13046  ;;  %v27014_v35 = vpop.eup %22965 }
 0x9a0   : > { %v22968_v15 = vpop.eup %22967 }
 0x9a3   : > { %v15006_v47 = vpop.permute.xlu0 %15005 }
 0x9a4   : > { %v26986_v23 = vpop.f32.mrb[150].mxu1  ;;  %21516 = vmatpush3.msra.mxu1 %v15006_v47 }
 0x9a5   : > { %29155 = vst [vmem:[#allocation74_spill] sm:$0xff] %v26986_v23  ;;  %v21479_v28 = vpop.f32.mrb[151].mxu1  ;;  %21518 = vmatmul.mubr.msk.f32.vlgmr.msra.gmra.mrb[158].mxu1 %vm1066_vm1, %v13216_v58  ;;  %21525 = vmatprep.subr.mxu1 %v28916_v40  ;;  %v29162_v58 = vld [vmem:[#allocation80_spill] sm:$0xff] }
 0x9a6   : > { %21527 = vmatprep.mubr.msk.f32.mxu1 %vm23182_vm4, %v28916_v40  ;;  %v12789_v28 = vsub.f32 %v29162_v58, %v26653_v13 }
 0x9ae   : > { %15385 = vrot.lane.b32.xlu1 %v29157_v9, %s23180_s15  ;;  %v13060_v9 = vsel %vm1066_vm1, %v27014_v35, 0.0 }
 0x9b1   : > { %13064 = vadd.xlane.f32.xlu0 %v13063_v22  ;;  %v12897_v22 = vmul.f32 1.442695, %v12789_v28 }
 0x9b3   : > { %22969 = vpow2.f32 %v12897_v22 }
 0x9b4   : > { %22971 = vrcp.f32 %v26839_v2  ;;  %v29168_v2 = vld [vmem:[#allocation84_spill] sm:$0xff] }
 0x9bd   : > { %v27029_v13 = vpop.eup %22969 }
 0x9be   : > { %v22972_v22 = vpop.eup %22971 }
 0x9c0   : > { %v27002_v18 = vpop.xlane.xlu1 %13043 }
 0x9c4   : > { %v15082_v53 = vpop.permute.xlu1 %15081  ;;  %v27004_v31 = vpop.f32.mrb[168].mxu0 }
 0x9c5   : > { %21521 = vmatpush3.msra.mxu0 %v15082_v53  ;;  %v21484_v47 = vpop.f32.mrb[169].mxu0  ;;  %v13218_v53 = vmul.f32 %v22968_v15, %v29163_v39  ;;  %v29167_v39 = vld [vmem:[#allocation90_spill] sm:$0xff] }
 0x9c6   : > { %21523 = vmatmul.mubr.msk.f32.vlgmr.msra.gmra.mrb[176].mxu0 %vm1066_vm1, %v13217_v37  ;;  %21530 = vmatprep.subr.mxu0 %v28916_v40  ;;  %v13069_v37 = vsel %vm1066_vm1, %v27029_v13, 0.0  ;;  %v29165_v47 = vld [vmem:[#allocation104_spill] sm:$0xff] }
 0x9c7   : > { %15461 = vrot.lane.b32.xlu0 %v29161_v48, %s23180_s15  ;;  %21532 = vmatprep.mubr.msk.f32.mxu0 %vm23182_vm4, %v28916_v40  ;;  %v29166_v48 = vld [vmem:[#allocation92_spill] sm:$0xff] }
 0x9c8   : > { %v12788_v58 = vsub.f32 %v29166_v48, %v29165_v47  ;;  %v29170_v47 = vld [vmem:[#allocation148_spill] sm:$0xff] }
 0x9ca   : > { %v12895_v28 = vmul.f32 1.442695, %v12788_v58 }
 0x9cc   : > { %22973 = vpow2.f32 %v12895_v28 }
 0x9cd   : > { %22975 = vrcp.f32 %v26843_v1 }
 0x9d2   : > { %13061 = vadd.xlane.f32.xlu1 %v13060_v9 }
 0x9d4   : > { %v27020_v6 = vpop.xlane.xlu0 %13052 }
 0x9d8   : > { %v15158_v24 = vpop.permute.xlu0 %15157  ;;  %v27022_v5 = vpop.f32.mrb[152].mxu1 }
 0x9d9   : > { %21526 = vmatpush3.msra.mxu1 %v15158_v24  ;;  %v21489_v26 = vpop.f32.mrb[153].mxu1 }
 0x9da   : > { %21528 = vmatmul.mubr.msk.f32.vlgmr.msra.gmra.mrb[160].mxu1 %vm1066_vm1, %v13218_v53  ;;  %21535 = vmatprep.subr.mxu1 %v28916_v40  ;;  %v13219_v53 = vmul.f32 %v22972_v22, %v29167_v39 }
 0x9db   : > { %21537 = vmatprep.mubr.msk.f32.mxu1 %vm23182_vm4, %v28916_v40 }
 0x9e3   : > { %15537 = vrot.lane.b32.xlu1 %v29164_v29, %s23180_s15  ;;  %v27050_v29 = vpop.eup %22973 }
 0x9e4   : > { %v13066_v58 = vsel %vm1066_vm1, %v27050_v29, 0.0 }
 0x9e6   : > { %13070 = vadd.xlane.f32.xlu0 %v13069_v37  ;;  %v29169_v37 = vld [vmem:[#allocation97_spill] sm:$0xff] }
 0x9e7   : > { %v12791_v48 = vsub.f32 %v29170_v47, %v29169_v37  ;;  %v29171_v37 = vld [vmem:[#allocation6_spill] sm:$0xff] }
 0x9e9   : > { %v12901_v28 = vmul.f32 1.442695, %v12791_v48 }
 0x9eb   : > { %22977 = vpow2.f32 %v12901_v28 }
 0x9ec   : > { %22979 = vrcp.f32 %v26825_v27  ;;  %v29174_v27 = vld [vmem:[#allocation12_spill] sm:$0xff] }
 0x9f5   : > { %v27038_v9 = vpop.xlane.xlu1 %13049 }
 0x9f9   : > { %v15234_v15 = vpop.permute.xlu1 %15233  ;;  %v27040_v24 = vpop.f32.mrb[170].mxu0 }
 0x9fa   : > { %21531 = vmatpush3.msra.mxu0 %v15234_v15  ;;  %v21494_v26 = vpop.f32.mrb[171].mxu0  ;;  %v22976_v15 = vpop.eup %22975 }
 0x9fb   : > { %21533 = vmatmul.mubr.msk.f32.vlgmr.msra.gmra.mrb[178].mxu0 %vm1066_vm1, %v13219_v53  ;;  %21540 = vmatprep.subr.mxu0 %v28916_v40  ;;  %v13220_v53 = vmul.f32 %v22976_v15, %v26657_v57  ;;  %v29172_v57 = vld [vmem:[#allocation36_spill] sm:$0xff] }
 0x9fc   : > { %15613 = vrot.lane.b32.xlu0 %v29168_v2, %s23180_s15  ;;  %21542 = vmatprep.mubr.msk.f32.mxu0 %vm23182_vm4, %v28916_v40  ;;  %v27065_v2 = vpop.eup %22977  ;;  %v12790_v48 = vsub.f32 %v29172_v57, %v26664_v0  ;;  %v29176_v57 = vld [vmem:[#allocation26_spill] sm:$0xff] }
 0x9fd   : > { %v13075_v47 = vsel %vm1066_vm1, %v27065_v2, 0.0  ;;  %v22980_v15 = vpop.eup %22979 }
 0xa07   : > { %13067 = vadd.xlane.f32.xlu1 %v13066_v58  ;;  %v12899_v58 = vmul.f32 1.442695, %v12790_v48 }
 0xa09   : > { %v27056_v22 = vpop.xlane.xlu0 %13058  ;;  %22981 = vpow2.f32 %v12899_v58 }
 0xa0a   : > { %22983 = vrcp.f32 %v26874_v63 }
 0xa0d   : > { %v15310_v39 = vpop.permute.xlu0 %15309 }
 0xa0e   : > { %v27059_v26 = vpop.f32.mrb[154].mxu1  ;;  %21536 = vmatpush3.msra.mxu1 %v15310_v39 }
 0xa0f   : > { %v21499_v1 = vpop.f32.mrb[155].mxu1  ;;  %21538 = vmatmul.mubr.msk.f32.vlgmr.msra.gmra.mrb[162].mxu1 %vm1066_vm1, %v13220_v53  ;;  %21545 = vmatprep.subr.mxu1 %v28916_v40  ;;  %v29173_v53 = vld [vmem:[#allocation88_spill] sm:$0xff] }
 0xa10   : > { %21547 = vmatprep.mubr.msk.f32.mxu1 %vm23182_vm4, %v28916_v40  ;;  %v13221_v1 = vmul.f32 %v22980_v15, %v29173_v53 }
 0xa13   : > { %v27086_v0 = vpop.eup %22981 }
 0xa14   : > { %v13072_v58 = vsel %vm1066_vm1, %v27086_v0, 0.0  ;;  %v22984_v53 = vpop.eup %22983 }
 0xa18   : > { %15689 = vrot.lane.b32.xlu1 %v29171_v37, %s23180_s15 }
 0xa1b   : > { %13076 = vadd.xlane.f32.xlu0 %v13075_v47  ;;  %v29175_v47 = vld [vmem:[#allocation122_spill] sm:$0xff] }
 0xa1c   : > { %v12793_v48 = vsub.f32 %v29176_v57, %v29175_v47  ;;  %v29177_v57 = vld [vmem:[#allocation3_spill] sm:$0xff] }
 0xa1e   : > { %v12905_v15 = vmul.f32 1.442695, %v12793_v48 }
 0xa20   : > { %22985 = vpow2.f32 %v12905_v15 }
 0xa21   : > { %22987 = vrcp.f32 %v26858_v50  ;;  %v29180_v50 = vld [vmem:[#allocation7_spill] sm:$0xff] }
 0xa2a   : > { %v27074_v28 = vpop.xlane.xlu1 %13055  ;;  %v27101_v47 = vpop.eup %22985 }
 0xa2b   : > { %v13081_v48 = vsel %vm1066_vm1, %v27101_v47, 0.0 }
 0xa2e   : > { %v15386_v39 = vpop.permute.xlu1 %15385 }
 0xa2f   : > { %v27077_v19 = vpop.f32.mrb[172].mxu0  ;;  %21541 = vmatpush3.msra.mxu0 %v15386_v39 }
 0xa30   : > { %v21504_v37 = vpop.f32.mrb[173].mxu0  ;;  %21543 = vmatmul.mubr.msk.f32.vlgmr.msra.gmra.mrb[180].mxu0 %vm1066_vm1, %v13221_v1  ;;  %21550 = vmatprep.subr.mxu0 %v28916_v40 }
 0xa31   : > { %15765 = vrot.lane.b32.xlu0 %v29174_v27, %s23180_s15  ;;  %21552 = vmatprep.mubr.msk.f32.mxu0 %vm23182_vm4, %v28916_v40  ;;  %v13222_v37 = vmul.f32 %v22984_v53, %v26701_v7  ;;  %v29178_v7 = vld [vmem:[#allocation110_spill] sm:$0xff] }
 0xa3c   : > { %13073 = vadd.xlane.f32.xlu1 %v13072_v58  ;;  %v12792_v58 = vsub.f32 %v29178_v7, %v26668_v52  ;;  %v29182_v7 = vld [vmem:[#allocation103_spill] sm:$0xff] }
 0xa3e   : > { %v27092_v39 = vpop.xlane.xlu0 %13064  ;;  %v12903_v15 = vmul.f32 1.442695, %v12792_v58 }
 0xa40   : > { %22989 = vpow2.f32 %v12903_v15 }
 0xa41   : > { %22991 = vrcp.f32 %v26906_v36 }
 0xa42   : > { %v15462_v1 = vpop.permute.xlu0 %15461 }
 0xa43   : > { %v27095_v27 = vpop.f32.mrb[156].mxu1  ;;  %21546 = vmatpush3.msra.mxu1 %v15462_v1  ;;  %v22988_v1 = vpop.eup %22987 }
 0xa44   : > { %v21509_v63 = vpop.f32.mrb[157].mxu1  ;;  %21548 = vmatmul.mubr.msk.f32.vlgmr.msra.gmra.mrb[164].mxu1 %vm1066_vm1, %v13222_v37  ;;  %21555 = vmatprep.subr.mxu1 %v28916_v40 }
 0xa45   : > { %21557 = vmatprep.mubr.msk.f32.mxu1 %vm23182_vm4, %v28916_v40  ;;  %v29179_v63 = vld [vmem:[#allocation163_spill] sm:$0xff] }
 0xa46   : > { %v13223_v56 = vmul.f32 %v22988_v1, %v29179_v63 }
 0xa4a   : > { %v27122_v52 = vpop.eup %22989 }
 0xa4b   : > { %v13078_v15 = vsel %vm1066_vm1, %v27122_v52, 0.0 }
 0xa4d   : > { %15841 = vrot.lane.b32.xlu1 %v29177_v57, %s23180_s15 }
 0xa50   : > { %13082 = vadd.xlane.f32.xlu0 %v13081_v48  ;;  %v29181_v48 = vld [vmem:[#allocation115_spill] sm:$0xff] }
 0xa51   : > { %v12795_v58 = vsub.f32 %v29182_v7, %v29181_v48  ;;  %v29184_v7 = vld [vmem:[#allocation9_spill] sm:$0xff] }
 0xa5f   : > { %v27110_v53 = vpop.xlane.xlu1 %13061 }
 0xa63   : > { %v15538_v37 = vpop.permute.xlu1 %15537 }
 0xa64   : > { %v27113_v49 = vpop.f32.mrb[174].mxu0  ;;  %21551 = vmatpush3.msra.mxu0 %v15538_v37  ;;  %v22992_v37 = vpop.eup %22991 }
 0xa65   : > { %v21514_v57 = vpop.f32.mrb[175].mxu0  ;;  %21553 = vmatmul.mubr.msk.f32.vlgmr.msra.gmra.mrb[182].mxu0 %vm1066_vm1, %v13223_v56  ;;  %21560 = vmatprep.subr.mxu0 %v28916_v40  ;;  %v12909_v56 = vmul.f32 1.442695, %v12795_v58 }
 0xa66   : > { %15917 = vrot.lane.b32.xlu0 %v29180_v50, %s23180_s15  ;;  %21562 = vmatprep.mubr.msk.f32.mxu0 %vm23182_vm4, %v28916_v40  ;;  %v13224_v57 = vmul.f32 %v22992_v37, %v26817_v62  ;;  %v29185_v62 = vld [vmem:[#allocation161_spill] sm:$0xff] }
 0xa67   : > { %22993 = vpow2.f32 %v12909_v56 }
 0xa68   : > { %22995 = vrcp.f32 %v26890_v20  ;;  %v29187_v20 = vld [vmem:[#allocation11_spill] sm:$0xff] }
 0xa71   : > { %13079 = vadd.xlane.f32.xlu1 %v13078_v15  ;;  %v27137_v48 = vpop.eup %22993  ;;  %v29186_v15 = vld [vmem:[#allocation125_spill] sm:$0xff] }
 0xa72   : > { %v13087_v58 = vsel %vm1066_vm1, %v27137_v48, 0.0  ;;  %v12794_v56 = vsub.f32 %v29186_v15, %v29185_v62  ;;  %v29188_v62 = vld [vmem:[#allocation138_spill] sm:$0xff] }
 0xa73   : > { %v27128_v1 = vpop.xlane.xlu0 %13070 }
 0xa74   : > { %v12907_v37 = vmul.f32 1.442695, %v12794_v56 }
 0xa76   : > { %22997 = vpow2.f32 %v12907_v37 }
 0xa77   : > { %v15614_v63 = vpop.permute.xlu0 %15613  ;;  %22999 = vrcp.f32 %v26966_v17 }
 0xa78   : > { %v27131_v50 = vpop.f32.mrb[158].mxu1  ;;  %21556 = vmatpush3.msra.mxu1 %v15614_v63 }
 0xa79   : > { %29183 = vst [vmem:[#allocation101_spill] sm:$0xff] %v27131_v50  ;;  %v21519_v36 = vpop.f32.mrb[159].mxu1  ;;  %21558 = vmatmul.mubr.msk.f32.vlgmr.msra.gmra.mrb[166].mxu1 %vm1066_vm1, %v13224_v57  ;;  %21565 = vmatprep.subr.mxu1 %v28916_v40  ;;  %v22996_v57 = vpop.eup %22995 }
 0xa7a   : > { %21567 = vmatprep.mubr.msk.f32.mxu1 %vm23182_vm4, %v28916_v40  ;;  %v13225_v3 = vmul.f32 %v22996_v57, %v26749_v14  ;;  %v29189_v14 = vld [vmem:[#allocation117_spill] sm:$0xff] }
 0xa7b   : > { %v12797_v15 = vsub.f32 %v29189_v14, %v29188_v62  ;;  %v29190_v14 = vld [vmem:[#allocation14_spill] sm:$0xff] }
 0xa82   : > { %15993 = vrot.lane.b32.xlu1 %v29184_v7, %s23180_s15 }
 0xa85   : > { %13088 = vadd.xlane.f32.xlu0 %v13087_v58  ;;  %v27158_v58 = vpop.eup %22997 }
 0xa86   : > { %v13084_v56 = vsel %vm1066_vm1, %v27158_v58, 0.0  ;;  %v23000_v57 = vpop.eup %22999 }
 0xa94   : > { %v27146_v63 = vpop.xlane.xlu1 %13067 }
 0xa98   : > { %v15690_v36 = vpop.permute.xlu1 %15689 }
 0xa99   : > { %v27149_v42 = vpop.f32.mrb[176].mxu0  ;;  %21561 = vmatpush3.msra.mxu0 %v15690_v36 }
 0xa9a   : > { %v21524_v7 = vpop.f32.mrb[177].mxu0  ;;  %21563 = vmatmul.mubr.msk.f32.vlgmr.msra.gmra.mrb[184].mxu0 %vm1066_vm1, %v13225_v3  ;;  %21570 = vmatprep.subr.mxu0 %v28916_v40  ;;  %v12913_v3 = vmul.f32 1.442695, %v12797_v15 }
 0xa9b   : > { %16069 = vrot.lane.b32.xlu0 %v29187_v20, %s23180_s15  ;;  %21572 = vmatprep.mubr.msk.f32.mxu0 %vm23182_vm4, %v28916_v40  ;;  %v13226_v7 = vmul.f32 %v23000_v57, %v26852_v44  ;;  %v29191_v44 = vld [vmem:[#allocation164_spill] sm:$0xff] }
 0xa9c   : > { %23001 = vpow2.f32 %v12913_v3 }
 0xa9d   : > { %23003 = vrcp.f32 %v26928_v54  ;;  %v29193_v54 = vld [vmem:[#allocation16_spill] sm:$0xff] }
 0xaa6   : > { %13085 = vadd.xlane.f32.xlu1 %v13084_v56  ;;  %v27173_v62 = vpop.eup %23001  ;;  %v29192_v56 = vld [vmem:[#allocation140_spill] sm:$0xff] }
 0xaa7   : > { %v13093_v15 = vsel %vm1066_vm1, %v27173_v62, 0.0  ;;  %v12796_v3 = vsub.f32 %v29192_v56, %v29191_v44  ;;  %v29194_v44 = vld [vmem:[#allocation131_spill] sm:$0xff] }
 0xaa8   : > { %v27164_v37 = vpop.xlane.xlu0 %13076 }
 0xaa9   : > { %v12911_v57 = vmul.f32 1.442695, %v12796_v3 }
 0xaab   : > { %23005 = vpow2.f32 %v12911_v57 }
 0xaac   : > { %v15766_v36 = vpop.permute.xlu0 %15765  ;;  %23007 = vrcp.f32 %v27002_v18 }
 0xaad   : > { %v27167_v20 = vpop.f32.mrb[160].mxu1  ;;  %21566 = vmatpush3.msra.mxu1 %v15766_v36 }
 0xaae   : > { %v21529_v17 = vpop.f32.mrb[161].mxu1  ;;  %21568 = vmatmul.mubr.msk.f32.vlgmr.msra.gmra.mrb[168].mxu1 %vm1066_vm1, %v13226_v7  ;;  %21575 = vmatprep.subr.mxu1 %v28916_v40  ;;  %v23004_v7 = vpop.eup %23003 }
 0xaaf   : > { %21577 = vmatprep.mubr.msk.f32.mxu1 %vm23182_vm4, %v28916_v40  ;;  %v13227_v10 = vmul.f32 %v23004_v7, %v26832_v30  ;;  %v29195_v30 = vld [vmem:[#allocation133_spill] sm:$0xff] }
 0xab0   : > { %v12799_v56 = vsub.f32 %v29195_v30, %v29194_v44  ;;  %v29196_v30 = vld [vmem:[#allocation25_spill] sm:$0xff] }
 0xab7   : > { %16145 = vrot.lane.b32.xlu1 %v29190_v14, %s23180_s15 }
 0xaba   : > { %13094 = vadd.xlane.f32.xlu0 %v13093_v15  ;;  %v27194_v15 = vpop.eup %23005 }
 0xabb   : > { %v13090_v3 = vsel %vm1066_vm1, %v27194_v15, 0.0  ;;  %v23008_v7 = vpop.eup %23007 }
 0xac9   : > { %v27182_v36 = vpop.xlane.xlu1 %13073 }
 0xacd   : > { %v15842_v17 = vpop.permute.xlu1 %15841 }
 0xace   : > { %v27185_v25 = vpop.f32.mrb[178].mxu0  ;;  %21571 = vmatpush3.msra.mxu0 %v15842_v17 }
 0xacf   : > { %v21534_v14 = vpop.f32.mrb[179].mxu0  ;;  %21573 = vmatmul.mubr.msk.f32.vlgmr.msra.gmra.mrb[186].mxu0 %vm1066_vm1, %v13227_v10  ;;  %21580 = vmatprep.subr.mxu0 %v28916_v40  ;;  %v12917_v10 = vmul.f32 1.442695, %v12799_v56 }
 0xad0   : > { %16221 = vrot.lane.b32.xlu0 %v29193_v54, %s23180_s15  ;;  %21582 = vmatprep.mubr.msk.f32.mxu0 %vm23182_vm4, %v28916_v40  ;;  %v13228_v14 = vmul.f32 %v23008_v7, %v26884_v61  ;;  %v29197_v61 = vld [vmem:[#allocation93_spill] sm:$0xff] }
 0xad1   : > { %23009 = vpow2.f32 %v12917_v10 }
 0xad2   : > { %23011 = vrcp.f32 %v26984_v46  ;;  %v29198_v46 = vld [vmem:[#allocation31_spill] sm:$0xff] }
 0xadb   : > { %13091 = vadd.xlane.f32.xlu1 %v13090_v3  ;;  %v27209_v44 = vpop.eup %23009  ;;  %v12798_v3 = vsub.f32 %v29197_v61, %v26686_v21 }
 0xadc   : > { %v13099_v56 = vsel %vm1066_vm1, %v27209_v44, 0.0 }
 0xadd   : > { %v27200_v57 = vpop.xlane.xlu0 %13082  ;;  %v12915_v10 = vmul.f32 1.442695, %v12798_v3 }
 0xadf   : > { %23013 = vpow2.f32 %v12915_v10 }
 0xae0   : > { %23015 = vrcp.f32 %v27038_v9 }
 0xae1   : > { %v15918_v17 = vpop.permute.xlu0 %15917 }
 0xae2   : > { %v27203_v54 = vpop.f32.mrb[162].mxu1  ;;  %21576 = vmatpush3.msra.mxu1 %v15918_v17  ;;  %v23012_v17 = vpop.eup %23011 }
 0xae3   : > { %v21539_v18 = vpop.f32.mrb[163].mxu1  ;;  %21578 = vmatmul.mubr.msk.f32.vlgmr.msra.gmra.mrb[170].mxu1 %vm1066_vm1, %v13228_v14  ;;  %21585 = vmatprep.subr.mxu1 %v28916_v40 }
 0xae4   : > { %21587 = vmatprep.mubr.msk.f32.mxu1 %vm23182_vm4, %v28916_v40  ;;  %v13229_v18 = vmul.f32 %v23012_v17, %v26865_v51  ;;  %v29200_v51 = vld [vmem:[#allocation149_spill] sm:$0xff] }
 0xae9   : > { %v27230_v21 = vpop.eup %23013 }
 0xaea   : > { %v13096_v3 = vsel %vm1066_vm1, %v27230_v21, 0.0 }
 0xaec   : > { %16297 = vrot.lane.b32.xlu1 %v29196_v30, %s23180_s15 }
 0xaef   : > { %13100 = vadd.xlane.f32.xlu0 %v13099_v56  ;;  %v29199_v56 = vld [vmem:[#allocation147_spill] sm:$0xff] }
 0xaf0   : > { %v12801_v61 = vsub.f32 %v29200_v51, %v29199_v56  ;;  %v29201_v51 = vld [vmem:[#allocation40_spill] sm:$0xff] }
 0xaf2   : > { %v12921_v10 = vmul.f32 1.442695, %v12801_v61 }
 0xaf4   : > { %23017 = vpow2.f32 %v12921_v10 }
 0xaf5   : > { %23019 = vrcp.f32 %v27020_v6  ;;  %v29204_v6 = vld [vmem:[#allocation49_spill] sm:$0xff] }
 0xafe   : > { %v27218_v7 = vpop.xlane.xlu1 %13079 }
 0xb02   : > { %v15994_v14 = vpop.permute.xlu1 %15993 }
 0xb03   : > { %v27221_v50 = vpop.f32.mrb[180].mxu0  ;;  %21581 = vmatpush3.msra.mxu0 %v15994_v14  ;;  %v23016_v14 = vpop.eup %23015 }
 0xb04   : > { %v21544_v30 = vpop.f32.mrb[181].mxu0  ;;  %21583 = vmatmul.mubr.msk.f32.vlgmr.msra.gmra.mrb[188].mxu0 %vm1066_vm1, %v13229_v18  ;;  %21590 = vmatprep.subr.mxu0 %v28916_v40  ;;  %v27245_v56 = vpop.eup %23017 }
 0xb05   : > { %16373 = vrot.lane.b32.xlu0 %v29198_v46, %s23180_s15  ;;  %21592 = vmatprep.mubr.msk.f32.mxu0 %vm23182_vm4, %v28916_v40  ;;  %v13230_v30 = vmul.f32 %v23016_v14, %v26918_v34  ;;  %v13105_v61 = vsel %vm1066_vm1, %v27245_v56, 0.0  ;;  %v29202_v34 = vld [vmem:[#allocation112_spill] sm:$0xff] }
 0xb10   : > { %13097 = vadd.xlane.f32.xlu1 %v13096_v3  ;;  %v12800_v3 = vsub.f32 %v29202_v34, %v26692_v43  ;;  %v29205_v43 = vld [vmem:[#allocation67_spill] sm:$0xff] }
 0xb12   : > { %v27236_v17 = vpop.xlane.xlu0 %13088  ;;  %v12919_v10 = vmul.f32 1.442695, %v12800_v3 }
 0xb14   : > { %23021 = vpow2.f32 %v12919_v10 }
 0xb15   : > { %23023 = vrcp.f32 %v27074_v28 }
 0xb16   : > { %v16070_v18 = vpop.permute.xlu0 %16069 }
 0xb17   : > { %v27239_v46 = vpop.f32.mrb[164].mxu1  ;;  %21586 = vmatpush3.msra.mxu1 %v16070_v18  ;;  %v23020_v18 = vpop.eup %23019 }
 0xb18   : > { %v21549_v9 = vpop.f32.mrb[165].mxu1  ;;  %21588 = vmatmul.mubr.msk.f32.vlgmr.msra.gmra.mrb[172].mxu1 %vm1066_vm1, %v13230_v30  ;;  %21595 = vmatprep.subr.mxu1 %v28916_v40 }
 0xb19   : > { %21597 = vmatprep.mubr.msk.f32.mxu1 %vm23182_vm4, %v28916_v40  ;;  %v13231_v9 = vmul.f32 %v23020_v18, %v26897_v8  ;;  %v29207_v18 = vld [vmem:[#allocation105_spill] sm:$0xff] }
 0xb1e   : > { %v27268_v8 = vpop.eup %23021 }
 0xb1f   : > { %v13102_v34 = vsel %vm1066_vm1, %v27268_v8, 0.0  ;;  %v23024_v10 = vpop.eup %23023 }
 0xb20   : > { %v13232_v28 = vmul.f32 %v23024_v10, %v26978_v12  ;;  %v29211_v10 = vld [vmem:[#allocation128_spill] sm:$0xff] }
 0xb21   : > { %16449 = vrot.lane.b32.xlu1 %v29201_v51, %s23180_s15 }
 0xb24   : > { %13106 = vadd.xlane.f32.xlu0 %v13105_v61  ;;  %v29206_v61 = vld [vmem:[#allocation79_spill] sm:$0xff] }
 0xb33   : > { %v27254_v14 = vpop.xlane.xlu1 %13085 }
 0xb37   : > { %v16146_v30 = vpop.permute.xlu1 %16145 }
 0xb38   : > { %v27257_v23 = vpop.f32.mrb[182].mxu0  ;;  %21591 = vmatpush3.msra.mxu0 %v16146_v30  ;;  %v12803_v30 = vsub.f32 %v29207_v18, %v26696_v59 }
 0xb39   : > { %29203 = vst [vmem:[#allocation82_spill] sm:$0xff] %v27257_v23  ;;  %v21554_v51 = vpop.f32.mrb[183].mxu0  ;;  %21593 = vmatmul.mubr.msk.f32.vlgmr.msra.gmra.mrb[190].mxu0 %vm1066_vm1, %v13231_v9  ;;  %21600 = vmatprep.subr.mxu0 %v28916_v40 }
 0xb3a   : > { %16525 = vrot.lane.b32.xlu0 %v29204_v6, %s23180_s15  ;;  %21602 = vmatprep.mubr.msk.f32.mxu0 %vm23182_vm4, %v28916_v40 }
 0xb3e   : > { %16677 = vrot.lane.b32.xlu0 %v29205_v43, %s23180_s15  ;;  %v12925_v43 = vmul.f32 1.442695, %v12803_v30 }
 0xb40   : > { %23025 = vpow2.f32 %v12925_v43 }
 0xb41   : > { %23027 = vrcp.f32 %v27056_v22 }
 0xb42   : > { %16753 = vrot.lane.b32.xlu0 %v29206_v61, %s23180_s15  ;;  %v29209_v61 = vld [vmem:[#allocation62_spill] sm:$0xff] }
 0xb45   : > { %13103 = vadd.xlane.f32.xlu1 %v13102_v34  ;;  %v29210_v34 = vld [vmem:[#allocation107_spill] sm:$0xff] }
 0xb46   : > { %v12802_v18 = vsub.f32 %v29211_v10, %v29210_v34 }
 0xb47   : > { %v27274_v3 = vpop.xlane.xlu0 %13094 }
 0xb4a   : > { %v27287_v59 = vpop.eup %23025 }
 0xb4b   : > { %v16222_v9 = vpop.permute.xlu0 %16221  ;;  %v13111_v12 = vsel %vm1066_vm1, %v27287_v59, 0.0 }
 0xb4c   : > { %v27279_v51 = vpop.f32.mrb[166].mxu1  ;;  %21596 = vmatpush3.msra.mxu1 %v16222_v9  ;;  %v12923_v9 = vmul.f32 1.442695, %v12802_v18  ;;  %v29215_v18 = vld [vmem:[#allocation42_spill] sm:$0xff] }
 0xb4d   : > { %29208 = vst [vmem:[#allocation123_spill] sm:$0xff] %v27279_v51  ;;  %v21559_v6 = vpop.f32.mrb[167].mxu1  ;;  %21598 = vmatmul.mubr.msk.f32.vlgmr.msra.gmra.mrb[174].mxu1 %vm1066_vm1, %v13232_v28  ;;  %21605 = vmatprep.subr.mxu1 %v28916_v40 }
 0xb4e   : > { %21607 = vmatprep.mubr.msk.f32.mxu1 %vm23182_vm4, %v28916_v40  ;;  %v23028_v6 = vpop.eup %23027  ;;  %23029 = vpow2.f32 %v12923_v9 }
 0xb4f   : > { %v13233_v43 = vmul.f32 %v23028_v6, %v26945_v16  ;;  %23031 = vrcp.f32 %v27110_v53 }
 0xb56   : > { %16601 = vrot.lane.b32.xlu1 %v29209_v61, %s23180_s15 }
 0xb58   : > { %v27304_v22 = vpop.eup %23029 }
 0xb59   : > { %v13108_v16 = vsel %vm1066_vm1, %v27304_v22, 0.0  ;;  %v23032_v10 = vpop.eup %23031 }
 0xb5a   : > { %v13234_v53 = vmul.f32 %v23032_v10, %v27014_v35  ;;  %v29220_v35 = vld [vmem:[#allocation162_spill] sm:$0xff]  ;;  %v29221_v10 = vld [vmem:[#allocation141_spill] sm:$0xff] }
 0xb61   : > { %13112 = vadd.xlane.f32.xlu0 %v13111_v12  ;;  %v29213_v12 = vld [vmem:[#allocation27_spill] sm:$0xff] }
 0xb68   : > { %v27294_v28 = vpop.xlane.xlu1 %13091 }
 0xb6c   : > { %v16298_v30 = vpop.permute.xlu1 %16297 }
 0xb6d   : > { %v27297_v61 = vpop.f32.mrb[184].mxu0  ;;  %21601 = vmatpush3.msra.mxu0 %v16298_v30 }
 0xb6e   : > { %29212 = vst [vmem:[#allocation22_spill] sm:$0xff] %v27297_v61  ;;  %v21564_v51 = vpop.f32.mrb[185].mxu0  ;;  %21603 = vmatmul.mubr.msk.f32.vlgmr.msra.gmra.mrb[192].mxu0 %vm1066_vm1, %v13233_v43  ;;  %21610 = vmatprep.subr.mxu0 %v28916_v40  ;;  %v29217_v43 = vld [vmem:[#allocation99_spill] sm:$0xff] }
 0xb6f   : > { %21612 = vmatprep.mubr.msk.f32.mxu0 %vm23182_vm4, %v28916_v40  ;;  %v29214_v51 = vld [vmem:[#allocation32_spill] sm:$0xff] }
 0xb77   : > { %16905 = vrot.lane.b32.xlu0 %v29213_v12, %s23180_s15  ;;  %v29218_v12 = vld [vmem:[#allocation119_spill] sm:$0xff] }
 0xb7a   : > { %13109 = vadd.xlane.f32.xlu1 %v13108_v16  ;;  %v12805_v16 = vsub.f32 %v29218_v12, %v29217_v43 }
 0xb7b   : > { %16981 = vrot.lane.b32.xlu0 %v29214_v51, %s23180_s15  ;;  %v29219_v51 = vld [vmem:[#allocation89_spill] sm:$0xff] }
 0xb7c   : > { %v27312_v34 = vpop.xlane.xlu0 %13100 }
 0xb7f   : > { %17057 = vrot.lane.b32.xlu0 %v29215_v18, %s23180_s15  ;;  %v12929_v18 = vmul.f32 1.442695, %v12805_v16 }
 0xb80   : > { %v16374_v9 = vpop.permute.xlu0 %16373 }
 0xb81   : > { %v27317_v6 = vpop.f32.mrb[168].mxu1  ;;  %21606 = vmatpush3.msra.mxu1 %v16374_v9  ;;  %23033 = vpow2.f32 %v12929_v18  ;;  %v12804_v9 = vsub.f32 %v29221_v10, %v29220_v35  ;;  %v29222_v18 = vld [vmem:[#allocation118_spill] sm:$0xff] }
 0xb82   : > { %29216 = vst [vmem:[#allocation116_spill] sm:$0xff] %v27317_v6  ;;  %v21569_v30 = vpop.f32.mrb[169].mxu1  ;;  %21608 = vmatmul.mubr.msk.f32.vlgmr.msra.gmra.mrb[176].mxu1 %vm1066_vm1, %v13234_v53  ;;  %21615 = vmatprep.subr.mxu1 %v28916_v40  ;;  %23035 = vrcp.f32 %v27092_v39 }
 0xb83   : > { %21617 = vmatprep.mubr.msk.f32.mxu1 %vm23182_vm4, %v28916_v40  ;;  %v12927_v53 = vmul.f32 1.442695, %v12804_v9 }
 0xb85   : > { %23037 = vpow2.f32 %v12927_v53 }
 0xb86   : > { %23039 = vrcp.f32 %v27146_v63 }
 0xb87   : > { %23041 = vrcp.f32 %v27182_v36  ;;  %v29223_v36 = vld [vmem:[#allocation85_spill] sm:$0xff] }
 0xb88   : > { %23043 = vrcp.f32 %v27128_v1 }
 0xb8b   : > { %16829 = vrot.lane.b32.xlu1 %v29219_v51, %s23180_s15  ;;  %v27330_v30 = vpop.eup %23033 }
 0xb8c   : > { %v13117_v61 = vsel %vm1066_vm1, %v27330_v30, 0.0  ;;  %v23036_v23 = vpop.eup %23035 }
 0xb8d   : > { %v13235_v12 = vmul.f32 %v23036_v23, %v26993_v41 }
 0xb8f   : > { %v27344_v51 = vpop.eup %23037 }
 0xb90   : > { %v13114_v23 = vsel %vm1066_vm1, %v27344_v51, 0.0 }
 0xb9d   : > { %v27332_v6 = vpop.xlane.xlu1 %13097 }
 0xb9e   : > { %13118 = vadd.xlane.f32.xlu0 %v13117_v61  ;;  %v23040_v61 = vpop.eup %23039 }
 0xb9f   : > { %v13236_v10 = vmul.f32 %v23040_v61, %v27050_v29  ;;  %v23042_v9 = vpop.eup %23041  ;;  %v29224_v29 = vld [vmem:[#allocation41_spill] sm:$0xff]  ;;  %v29227_v61 = vld [vmem:[#allocation135_spill] sm:$0xff] }
 0xba1   : > { %v16450_v43 = vpop.permute.xlu1 %16449 }
 0xba2   : > { %v27337_v16 = vpop.f32.mrb[186].mxu0  ;;  %21611 = vmatpush3.msra.mxu0 %v16450_v43 }
 0xba3   : > { %v21574_v39 = vpop.f32.mrb[187].mxu0  ;;  %21613 = vmatmul.mubr.msk.f32.vlgmr.msra.gmra.mrb[194].mxu0 %vm1066_vm1, %v13235_v12  ;;  %21620 = vmatprep.subr.mxu0 %v28916_v40  ;;  %v13238_v12 = vmul.f32 %v23042_v9, %v27086_v0  ;;  %v29228_v0 = vld [vmem:[#allocation166_spill] sm:$0xff] }
 0xba4   : > { %21622 = vmatprep.mubr.msk.f32.mxu0 %vm23182_vm4, %v28916_v40  ;;  %v29225_v39 = vld [vmem:[#allocation51_spill] sm:$0xff] }
 0xbaf   : > { %13115 = vadd.xlane.f32.xlu1 %v13114_v23  ;;  %v29226_v23 = vld [vmem:[#allocation165_spill] sm:$0xff] }
 0xbb1   : > { %v27349_v41 = vpop.xlane.xlu0 %13106 }
 0xbb4   : > { %17209 = vrot.lane.b32.xlu0 %v29222_v18, %s23180_s15  ;;  %v12807_v18 = vsub.f32 %v29227_v61, %v29226_v23 }
 0xbb5   : > { %v16526_v35 = vpop.permute.xlu0 %16525 }
 0xbb6   : > { %v27354_v53 = vpop.f32.mrb[170].mxu1  ;;  %21616 = vmatpush3.msra.mxu1 %v16526_v35  ;;  %v12933_v35 = vmul.f32 1.442695, %v12807_v18 }
 0xbb7   : > { %v21579_v63 = vpop.f32.mrb[171].mxu1  ;;  %21618 = vmatmul.mubr.msk.f32.vlgmr.msra.gmra.mrb[178].mxu1 %vm1066_vm1, %v13236_v10  ;;  %21625 = vmatprep.subr.mxu1 %v28916_v40  ;;  %v29229_v10 = vld [vmem:[#allocation19_spill] sm:$0xff] }
 0xbb8   : > { %17285 = vrot.lane.b32.xlu0 %v29223_v36, %s23180_s15  ;;  %21627 = vmatprep.mubr.msk.f32.mxu1 %vm23182_vm4, %v28916_v40  ;;  %23045 = vpow2.f32 %v12933_v35  ;;  %v12806_v9 = vsub.f32 %v29229_v10, %v29228_v0 }
 0xbb9   : > { %v16678_v43 = vpop.permute.xlu0 %16677  ;;  %23047 = vrcp.f32 %v27164_v37 }
 0xbba   : > { %21626 = vmatpush3.msra.mxu1 %v16678_v43  ;;  %v12931_v63 = vmul.f32 1.442695, %v12806_v9  ;;  %v23044_v43 = vpop.eup %23043 }
 0xbbb   : > { %21628 = vmatmul.mubr.msk.f32.vlgmr.msra.gmra.mrb[180].mxu1 %vm1066_vm1, %v13238_v12  ;;  %21635 = vmatprep.subr.mxu1 %v28916_v40 }
 0xbbc   : > { %17361 = vrot.lane.b32.xlu0 %v29224_v29, %s23180_s15  ;;  %21637 = vmatprep.mubr.msk.f32.mxu1 %vm23182_vm4, %v28916_v40  ;;  %23049 = vpow2.f32 %v12931_v63 }
 0xbbd   : > { %v16754_v1 = vpop.permute.xlu0 %16753  ;;  %23051 = vrcp.f32 %v27200_v57  ;;  %v29231_v57 = vld [vmem:[#allocation53_spill] sm:$0xff] }
 0xbbe   : > { %23053 = vrcp.f32 %v27236_v17 }
 0xbbf   : > { %23055 = vrcp.f32 %v27218_v7 }
 0xbc0   : > { %17133 = vrot.lane.b32.xlu1 %v29225_v39, %s23180_s15  ;;  %v13237_v39 = vmul.f32 %v23044_v43, %v27029_v13  ;;  %v29230_v43 = vld [vmem:[#allocation160_spill] sm:$0xff]  ;;  %23057 = vrcp.f32 %v27254_v14 }
 0xbc1   : > { %v29241_v14 = vld [vmem:[#allocation156_spill] sm:$0xff] }
 0xbc2   : > { %v27379_v12 = vpop.eup %23045 }
 0xbc3   : > { %v23048_v23 = vpop.eup %23047  ;;  %v13123_v37 = vsel %vm1066_vm1, %v27379_v12, 0.0 }
 0xbc4   : > { %v13239_v35 = vmul.f32 %v23048_v23, %v27065_v2  ;;  %v29232_v23 = vld [vmem:[#allocation29_spill] sm:$0xff] }
 0xbc6   : > { %v27395_v13 = vpop.eup %23049 }
 0xbc7   : > { %v13120_v0 = vsel %vm1066_vm1, %v27395_v13, 0.0  ;;  %v23052_v63 = vpop.eup %23051 }
 0xbd2   : > { %v27377_v36 = vpop.xlane.xlu1 %13103 }
 0xbd6   : > { %v16602_v29 = vpop.permute.xlu1 %16601 }
 0xbd7   : > { %v27382_v61 = vpop.f32.mrb[188].mxu0  ;;  %21621 = vmatpush3.msra.mxu0 %v16602_v29 }
 0xbd8   : > { %v21584_v18 = vpop.f32.mrb[189].mxu0  ;;  %21623 = vmatmul.mubr.msk.f32.vlgmr.msra.gmra.mrb[196].mxu0 %vm1066_vm1, %v13237_v39  ;;  %21630 = vmatprep.subr.mxu0 %v28916_v40  ;;  %v13241_v39 = vmul.f32 %v23052_v63, %v27101_v47  ;;  %v29234_v47 = vld [vmem:[#allocation113_spill] sm:$0xff]  ;;  %v29238_v63 = vld [vmem:[#allocation167_spill] sm:$0xff] }
 0xbd9   : > { %21631 = vmatpush3.msra.mxu0 %v16754_v1  ;;  %21632 = vmatprep.mubr.msk.f32.mxu0 %vm23182_vm4, %v28916_v40  ;;  %v23054_v1 = vpop.eup %23053  ;;  %v29233_v18 = vld [vmem:[#allocation69_spill] sm:$0xff] }
 0xbda   : > { %21640 = vmatprep.subr.mxu0 %v28916_v40 }
 0xbdb   : > { %13124 = vadd.xlane.f32.xlu0 %v13123_v37 }
 0xbdc   : > { %21633 = vmatmul.mubr.msk.f32.vlgmr.msra.gmra.mrb[198].mxu0 %vm1066_vm1, %v13239_v35  ;;  %v13243_v35 = vmul.f32 %v23054_v1, %v27137_v48  ;;  %v29237_v48 = vld [vmem:[#allocation17_spill] sm:$0xff] }
 0xbdd   : > { %21642 = vmatprep.mubr.msk.f32.mxu0 %vm23182_vm4, %v28916_v40 }
 0xbe4   : > { %13121 = vadd.xlane.f32.xlu1 %v13120_v0  ;;  %v29235_v0 = vld [vmem:[#allocation44_spill] sm:$0xff] }
 0xbeb   : > { %v27400_v10 = vpop.f32.mrb[172].mxu1 }
 0xbec   : > { %v21589_v9 = vpop.f32.mrb[173].mxu1 }
 0xbed   : > { %v29236_v9 = vld [vmem:[#allocation71_spill] sm:$0xff] }
 0xbee   : > { %v27403_v2 = vpop.xlane.xlu0 %13112 }
 0xbf1   : > { %17589 = vrot.lane.b32.xlu0 %v29230_v43, %s23180_s15  ;;  %v29239_v43 = vld [vmem:[#allocation146_spill] sm:$0xff] }
 0xbf2   : > { %v16906_v29 = vpop.permute.xlu0 %16905 }
 0xbf3   : > { %21641 = vmatpush3.msra.mxu0 %v16906_v29  ;;  %v12808_v29 = vsub.f32 %v29239_v43, %v29238_v63  ;;  %v29245_v63 = vld [vmem:[#allocation126_spill] sm:$0xff] }
 0xbf4   : > { %21643 = vmatmul.mubr.msk.f32.vlgmr.msra.gmra.mrb[200].mxu0 %vm1066_vm1, %v13241_v39  ;;  %21650 = vmatprep.subr.mxu0 %v28916_v40 }
 0xbf5   : > { %17437 = vrot.lane.b32.xlu1 %v29231_v57, %s23180_s15  ;;  %17665 = vrot.lane.b32.xlu0 %v29232_v23, %s23180_s15  ;;  %v23056_v57 = vpop.eup %23055  ;;  %v29240_v23 = vld [vmem:[#allocation152_spill] sm:$0xff]  ;;  %v12935_v1 = vmul.f32 1.442695, %v12808_v29 }
 0xbf6   : > { %v16982_v17 = vpop.permute.xlu0 %16981  ;;  %21652 = vmatprep.mubr.msk.f32.mxu0 %vm23182_vm4, %v28916_v40  ;;  %v29246_v29 = vld [vmem:[#allocation60_spill] sm:$0xff] }
 0xbf7   : > { %23059 = vpow2.f32 %v12935_v1  ;;  %v29248_v1 = vld [vmem:[#allocation20_spill] sm:$0xff] }
 0xbf8   : > { %23061 = vrcp.f32 %v27274_v3 }
 0xbf9   : > { %17513 = vrot.lane.b32.xlu1 %v29233_v18, %s23180_s15  ;;  %17741 = vrot.lane.b32.xlu0 %v29234_v47, %s23180_s15  ;;  %v13240_v18 = vmul.f32 %v23056_v57, %v27122_v52  ;;  %v23058_v47 = vpop.eup %23057  ;;  %v29242_v52 = vld [vmem:[#allocation4_spill] sm:$0xff]  ;;  %23063 = vrcp.f32 %v27312_v34 }
 0xbfa   : > { %v17058_v37 = vpop.permute.xlu0 %17057  ;;  %v29252_v34 = vld [vmem:[#allocation120_spill] sm:$0xff]  ;;  %23065 = vrcp.f32 %v27294_v28  ;;  %v29256_v28 = vld [vmem:[#allocation134_spill] sm:$0xff] }
 0xbfb   : > { %21651 = vmatpush3.msra.mxu0 %v17058_v37  ;;  %23067 = vrcp.f32 %v27332_v6  ;;  %v29257_v6 = vld [vmem:[#allocation100_spill] sm:$0xff] }
 0xbfc   : > { %21653 = vmatmul.mubr.msk.f32.vlgmr.msra.gmra.mrb[202].mxu0 %vm1066_vm1, %v13243_v35  ;;  %21660 = vmatprep.subr.mxu0 %v28916_v40  ;;  %23069 = vrcp.f32 %v27377_v36 }
 0xbfd   : > { %17817 = vrot.lane.b32.xlu0 %v29235_v0, %s23180_s15  ;;  %21662 = vmatprep.mubr.msk.f32.mxu0 %vm23182_vm4, %v28916_v40  ;;  %v13242_v0 = vmul.f32 %v23058_v47, %v27158_v58  ;;  %v29249_v47 = vld [vmem:[#allocation130_spill] sm:$0xff]  ;;  %23071 = vrcp.f32 %v27349_v41  ;;  %v29282_v41 = vld [vmem:[#allocation23_spill] sm:$0xff] }
 0xc01   : > { %17969 = vrot.lane.b32.xlu0 %v29236_v9, %s23180_s15  ;;  %v29243_v9 = vld [vmem:[#allocation43_spill] sm:$0xff] }
 0xc05   : > { %18045 = vrot.lane.b32.xlu0 %v29237_v48, %s23180_s15  ;;  %v27457_v48 = vpop.eup %23059 }
 0xc06   : > { %v13126_v58 = vsel %vm1066_vm1, %v27457_v48, 0.0 }
 0xc07   : > { %v27435_v39 = vpop.xlane.xlu1 %13109 }
 0xc08   : > { %23073 = vrcp.f32 %v27435_v39 }
 0xc09   : > { %7352 = vrot.lane.b32.xlu0 %v29240_v23, %s23183_s17  ;;  %v29247_v23 = vld [vmem:[#allocation124_spill] sm:$0xff]  ;;  %23075 = vrcp.f32 %v27403_v2 }
 0xc0b   : > { %v16830_v7 = vpop.permute.xlu1 %16829 }
 0xc0c   : > { %v27440_v37 = vpop.f32.mrb[190].mxu0  ;;  %21636 = vmatpush3.msra.mxu1 %v16830_v7 }
 0xc0d   : > { %7354 = vrot.lane.b32.xlu0 %v29241_v14, %s23183_s17  ;;  %v21594_v35 = vpop.f32.mrb[191].mxu0  ;;  %21638 = vmatmul.mubr.msk.f32.vlgmr.msra.gmra.mrb[182].mxu1 %vm1066_vm1, %v13240_v18  ;;  %v23062_v18 = vpop.eup %23061  ;;  %v29250_v14 = vld [vmem:[#allocation52_spill] sm:$0xff] }
 0xc0e   : > { %21645 = vmatprep.subr.mxu1 %v28916_v40  ;;  %21647 = vmatprep.mubr.msk.f32.mxu1 %vm23182_vm4, %v28916_v40  ;;  %v13245_v3 = vmul.f32 %v23062_v18, %v27173_v62  ;;  %v29253_v62 = vld [vmem:[#allocation143_spill] sm:$0xff] }
 0xc0f   : > { %21646 = vmatpush3.msra.mxu1 %v16982_v17  ;;  %v29244_v17 = vld [vmem:[#allocation48_spill] sm:$0xff] }
 0xc10   : > { %21655 = vmatprep.subr.mxu1 %v28916_v40 }
 0xc11   : > { %7416 = vrot.lane.b32.xlu0 %v29242_v52, %s23184_s18  ;;  %21648 = vmatmul.mubr.msk.f32.vlgmr.msra.gmra.mrb[184].mxu1 %vm1066_vm1, %v13242_v0  ;;  %v29251_v0 = vld [vmem:[#allocation64_spill] sm:$0xff] }
 0xc12   : > { %21657 = vmatprep.mubr.msk.f32.mxu1 %vm23182_vm4, %v28916_v40 }
 0xc15   : > { %7480 = vrot.lane.b32.xlu0 %v29243_v9, %s23185_s19  ;;  %v23064_v9 = vpop.eup %23063 }
 0xc19   : > { %7356 = vrot.lane.b32.xlu0 %v29244_v17, %s23183_s17  ;;  %v29254_v17 = vld [vmem:[#allocation96_spill] sm:$0xff] }
 0xc1d   : > { %13127 = vadd.xlane.f32.xlu1 %v13126_v58  ;;  %7420 = vrot.lane.b32.xlu0 %v29245_v63, %s23184_s18  ;;  %v13247_v63 = vmul.f32 %v23064_v9, %v27209_v44  ;;  %v29258_v44 = vld [vmem:[#allocation10_spill] sm:$0xff]  ;;  %v29262_v9 = vld [vmem:[#allocation159_spill] sm:$0xff] }
 0xc20   : > { %v27465_v43 = vpop.f32.mrb[174].mxu1 }
 0xc21   : > { %7484 = vrot.lane.b32.xlu0 %v29246_v29, %s23185_s19  ;;  %v21599_v57 = vpop.f32.mrb[175].mxu1  ;;  %v29255_v29 = vld [vmem:[#allocation144_spill] sm:$0xff] }
 0xc25   : > { %7360 = vrot.lane.b32.xlu0 %v29247_v23, %s23183_s17  ;;  %v23066_v23 = vpop.eup %23065 }
 0xc26   : > { %v13244_v18 = vmul.f32 %v23066_v23, %v27194_v15  ;;  %v29270_v23 = vld [vmem:[#allocation24_spill] sm:$0xff] }
 0xc29   : > { %7424 = vrot.lane.b32.xlu0 %v29248_v1, %s23184_s18 }
 0xc2b   : > { %v27475_v7 = vpop.xlane.xlu0 %13118 }
 0xc2d   : > { %7488 = vrot.lane.b32.xlu0 %v29249_v47, %s23185_s19  ;;  %v23068_v47 = vpop.eup %23067 }
 0xc2e   : > { %17893 = vrot.lane.b32.xlu1 %v29250_v14, %s23180_s15  ;;  %v13246_v15 = vmul.f32 %v23068_v47, %v27230_v21  ;;  %v29265_v21 = vld [vmem:[#allocation59_spill] sm:$0xff]  ;;  %v29274_v47 = vld [vmem:[#allocation81_spill] sm:$0xff] }
 0xc2f   : > { %v17210_v35 = vpop.permute.xlu0 %17209 }
 0xc30   : > { %21661 = vmatpush3.msra.mxu0 %v17210_v35  ;;  %v29259_v35 = vld [vmem:[#allocation13_spill] sm:$0xff] }
 0xc31   : > { %7364 = vrot.lane.b32.xlu0 %v29251_v0, %s23183_s17  ;;  %21663 = vmatmul.mubr.msk.f32.vlgmr.msra.gmra.mrb[204].mxu0 %vm1066_vm1, %v13245_v3  ;;  %v29260_v3 = vld [vmem:[#allocation68_spill] sm:$0xff] }
 0xc32   : > { %7418 = vrot.lane.b32.xlu1 %v29252_v34, %s23184_s18  ;;  %21670 = vmatprep.subr.mxu0 %v28916_v40  ;;  %v29261_v34 = vld [vmem:[#allocation145_spill] sm:$0xff] }
 0xc33   : > { %v17286_v52 = vpop.permute.xlu0 %17285  ;;  %21672 = vmatprep.mubr.msk.f32.mxu0 %vm23182_vm4, %v28916_v40 }
 0xc35   : > { %7428 = vrot.lane.b32.xlu0 %v29253_v62, %s23184_s18  ;;  %v29263_v62 = vld [vmem:[#allocation35_spill] sm:$0xff] }
 0xc36   : > { %7482 = vrot.lane.b32.xlu1 %v29254_v17, %s23185_s19  ;;  %v29266_v17 = vld [vmem:[#allocation102_spill] sm:$0xff] }
 0xc37   : > { %v17362_v58 = vpop.permute.xlu0 %17361 }
 0xc38   : > { %21671 = vmatpush3.msra.mxu0 %v17362_v58  ;;  %v29267_v58 = vld [vmem:[#allocation39_spill] sm:$0xff] }
 0xc39   : > { %7492 = vrot.lane.b32.xlu0 %v29255_v29, %s23185_s19  ;;  %21673 = vmatmul.mubr.msk.f32.vlgmr.msra.gmra.mrb[206].mxu0 %vm1066_vm1, %v13247_v63  ;;  %v29268_v63 = vld [vmem:[#allocation95_spill] sm:$0xff]  ;;  %v29269_v29 = vld [vmem:[#allocation2_spill] sm:$0xff] }
 0xc3a   : > { %7358 = vrot.lane.b32.xlu1 %v29256_v28, %s23183_s17  ;;  %21680 = vmatprep.subr.mxu0 %v28916_v40 }
 0xc3b   : > { %21682 = vmatprep.mubr.msk.f32.mxu0 %vm23182_vm4, %v28916_v40 }
 0xc3c   : > { %v13116_v57 = vpop.xlane.xlu1 %13115 }
 0xc3d   : > { %7368 = vrot.lane.b32.xlu0 %v29257_v6, %s23183_s17  ;;  %23077 = vrcp.f32 %v13116_v57 }
 0xc3e   : > { %7422 = vrot.lane.b32.xlu1 %v29258_v44, %s23184_s18  ;;  %v29271_v44 = vld [vmem:[#allocation55_spill] sm:$0xff]  ;;  %23079 = vrcp.f32 %v27475_v7 }
 0xc40   : > { %v17134_v1 = vpop.permute.xlu1 %17133 }
 0xc41   : > { %v16369_v14 = vpop.f32.mrb[192].mxu0  ;;  %7432 = vrot.lane.b32.xlu0 %v29259_v35, %s23184_s18  ;;  %21656 = vmatpush3.msra.mxu1 %v17134_v1  ;;  %v29272_v1 = vld [vmem:[#allocation137_spill] sm:$0xff] }
 0xc42   : > { %7486 = vrot.lane.b32.xlu1 %v29260_v3, %s23185_s19  ;;  %v21604_v0 = vpop.f32.mrb[193].mxu0  ;;  %21658 = vmatmul.mubr.msk.f32.vlgmr.msra.gmra.mrb[186].mxu1 %vm1066_vm1, %v13244_v18  ;;  %v29273_v18 = vld [vmem:[#allocation58_spill] sm:$0xff]  ;;  %v29275_v35 = vld [vmem:[#allocation5_spill] sm:$0xff]  ;;  %v29276_v3 = vld [vmem:[#allocation136_spill] sm:$0xff] }
 0xc43   : > { %21665 = vmatprep.subr.mxu1 %v28916_v40  ;;  %21667 = vmatprep.mubr.msk.f32.mxu1 %vm23182_vm4, %v28916_v40  ;;  %v29277_v0 = vld [vmem:[#allocation108_spill] sm:$0xff] }
 0xc44   : > { %21666 = vmatpush3.msra.mxu1 %v17286_v52  ;;  %v29264_v52 = vld [vmem:[#allocation8_spill] sm:$0xff] }
 0xc45   : > { %7496 = vrot.lane.b32.xlu0 %v29261_v34, %s23185_s19  ;;  %21675 = vmatprep.subr.mxu1 %v28916_v40 }
 0xc46   : > { %7362 = vrot.lane.b32.xlu1 %v29262_v9, %s23183_s17  ;;  %21668 = vmatmul.mubr.msk.f32.vlgmr.msra.gmra.mrb[188].mxu1 %vm1066_vm1, %v13246_v15  ;;  %v29278_v15 = vld [vmem:[#allocation121_spill] sm:$0xff] }
 0xc47   : > { %21677 = vmatprep.mubr.msk.f32.mxu1 %vm23182_vm4, %v28916_v40  ;;  %v29279_v9 = vld [vmem:[#allocation77_spill] sm:$0xff] }
 0xc49   : > { %7372 = vrot.lane.b32.xlu0 %v29263_v62, %s23183_s17  ;;  %v29280_v62 = vld [vmem:[#allocation18_spill] sm:$0xff] }
 0xc4a   : > { %7426 = vrot.lane.b32.xlu1 %v29264_v52, %s23184_s18 }
 0xc4d   : > { %7436 = vrot.lane.b32.xlu0 %v29265_v21, %s23184_s18  ;;  %v29281_v21 = vld [vmem:[#allocation34_spill] sm:$0xff] }
 0xc4e   : > { %7490 = vrot.lane.b32.xlu1 %v29266_v17, %s23185_s19 }
 0xc51   : > { %7500 = vrot.lane.b32.xlu0 %v29267_v58, %s23185_s19  ;;  %v23070_v58 = vpop.eup %23069 }
 0xc52   : > { %7366 = vrot.lane.b32.xlu1 %v29268_v63, %s23183_s17  ;;  %v23072_v39 = vpop.eup %23071 }
 0xc55   : > { %7376 = vrot.lane.b32.xlu0 %v29269_v29, %s23183_s17  ;;  %v27541_v28 = vpop.f32.mrb[176].mxu1  ;;  %v23074_v29 = vpop.eup %23073 }
 0xc56   : > { %7430 = vrot.lane.b32.xlu1 %v29270_v23, %s23184_s18  ;;  %v21609_v6 = vpop.f32.mrb[177].mxu1  ;;  %v29283_v23 = vld [vmem:[#allocation65_spill] sm:$0xff] }
 0xc59   : > { %7440 = vrot.lane.b32.xlu0 %v29271_v44, %s23184_s18  ;;  %v23076_v44 = vpop.eup %23075 }
 0xc5a   : > { %7494 = vrot.lane.b32.xlu1 %v29272_v1, %s23185_s19  ;;  %v29284_v1 = vld [vmem:[#allocation15_spill] sm:$0xff] }
 0xc5d   : > { %7504 = vrot.lane.b32.xlu0 %v29273_v18, %s23185_s19  ;;  %v23078_v18 = vpop.eup %23077 }
 0xc5e   : > { %7370 = vrot.lane.b32.xlu1 %v29274_v47, %s23183_s17 }
 0xc61   : > { %7380 = vrot.lane.b32.xlu0 %v29275_v35, %s23183_s17  ;;  %v29285_v35 = vld [vmem:[#allocation33_spill] sm:$0xff] }
 0xc62   : > { %7434 = vrot.lane.b32.xlu1 %v29276_v3, %s23184_s18  ;;  %v13252_v3 = vmul.f32 %v23078_v18, %v27344_v51 }
 0xc65   : > { %7444 = vrot.lane.b32.xlu0 %v29277_v0, %s23184_s18 }
 0xc66   : > { %7498 = vrot.lane.b32.xlu1 %v29278_v15, %s23185_s19  ;;  %v29286_v15 = vld [vmem:[#allocation83_spill] sm:$0xff] }
 0xc68   : > { %v13125_v34 = vpop.xlane.xlu0 %13124 }
 0xc69   : > { %7508 = vrot.lane.b32.xlu0 %v29279_v9, %s23185_s19  ;;  %23081 = vrcp.f32 %v13125_v34  ;;  %v29288_v9 = vld [vmem:[#allocation50_spill] sm:$0xff] }
 0xc6a   : > { %7374 = vrot.lane.b32.xlu1 %v29280_v62, %s23183_s17 }
 0xc6c   : > { %v17590_v52 = vpop.permute.xlu0 %17589 }
 0xc6d   : > { %18129 = vrot.lane.b32.xlu0 %v26943_v33, %s23183_s17  ;;  %v13248_v33 = vmul.f32 %v23070_v58, %v27268_v8  ;;  %v13249_v8 = vmul.f32 %v23072_v39, %v27245_v56  ;;  %v13251_v56 = vmul.f32 %v23076_v44, %v27287_v59 }
 0xc6e   : > { %7438 = vrot.lane.b32.xlu1 %v29281_v21, %s23184_s18 }
 0xc70   : > { %v17666_v36 = vpop.permute.xlu0 %17665 }
 0xc71   : > { %v27573_v17 = vpop.xlane.xlu1 %13121  ;;  %18249 = vrot.lane.b32.xlu0 %v16369_v14, %s23183_s17  ;;  %v13250_v14 = vmul.f32 %v23074_v29, %v27304_v22  ;;  %v23080_v22 = vpop.eup %23079 }
 0xc72   : > { %7502 = vrot.lane.b32.xlu1 %v29282_v41, %s23185_s19  ;;  %v13253_v59 = vmul.f32 %v23080_v22, %v27330_v30  ;;  %v29287_v30 = vld [vmem:[#allocation142_spill] sm:$0xff]  ;;  %23083 = vrcp.f32 %v27573_v17 }
 0xc73   : > { %v23082_v0 = vpop.eup %23081 }
 0xc74   : > { %v17742_v57 = vpop.permute.xlu0 %17741  ;;  %v13255_v34 = vmul.f32 %v23082_v0, %v27379_v12 }
 0xc75   : > { %v17438_v63 = vpop.permute.xlu1 %17437 }
 0xc76   : > { %7378 = vrot.lane.b32.xlu1 %v29283_v23, %s23183_s17  ;;  %v27582_v2 = vpop.f32.mrb[194].mxu0  ;;  %21676 = vmatpush3.msra.mxu1 %v17438_v63 }
 0xc77   : > { %v21614_v6 = vpop.f32.mrb[195].mxu0  ;;  %21678 = vmatmul.mubr.msk.f32.vlgmr.msra.gmra.mrb[190].mxu1 %vm1066_vm1, %v13248_v33  ;;  %21685 = vmatprep.subr.mxu1 %v28916_v40 }
 0xc78   : > { %21686 = vmatpush3.msra.mxu1 %v17590_v52  ;;  %21687 = vmatprep.mubr.msk.f32.mxu1 %vm23182_vm4, %v28916_v40  ;;  %v17818_v47 = vpop.permute.xlu0 %17817 }
 0xc79   : > { %v17514_v7 = vpop.permute.xlu1 %17513  ;;  %21695 = vmatprep.subr.mxu1 %v28916_v40 }
 0xc7a   : > { %7442 = vrot.lane.b32.xlu1 %v29284_v1, %s23184_s18  ;;  %21681 = vmatpush3.msra.mxu0 %v17514_v7 }
 0xc7b   : > { %21683 = vmatmul.mubr.msk.f32.vlgmr.msra.gmra.mrb[208].mxu0 %vm1066_vm1, %v13249_v8  ;;  %21688 = vmatmul.mubr.msk.f32.vlgmr.msra.gmra.mrb[192].mxu1 %vm1066_vm1, %v13250_v14 }
 0xc7c   : > { %21690 = vmatprep.subr.mxu0 %v28916_v40  ;;  %21696 = vmatpush3.msra.mxu1 %v17742_v57  ;;  %v17970_v51 = vpop.permute.xlu0 %17969  ;;  %v23084_v33 = vpop.eup %23083 }
 0xc7d   : > { %21691 = vmatpush3.msra.mxu0 %v17666_v36  ;;  %21692 = vmatprep.mubr.msk.f32.mxu0 %vm23182_vm4, %v28916_v40  ;;  %v13254_v6 = vmul.f32 %v23084_v33, %v27395_v13 }
 0xc7e   : > { %7506 = vrot.lane.b32.xlu1 %v29285_v35, %s23185_s19  ;;  %21697 = vmatprep.mubr.msk.f32.mxu1 %vm23182_vm4, %v28916_v40 }
 0xc7f   : > { %21700 = vmatprep.subr.mxu0 %v28916_v40  ;;  %21693 = vmatmul.mubr.msk.f32.vlgmr.msra.gmra.mrb[210].mxu0 %vm1066_vm1, %v13251_v56 }
 0xc80   : > { %21698 = vmatmul.mubr.msk.f32.vlgmr.msra.gmra.mrb[194].mxu1 %vm1066_vm1, %v13252_v3  ;;  %21701 = vmatpush3.msra.mxu0 %v17818_v47  ;;  %v18046_v12 = vpop.permute.xlu0 %18045 }
 0xc81   : > { %21702 = vmatprep.mubr.msk.f32.mxu0 %vm23182_vm4, %v28916_v40  ;;  %21710 = vmatprep.subr.mxu0 %v28916_v40 }
 0xc82   : > { %7382 = vrot.lane.b32.xlu1 %v29286_v15, %s23183_s17  ;;  %21705 = vmatprep.subr.mxu1 %v28916_v40 }
 0xc83   : > { %21703 = vmatmul.mubr.msk.f32.vlgmr.msra.gmra.mrb[212].mxu0 %vm1066_vm1, %v13253_v59  ;;  %21707 = vmatprep.mubr.msk.f32.mxu1 %vm23182_vm4, %v28916_v40 }
 0xc84   : > { %21711 = vmatpush3.msra.mxu0 %v17970_v51  ;;  %21712 = vmatprep.mubr.msk.f32.mxu0 %vm23182_vm4, %v28916_v40  ;;  %v7353_v58 = vpop.permute.xlu0 %7352 }
 0xc86   : > { %7446 = vrot.lane.b32.xlu1 %v29287_v30, %s23184_s18  ;;  %v29290_v30 = vld [vmem:[#allocation76_spill] sm:$0xff] }
 0xc87   : > { %21713 = vmatmul.mubr.msk.f32.vlgmr.msra.gmra.mrb[214].mxu0 %vm1066_vm1, %v13255_v34 }
 0xc88   : > { %v7355_v41 = vpop.permute.xlu0 %7354 }
 0xc8a   : > { %7510 = vrot.lane.b32.xlu1 %v29288_v9, %s23185_s19  ;;  %v27625_v62 = vpop.f32.mrb[178].mxu1  ;;  %v7529_v9 = vsel %vm1066_vm1, %v29290_v30, %v7355_v41 }
 0xc8b   : > { %v21619_v52 = vpop.f32.mrb[179].mxu1 }
 0xc8c   : > { %v7417_v39 = vpop.permute.xlu0 %7416 }
 0xc8e   : > { %18161 = vrot.lane.b32.xlu1 %v27004_v31, %s23184_s18  ;;  %v27629_v21 = vpop.f32.mrb[180].mxu1 }
 0xc8f   : > { %v21629_v36 = vpop.f32.mrb[181].mxu1 }
 0xc90   : > { %v7481_v23 = vpop.permute.xlu0 %7480 }
 0xc92   : > { %18193 = vrot.lane.b32.xlu1 %v27149_v42, %s23185_s19 }
 0xc94   : > { %v7357_v17 = vpop.permute.xlu0 %7356 }
 0xc98   : > { %v7421_v18 = vpop.permute.xlu0 %7420 }
 0xc9c   : > { %v7485_v47 = vpop.permute.xlu0 %7484 }
 0xca0   : > { %v7361_v35 = vpop.permute.xlu0 %7360 }
 0xcaa   : > { %v13128_v63 = vpop.xlane.xlu1 %13127 }
 0xcab   : > { %23085 = vrcp.f32 %v13128_v63  ;;  %v27634_v29 = vpop.f32.mrb[196].mxu0 }
 0xcac   : > { %v21624_v57 = vpop.f32.mrb[197].mxu0 }
 0xcae   : > { %v17894_v31 = vpop.permute.xlu1 %17893 }
 0xcaf   : > { %v27637_v7 = vpop.f32.mrb[198].mxu0  ;;  %21706 = vmatpush3.msra.mxu1 %v17894_v31 }
 0xcb0   : > { %v21634_v42 = vpop.f32.mrb[199].mxu0  ;;  %21708 = vmatmul.mubr.msk.f32.vlgmr.msra.gmra.mrb[196].mxu1 %vm1066_vm1, %v13254_v6  ;;  %21715 = vmatprep.subr.mxu1 %v28916_v40 }
 0xcb1   : > { %21716 = vmatpush3.msra.mxu1 %v18046_v12  ;;  %21717 = vmatprep.mubr.msk.f32.mxu1 %vm23182_vm4, %v28916_v40  ;;  %v29289_v40 = vld [vmem:[#allocation86_spill] sm:$0xff] }
 0xcb2   : > { %v7419_v8 = vpop.permute.xlu1 %7418  ;;  %v7528_v0 = vsel %vm1066_vm1, %v29289_v40, %v7353_v58 }
 0xcb3   : > { %v7544_v51 = vsel %vm3847_vm3, %v7528_v0, %v7417_v39  ;;  %v7545_v52 = vsel %vm3847_vm3, %v7529_v9, %v7419_v8 }
 0xcb4   : > { %v7561_v34 = vsel %vm7560_vm5, %v7544_v51, %v7481_v23  ;;  %v29292_v51 = vld [vmem:[#allocation94_spill] sm:$0xff] }
 0xcb5   : > { %v23086_v14 = vpop.eup %23085 }
 0xcb6   : > { %v7483_v44 = vpop.permute.xlu1 %7482  ;;  %v13256_v1 = vmul.f32 %v23086_v14, %v27457_v48  ;;  %v7425_v48 = vpop.permute.xlu0 %7424 }
 0xcb7   : > { %v7562_v36 = vsel %vm7560_vm5, %v7545_v52, %v7483_v44 }
 0xcb8   : > { %21718 = vmatmul.mubr.msk.f32.vlgmr.msra.gmra.mrb[198].mxu1 %vm1066_vm1, %v13256_v1  ;;  %v29291_v1 = vld [vmem:[#allocation114_spill] sm:$0xff] }
 0xcba   : > { %v7359_v13 = vpop.permute.xlu1 %7358  ;;  %v7489_v33 = vpop.permute.xlu0 %7488 }
 0xcbe   : > { %v7423_v56 = vpop.permute.xlu1 %7422  ;;  %v7365_v39 = vpop.permute.xlu0 %7364 }
 0xcc2   : > { %v7487_v22 = vpop.permute.xlu1 %7486  ;;  %v7429_v31 = vpop.permute.xlu0 %7428 }
 0xcc6   : > { %v7363_v15 = vpop.permute.xlu1 %7362  ;;  %v7493_v8 = vpop.permute.xlu0 %7492 }
 0xcc7   : > { %v16977_v3 = vpop.f32.mrb[200].mxu0 }
 0xcc8   : > { %18281 = vrot.lane.b32.xlu0 %v16977_v3, %s23184_s18  ;;  %v21644_v59 = vpop.f32.mrb[201].mxu0  ;;  %v7530_v3 = vsel %vm1066_vm1, %v29291_v1, %v7357_v17 }
 0xcc9   : > { %v7546_v59 = vsel %vm3847_vm3, %v7530_v3, %v7421_v18 }
 0xcca   : > { %v7427_v12 = vpop.permute.xlu1 %7426  ;;  %v7369_v0 = vpop.permute.xlu0 %7368 }
 0xccc   : > { %18377 = vrot.lane.b32.xlu0 %v7561_v34, %s23178_s29  ;;  %v7531_v34 = vsel %vm1066_vm1, %v29292_v51, %v7359_v13 }
 0xccd   : > { %v7547_v30 = vsel %vm3847_vm3, %v7531_v34, %v7423_v56 }
 0xcce   : > { %v7491_v58 = vpop.permute.xlu1 %7490  ;;  %v7564_v9 = vsel %vm7560_vm5, %v7547_v30, %v7487_v22 }
 0xccf   : > { %v17129_v63 = vpop.f32.mrb[202].mxu0 }
 0xcd0   : > { %v21654_v57 = vpop.f32.mrb[203].mxu0  ;;  %18379 = vrot.lane.b32.xlu0 %v7562_v36, %s23178_s29  ;;  %v7433_v36 = vpop.permute.xlu0 %7432 }
 0xcd2   : > { %v7367_v23 = vpop.permute.xlu1 %7366 }
 0xcd4   : > { %18251 = vrot.lane.b32.xlu0 %v27541_v28, %s23183_s17  ;;  %v7563_v28 = vsel %vm7560_vm5, %v7546_v59, %v7485_v47  ;;  %v7497_v18 = vpop.permute.xlu0 %7496  ;;  %v29293_v47 = vld [vmem:[#allocation106_spill] sm:$0xff] }
 0xcd5   : > { %v7532_v57 = vsel %vm1066_vm1, %v29293_v47, %v7361_v35 }
 0xcd6   : > { %v7431_v41 = vpop.permute.xlu1 %7430  ;;  %v7548_v13 = vsel %vm3847_vm3, %v7532_v57, %v7425_v48 }
 0xcd7   : > { %v7565_v56 = vsel %vm7560_vm5, %v7548_v13, %v7489_v33 }
 0xcd8   : > { %v7373_v22 = vpop.permute.xlu0 %7372 }
 0xcda   : > { %v7495_v40 = vpop.permute.xlu1 %7494 }
 0xcdc   : > { %v7437_v35 = vpop.permute.xlu0 %7436 }
 0xcde   : > { %v7371_v52 = vpop.permute.xlu1 %7370 }
 0xce0   : > { %v27658_v6 = vpop.f32.mrb[182].mxu1  ;;  %v7501_v59 = vpop.permute.xlu0 %7500 }
 0xce1   : > { %v21639_v42 = vpop.f32.mrb[183].mxu1 }
 0xce2   : > { %v7435_v17 = vpop.permute.xlu1 %7434 }
 0xce4   : > { %v17053_v14 = vpop.f32.mrb[184].mxu1 }
 0xce5   : > { %v21649_v44 = vpop.f32.mrb[185].mxu1  ;;  %18283 = vrot.lane.b32.xlu0 %v17053_v14, %s23184_s18  ;;  %v29294_v14 = vld [vmem:[#allocation129_spill] sm:$0xff] }
 0xce6   : > { %v7499_v42 = vpop.permute.xlu1 %7498  ;;  %v7533_v44 = vsel %vm1066_vm1, %v29294_v14, %v7363_v15  ;;  %v27692_v15 = vpop.permute.xlu0 %7376 }
 0xce9   : > { %18381 = vrot.lane.b32.xlu0 %v7563_v28, %s23178_s29 }
 0xcea   : > { %v27698_v34 = vpop.permute.xlu0 %7440 }
 0xced   : > { %18383 = vrot.lane.b32.xlu0 %v7564_v9, %s23178_s29 }
 0xcf1   : > { %18253 = vrot.lane.b32.xlu0 %v27582_v2, %s23183_s17  ;;  %v7549_v2 = vsel %vm3847_vm3, %v7533_v44, %v7427_v12 }
 0xcf2   : > { %v7566_v1 = vsel %vm7560_vm5, %v7549_v2, %v7491_v58 }
 0xcf5   : > { %18285 = vrot.lane.b32.xlu0 %v17129_v63, %s23184_s18  ;;  %v27684_v63 = vpop.permute.xlu1 %7374 }
 0xcf9   : > { %18385 = vrot.lane.b32.xlu0 %v7565_v56, %s23178_s29  ;;  %v27688_v33 = vpop.permute.xlu1 %7438  ;;  %v27706_v56 = vpop.permute.xlu0 %7504 }
 0xcfd   : > { %18387 = vrot.lane.b32.xlu0 %v7566_v1, %s23178_s29  ;;  %v27690_v28 = vpop.permute.xlu1 %7502  ;;  %v29296_v1 = vld [vmem:[#allocation127_spill] sm:$0xff] }
 0xd01   : > { %18255 = vrot.lane.b32.xlu0 %v27625_v62, %s23183_s17  ;;  %v27696_v51 = vpop.permute.xlu1 %7378  ;;  %v29295_v62 = vld [vmem:[#allocation98_spill] sm:$0xff] }
 0xd02   : > { %v7534_v47 = vsel %vm1066_vm1, %v29295_v62, %v7365_v39 }
 0xd03   : > { %v7550_v13 = vsel %vm3847_vm3, %v7534_v47, %v7429_v31 }
 0xd04   : > { %v17281_v48 = vpop.f32.mrb[204].mxu0  ;;  %v7567_v14 = vsel %vm7560_vm5, %v7550_v13, %v7493_v8 }
 0xd05   : > { %v21664_v3 = vpop.f32.mrb[205].mxu0  ;;  %v27703_v57 = vpop.permute.xlu1 %7442 }
 0xd06   : > { %v7535_v3 = vsel %vm1066_vm1, %v29296_v1, %v7367_v23  ;;  %v29297_v23 = vld [vmem:[#allocation154_spill] sm:$0xff] }
 0xd09   : > { %v27714_v39 = vpop.permute.xlu1 %7506 }
 0xd0c   : > { %v27694_v12 = vpop.f32.mrb[206].mxu0 }
 0xd0d   : > { %v21674_v58 = vpop.f32.mrb[207].mxu0  ;;  %v27721_v31 = vpop.permute.xlu1 %7382 }
 0xd0e   : > { %v7551_v58 = vsel %vm3847_vm3, %v7535_v3, %v7431_v41  ;;  %v7536_v41 = vsel %vm1066_vm1, %v29297_v23, %v7369_v0 }
 0xd11   : > { %v27730_v47 = vpop.permute.xlu1 %7446 }
 0xd15   : > { %v17205_v30 = vpop.f32.mrb[186].mxu1  ;;  %v27740_v0 = vpop.permute.xlu1 %7510 }
 0xd16   : > { %v21659_v9 = vpop.f32.mrb[187].mxu1  ;;  %18287 = vrot.lane.b32.xlu0 %v17205_v30, %s23184_s18  ;;  %v7568_v30 = vsel %vm7560_vm5, %v7551_v58, %v7495_v40  ;;  %v7552_v40 = vsel %vm3847_vm3, %v7536_v41, %v7433_v36 }
 0xd17   : > { %v27716_v9 = vpop.permute.xlu0 %7380  ;;  %v7569_v62 = vsel %vm7560_vm5, %v7552_v40, %v7497_v18  ;;  %v18441_v18 = vld [vmem:[%s28451_s5] sm:$0xff] }
 0xd19   : > { %v17357_v44 = vpop.f32.mrb[188].mxu1 }
 0xd1a   : > { %v21669_v2 = vpop.f32.mrb[189].mxu1  ;;  %18389 = vrot.lane.b32.xlu0 %v7567_v14, %s23178_s29 }
 0xd1b   : > { %v27723_v8 = vpop.permute.xlu0 %7444 }
 0xd1e   : > { %18391 = vrot.lane.b32.xlu0 %v7568_v30, %s23178_s29  ;;  %v18444_v30 = vld [vmem:[%s28451_s5 + $0x18] sm:$0xff] }
 0xd1f   : > { %v27732_v13 = vpop.permute.xlu0 %7508 }
 0xd22   : > { %18257 = vrot.lane.b32.xlu0 %v27634_v29, %s23183_s17  ;;  %v29298_v29 = vld [vmem:[#allocation150_spill] sm:$0xff] }
 0xd23   : > { %v7537_v14 = vsel %vm1066_vm1, %v29298_v29, %v7371_v52  ;;  %v18130_v36 = vpop.permute.xlu0 %18129  ;;  %v18442_v52 = vld [vmem:[%s28451_s5 + $0x8] sm:$0xff] }
 0xd24   : > { %v7553_v2 = vsel %vm3847_vm3, %v7537_v14, %v7435_v17  ;;  %v22160_v1 = vpack.c.bf16 %v18442_v52, %v18441_v18  ;;  %v18162_v17 = vpop.permute.xlu1 %18161  ;;  %v18445_v14 = vld [vmem:[%s28451_s5 + $0x20] sm:$0xff] }
 0xd26   : > { %18289 = vrot.lane.b32.xlu0 %v17281_v48, %s23184_s18  ;;  %v7570_v48 = vsel %vm7560_vm5, %v7553_v2, %v7499_v42  ;;  %22161 = vmatprep.subr.bf16.mxu0 %v22160_v1  ;;  %v29299_v42 = vld [vmem:[#allocation111_spill] sm:$0xff] }
 0xd27   : > { %v27750_v3 = vpop.permute.xlu0 %18249  ;;  %v7538_v58 = vsel %vm1066_vm1, %v29299_v42, %v7373_v22  ;;  %22163 = vmatpush3.bf16.msra.mxu0 %v22160_v1  ;;  %v29300_v22 = vld [vmem:[#allocation157_spill] sm:$0xff] }
 0xd28   : > { %v7554_v23 = vsel %vm3847_vm3, %v7538_v58, %v7437_v35  ;;  %v18194_v29 = vpop.permute.xlu1 %18193  ;;  %v18446_v35 = vld [vmem:[%s28451_s5 + $0x28] sm:$0xff] }
 0xd29   : > { %v7571_v40 = vsel %vm7560_vm5, %v7554_v23, %v7501_v59  ;;  %v18217_v59 = vsel %vm1066_vm1, %v26916_v45, %v18130_v36  ;;  %v18447_v45 = vld [vmem:[%s28451_s5 + $0x30] sm:$0xff]  ;;  %v29301_v36 = vld [vmem:[#allocation158_spill] sm:$0xff] }
 0xd2a   : > { %18393 = vrot.lane.b32.xlu0 %v7569_v62, %s23178_s29  ;;  %v7539_v62 = vsel %vm1066_vm1, %v29300_v22, %v27684_v63  ;;  %v18225_v18 = vsel %vm3847_vm3, %v18217_v59, %v18162_v17  ;;  %v7540_v17 = vsel %vm1066_vm1, %v29301_v36, %v27692_v15 }
 0xd2b   : > { %v7555_v2 = vsel %vm3847_vm3, %v7539_v62, %v27688_v33  ;;  %v18233_v52 = vsel %vm7560_vm5, %v18225_v18, %v18194_v29  ;;  %v18448_v33 = vld [vmem:[%s28451_s5 + $0x38] sm:$0xff]  ;;  %v7556_v58 = vsel %vm3847_vm3, %v7540_v17, %v27698_v34 }
 0xd2c   : > { %v7572_v63 = vsel %vm7560_vm5, %v7555_v2, %v27690_v28  ;;  %v22172_v28 = vpack.c.bf16 %v18448_v33, %v18447_v45 }
 0xd2e   : > { %18395 = vrot.lane.b32.xlu0 %v7570_v48, %s23178_s29  ;;  %v22168_v48 = vpack.c.bf16 %v18446_v35, %v18445_v14 }
 0xd32   : > { %18259 = vrot.lane.b32.xlu0 %v27629_v21, %s23183_s17  ;;  %v18443_v21 = vld [vmem:[%s28451_s5 + $0x10] sm:$0xff] }
 0xd33   : > { %v22164_v41 = vpack.c.bf16 %v18444_v30, %v18443_v21  ;;  %v7573_v21 = vsel %vm7560_vm5, %v7556_v58, %v27706_v56 }
 0xd35   : > { %22165 = vmatprep.subr.bf16.mxu0 %v22164_v41 }
 0xd36   : > { %18291 = vrot.lane.b32.xlu0 %v17357_v44, %s23184_s18  ;;  %22167 = vmatpush3.bf16.msra.mxu0 %v22164_v41 }
 0xd37   : > { %22169 = vmatprep.subr.bf16.mxu0 %v22168_v48 }
 0xd3a   : > { %18397 = vrot.lane.b32.xlu0 %v7571_v40, %s23178_s29  ;;  %v27764_v44 = vpop.permute.xlu0 %18281  ;;  %22171 = vmatpush3.bf16.msra.mxu0 %v22168_v48 }
 0xd3b   : > { %22173 = vmatprep.subr.bf16.mxu0 %v22172_v28 }
 0xd3e   : > { %18399 = vrot.lane.b32.xlu0 %v7572_v63, %s23178_s29  ;;  %v18378_v1 = vpop.permute.xlu0 %18377  ;;  %22175 = vmatpush3.bf16.msra.mxu0 %v22172_v28  ;;  %v29309_v63 = vld [vmem:[#allocation151_spill] sm:$0xff] }
 0xd3f   : > { %v18425_v42 = vsel %vm465_vm0, %v18233_v52, %v18378_v1  ;;  %v7543_v18 = vsel %vm1066_vm1, %v29309_v63, %v27721_v31 }
 0xd40   : > { %21736 = vmatprep.mubr.msk.f32.mxu0 %vm18456_vm6, %v18425_v42  ;;  %v7559_v52 = vsel %vm3847_vm3, %v7543_v18, %v27730_v47  ;;  %v29310_v47 = vld [vmem:[#allocation45_spill] sm:$0xff]  ;;  %v29314_v18 = vld [vmem:[#allocation91_spill] sm:$0xff] }
 0xd41   : > { %v7576_v45 = vsel %vm7560_vm5, %v7559_v52, %v27740_v0 }
 0xd42   : > { %18261 = vrot.lane.b32.xlu0 %v27637_v7, %s23183_s17  ;;  %v29302_v7 = vld [vmem:[#allocation153_spill] sm:$0xff] }
 0xd43   : > { %v7541_v23 = vsel %vm1066_vm1, %v29302_v7, %v27696_v51 }
 0xd46   : > { %18293 = vrot.lane.b32.xlu0 %v27694_v12, %s23184_s18  ;;  %v7557_v12 = vsel %vm3847_vm3, %v7541_v23, %v27703_v57  ;;  %v29311_v23 = vld [vmem:[#allocation116_spill] sm:$0xff] }
 0xd47   : > { %v7574_v15 = vsel %vm7560_vm5, %v7557_v12, %v27714_v39  ;;  %v29303_v39 = vld [vmem:[#allocation155_spill] sm:$0xff] }
 0xd48   : > { %v7542_v35 = vsel %vm1066_vm1, %v29303_v39, %v27716_v9 }
 0xd4a   : > { %v17509_v30 = vpop.f32.mrb[190].mxu1  ;;  %18401 = vrot.lane.b32.xlu0 %v7573_v21, %s23178_s29 }
 0xd4b   : > { %v21679_v41 = vpop.f32.mrb[191].mxu1 }
 0xd4e   : > { %v17585_v40 = vpop.f32.mrb[208].mxu0  ;;  %v17661_v22 = vpop.f32.mrb[192].mxu1  ;;  %18403 = vrot.lane.b32.xlu0 %v7574_v15, %s23178_s29 }
 0xd4f   : > { %18313 = vrot.lane.b32.xlu1 %v17585_v40, %s23185_s19  ;;  %v21684_v34 = vpop.f32.mrb[209].mxu0  ;;  %v21689_v56 = vpop.f32.mrb[193].mxu1 }
 0xd52   : > { %v17737_v62 = vpop.f32.mrb[210].mxu0  ;;  %18263 = vrot.lane.b32.xlu0 %v27658_v6, %s23183_s17  ;;  %v7558_v6 = vsel %vm3847_vm3, %v7542_v35, %v27723_v8 }
 0xd53   : > { %v17813_v51 = vpop.f32.mrb[194].mxu1  ;;  %18131 = vrot.lane.b32.xlu1 %v26955_v32, %s23183_s17  ;;  %v21694_v57 = vpop.f32.mrb[211].mxu0  ;;  %v7575_v2 = vsel %vm7560_vm5, %v7558_v6, %v27732_v13 }
 0xd54   : > { %v21699_v29 = vpop.f32.mrb[195].mxu1  ;;  %v29312_v57 = vld [vmem:[#allocation70_spill] sm:$0xff] }
 0xd56   : > { %v17889_v14 = vpop.f32.mrb[212].mxu0  ;;  %18295 = vrot.lane.b32.xlu0 %v17509_v30, %s23184_s18 }
 0xd57   : > { %18163 = vrot.lane.b32.xlu1 %v27022_v5, %s23184_s18  ;;  %v21704_v59 = vpop.f32.mrb[213].mxu0 }
 0xd5a   : > { %v18041_v32 = vpop.f32.mrb[214].mxu0  ;;  %18405 = vrot.lane.b32.xlu0 %v7575_v2, %s23178_s29 }
 0xd5b   : > { %18195 = vrot.lane.b32.xlu1 %v27167_v20, %s23185_s19  ;;  %v21714_v48 = vpop.f32.mrb[215].mxu0 }
 0xd5f   : > { %18315 = vrot.lane.b32.xlu1 %v17661_v22, %s23185_s19 }
 0xd63   : > { %18133 = vrot.lane.b32.xlu1 %v26953_v11, %s23183_s17 }
 0xd67   : > { %18165 = vrot.lane.b32.xlu1 %v27040_v24, %s23184_s18  ;;  %v18380_v24 = vpop.permute.xlu0 %18379 }
 0xd6b   : > { %18197 = vrot.lane.b32.xlu1 %v27185_v25, %s23185_s19 }
 0xd6f   : > { %18317 = vrot.lane.b32.xlu1 %v17737_v62, %s23185_s19 }
 0xd73   : > { %18135 = vrot.lane.b32.xlu1 %v26959_v55, %s23183_s17 }
 0xd77   : > { %18167 = vrot.lane.b32.xlu1 %v27059_v26, %s23184_s18  ;;  %v18252_v26 = vpop.permute.xlu0 %18251 }
 0xd78   : > { %v18338_v41 = vsel %vm1066_vm1, %v29311_v23, %v18252_v26 }
 0xd7b   : > { %18199 = vrot.lane.b32.xlu1 %v27203_v54, %s23185_s19  ;;  %v29305_v54 = vld [vmem:[#allocation74_spill] sm:$0xff] }
 0xd7f   : > { %18319 = vrot.lane.b32.xlu1 %v17813_v51, %s23185_s19 }
 0xd83   : > { %18137 = vrot.lane.b32.xlu1 %v26957_v38, %s23183_s17  ;;  %v17965_v11 = vpop.f32.mrb[196].mxu1  ;;  %v18284_v38 = vpop.permute.xlu0 %18283 }
 0xd84   : > { %v21709_v5 = vpop.f32.mrb[197].mxu1  ;;  %v18346_v12 = vsel %vm3847_vm3, %v18338_v41, %v18284_v38  ;;  %v29313_v38 = vld [vmem:[#allocation56_spill] sm:$0xff] }
 0xd87   : > { %18169 = vrot.lane.b32.xlu1 %v27077_v19, %s23184_s18  ;;  %v18382_v19 = vpop.permute.xlu0 %18381 }
 0xd8b   : > { %18201 = vrot.lane.b32.xlu1 %v27221_v50, %s23185_s19  ;;  %v18117_v25 = vpop.f32.mrb[198].mxu1  ;;  %v18384_v50 = vpop.permute.xlu0 %18383 }
 0xd8c   : > { %v21719_v55 = vpop.f32.mrb[199].mxu1 }
 0xd8f   : > { %18321 = vrot.lane.b32.xlu1 %v17889_v14, %s23185_s19  ;;  %v18254_v20 = vpop.permute.xlu0 %18253 }
 0xd90   : > { %v18339_v6 = vsel %vm1066_vm1, %v27337_v16, %v18254_v20 }
 0xd93   : > { %18139 = vrot.lane.b32.xlu1 %v26964_v4, %s23183_s17  ;;  %v29304_v4 = vld [vmem:[#allocation82_spill] sm:$0xff] }
 0xd97   : > { %18171 = vrot.lane.b32.xlu1 %v27095_v27, %s23184_s18  ;;  %v18286_v27 = vpop.permute.xlu0 %18285 }
 0xd9b   : > { %18203 = vrot.lane.b32.xlu1 %v27239_v46, %s23185_s19  ;;  %v29306_v46 = vld [vmem:[#allocation101_spill] sm:$0xff]  ;;  %v18386_v9 = vpop.permute.xlu0 %18385 }
 0xd9f   : > { %18323 = vrot.lane.b32.xlu1 %v17965_v11, %s23185_s19  ;;  %v18388_v8 = vpop.permute.xlu0 %18387 }
 0xda3   : > { %18141 = vrot.lane.b32.xlu1 %v26968_v60, %s23183_s17  ;;  %v29307_v60 = vld [vmem:[#allocation123_spill] sm:$0xff] }
 0xda7   : > { %18173 = vrot.lane.b32.xlu1 %v27113_v49, %s23184_s18  ;;  %v29308_v49 = vld [vmem:[#allocation22_spill] sm:$0xff] }
 0xda8   : > { %v18337_v13 = vsel %vm1066_vm1, %v29308_v49, %v27750_v3  ;;  %v18256_v3 = vpop.permute.xlu0 %18255 }
 0xda9   : > { %v18345_v1 = vsel %vm3847_vm3, %v18337_v13, %v27764_v44 }
 0xdab   : > { %18205 = vrot.lane.b32.xlu1 %v29304_v4, %s23185_s19 }
 0xdac   : > { %v18288_v36 = vpop.permute.xlu0 %18287 }
 0xdaf   : > { %18325 = vrot.lane.b32.xlu1 %v18041_v32, %s23185_s19  ;;  %v18347_v32 = vsel %vm3847_vm3, %v18339_v6, %v18286_v27  ;;  %v18340_v27 = vsel %vm1066_vm1, %v27354_v53, %v18256_v3 }
 0xdb0   : > { %v18390_v30 = vpop.permute.xlu0 %18389 }
 0xdb3   : > { %18143 = vrot.lane.b32.xlu1 %v29305_v54, %s23183_s17  ;;  %v18348_v54 = vsel %vm3847_vm3, %v18340_v27, %v18288_v36 }
 0xdb4   : > { %v18392_v34 = vpop.permute.xlu0 %18391 }
 0xdb7   : > { %18175 = vrot.lane.b32.xlu1 %v29306_v46, %s23184_s18 }
 0xdb8   : > { %v18258_v51 = vpop.permute.xlu0 %18257 }
 0xdbb   : > { %18207 = vrot.lane.b32.xlu1 %v29307_v60, %s23185_s19 }
 0xdbc   : > { %v18290_v2 = vpop.permute.xlu0 %18289 }
 0xdbf   : > { %18327 = vrot.lane.b32.xlu1 %v18117_v25, %s23185_s19 }
 0xdc0   : > { %v18394_v55 = vpop.permute.xlu0 %18393 }
 0xdc1   : > { %v18314_v42 = vpop.permute.xlu1 %18313 }
 0xdc2   : > { %v18353_v33 = vsel %vm7560_vm5, %v18345_v1, %v18314_v42 }
 0xdc3   : > { %v18426_v28 = vsel %vm465_vm0, %v18353_v33, %v18380_v24  ;;  %18407 = vrot.lane.b32.xlu1 %v7576_v45, %s23178_s29 }
 0xdc4   : > { %21737 = vmatmul.mubr.msk.f32.vlgmr.msra.gmra.mrb[216].mxu0 %vm18456_vm6, %v18426_v28  ;;  %v18396_v26 = vpop.permute.xlu0 %18395  ;;  %v18341_v28 = vsel %vm1066_vm1, %v27382_v61, %v18258_v51 }
 0xdc5   : > { %v18132_v31 = vpop.permute.xlu1 %18131  ;;  %v18349_v3 = vsel %vm3847_vm3, %v18341_v28, %v18290_v2 }
 0xdc6   : > { %v18218_v58 = vsel %vm1066_vm1, %v29310_v47, %v18132_v31 }
 0xdc9   : > { %v18164_v17 = vpop.permute.xlu1 %18163 }
 0xdca   : > { %v18226_v44 = vsel %vm3847_vm3, %v18218_v58, %v18164_v17 }
 0xdcd   : > { %v18196_v21 = vpop.permute.xlu1 %18195 }
 0xdce   : > { %v18234_v0 = vsel %vm7560_vm5, %v18226_v44, %v18196_v21 }
 0xdcf   : > { %v18427_v7 = vsel %vm465_vm0, %v18234_v0, %v18382_v19 }
 0xdd0   : > { %21739 = vmatprep.mubr.msk.f32.mxu0 %vm18456_vm6, %v18427_v7 }
 0xdd1   : > { %v18316_v15 = vpop.permute.xlu1 %18315 }
 0xdd2   : > { %v18354_v40 = vsel %vm7560_vm5, %v18346_v12, %v18316_v15 }
 0xdd3   : > { %v18428_v22 = vsel %vm465_vm0, %v18354_v40, %v18384_v50 }
 0xdd4   : > { %21740 = vmatmul.mubr.msk.f32.gmra.mrb[218].mxu0 %vm18456_vm6, %v18428_v22 }
 0xdd5   : > { %v18134_v56 = vpop.permute.xlu1 %18133 }
 0xdd6   : > { %v18219_v29 = vsel %vm1066_vm1, %v29312_v57, %v18134_v56 }
 0xdd9   : > { %v18166_v62 = vpop.permute.xlu1 %18165 }
 0xdda   : > { %v18227_v14 = vsel %vm3847_vm3, %v18219_v29, %v18166_v62 }
 0xddd   : > { %v18198_v39 = vpop.permute.xlu1 %18197 }
 0xdde   : > { %v18235_v35 = vsel %vm7560_vm5, %v18227_v14, %v18198_v39  ;;  %v29316_v14 = vld [vmem:[#allocation87_spill] sm:$0xff] }
 0xddf   : > { %v18429_v59 = vsel %vm465_vm0, %v18235_v35, %v18386_v9  ;;  %v18260_v9 = vpop.permute.xlu0 %18259 }
 0xde0   : > { %21742 = vmatprep.mubr.msk.f32.mxu0 %vm18456_vm6, %v18429_v59  ;;  %v18342_v12 = vsel %vm1066_vm1, %v27400_v10, %v18260_v9 }
 0xde1   : > { %v18318_v48 = vpop.permute.xlu1 %18317 }
 0xde2   : > { %v18355_v11 = vsel %vm7560_vm5, %v18347_v32, %v18318_v48 }
 0xde3   : > { %v18430_v5 = vsel %vm465_vm0, %v18355_v11, %v18388_v8  ;;  %v18292_v13 = vpop.permute.xlu0 %18291 }
 0xde4   : > { %21743 = vmatmul.mubr.msk.f32.gmra.mrb[220].mxu0 %vm18456_vm6, %v18430_v5  ;;  %v18350_v40 = vsel %vm3847_vm3, %v18342_v12, %v18292_v13 }
 0xde5   : > { %v18136_v25 = vpop.permute.xlu1 %18135 }
 0xde6   : > { %v18220_v19 = vsel %vm1066_vm1, %v29313_v38, %v18136_v25  ;;  %v29317_v38 = vld [vmem:[#allocation109_spill] sm:$0xff] }
 0xde7   : > { %v18398_v42 = vpop.permute.xlu0 %18397 }
 0xde9   : > { %v18168_v24 = vpop.permute.xlu1 %18167 }
 0xdea   : > { %v18228_v16 = vsel %vm3847_vm3, %v18220_v19, %v18168_v24 }
 0xdeb   : > { %v18400_v47 = vpop.permute.xlu0 %18399 }
 0xded   : > { %v18200_v50 = vpop.permute.xlu1 %18199 }
 0xdee   : > { %v18236_v4 = vsel %vm7560_vm5, %v18228_v16, %v18200_v50 }
 0xdef   : > { %v18431_v20 = vsel %vm465_vm0, %v18236_v4, %v18390_v30  ;;  %v18262_v21 = vpop.permute.xlu0 %18261  ;;  %v29315_v30 = vld [vmem:[#allocation61_spill] sm:$0xff] }
 0xdf0   : > { %21745 = vmatprep.mubr.msk.f32.mxu0 %vm18456_vm6, %v18431_v20  ;;  %v18343_v2 = vsel %vm1066_vm1, %v27440_v37, %v18262_v21 }
 0xdf1   : > { %v18320_v46 = vpop.permute.xlu1 %18319 }
 0xdf2   : > { %v18356_v60 = vsel %vm7560_vm5, %v18348_v54, %v18320_v46 }
 0xdf3   : > { %v18432_v8 = vsel %vm465_vm0, %v18356_v60, %v18392_v34  ;;  %v18294_v15 = vpop.permute.xlu0 %18293 }
 0xdf4   : > { %21746 = vmatmul.mubr.msk.f32.gmra.mrb[222].mxu0 %vm18456_vm6, %v18432_v8  ;;  %v18351_v32 = vsel %vm3847_vm3, %v18343_v2, %v18294_v15  ;;  %v23156_v15 = vld [vmem:[%s23272_s14 + $0x20] sm:$0xff] }
 0xdf5   : > { %v18138_v49 = vpop.permute.xlu1 %18137 }
 0xdf6   : > { %v18221_v52 = vsel %vm1066_vm1, %v29314_v18, %v18138_v49  ;;  %v27976_v49 = vld [vmem:[%s28452_s6] ss:$0 sm:$0xff] }
 0xdf7   : > { %v18402_v51 = vpop.permute.xlu0 %18401 }
 0xdf9   : > { %v18170_v63 = vpop.permute.xlu1 %18169 }
 0xdfa   : > { %v18229_v53 = vsel %vm3847_vm3, %v18221_v52, %v18170_v63  ;;  %v23151_v52 = vld [vmem:[%s23272_s14 + $0x8] sm:$0xff] }
 0xdfb   : > { %v18404_v29 = vpop.permute.xlu0 %18403 }
 0xdfd   : > { %v18202_v1 = vpop.permute.xlu1 %18201 }
 0xdfe   : > { %v18237_v45 = vsel %vm7560_vm5, %v18229_v53, %v18202_v1  ;;  %v23152_v1 = vld [vmem:[%s23272_s14] sm:$0xff] }
 0xdff   : > { %v18433_v33 = vsel %vm465_vm0, %v18237_v45, %v18394_v55  ;;  %v18264_v11 = vpop.permute.xlu0 %18263 }
 0xe00   : > { %21748 = vmatprep.mubr.msk.f32.mxu0 %vm18456_vm6, %v18433_v33  ;;  %v18344_v54 = vsel %vm1066_vm1, %v27465_v43, %v18264_v11  ;;  %v23159_v11 = vld [vmem:[%s23272_s14 + $0x48] sm:$0xff] }
 0xe01   : > { %v18322_v31 = vpop.permute.xlu1 %18321 }
 0xe02   : > { %v18357_v36 = vsel %vm7560_vm5, %v18349_v3, %v18322_v31 }
 0xe03   : > { %v18434_v17 = vsel %vm465_vm0, %v18357_v36, %v18396_v26  ;;  %v18296_v24 = vpop.permute.xlu0 %18295 }
 0xe04   : > { %21749 = vmatmul.mubr.msk.f32.gmra.mrb[224].mxu0 %vm18456_vm6, %v18434_v17  ;;  %v18352_v46 = vsel %vm3847_vm3, %v18344_v54, %v18296_v24  ;;  %v23153_v17 = vld [vmem:[%s23272_s14 + $0x10] sm:$0xff] }
 0xe05   : > { %v18140_v58 = vpop.permute.xlu1 %18139 }
 0xe06   : > { %v18222_v0 = vsel %vm1066_vm1, %v29315_v30, %v18140_v58  ;;  %v23154_v58 = vld [vmem:[%s23272_s14 + $0x18] sm:$0xff] }
 0xe07   : > { %v18406_v50 = vpop.permute.xlu0 %18405 }
 0xe09   : > { %v18172_v44 = vpop.permute.xlu1 %18171 }
 0xe0a   : > { %v18230_v61 = vsel %vm3847_vm3, %v18222_v0, %v18172_v44 }
 0xe0d   : > { %v18204_v7 = vpop.permute.xlu1 %18203 }
 0xe0e   : > { %v18238_v23 = vsel %vm7560_vm5, %v18230_v61, %v18204_v7 }
 0xe0f   : > { %v18435_v41 = vsel %vm465_vm0, %v18238_v23, %v18398_v42 }
 0xe10   : > { %21751 = vmatprep.mubr.msk.f32.mxu0 %vm18456_vm6, %v18435_v41  ;;  %v23155_v41 = vld [vmem:[%s23272_s14 + $0x28] sm:$0xff] }
 0xe11   : > { %v18324_v22 = vpop.permute.xlu1 %18323 }
 0xe12   : > { %v18358_v34 = vsel %vm7560_vm5, %v18350_v40, %v18324_v22 }
 0xe13   : > { %v18436_v56 = vsel %vm465_vm0, %v18358_v34, %v18400_v47 }
 0xe14   : > { %21752 = vmatmul.mubr.msk.f32.gmra.mrb[226].mxu0 %vm18456_vm6, %v18436_v56 }
 0xe15   : > { %v18142_v62 = vpop.permute.xlu1 %18141 }
 0xe16   : > { %v18223_v39 = vsel %vm1066_vm1, %v29316_v14, %v18142_v62 }
 0xe19   : > { %v18174_v57 = vpop.permute.xlu1 %18173 }
 0xe1a   : > { %v18231_v10 = vsel %vm3847_vm3, %v18223_v39, %v18174_v57  ;;  %v23158_v39 = vld [vmem:[%s23272_s14 + $0x30] sm:$0xff] }
 0xe1d   : > { %v18206_v35 = vpop.permute.xlu1 %18205 }
 0xe1e   : > { %v18239_v59 = vsel %vm7560_vm5, %v18231_v10, %v18206_v35 }
 0xe1f   : > { %v18437_v6 = vsel %vm465_vm0, %v18239_v59, %v18402_v51 }
 0xe20   : > { %21754 = vmatprep.mubr.msk.f32.mxu0 %vm18456_vm6, %v18437_v6 }
 0xe21   : > { %v18326_v48 = vpop.permute.xlu1 %18325 }
 0xe22   : > { %v18359_v5 = vsel %vm7560_vm5, %v18351_v32, %v18326_v48 }
 0xe23   : > { %v18438_v25 = vsel %vm465_vm0, %v18359_v5, %v18404_v29  ;;  %v23157_v29 = vld [vmem:[%s23272_s14 + $0x38] sm:$0xff] }
 0xe24   : > { %21755 = vmatmul.mubr.msk.f32.gmra.mrb[228].mxu0 %vm18456_vm6, %v18438_v25  ;;  %v23160_v25 = vld [vmem:[%s23272_s14 + $0x40] sm:$0xff] }
 0xe25   : > { %v18144_v55 = vpop.permute.xlu1 %18143 }
 0xe26   : > { %v18224_v19 = vsel %vm1066_vm1, %v29317_v38, %v18144_v55 }
 0xe29   : > { %v18176_v26 = vpop.permute.xlu1 %18175 }
 0xe2a   : > { %v18232_v37 = vsel %vm3847_vm3, %v18224_v19, %v18176_v26 }
 0xe2d   : > { %v18208_v16 = vpop.permute.xlu1 %18207 }
 0xe2e   : > { %v18240_v4 = vsel %vm7560_vm5, %v18232_v37, %v18208_v16 }
 0xe2f   : > { %v18439_v20 = vsel %vm465_vm0, %v18240_v4, %v18406_v50  ;;  %v23161_v50 = vld [vmem:[%s23272_s14 + $0x58] sm:$0xff] }
 0xe30   : > { %21757 = vmatprep.mubr.msk.f32.mxu0 %vm18456_vm6, %v18439_v20  ;;  %v23162_v20 = vld [vmem:[%s23272_s14 + $0x50] sm:$0xff] }
 0xe31   : > { %v18328_v27 = vpop.permute.xlu1 %18327 }
 0xe32   : > { %v18360_v9 = vsel %vm7560_vm5, %v18352_v46, %v18328_v27 }
 0xe35   : > { %v18408_v60 = vpop.permute.xlu1 %18407 }
 0xe36   : > { %v18440_v8 = vsel %vm465_vm0, %v18360_v9, %v18408_v60 }
 0xe37   : > { %21758 = vmatmul.mubr.msk.f32.gmra.mrb[230].mxu0 %vm18456_vm6, %v18440_v8 }
 0xe97   : > { %v21738_v13 = vpop.f32.mrb[216].mxu0 }
 0xe98   : > { %v18577_v63 = vadd.f32 %v21738_v13, %v27976_v49  ;;  %v18571_v18 = vpop.f32.mrb[217].mxu0 }
 0xe99   : > { %v18572_v43 = vadd.f32 %v27976_v49, %v18571_v18 }
 0xe9a   : > { %v27981_v53 = vadd.f32 %v23151_v52, %v18577_v63  ;;  %v23163_v63 = vld [vmem:[%s23272_s14 + $0x68] sm:$0xff] }
 0xe9b   : > { %v27984_v42 = vadd.f32 %v23152_v1, %v18572_v43  ;;  %v23164_v43 = vld [vmem:[%s23272_s14 + $0x60] sm:$0xff] }
 0xe9c   : > { %v18669_v45 = vsel %vm465_vm0, %v27981_v53, 0.0 }
 0xe9d   : > { %18670 = vadd.xlane.f32.xlu1 %v18669_v45  ;;  %v18666_v33 = vsel %vm465_vm0, %v27984_v42, 0.0 }
 0xe9e   : > { %18667 = vadd.xlane.f32.xlu0 %v18666_v33 }
 0xea7   : > { %v21741_v28 = vpop.f32.mrb[218].mxu0 }
 0xea8   : > { %v18581_v3 = vpop.f32.mrb[219].mxu0  ;;  %v18587_v31 = vadd.f32 %v21741_v28, %v27976_v49 }
 0xea9   : > { %v18582_v36 = vadd.f32 %v27976_v49, %v18581_v3 }
 0xeaa   : > { %v27996_v44 = vadd.f32 %v23154_v58, %v18587_v31  ;;  %v23166_v58 = vld [vmem:[%s23272_s14 + $0x70] sm:$0xff] }
 0xeab   : > { %v27993_v47 = vadd.f32 %v23153_v17, %v18582_v36  ;;  %v23165_v36 = vld [vmem:[%s23272_s14 + $0x78] sm:$0xff] }
 0xeac   : > { %v18675_v30 = vsel %vm465_vm0, %v27996_v44, 0.0 }
 0xead   : > { %v18672_v21 = vsel %vm465_vm0, %v27993_v47, 0.0 }
 0xeae   : > { %18673 = vadd.xlane.f32.xlu0 %v18672_v21 }
 0xeb2   : > { %18676 = vadd.xlane.f32.xlu0 %v18675_v30 }
 0xeb7   : > { %v21744_v0 = vpop.f32.mrb[220].mxu0 }
 0xeb8   : > { %v18597_v61 = vadd.f32 %v21744_v0, %v27976_v49  ;;  %v18591_v7 = vpop.f32.mrb[221].mxu0 }
 0xeb9   : > { %v18592_v23 = vadd.f32 %v27976_v49, %v18591_v7 }
 0xeba   : > { %v28005_v12 = vadd.f32 %v23155_v41, %v18597_v61 }
 0xebb   : > { %v28008_v40 = vadd.f32 %v23156_v15, %v18592_v23 }
 0xebc   : > { %v18681_v22 = vsel %vm465_vm0, %v28005_v12, 0.0 }
 0xebd   : > { %18682 = vadd.xlane.f32.xlu0 %v18681_v22  ;;  %v18678_v34 = vsel %vm465_vm0, %v28008_v40, 0.0 }
 0xebe   : > { %18679 = vadd.xlane.f32.xlu1 %v18678_v34 }
 0xec7   : > { %v21747_v56 = vpop.f32.mrb[222].mxu0 }
 0xec8   : > { %v18607_v62 = vadd.f32 %v21747_v56, %v27976_v49  ;;  %v18601_v51 = vpop.f32.mrb[223].mxu0 }
 0xec9   : > { %v18602_v57 = vadd.f32 %v27976_v49, %v18601_v51 }
 0xeca   : > { %v28017_v14 = vadd.f32 %v23157_v29, %v18607_v62 }
 0xecb   : > { %v28020_v10 = vadd.f32 %v23158_v39, %v18602_v57 }
 0xecc   : > { %v18687_v35 = vsel %vm465_vm0, %v28017_v14, 0.0 }
 0xecd   : > { %18688 = vadd.xlane.f32.xlu0 %v18687_v35  ;;  %v18684_v59 = vsel %vm465_vm0, %v28020_v10, 0.0 }
 0xece   : > { %18685 = vadd.xlane.f32.xlu1 %v18684_v59 }
 0xed7   : > { %v21750_v6 = vpop.f32.mrb[224].mxu0 }
 0xed8   : > { %v18617_v2 = vadd.f32 %v21750_v6, %v27976_v49  ;;  %v18611_v32 = vpop.f32.mrb[225].mxu0 }
 0xed9   : > { %v18612_v48 = vadd.f32 %v27976_v49, %v18611_v32 }
 0xeda   : > { %v28029_v5 = vadd.f32 %v23159_v11, %v18617_v2 }
 0xedb   : > { %v28032_v55 = vadd.f32 %v23160_v25, %v18612_v48 }
 0xedc   : > { %v18693_v24 = vsel %vm465_vm0, %v28029_v5, 0.0 }
 0xedd   : > { %18694 = vadd.xlane.f32.xlu0 %v18693_v24  ;;  %v18690_v26 = vsel %vm465_vm0, %v28032_v55, 0.0 }
 0xede   : > { %18691 = vadd.xlane.f32.xlu1 %v18690_v26 }
 0xee7   : > { %v21753_v38 = vpop.f32.mrb[226].mxu0 }
 0xee8   : > { %v18627_v19 = vadd.f32 %v21753_v38, %v27976_v49  ;;  %v18621_v37 = vpop.f32.mrb[227].mxu0 }
 0xee9   : > { %v18622_v16 = vadd.f32 %v27976_v49, %v18621_v37  ;;  %v18920_v37 = vld [vmem:[%s28455_s9] sm:$0xff] }
 0xeea   : > { %v28041_v4 = vadd.f32 %v23161_v50, %v18627_v19 }
 0xeeb   : > { %v28044_v27 = vadd.f32 %v23162_v20, %v18622_v16  ;;  %v18921_v16 = vld [vmem:[%s28455_s9 + $0x8] sm:$0xff] }
 0xeec   : > { %v18699_v54 = vsel %vm465_vm0, %v28041_v4, 0.0  ;;  %v22176_v20 = vpack.c.bf16 %v18921_v16, %v18920_v37 }
 0xeed   : > { %18700 = vadd.xlane.f32.xlu0 %v18699_v54  ;;  %v18696_v46 = vsel %vm465_vm0, %v28044_v27, 0.0 }
 0xeee   : > { %18697 = vadd.xlane.f32.xlu1 %v18696_v46  ;;  %22177 = vmatprep.subr.bf16.mxu0 %v22176_v20 }
 0xeef   : > { %22200 = vmatprep.subr.bf16.mxu1 %v22176_v20  ;;  %22179 = vmatpush3.bf16.msra.mxu0 %v22176_v20 }
 0xef0   : > { %22202 = vmatpush3.bf16.msra.mxu1 %v22176_v20 }
 0xef7   : > { %v21756_v9 = vpop.f32.mrb[228].mxu0 }
 0xef8   : > { %v18637_v60 = vadd.f32 %v21756_v9, %v27976_v49  ;;  %v18631_v8 = vpop.f32.mrb[229].mxu0 }
 0xef9   : > { %v18632_v13 = vadd.f32 %v27976_v49, %v18631_v8  ;;  %v18923_v8 = vld [vmem:[%s28455_s9 + $0x18] sm:$0xff] }
 0xefa   : > { %v28053_v18 = vadd.f32 %v23163_v63, %v18637_v60  ;;  %v18922_v60 = vld [vmem:[%s28455_s9 + $0x10] sm:$0xff] }
 0xefb   : > { %v28056_v52 = vadd.f32 %v23164_v43, %v18632_v13  ;;  %v22180_v13 = vpack.c.bf16 %v18923_v8, %v18922_v60 }
 0xefc   : > { %v18705_v1 = vsel %vm465_vm0, %v28053_v18, 0.0 }
 0xefd   : > { %18706 = vadd.xlane.f32.xlu0 %v18705_v1  ;;  %v18702_v45 = vsel %vm465_vm0, %v28056_v52, 0.0  ;;  %22181 = vmatprep.subr.bf16.mxu0 %v22180_v13 }
 0xefe   : > { %18703 = vadd.xlane.f32.xlu1 %v18702_v45  ;;  %22201 = vmatprep.subr.bf16.mxu1 %v22180_v13 }
 0xeff   : > { %22183 = vmatpush3.bf16.msra.mxu0 %v22180_v13  ;;  %22203 = vmatpush3.bf16.msra.mxu1 %v22180_v13 }
 0xf0a   : > { %v21759_v33 = vpop.f32.mrb[230].mxu0 }
 0xf0b   : > { %v18647_v28 = vadd.f32 %v21759_v33, %v27976_v49  ;;  %v18641_v3 = vpop.f32.mrb[231].mxu0 }
 0xf0c   : > { %v18642_v31 = vadd.f32 %v27976_v49, %v18641_v3 }
 0xf0d   : > { %v28065_v17 = vadd.f32 %v23165_v36, %v18647_v28 }
 0xf0e   : > { %v28068_v21 = vadd.f32 %v23166_v58, %v18642_v31 }
 0xf0f   : > { %v18711_v30 = vsel %vm465_vm0, %v28065_v17, 0.0 }
 0xf10   : > { %18712 = vadd.xlane.f32.xlu0 %v18711_v30  ;;  %v18708_v0 = vsel %vm465_vm0, %v28068_v21, 0.0 }
 0xf11   : > { %18709 = vadd.xlane.f32.xlu1 %v18708_v0 }
 0xf2a   : > { %v18671_v61 = vpop.xlane.xlu1 %18670 }
 0xf2b   : > { %v18715_v7 = vmul.f32 0.03125, %v18671_v61  ;;  %v18668_v23 = vpop.xlane.xlu0 %18667 }
 0xf2c   : > { %v18714_v41 = vmul.f32 0.03125, %v18668_v23 }
 0xf2d   : > { %v28075_v49 = vsub.f32 %v27981_v53, %v18715_v7 }
 0xf2e   : > { %v28078_v15 = vsub.f32 %v27984_v42, %v18714_v41 }
 0xf2f   : > { %v18747_v22 = vmul.f32 %v28075_v49, %v28075_v49 }
 0xf30   : > { %v18746_v34 = vmul.f32 %v28078_v15, %v28078_v15 }
 0xf31   : > { %v18765_v56 = vsel %vm465_vm0, %v18747_v22, 0.0 }
 0xf32   : > { %18766 = vadd.xlane.f32.xlu0 %v18765_v56  ;;  %v18762_v62 = vsel %vm465_vm0, %v18746_v34, 0.0 }
 0xf33   : > { %18763 = vadd.xlane.f32.xlu1 %v18762_v62 }
 0xf3b   : > { %v18674_v51 = vpop.xlane.xlu0 %18673 }
 0xf3c   : > { %v18716_v57 = vmul.f32 0.03125, %v18674_v51 }
 0xf3e   : > { %v28087_v29 = vsub.f32 %v27993_v47, %v18716_v57 }
 0xf3f   : > { %v18677_v39 = vpop.xlane.xlu0 %18676 }
 0xf40   : > { %v18717_v35 = vmul.f32 0.03125, %v18677_v39  ;;  %v18748_v59 = vmul.f32 %v28087_v29, %v28087_v29 }
 0xf42   : > { %v28092_v6 = vsub.f32 %v27996_v44, %v18717_v35  ;;  %v18768_v2 = vsel %vm465_vm0, %v18748_v59, 0.0 }
 0xf43   : > { %18769 = vadd.xlane.f32.xlu1 %v18768_v2 }
 0xf44   : > { %v18749_v32 = vmul.f32 %v28092_v6, %v28092_v6 }
 0xf46   : > { %v18771_v48 = vsel %vm465_vm0, %v18749_v32, 0.0 }
 0xf47   : > { %18772 = vadd.xlane.f32.xlu0 %v18771_v48 }
 0xf4a   : > { %v18683_v11 = vpop.xlane.xlu0 %18682 }
 0xf4b   : > { %v18719_v25 = vmul.f32 0.03125, %v18683_v11  ;;  %v18680_v24 = vpop.xlane.xlu1 %18679 }
 0xf4c   : > { %v18718_v26 = vmul.f32 0.03125, %v18680_v24 }
 0xf4d   : > { %v28099_v38 = vsub.f32 %v28005_v12, %v18719_v25 }
 0xf4e   : > { %v28102_v19 = vsub.f32 %v28008_v40, %v18718_v26 }
 0xf4f   : > { %v18751_v50 = vmul.f32 %v28099_v38, %v28099_v38 }
 0xf50   : > { %v18750_v54 = vmul.f32 %v28102_v19, %v28102_v19 }
 0xf51   : > { %v18777_v46 = vsel %vm465_vm0, %v18751_v50, 0.0 }
 0xf52   : > { %18778 = vadd.xlane.f32.xlu0 %v18777_v46  ;;  %v18774_v9 = vsel %vm465_vm0, %v18750_v54, 0.0 }
 0xf53   : > { %18775 = vadd.xlane.f32.xlu1 %v18774_v9 }
 0xf5a   : > { %v18689_v63 = vpop.xlane.xlu0 %18688 }
 0xf5b   : > { %v18721_v43 = vmul.f32 0.03125, %v18689_v63  ;;  %v18686_v1 = vpop.xlane.xlu1 %18685 }
 0xf5c   : > { %v18720_v45 = vmul.f32 0.03125, %v18686_v1 }
 0xf5d   : > { %v28123_v33 = vsub.f32 %v28017_v14, %v18721_v43 }
 0xf5e   : > { %v28126_v28 = vsub.f32 %v28020_v10, %v18720_v45 }
 0xf5f   : > { %v18753_v3 = vmul.f32 %v28123_v33, %v28123_v33 }
 0xf60   : > { %v18752_v31 = vmul.f32 %v28126_v28, %v28126_v28 }
 0xf61   : > { %v18783_v36 = vsel %vm465_vm0, %v18753_v3, 0.0 }
 0xf62   : > { %18784 = vadd.xlane.f32.xlu0 %v18783_v36  ;;  %v18780_v58 = vsel %vm465_vm0, %v18752_v31, 0.0 }
 0xf63   : > { %18781 = vadd.xlane.f32.xlu1 %v18780_v58 }
 0xf6a   : > { %v18695_v30 = vpop.xlane.xlu0 %18694 }
 0xf6b   : > { %v18723_v0 = vmul.f32 0.03125, %v18695_v30  ;;  %v18692_v61 = vpop.xlane.xlu1 %18691 }
 0xf6c   : > { %v18722_v7 = vmul.f32 0.03125, %v18692_v61 }
 0xf6d   : > { %v28135_v23 = vsub.f32 %v28029_v5, %v18723_v0 }
 0xf6e   : > { %v28138_v41 = vsub.f32 %v28032_v55, %v18722_v7 }
 0xf6f   : > { %v18755_v22 = vmul.f32 %v28135_v23, %v28135_v23 }
 0xf70   : > { %v18754_v34 = vmul.f32 %v28138_v41, %v28138_v41 }
 0xf71   : > { %v18789_v56 = vsel %vm465_vm0, %v18755_v22, 0.0 }
 0xf72   : > { %18790 = vadd.xlane.f32.xlu0 %v18789_v56  ;;  %v18786_v62 = vsel %vm465_vm0, %v18754_v34, 0.0 }
 0xf73   : > { %18787 = vadd.xlane.f32.xlu1 %v18786_v62  ;;  %v28185_v62 = vld [vmem:[%s28453_s7] ss:$0 sm:$0xff] }
 0xf7a   : > { %v18701_v51 = vpop.xlane.xlu0 %18700 }
 0xf7b   : > { %v18725_v57 = vmul.f32 0.03125, %v18701_v51  ;;  %v18698_v39 = vpop.xlane.xlu1 %18697 }
 0xf7c   : > { %v18724_v35 = vmul.f32 0.03125, %v18698_v39 }
 0xf7d   : > { %v28147_v59 = vsub.f32 %v28041_v4, %v18725_v57 }
 0xf7e   : > { %v28150_v2 = vsub.f32 %v28044_v27, %v18724_v35 }
 0xf7f   : > { %v18757_v32 = vmul.f32 %v28147_v59, %v28147_v59 }
 0xf80   : > { %v18756_v48 = vmul.f32 %v28150_v2, %v28150_v2 }
 0xf81   : > { %v18795_v11 = vsel %vm465_vm0, %v18757_v32, 0.0  ;;  %v28192_v32 = vld [vmem:[%s28454_s8] ss:$0 sm:$0xff] }
 0xf82   : > { %18796 = vadd.xlane.f32.xlu0 %v18795_v11  ;;  %v18792_v25 = vsel %vm465_vm0, %v18756_v48, 0.0 }
 0xf83   : > { %18793 = vadd.xlane.f32.xlu1 %v18792_v25 }
 0xf8a   : > { %v18707_v24 = vpop.xlane.xlu0 %18706 }
 0xf8b   : > { %v18727_v26 = vmul.f32 0.03125, %v18707_v24  ;;  %v18704_v37 = vpop.xlane.xlu1 %18703 }
 0xf8c   : > { %v18726_v16 = vmul.f32 0.03125, %v18704_v37 }
 0xf8d   : > { %v28159_v50 = vsub.f32 %v28053_v18, %v18727_v26 }
 0xf8e   : > { %v28162_v20 = vsub.f32 %v28056_v52, %v18726_v16 }
 0xf8f   : > { %v18759_v54 = vmul.f32 %v28159_v50, %v28159_v50 }
 0xf90   : > { %v18758_v46 = vmul.f32 %v28162_v20, %v28162_v20 }
 0xf91   : > { %v18801_v9 = vsel %vm465_vm0, %v18759_v54, 0.0 }
 0xf92   : > { %18802 = vadd.xlane.f32.xlu0 %v18801_v9  ;;  %v18798_v60 = vsel %vm465_vm0, %v18758_v46, 0.0 }
 0xf93   : > { %18799 = vadd.xlane.f32.xlu1 %v18798_v60 }
 0xf9d   : > { %v18713_v8 = vpop.xlane.xlu0 %18712 }
 0xf9e   : > { %v18729_v13 = vmul.f32 0.03125, %v18713_v8  ;;  %v18710_v63 = vpop.xlane.xlu1 %18709 }
 0xf9f   : > { %v18728_v43 = vmul.f32 0.03125, %v18710_v63 }
 0xfa0   : > { %v28171_v1 = vsub.f32 %v28065_v17, %v18729_v13 }
 0xfa1   : > { %v28174_v45 = vsub.f32 %v28068_v21, %v18728_v43 }
 0xfa2   : > { %v18761_v3 = vmul.f32 %v28171_v1, %v28171_v1 }
 0xfa3   : > { %v18760_v31 = vmul.f32 %v28174_v45, %v28174_v45 }
 0xfa4   : > { %v18807_v36 = vsel %vm465_vm0, %v18761_v3, 0.0 }
 0xfa5   : > { %18808 = vadd.xlane.f32.xlu0 %v18807_v36  ;;  %v18804_v58 = vsel %vm465_vm0, %v18760_v31, 0.0 }
 0xfa6   : > { %18805 = vadd.xlane.f32.xlu1 %v18804_v58 }
 0xfbf   : > { %v18767_v30 = vpop.xlane.xlu0 %18766 }
 0xfc0   : > { %v18811_v0 = vmul.f32 0.03125, %v18767_v30  ;;  %v18764_v61 = vpop.xlane.xlu1 %18763 }
 0xfc1   : > { %v18810_v7 = vmul.f32 0.03125, %v18764_v61 }
 0xfc2   : > { %v18827_v22 = vadd.f32 1e-05, %v18811_v0 }
 0xfc3   : > { %v18826_v34 = vadd.f32 1e-05, %v18810_v7 }
 0xfc4   : > { %23087 = vrsqrt.f32 %v18827_v22 }
 0xfc5   : > { %23089 = vrsqrt.f32 %v18826_v34 }
 0xfce   : > { %v23088_v56 = vpop.eup %23087 }
 0xfcf   : > { %v23090_v51 = vpop.eup %23089  ;;  %v18859_v57 = vmul.f32 %v23088_v56, %v28075_v49 }
 0xfd0   : > { %v18770_v39 = vpop.xlane.xlu1 %18769  ;;  %v18858_v35 = vmul.f32 %v23090_v51, %v28078_v15 }
 0xfd1   : > { %v18882_v48 = vmul.f32 %v28185_v62, %v18859_v57  ;;  %v18812_v11 = vmul.f32 0.03125, %v18770_v39 }
 0xfd2   : > { %v18881_v25 = vmul.f32 %v28185_v62, %v18858_v35 }
 0xfd3   : > { %v18828_v24 = vadd.f32 1e-05, %v18812_v11  ;;  %v18905_v16 = vadd.f32 %v28192_v32, %v18882_v48 }
 0xfd4   : > { %v18773_v26 = vpop.xlane.xlu0 %18772  ;;  %v18904_v37 = vadd.f32 %v28192_v32, %v18881_v25 }
 0xfd5   : > { %23091 = vrsqrt.f32 %v18828_v24  ;;  %v18813_v49 = vmul.f32 0.03125, %v18773_v26 }
 0xfd6   : > { %21768 = vmatprep.mubr.msk.f32.mxu0 %vm465_vm0, %v18904_v37 }
 0xfd7   : > { %v18829_v15 = vadd.f32 1e-05, %v18813_v49  ;;  %21769 = vmatmul.mubr.msk.f32.vlgmr.msra.gmra.mrb[232].mxu0 %vm465_vm0, %v18905_v16 }
 0xfd9   : > { %23093 = vrsqrt.f32 %v18829_v15 }
 0xfdf   : > { %v23092_v54 = vpop.eup %23091  ;;  %v18779_v46 = vpop.xlane.xlu0 %18778 }
 0xfe0   : > { %v18815_v9 = vmul.f32 0.03125, %v18779_v46  ;;  %v18776_v60 = vpop.xlane.xlu1 %18775  ;;  %v18860_v8 = vmul.f32 %v23092_v54, %v28087_v29 }
 0xfe1   : > { %v18814_v13 = vmul.f32 0.03125, %v18776_v60 }
 0xfe2   : > { %v18831_v63 = vadd.f32 1e-05, %v18815_v9  ;;  %v18883_v43 = vmul.f32 %v28185_v62, %v18860_v8 }
 0xfe3   : > { %v23094_v3 = vpop.eup %23093  ;;  %v18830_v31 = vadd.f32 1e-05, %v18814_v13 }
 0xfe4   : > { %23095 = vrsqrt.f32 %v18831_v63  ;;  %v18906_v36 = vadd.f32 %v28192_v32, %v18883_v43  ;;  %v18861_v58 = vmul.f32 %v23094_v3, %v28092_v6 }
 0xfe5   : > { %23097 = vrsqrt.f32 %v18830_v31 }
 0xfe6   : > { %21771 = vmatprep.mubr.msk.f32.mxu0 %vm465_vm0, %v18906_v36  ;;  %v18884_v30 = vmul.f32 %v28185_v62, %v18861_v58 }
 0xfe8   : > { %v18907_v0 = vadd.f32 %v28192_v32, %v18884_v30 }
 0xfea   : > { %21772 = vmatmul.mubr.msk.f32.gmra.mrb[234].mxu0 %vm465_vm0, %v18907_v0 }
 0xfee   : > { %v23096_v29 = vpop.eup %23095 }
 0xfef   : > { %v23098_v61 = vpop.eup %23097  ;;  %v18785_v7 = vpop.xlane.xlu0 %18784  ;;  %v18863_v22 = vmul.f32 %v23096_v29, %v28099_v38 }
 0xff0   : > { %v18817_v34 = vmul.f32 0.03125, %v18785_v7  ;;  %v18782_v56 = vpop.xlane.xlu1 %18781  ;;  %v18862_v51 = vmul.f32 %v23098_v61, %v28102_v19 }
 0xff1   : > { %v18816_v57 = vmul.f32 0.03125, %v18782_v56  ;;  %v18886_v6 = vmul.f32 %v28185_v62, %v18863_v22 }
 0xff2   : > { %v18833_v39 = vadd.f32 1e-05, %v18817_v34  ;;  %v18885_v35 = vmul.f32 %v28185_v62, %v18862_v51 }
 0xff3   : > { %v18832_v48 = vadd.f32 1e-05, %v18816_v57  ;;  %v18909_v25 = vadd.f32 %v28192_v32, %v18886_v6 }
 0xff4   : > { %23099 = vrsqrt.f32 %v18833_v39  ;;  %v18908_v11 = vadd.f32 %v28192_v32, %v18885_v35 }
 0xff5   : > { %23101 = vrsqrt.f32 %v18832_v48 }
 0xff6   : > { %21774 = vmatprep.mubr.msk.f32.mxu0 %vm465_vm0, %v18908_v11 }
 0xff7   : > { %21775 = vmatmul.mubr.msk.f32.gmra.mrb[236].mxu0 %vm465_vm0, %v18909_v25 }
 0xffe   : > { %v23100_v38 = vpop.eup %23099 }
 0xfff   : > { %v23102_v24 = vpop.eup %23101  ;;  %v18865_v19 = vmul.f32 %v23100_v38, %v28123_v33  ;;  %v18791_v26 = vpop.xlane.xlu0 %18790 }
0x1000   : > { %v18819_v37 = vmul.f32 0.03125, %v18791_v26  ;;  %v18788_v16 = vpop.xlane.xlu1 %18787  ;;  %v18864_v49 = vmul.f32 %v23102_v24, %v28126_v28 }
0x1001   : > { %v18818_v15 = vmul.f32 0.03125, %v18788_v16  ;;  %v18888_v54 = vmul.f32 %v28185_v62, %v18865_v19 }
0x1002   : > { %v18835_v46 = vadd.f32 1e-05, %v18819_v37  ;;  %v18887_v9 = vmul.f32 %v28185_v62, %v18864_v49 }
0x1003   : > { %v18834_v60 = vadd.f32 1e-05, %v18818_v15  ;;  %v18911_v13 = vadd.f32 %v28192_v32, %v18888_v54 }
0x1004   : > { %23103 = vrsqrt.f32 %v18835_v46  ;;  %v18910_v8 = vadd.f32 %v28192_v32, %v18887_v9 }
0x1005   : > { %23105 = vrsqrt.f32 %v18834_v60 }
0x1006   : > { %21777 = vmatprep.mubr.msk.f32.mxu1 %vm465_vm0, %v18910_v8 }
0x1007   : > { %21778 = vmatmul.mubr.msk.f32.vlgmr.msra.gmra.mrb[200].mxu1 %vm465_vm0, %v18911_v13 }
0x100e   : > { %v23104_v33 = vpop.eup %23103 }
0x100f   : > { %v23106_v63 = vpop.eup %23105  ;;  %v18797_v28 = vpop.xlane.xlu0 %18796  ;;  %v18867_v43 = vmul.f32 %v23104_v33, %v28135_v23 }
0x1010   : > { %v18821_v3 = vmul.f32 0.03125, %v18797_v28  ;;  %v18794_v31 = vpop.xlane.xlu1 %18793  ;;  %v18866_v36 = vmul.f32 %v23106_v63, %v28138_v41 }
0x1011   : > { %v18820_v58 = vmul.f32 0.03125, %v18794_v31  ;;  %v18890_v30 = vmul.f32 %v28185_v62, %v18867_v43 }
0x1012   : > { %v18837_v0 = vadd.f32 1e-05, %v18821_v3  ;;  %v18889_v29 = vmul.f32 %v28185_v62, %v18866_v36  ;;  %v19284_v36 = vld [vmem:[%s28457_s11] sm:$0xff] }
0x1013   : > { %v18836_v61 = vadd.f32 1e-05, %v18820_v58  ;;  %v18913_v22 = vadd.f32 %v28192_v32, %v18890_v30  ;;  %v19288_v30 = vld [vmem:[%s28457_s11 + $0x20] sm:$0xff] }
0x1014   : > { %23107 = vrsqrt.f32 %v18837_v0  ;;  %v18912_v7 = vadd.f32 %v28192_v32, %v18889_v29  ;;  %v19289_v0 = vld [vmem:[%s28457_s11 + $0x28] sm:$0xff] }
0x1015   : > { %23109 = vrsqrt.f32 %v18836_v61  ;;  %v22192_v29 = vpack.c.bf16 %v19289_v0, %v19288_v30  ;;  %v19290_v61 = vld [vmem:[%s28457_s11 + $0x30] sm:$0xff] }
0x1016   : > { %21780 = vmatprep.mubr.msk.f32.mxu1 %vm465_vm0, %v18912_v7  ;;  %v19291_v7 = vld [vmem:[%s28457_s11 + $0x38] sm:$0xff] }
0x1017   : > { %21781 = vmatmul.mubr.msk.f32.gmra.mrb[202].mxu1 %vm465_vm0, %v18913_v22  ;;  %v22196_v22 = vpack.c.bf16 %v19291_v7, %v19290_v61 }
0x101e   : > { %v23108_v23 = vpop.eup %23107 }
0x101f   : > { %v23110_v34 = vpop.eup %23109  ;;  %v18803_v41 = vpop.xlane.xlu0 %18802  ;;  %v18869_v56 = vmul.f32 %v23108_v23, %v28147_v59  ;;  %v20014_v23 = vld [vmem:[%s28456_s10] ss:$0 sm:$0xff] }
0x1020   : > { %v18823_v51 = vmul.f32 0.03125, %v18803_v41  ;;  %v18800_v57 = vpop.xlane.xlu1 %18799  ;;  %v18868_v6 = vmul.f32 %v23110_v34, %v28150_v2 }
0x1021   : > { %v18822_v39 = vmul.f32 0.03125, %v18800_v57  ;;  %v18892_v35 = vmul.f32 %v28185_v62, %v18869_v56 }
0x1022   : > { %v18839_v48 = vadd.f32 1e-05, %v18823_v51  ;;  %v18891_v11 = vmul.f32 %v28185_v62, %v18868_v6 }
0x1023   : > { %v18838_v25 = vadd.f32 1e-05, %v18822_v39  ;;  %v18915_v24 = vadd.f32 %v28192_v32, %v18892_v35 }
0x1024   : > { %23111 = vrsqrt.f32 %v18839_v48  ;;  %v18914_v38 = vadd.f32 %v28192_v32, %v18891_v11 }
0x1025   : > { %23113 = vrsqrt.f32 %v18838_v25 }
0x1026   : > { %21783 = vmatprep.mubr.msk.f32.mxu1 %vm465_vm0, %v18914_v38 }
0x1027   : > { %21784 = vmatmul.mubr.msk.f32.gmra.mrb[204].mxu1 %vm465_vm0, %v18915_v24 }
0x102e   : > { %v23112_v59 = vpop.eup %23111 }
0x102f   : > { %v23114_v19 = vpop.eup %23113  ;;  %v18871_v2 = vmul.f32 %v23112_v59, %v28159_v50 }
0x1030   : > { %v18870_v26 = vmul.f32 %v23114_v19, %v28162_v20 }
0x1031   : > { %v18894_v37 = vmul.f32 %v28185_v62, %v18871_v2 }
0x1032   : > { %v18809_v16 = vpop.xlane.xlu0 %18808  ;;  %v18893_v49 = vmul.f32 %v28185_v62, %v18870_v26 }
0x1033   : > { %v18825_v15 = vmul.f32 0.03125, %v18809_v16  ;;  %v18806_v54 = vpop.xlane.xlu1 %18805  ;;  %v18917_v8 = vadd.f32 %v28192_v32, %v18894_v37 }
0x1034   : > { %v18824_v46 = vmul.f32 0.03125, %v18806_v54  ;;  %v18916_v9 = vadd.f32 %v28192_v32, %v18893_v49 }
0x1035   : > { %v18841_v60 = vadd.f32 1e-05, %v18825_v15 }
0x1036   : > { %v18840_v13 = vadd.f32 1e-05, %v18824_v46  ;;  %21786 = vmatprep.mubr.msk.f32.mxu1 %vm465_vm0, %v18916_v9 }
0x1037   : > { %23115 = vrsqrt.f32 %v18841_v60  ;;  %21787 = vmatmul.mubr.msk.f32.gmra.mrb[206].mxu1 %vm465_vm0, %v18917_v8 }
0x1038   : > { %23117 = vrsqrt.f32 %v18840_v13 }
0x1041   : > { %v23116_v50 = vpop.eup %23115 }
0x1042   : > { %v23118_v20 = vpop.eup %23117  ;;  %v18873_v33 = vmul.f32 %v23116_v50, %v28171_v1  ;;  %v19285_v1 = vld [vmem:[%s28457_s11 + $0x8] sm:$0xff] }
0x1043   : > { %v18872_v63 = vmul.f32 %v23118_v20, %v28174_v45  ;;  %v19286_v45 = vld [vmem:[%s28457_s11 + $0x10] sm:$0xff] }
0x1044   : > { %v18896_v28 = vmul.f32 %v28185_v62, %v18873_v33 }
0x1045   : > { %v18895_v43 = vmul.f32 %v28185_v62, %v18872_v63  ;;  %v22184_v62 = vpack.c.bf16 %v19285_v1, %v19284_v36 }
0x1046   : > { %v18919_v31 = vadd.f32 %v28192_v32, %v18896_v28 }
0x1047   : > { %v18918_v3 = vadd.f32 %v28192_v32, %v18895_v43  ;;  %v19287_v32 = vld [vmem:[%s28457_s11 + $0x18] sm:$0xff]  ;;  %22185 = vmatprep.subr.bf16.mxu1 %v22184_v62 }
0x1048   : > { %v22188_v58 = vpack.c.bf16 %v19287_v32, %v19286_v45  ;;  %22187 = vmatpush3.bf16.msra.mxu1 %v22184_v62 }
0x1049   : > { %21789 = vmatprep.mubr.msk.f32.mxu1 %vm465_vm0, %v18918_v3 }
0x104a   : > { %21790 = vmatmul.mubr.msk.f32.gmra.mrb[208].mxu1 %vm465_vm0, %v18919_v31  ;;  %22189 = vmatprep.subr.bf16.mxu1 %v22188_v58 }
0x104c   : > { %22191 = vmatpush3.bf16.msra.mxu1 %v22188_v58 }
0x104d   : > { %22193 = vmatprep.subr.bf16.mxu1 %v22192_v29 }
0x1050   : > { %22195 = vmatpush3.bf16.msra.mxu1 %v22192_v29 }
0x1051   : > { %22197 = vmatprep.subr.bf16.mxu1 %v22196_v22 }
0x1054   : > { %22199 = vmatpush3.bf16.msra.mxu1 %v22196_v22 }
0x10aa   : > { %v21770_v34 = vpop.f32.mrb[232].mxu0 }
0x10ab   : > { %v19051_v41 = vadd.f32 %v21770_v34, %v20014_v23  ;;  %v19045_v56 = vpop.f32.mrb[233].mxu0 }
0x10ac   : > { %v19046_v51 = vadd.f32 %v20014_v23, %v19045_v56 }
0x10ad   : > { %19222 = vrot.lane.b32.xlu0 %v19051_v41, %s23181_s16  ;;  %v19141_v13 = vmul.f32 0.70710677, %v19051_v41  ;;  %v19125_v32 = vmul.f32 0.5, %v19051_v41 }
0x10ae   : > { %19220 = vrot.lane.b32.xlu1 %v19046_v51, %s23181_s16  ;;  %v19140_v60 = vmul.f32 0.70710677, %v19046_v51  ;;  %v19124_v1 = vmul.f32 0.5, %v19046_v51 }
0x10b0   : > { %23119 = verf.f32 %v19140_v60 }
0x10b1   : > { %23121 = verf.f32 %v19141_v13 }
0x10ba   : > { %v23120_v63 = vpop.eup %23119 }
0x10bb   : > { %v23122_v28 = vpop.eup %23121  ;;  %v19172_v43 = vadd.f32 1.0, %v23120_v63 }
0x10bc   : > { %v19173_v3 = vadd.f32 1.0, %v23122_v28 }
0x10bd   : > { %v21773_v57 = vpop.f32.mrb[234].mxu0  ;;  %v19188_v0 = vmul.f32 %v19172_v43, %v19124_v1 }
0x10be   : > { %v19055_v6 = vpop.f32.mrb[235].mxu0  ;;  %v28289_v35 = vadd.f32 %v21773_v57, %v20014_v23  ;;  %v19189_v29 = vmul.f32 %v19173_v3, %v19125_v32 }
0x10bf   : > { %v28285_v39 = vadd.f32 %v20014_v23, %v19055_v6 }
0x10c0   : > { %v19143_v7 = vmul.f32 0.70710677, %v28289_v35 }
0x10c1   : > { %19224 = vrot.lane.b32.xlu1 %v28285_v39, %s23181_s16  ;;  %v19142_v31 = vmul.f32 0.70710677, %v28285_v39  ;;  %v19126_v6 = vmul.f32 0.5, %v28285_v39 }
0x10c3   : > { %23123 = verf.f32 %v19142_v31 }
0x10c4   : > { %23125 = verf.f32 %v19143_v7 }
0x10c5   : > { %19226 = vrot.lane.b32.xlu1 %v28289_v35, %s23181_s16 }
0x10ca   : > { %v21776_v48 = vpop.f32.mrb[236].mxu0 }
0x10cb   : > { %v28293_v11 = vadd.f32 %v21776_v48, %v20014_v23  ;;  %v19065_v25 = vpop.f32.mrb[237].mxu0 }
0x10cc   : > { %v28295_v38 = vadd.f32 %v20014_v23, %v19065_v25 }
0x10cd   : > { %19230 = vrot.lane.b32.xlu1 %v28293_v11, %s23181_s16  ;;  %v23124_v41 = vpop.eup %23123  ;;  %v19145_v56 = vmul.f32 0.70710677, %v28293_v11 }
0x10ce   : > { %19228 = vrot.lane.b32.xlu0 %v28295_v38, %s23181_s16  ;;  %v19174_v51 = vadd.f32 1.0, %v23124_v41  ;;  %v23126_v57 = vpop.eup %23125  ;;  %v19128_v28 = vmul.f32 0.5, %v28295_v38 }
0x10cf   : > { %v19175_v25 = vadd.f32 1.0, %v23126_v57 }
0x10d0   : > { %v19190_v48 = vmul.f32 %v19174_v51, %v19126_v6 }
0x10da   : > { %v21779_v24 = vpop.f32.mrb[200].mxu1 }
0x10db   : > { %v28301_v59 = vadd.f32 %v21779_v24, %v20014_v23  ;;  %v19075_v19 = vpop.f32.mrb[201].mxu1 }
0x10dc   : > { %v28303_v2 = vadd.f32 %v20014_v23, %v19075_v19 }
0x10dd   : > { %19234 = vrot.lane.b32.xlu1 %v28301_v59, %s23181_s16  ;;  %v19131_v7 = vmul.f32 0.5, %v28301_v59 }
0x10de   : > { %19232 = vrot.lane.b32.xlu0 %v28303_v2, %s23181_s16  ;;  %v19146_v13 = vmul.f32 0.70710677, %v28303_v2 }
0x10ea   : > { %v21782_v26 = vpop.f32.mrb[202].mxu1 }
0x10eb   : > { %v28309_v37 = vadd.f32 %v21782_v26, %v20014_v23  ;;  %v19085_v16 = vpop.f32.mrb[203].mxu1  ;;  %v19127_v26 = vmul.f32 0.5, %v28289_v35  ;;  %v19129_v35 = vmul.f32 0.5, %v28293_v11  ;;  %v19130_v11 = vmul.f32 0.5, %v28303_v2 }
0x10ec   : > { %v28311_v49 = vadd.f32 %v20014_v23, %v19085_v16 }
0x10ed   : > { %19238 = vrot.lane.b32.xlu1 %v28309_v37, %s23181_s16  ;;  %v19191_v16 = vmul.f32 %v19175_v25, %v19127_v26 }
0x10ee   : > { %19236 = vrot.lane.b32.xlu0 %v28311_v49, %s23181_s16 }
0x10fa   : > { %v21785_v15 = vpop.f32.mrb[204].mxu1 }
0x10fb   : > { %v28317_v54 = vadd.f32 %v21785_v15, %v20014_v23  ;;  %v19095_v46 = vpop.f32.mrb[205].mxu1 }
0x10fc   : > { %v28319_v9 = vadd.f32 %v20014_v23, %v19095_v46 }
0x10fd   : > { %19242 = vrot.lane.b32.xlu1 %v28317_v54, %s23181_s16  ;;  %v19151_v2 = vmul.f32 0.70710677, %v28317_v54 }
0x10fe   : > { %19240 = vrot.lane.b32.xlu0 %v28319_v9, %s23181_s16 }
0x110a   : > { %v21788_v8 = vpop.f32.mrb[206].mxu1 }
0x110b   : > { %v28325_v50 = vadd.f32 %v21788_v8, %v20014_v23  ;;  %v19105_v20 = vpop.f32.mrb[207].mxu1 }
0x110c   : > { %v28327_v33 = vadd.f32 %v20014_v23, %v19105_v20  ;;  %v19147_v20 = vmul.f32 0.70710677, %v28301_v59  ;;  %v19132_v59 = vmul.f32 0.5, %v28311_v49 }
0x110d   : > { %19246 = vrot.lane.b32.xlu1 %v28325_v50, %s23181_s16 }
0x110e   : > { %19244 = vrot.lane.b32.xlu0 %v28327_v33, %s23181_s16 }
0x111d   : > { %v21791_v36 = vpop.f32.mrb[208].mxu1 }
0x111e   : > { %v28334_v45 = vadd.f32 %v21791_v36, %v20014_v23  ;;  %v19115_v62 = vpop.f32.mrb[209].mxu1 }
0x111f   : > { %v28336_v58 = vadd.f32 %v20014_v23, %v19115_v62  ;;  %v19223_v30 = vpop.permute.xlu0 %19222  ;;  %v19144_v23 = vmul.f32 0.70710677, %v28295_v38  ;;  %v19149_v38 = vmul.f32 0.70710677, %v28309_v37 }
0x1120   : > { %v19221_v61 = vpop.permute.xlu1 %19220  ;;  %19250 = vrot.lane.b32.xlu1 %v28334_v45, %s23181_s16  ;;  %v19269_v34 = vmul.f32 %v19223_v30, %v19189_v29 }
0x1121   : > { %v19268_v22 = vmul.f32 %v19221_v61, %v19188_v0  ;;  %19248 = vrot.lane.b32.xlu0 %v28336_v58, %s23181_s16  ;;  %23127 = verf.f32 %v19144_v23  ;;  %v19148_v0 = vmul.f32 0.70710677, %v28311_v49  ;;  %v19153_v49 = vmul.f32 0.70710677, %v28325_v50 }
0x1122   : > { %23129 = verf.f32 %v19145_v56 }
0x1123   : > { %21808 = vmatprep.mubr.msk.f32.mxu1 %vm18456_vm6, %v19268_v22  ;;  %23131 = verf.f32 %v19146_v13 }
0x1124   : > { %21809 = vmatmul.mubr.msk.f32.vlgmr.msra.gmra.mrb[210].mxu1 %vm18456_vm6, %v19269_v34  ;;  %23133 = verf.f32 %v19147_v20 }
0x1125   : > { %23135 = verf.f32 %v19148_v0 }
0x1126   : > { %23137 = verf.f32 %v19149_v38 }
0x112b   : > { %v23128_v46 = vpop.eup %23127 }
0x112c   : > { %v23130_v8 = vpop.eup %23129  ;;  %v19176_v39 = vadd.f32 1.0, %v23128_v46 }
0x112d   : > { %v19177_v63 = vadd.f32 1.0, %v23130_v8  ;;  %v23132_v32 = vpop.eup %23131 }
0x112e   : > { %v19192_v3 = vmul.f32 %v19176_v39, %v19128_v28  ;;  %v23134_v30 = vpop.eup %23133  ;;  %v19178_v29 = vadd.f32 1.0, %v23132_v32  ;;  %v19152_v39 = vmul.f32 0.70710677, %v28327_v33 }
0x112f   : > { %v19193_v31 = vmul.f32 %v19177_v63, %v19129_v35  ;;  %v19179_v61 = vadd.f32 1.0, %v23134_v30  ;;  %v23136_v57 = vpop.eup %23135  ;;  %v19135_v35 = vmul.f32 0.5, %v28317_v54  ;;  %v19155_v54 = vmul.f32 0.70710677, %v28334_v45 }
0x1130   : > { %v19194_v34 = vmul.f32 %v19178_v29, %v19130_v11  ;;  %v23138_v6 = vpop.eup %23137  ;;  %v19180_v25 = vadd.f32 1.0, %v23136_v57  ;;  %v19136_v29 = vmul.f32 0.5, %v28327_v33 }
0x1131   : > { %v19195_v23 = vmul.f32 %v19179_v61, %v19131_v7  ;;  %v19137_v61 = vmul.f32 0.5, %v28325_v50  ;;  %v19139_v50 = vmul.f32 0.5, %v28334_v45 }
0x1133   : > { %v19225_v24 = vpop.permute.xlu1 %19224 }
0x1134   : > { %v19270_v19 = vmul.f32 %v19225_v24, %v19190_v48  ;;  %v19150_v48 = vmul.f32 0.70710677, %v28319_v9  ;;  %v19181_v24 = vadd.f32 1.0, %v23138_v6  ;;  %v19138_v6 = vmul.f32 0.5, %v28336_v58 }
0x1136   : > { %21811 = vmatprep.mubr.msk.f32.mxu1 %vm18456_vm6, %v19270_v19  ;;  %23139 = verf.f32 %v19150_v48  ;;  %v19133_v19 = vmul.f32 0.5, %v28309_v37  ;;  %v19134_v37 = vmul.f32 0.5, %v28319_v9  ;;  %v19154_v9 = vmul.f32 0.70710677, %v28336_v58 }
0x1137   : > { %v19227_v15 = vpop.permute.xlu1 %19226  ;;  %23141 = verf.f32 %v19151_v2 }
0x1138   : > { %v19271_v60 = vmul.f32 %v19227_v15, %v19191_v16  ;;  %v19196_v16 = vmul.f32 %v19180_v25, %v19132_v59  ;;  %v19197_v15 = vmul.f32 %v19181_v24, %v19133_v19  ;;  %23143 = verf.f32 %v19152_v39 }
0x1139   : > { %23145 = verf.f32 %v19153_v49 }
0x113a   : > { %21812 = vmatmul.mubr.msk.f32.gmra.mrb[212].mxu1 %vm18456_vm6, %v19271_v60  ;;  %23147 = verf.f32 %v19154_v9 }
0x113b   : > { %23149 = verf.f32 %v19155_v54 }
0x113f   : > { %v19231_v43 = vpop.permute.xlu1 %19230 }
0x1140   : > { %v19229_v36 = vpop.permute.xlu0 %19228  ;;  %v19273_v62 = vmul.f32 %v19231_v43, %v19193_v31  ;;  %v23140_v13 = vpop.eup %23139 }
0x1141   : > { %v19272_v1 = vmul.f32 %v19229_v36, %v19192_v3  ;;  %v23142_v20 = vpop.eup %23141  ;;  %v19182_v63 = vadd.f32 1.0, %v23140_v13 }
0x1142   : > { %v19183_v28 = vadd.f32 1.0, %v23142_v20  ;;  %v23144_v32 = vpop.eup %23143 }
0x1143   : > { %21814 = vmatprep.mubr.msk.f32.mxu1 %vm18456_vm6, %v19272_v1  ;;  %v19198_v3 = vmul.f32 %v19182_v63, %v19134_v37  ;;  %v23146_v30 = vpop.eup %23145  ;;  %v19184_v0 = vadd.f32 1.0, %v23144_v32 }
0x1144   : > { %21815 = vmatmul.mubr.msk.f32.gmra.mrb[214].mxu1 %vm18456_vm6, %v19273_v62  ;;  %v19199_v31 = vmul.f32 %v19183_v28, %v19135_v35  ;;  %v19185_v38 = vadd.f32 1.0, %v23146_v30 }
0x1145   : > { %v19200_v7 = vmul.f32 %v19184_v0, %v19136_v29 }
0x114f   : > { %v19235_v22 = vpop.permute.xlu1 %19234 }
0x1150   : > { %v19233_v41 = vpop.permute.xlu0 %19232  ;;  %v19275_v51 = vmul.f32 %v19235_v22, %v19195_v23  ;;  %v19201_v22 = vmul.f32 %v19185_v38, %v19137_v61 }
0x1151   : > { %v19274_v56 = vmul.f32 %v19233_v41, %v19194_v34 }
0x1153   : > { %21817 = vmatprep.mubr.msk.f32.mxu1 %vm18456_vm6, %v19274_v56  ;;  %v23148_v56 = vpop.eup %23147 }
0x1154   : > { %21818 = vmatmul.mubr.msk.f32.gmra.mrb[216].mxu1 %vm18456_vm6, %v19275_v51  ;;  %v23150_v51 = vpop.eup %23149  ;;  %v19186_v57 = vadd.f32 1.0, %v23148_v56 }
0x1155   : > { %v19187_v33 = vadd.f32 1.0, %v23150_v51 }
0x1156   : > { %v19202_v2 = vmul.f32 %v19186_v57, %v19138_v6 }
0x1157   : > { %v19203_v25 = vmul.f32 %v19187_v33, %v19139_v50 }
0x115f   : > { %v19239_v26 = vpop.permute.xlu1 %19238 }
0x1160   : > { %v19237_v46 = vpop.permute.xlu0 %19236  ;;  %v19277_v8 = vmul.f32 %v19239_v26, %v19197_v15  ;;  %v20031_v26 = vld [vmem:[%s28458_s12] ss:$0 sm:$0xff] }
0x1161   : > { %v19276_v60 = vmul.f32 %v19237_v46, %v19196_v16 }
0x1163   : > { %21820 = vmatprep.mubr.msk.f32.mxu1 %vm18456_vm6, %v19276_v60 }
0x1164   : > { %21821 = vmatmul.mubr.msk.f32.gmra.mrb[218].mxu1 %vm18456_vm6, %v19277_v8 }
0x116f   : > { %v19243_v43 = vpop.permute.xlu1 %19242 }
0x1170   : > { %v19241_v36 = vpop.permute.xlu0 %19240  ;;  %v19279_v62 = vmul.f32 %v19243_v43, %v19199_v31 }
0x1171   : > { %v19278_v1 = vmul.f32 %v19241_v36, %v19198_v3 }
0x1173   : > { %21823 = vmatprep.mubr.msk.f32.mxu1 %vm18456_vm6, %v19278_v1 }
0x1174   : > { %21824 = vmatmul.mubr.msk.f32.gmra.mrb[220].mxu1 %vm18456_vm6, %v19279_v62 }
0x117f   : > { %v19247_v11 = vpop.permute.xlu1 %19246 }
0x1180   : > { %v19245_v34 = vpop.permute.xlu0 %19244  ;;  %v19281_v41 = vmul.f32 %v19247_v11, %v19201_v22 }
0x1181   : > { %v19280_v23 = vmul.f32 %v19245_v34, %v19200_v7 }
0x1183   : > { %21826 = vmatprep.mubr.msk.f32.mxu1 %vm18456_vm6, %v19280_v23 }
0x1184   : > { %21827 = vmatmul.mubr.msk.f32.gmra.mrb[222].mxu1 %vm18456_vm6, %v19281_v41 }
0x1192   : > { %v19251_v48 = vpop.permute.xlu1 %19250 }
0x1193   : > { %v19249_v24 = vpop.permute.xlu0 %19248  ;;  %v19283_v19 = vmul.f32 %v19251_v48, %v19203_v25 }
0x1194   : > { %v19282_v59 = vmul.f32 %v19249_v24, %v19202_v2 }
0x1196   : > { %21829 = vmatprep.mubr.msk.f32.mxu1 %vm18456_vm6, %v19282_v59 }
0x1197   : > { %21830 = vmatmul.mubr.msk.f32.gmra.mrb[224].mxu1 %vm18456_vm6, %v19283_v19 }
0x11f7   : > { %v21810_v16 = vpop.f32.mrb[210].mxu1 }
0x11f8   : > { %v19419_v15 = vadd.f32 %v21810_v16, %v20031_v26  ;;  %v19413_v46 = vpop.f32.mrb[211].mxu1 }
0x11f9   : > { %v19414_v45 = vadd.f32 %v20031_v26, %v19413_v46 }
0x11fa   : > { %v19493_v58 = vadd.f32 %v19419_v15, %v27981_v53 }
0x11fb   : > { %v19492_v60 = vadd.f32 %v19414_v45, %v27984_v42 }
0x11fc   : > { %19509 = vst.msk [vmem:[%s28393_s24 + $0x8] sm:$0xff] %vm465_vm0, %v19493_v58 }
0x11fd   : > { %19508 = vst.msk [vmem:[%s28393_s24] sm:$0xff] %vm465_vm0, %v19492_v60 }
0x120d   : > { %v21813_v8 = vpop.f32.mrb[212].mxu1 }
0x120e   : > { %v19429_v13 = vadd.f32 %v21813_v8, %v20031_v26  ;;  %v19423_v20 = vpop.f32.mrb[213].mxu1 }
0x120f   : > { %v19424_v39 = vadd.f32 %v20031_v26, %v19423_v20 }
0x1210   : > { %v19495_v49 = vadd.f32 %v19429_v13, %v27996_v44 }
0x1211   : > { %v19494_v63 = vadd.f32 %v19424_v39, %v27993_v47 }
0x1212   : > { %19511 = vst.msk [vmem:[%s28393_s24 + $0x18] sm:$0xff] %vm465_vm0, %v19495_v49 }
0x1213   : > { %19510 = vst.msk [vmem:[%s28393_s24 + $0x10] sm:$0xff] %vm465_vm0, %v19494_v63 }
0x1217   : > { %v21816_v53 = vpop.f32.mrb[214].mxu1 }
0x1218   : > { %v19439_v42 = vadd.f32 %v21816_v53, %v20031_v26  ;;  %v19433_v28 = vpop.f32.mrb[215].mxu1 }
0x1219   : > { %v19434_v37 = vadd.f32 %v20031_v26, %v19433_v28 }
0x121a   : > { %v19497_v35 = vadd.f32 %v19439_v42, %v28005_v12 }
0x121b   : > { %v19496_v43 = vadd.f32 %v19434_v37, %v28008_v40 }
0x121c   : > { %19513 = vst.msk [vmem:[%s28393_s24 + $0x28] sm:$0xff] %vm465_vm0, %v19497_v35 }
0x121d   : > { %19512 = vst.msk [vmem:[%s28393_s24 + $0x20] sm:$0xff] %vm465_vm0, %v19496_v43 }
0x1227   : > { %v21819_v47 = vpop.f32.mrb[216].mxu1 }
0x1228   : > { %v19449_v44 = vadd.f32 %v21819_v47, %v20031_v26  ;;  %v19443_v3 = vpop.f32.mrb[217].mxu1 }
0x1229   : > { %v19444_v31 = vadd.f32 %v20031_v26, %v19443_v3 }
0x122a   : > { %v19499_v36 = vadd.f32 %v19449_v44, %v28017_v14 }
0x122b   : > { %v19498_v1 = vadd.f32 %v19444_v31, %v28020_v10 }
0x122c   : > { %19515 = vst.msk [vmem:[%s28393_s24 + $0x38] sm:$0xff] %vm465_vm0, %v19499_v36 }
0x122d   : > { %19514 = vst.msk [vmem:[%s28393_s24 + $0x30] sm:$0xff] %vm465_vm0, %v19498_v1 }
0x1237   : > { %v21822_v12 = vpop.f32.mrb[218].mxu1 }
0x1238   : > { %v19459_v40 = vadd.f32 %v21822_v12, %v20031_v26  ;;  %v19453_v62 = vpop.f32.mrb[219].mxu1 }
0x1239   : > { %v19454_v32 = vadd.f32 %v20031_v26, %v19453_v62 }
0x123a   : > { %v19501_v30 = vadd.f32 %v19459_v40, %v28029_v5 }
0x123b   : > { %v19500_v0 = vadd.f32 %v19454_v32, %v28032_v55 }
0x123c   : > { %19517 = vst.msk [vmem:[%s28393_s24 + $0x48] sm:$0xff] %vm465_vm0, %v19501_v30 }
0x123d   : > { %19516 = vst.msk [vmem:[%s28393_s24 + $0x40] sm:$0xff] %vm465_vm0, %v19500_v0 }
0x1247   : > { %v21825_v14 = vpop.f32.mrb[220].mxu1 }
0x1248   : > { %v19469_v10 = vadd.f32 %v21825_v14, %v20031_v26  ;;  %v19463_v38 = vpop.f32.mrb[221].mxu1 }
0x1249   : > { %v19464_v9 = vadd.f32 %v20031_v26, %v19463_v38 }
0x124a   : > { %v19503_v29 = vadd.f32 %v19469_v10, %v28041_v4 }
0x124b   : > { %v19502_v54 = vadd.f32 %v19464_v9, %v28044_v27 }
0x124c   : > { %19519 = vst.msk [vmem:[%s28393_s24 + $0x58] sm:$0xff] %vm465_vm0, %v19503_v29 }
0x124d   : > { %19518 = vst.msk [vmem:[%s28393_s24 + $0x50] sm:$0xff] %vm465_vm0, %v19502_v54 }
0x1257   : > { %v21828_v5 = vpop.f32.mrb[222].mxu1 }
0x1258   : > { %v19479_v55 = vadd.f32 %v21828_v5, %v20031_v26  ;;  %v19473_v61 = vpop.f32.mrb[223].mxu1 }
0x1259   : > { %v19474_v11 = vadd.f32 %v20031_v26, %v19473_v61 }
0x125a   : > { %v19505_v7 = vadd.f32 %v19479_v55, %v28053_v18 }
0x125b   : > { %v19504_v22 = vadd.f32 %v19474_v11, %v28056_v52 }
0x125c   : > { %19521 = vst.msk [vmem:[%s28393_s24 + $0x68] sm:$0xff] %vm465_vm0, %v19505_v7 }
0x125d   : > { %19520 = vst.msk [vmem:[%s28393_s24 + $0x60] sm:$0xff] %vm465_vm0, %v19504_v22 }
0x126a   : > { %v21831_v4 = vpop.f32.mrb[224].mxu1 }
0x126b   : > { %v19489_v27 = vadd.f32 %v21831_v4, %v20031_v26  ;;  %v19483_v34 = vpop.f32.mrb[225].mxu1 }
0x126c   : > { %v19484_v23 = vadd.f32 %v20031_v26, %v19483_v34 }
0x126d   : > { %v19507_v41 = vadd.f32 %v19489_v27, %v28065_v17 }
0x126e   : > { %v19506_v56 = vadd.f32 %v19484_v23, %v28068_v21 }
0x126f   : > { %19523 = vst.msk [vmem:[%s28393_s24 + $0x78] sm:$0xff] %vm465_vm0, %v19507_v41 }
0x1270   : > { %19522 = vst.msk [vmem:[%s28393_s24 + $0x70] sm:$0xff] %vm465_vm0, %v19506_v56 }
0x1271 PF: > { %s23_s25 = sadd.s32 1, %s23173_s25  }
0x1272   : > { %p20_p4 = scmp.ge.s32.totalorder %s23_s25, 4  }
0x1274   :  { %22 = sbr.rel (!%p20_p4) target bundleno = 1 (0x1), region = 102 }

</bundles_post_ra>
